<compile_context>
chip_gen: v7x
topology: tpu7x:2x2x1
jax: 0.10.0
libtpu: 0.0.40
codegen_flags: <defaults>
</compile_context>

<pallas_src>
import functools
import math

import jax
import jax.numpy as jnp
import numpy as np
from jax.experimental import pallas as pl
from jax.experimental.pallas import tpu as pltpu


def _sigmoid(v):
    return 1.0 / (1.0 + jnp.exp(-v))


def _att_gru_kernel(
    x_ref,      # (B, T, D)
    wih1_ref,   # (D, 3H1)
    bih1_ref,   # (1, 3H1)
    whh1_ref,   # (H1, 3H1)
    bhh1_ref,   # (1, 3H1)
    wih2_ref,   # (H1, 3H2)   BN1 folded in
    bih2_ref,   # (1, 3H2)    BN1 folded in
    whh2_ref,   # (H2, 3H2)
    bhh2_ref,   # (1, 3H2)
    wq_ref,     # (H2, H2)    BN2 folded in
    bq_ref,     # (1, H2)
    wk_ref,     # (H2, H2)    BN2 folded in
    bk_ref,     # (1, H2)
    wv_ref,     # (H2, H2)    BN2 folded in
    bv_ref,     # (1, H2)
    wo_ref,     # (H2, H2)
    bo_ref,     # (1, H2)
    wfc_ref,    # (H2, OP)    zero-padded to OP=128 lanes
    bfc_ref,    # (1, OP)
    out_ref,    # (B, OP)
    *,
    num_heads,
):
    B, T, D = x_ref.shape
    H1 = whh1_ref.shape[0]
    H2 = whh2_ref.shape[0]
    f32 = jnp.float32
    dot = functools.partial(jnp.dot, preferred_element_type=f32)

    # ---------------- GRU layer 1 ----------------
    # Hoisted input projection for ALL time steps (one batched matmul).
    x2d = x_ref[...].reshape(B * T, D)
    gi1 = (dot(x2d, wih1_ref[...]) + bih1_ref[...]).reshape(B, T, 3 * H1)

    whh1 = whh1_ref[...]          # hoisted weight / bias loads
    bhh1 = bhh1_ref[...]
    h1 = jnp.zeros((B, H1), f32)
    h1_steps = []
    for t in range(T):            # static, fully unrolled
        gh = dot(h1, whh1) + bhh1
        gi = gi1[:, t, :]
        r = _sigmoid(gi[:, :H1] + gh[:, :H1])
        z = _sigmoid(gi[:, H1:2 * H1] + gh[:, H1:2 * H1])
        n = jnp.tanh(gi[:, 2 * H1:] + r * gh[:, 2 * H1:])
        h1 = (1.0 - z) * n + z * h1
        h1_steps.append(h1)

    # ---------------- GRU layer 2 (BN1 already folded into wih2/bih2) ----------------
    h1_seq = jnp.concatenate([h[:, None, :] for h in h1_steps], axis=1)   # (B, T, H1)
    gi2 = (dot(h1_seq.reshape(B * T, H1), wih2_ref[...])
           + bih2_ref[...]).reshape(B, T, 3 * H2)

    whh2 = whh2_ref[...]
    bhh2 = bhh2_ref[...]
    h2 = jnp.zeros((B, H2), f32)
    h2_steps = []
    for t in range(T):
        gh = dot(h2, whh2) + bhh2
        gi = gi2[:, t, :]
        r = _sigmoid(gi[:, :H2] + gh[:, :H2])
        z = _sigmoid(gi[:, H2:2 * H2] + gh[:, H2:2 * H2])
        n = jnp.tanh(gi[:, 2 * H2:] + r * gh[:, 2 * H2:])
        h2 = (1.0 - z) * n + z * h2
        h2_steps.append(h2)

    # ---------------- Multi-head self-attention (BN2 folded into q/k/v) ----------------
    h2_seq = jnp.concatenate([h[:, None, :] for h in h2_steps], axis=1)   # (B, T, H2)
    h2_flat = h2_seq.reshape(B * T, H2)
    q = (dot(h2_flat, wq_ref[...]) + bq_ref[...]).reshape(B, T, H2)
    k = (dot(h2_flat, wk_ref[...]) + bk_ref[...]).reshape(B, T, H2)
    v = (dot(h2_flat, wv_ref[...]) + bv_ref[...]).reshape(B, T, H2)

    hd = H2 // num_heads
    scale = hd ** -0.5
    head_outs = []
    for h in range(num_heads):    # static head loop, tiny per-head batched matmuls
        sl = slice(h * hd, (h + 1) * hd)
        qh, kh, vh = q[:, :, sl], k[:, :, sl], v[:, :, sl]     # (B, T, hd)
        s = jnp.einsum("btd,bsd->bts", qh, kh, preferred_element_type=f32) * scale
        s = s - jnp.max(s, axis=-1, keepdims=True)
        p = jnp.exp(s)
        p = p / jnp.sum(p, axis=-1, keepdims=True)
        head_outs.append(jnp.einsum("bts,bsd->btd", p, vh, preferred_element_type=f32))
    attn = jnp.concatenate(head_outs, axis=-1)                  # (B, T, H2)
    attn = (dot(attn.reshape(B * T, H2), wo_ref[...])
            + bo_ref[...]).reshape(B, T, H2)

    # ---------------- global max-pool over time, tanh, fc1 ----------------
    pooled = attn[:, 0, :]
    for t in range(1, T):
        pooled = jnp.maximum(pooled, attn[:, t, :])
    act = jnp.tanh(pooled)
    out_ref[...] = dot(act, wfc_ref[...]) + bfc_ref[...]        # (B, OP) lane-dense store


def att_gru_forward(x, kp, *, num_heads, output_dim):
    """x: (B, T, D) float32 (PyTorch batch_first). Returns (B, output_dim)."""
    B, T, D = x.shape
    OP = kp["wfc"].shape[1]

    args = (
        x,
        kp["wih1"], kp["bih1"], kp["whh1"], kp["bhh1"],
        kp["wih2"], kp["bih2"], kp["whh2"], kp["bhh2"],
        kp["wq"], kp["bq"], kp["wk"], kp["bk"], kp["wv"], kp["bv"],
        kp["wo"], kp["bo"], kp["wfc"], kp["bfc"],
    )

    def full(a):
        n = a.ndim
        return pl.BlockSpec(a.shape, lambda i: (0,) * n)

    grid_spec = pltpu.PrefetchScalarGridSpec(
        num_scalar_prefetch=0,
        grid=(1,),                               # single invocation: everything lives in VMEM
        in_specs=[full(a) for a in args],
        out_specs=pl.BlockSpec((B, OP), lambda i: (0, 0)),
    )

    out_pad = pl.pallas_call(
        functools.partial(_att_gru_kernel, num_heads=num_heads),
        out_shape=jax.ShapeDtypeStruct((B, OP), jnp.float32),
        grid_spec=grid_spec,
        compiler_params=pltpu.CompilerParams(dimension_semantics=("arbitrary",)),
    )(*args)
    return out_pad[:, :output_dim]


# ----------------------------------------------------------------------------------------
# Parameter construction (PyTorch-convention "raw" params) + algebraic folding for the kernel
# ----------------------------------------------------------------------------------------
def make_raw_params(key, input_dim, h1, h2, output_dim):
    def u(k, shape, bound):
        return jax.random.uniform(k, shape, jnp.float32, minval=-bound, maxval=bound)

    ks = jax.random.split(key, 24)
    b1 = 1.0 / math.sqrt(h1)
    b2 = 1.0 / math.sqrt(h2)
    be = 1.0 / math.sqrt(h2)
    return dict(
        # GRU1 (PyTorch layout: weight (3H, in), gate order [r|z|n])
        w_ih1=u(ks[0], (3 * h1, input_dim), b1),
        w_hh1=u(ks[1], (3 * h1, h1), b1),
        b_ih1=u(ks[2], (3 * h1,), b1),
        b_hh1=u(ks[3], (3 * h1,), b1),
        # BatchNorm1d #1 (eval running stats)
        bn1_gamma=1.0 + 0.1 * jax.random.normal(ks[4], (h1,), jnp.float32),
        bn1_beta=0.1 * jax.random.normal(ks[5], (h1,), jnp.float32),
        bn1_mean=0.1 * jax.random.normal(ks[6], (h1,), jnp.float32),
        bn1_var=1.0 + 0.1 * jnp.abs(jax.random.normal(ks[7], (h1,), jnp.float32)),
        # GRU2
        w_ih2=u(ks[8], (3 * h2, h1), b2),
        w_hh2=u(ks[9], (3 * h2, h2), b2),
        b_ih2=u(ks[10], (3 * h2,), b2),
        b_hh2=u(ks[11], (3 * h2,), b2),
        # BatchNorm1d #2
        bn2_gamma=1.0 + 0.1 * jax.random.normal(ks[12], (h2,), jnp.float32),
        bn2_beta=0.1 * jax.random.normal(ks[13], (h2,), jnp.float32),
        bn2_mean=0.1 * jax.random.normal(ks[14], (h2,), jnp.float32),
        bn2_var=1.0 + 0.1 * jnp.abs(jax.random.normal(ks[15], (h2,), jnp.float32)),
        # MultiheadAttention (embed = h2): in_proj rows [Wq; Wk; Wv]
        in_proj_w=u(ks[16], (3 * h2, h2), be),
        in_proj_b=u(ks[17], (3 * h2,), be),
        out_proj_w=u(ks[18], (h2, h2), be),
        out_proj_b=u(ks[19], (h2,), be),
        # fc1
        fc_w=u(ks[20], (output_dim, h2), be),
        fc_b=u(ks[21], (output_dim,), be),
    )


def fold_params(raw, *, out_pad=128, eps=1e-5):
    """Transpose to (in, out), fold eval-mode BN affines into adjacent matmuls, pad fc to 128 lanes."""
    h1 = raw["w_hh1"].shape[1]
    h2 = raw["w_hh2"].shape[1]
    o = raw["fc_w"].shape[0]

    scale1 = raw["bn1_gamma"] / jnp.sqrt(raw["bn1_var"] + eps)     # (H1,)
    shift1 = raw["bn1_beta"] - raw["bn1_mean"] * scale1
    scale2 = raw["bn2_gamma"] / jnp.sqrt(raw["bn2_var"] + eps)     # (H2,)
    shift2 = raw["bn2_beta"] - raw["bn2_mean"] * scale2

    # BN1 folded into GRU2 input projection:  z1 @ Wih2^T + b = h1 @ (diag(s1)Wih2^T) + (sh1 Wih2^T + b)
    wih2_t = raw["w_ih2"].T                                        # (H1, 3H2)
    wih2_f = scale1[:, None] * wih2_t
    bih2_f = shift1[None, :] @ wih2_t + raw["b_ih2"][None, :]

    # BN2 folded into the attention q/k/v projections.
    wq_pt, wk_pt, wv_pt = jnp.split(raw["in_proj_w"], 3, axis=0)
    bq_pt, bk_pt, bv_pt = jnp.split(raw["in_proj_b"], 3, axis=0)

    def fold_proj(w_pt, b_pt):
        w_t = w_pt.T                                               # (H2, H2)
        return scale2[:, None] * w_t, shift2[None, :] @ w_t + b_pt[None, :]

    wq_f, bq_f = fold_proj(wq_pt, bq_pt)
    wk_f, bk_f = fold_proj(wk_pt, bk_pt)
    wv_f, bv_f = fold_proj(wv_pt, bv_pt)

    op = max(out_pad, o)
    wfc = jnp.zeros((h2, op), jnp.float32).at[:, :o].set(raw["fc_w"].T)
    bfc = jnp.zeros((1, op), jnp.float32).at[:, :o].set(raw["fc_b"][None, :])

    return dict(
        wih1=raw["w_ih1"].T, bih1=raw["b_ih1"][None, :],
        whh1=raw["w_hh1"].T, bhh1=raw["b_hh1"][None, :],
        wih2=wih2_f, bih2=bih2_f,
        whh2=raw["w_hh2"].T, bhh2=raw["b_hh2"][None, :],
        wq=wq_f, bq=bq_f, wk=wk_f, bk=bk_f, wv=wv_f, bv=bv_f,
        wo=raw["out_proj_w"].T, bo=raw["out_proj_b"][None, :],
        wfc=wfc, bfc=bfc,
    )


# ----------------------------------------------------------------------------------------
# Pure-JAX reference (unfolded params, PyTorch eval-mode semantics) for correctness checking
# ----------------------------------------------------------------------------------------
def reference_forward(x, raw, *, num_heads, eps=1e-5):
    B, T, _ = x.shape

    def gru_layer(inp, w_ih, w_hh, b_ih, b_hh):
        H = w_hh.shape[1]
        h = jnp.zeros((B, H), jnp.float32)
        outs = []
        for t in range(T):
            gi = inp[:, t, :] @ w_ih.T + b_ih
            gh = h @ w_hh.T + b_hh
            r = jax.nn.sigmoid(gi[:, :H] + gh[:, :H])
            z = jax.nn.sigmoid(gi[:, H:2 * H] + gh[:, H:2 * H])
            n = jnp.tanh(gi[:, 2 * H:] + r * gh[:, 2 * H:])
            h = (1.0 - z) * n + z * h
            outs.append(h)
        return jnp.stack(outs, axis=1)                              # (B, T, H)

    def bn_eval(y, g, b, m, v):
        return (y - m) / jnp.sqrt(v + eps) * g + b

    h1 = gru_layer(x, raw["w_ih1"], raw["w_hh1"], raw["b_ih1"], raw["b_hh1"])
    z1 = bn_eval(h1, raw["bn1_gamma"], raw["bn1_beta"], raw["bn1_mean"], raw["bn1_var"])
    h2 = gru_layer(z1, raw["w_ih2"], raw["w_hh2"], raw["b_ih2"], raw["b_hh2"])
    z2 = bn_eval(h2, raw["bn2_gamma"], raw["bn2_beta"], raw["bn2_mean"], raw["bn2_var"])

    E = z2.shape[-1]
    hd = E // num_heads
    wq, wk, wv = jnp.split(raw["in_proj_w"], 3, axis=0)
    bq, bk, bv = jnp.split(raw["in_proj_b"], 3, axis=0)
    q = z2 @ wq.T + bq
    k = z2 @ wk.T + bk
    v = z2 @ wv.T + bv

    def heads(a):
        return a.reshape(B, T, num_heads, hd).transpose(0, 2, 1, 3)  # (B, nh, T, hd)

    qh, kh, vh = heads(q), heads(k), heads(v)
    scores = jnp.einsum("bhtd,bhsd->bhts", qh, kh) / math.sqrt(hd)
    w = jax.nn.softmax(scores, axis=-1)
    o = jnp.einsum("bhts,bhsd->bhtd", w, vh)
    o = o.transpose(0, 2, 1, 3).reshape(B, T, E)
    attn_out = o @ raw["out_proj_w"].T + raw["out_proj_b"]

    pooled = jnp.max(attn_out, axis=1)
    return jnp.tanh(pooled) @ raw["fc_w"].T + raw["fc_b"]


if __name__ == "__main__":
    # Small shapes consistent with the module
    B, T = 8, 8
    INPUT_DIM, HIDDEN1, HIDDEN2, OUTPUT_DIM = 16, 32, 32, 8
    NUM_HEADS = 4
    DROPOUT_RATE = 0.2   # eval mode -> identity

    key = jax.random.PRNGKey(0)
    kx, kp = jax.random.split(key)
    x = jax.random.normal(kx, (B, T, INPUT_DIM), jnp.float32)

    raw = make_raw_params(kp, INPUT_DIM, HIDDEN1, HIDDEN2, OUTPUT_DIM)
    folded = fold_params(raw)

    out = att_gru_forward(x, folded, num_heads=NUM_HEADS, output_dim=OUTPUT_DIM)
    out = jax.block_until_ready(out)

    ref = jax.block_until_ready(reference_forward(x, raw, num_heads=NUM_HEADS))
    np.testing.assert_allclose(np.asarray(out), np.asarray(ref), rtol=1e-4, atol=1e-4)

    print("KERNEL_OK")
</pallas_src>

<mosaic_0001>
module attributes {stable_mosaic.version = 11 : i64} {
  func.func @_att_gru_kernel(%arg0: i32, %arg1: memref<8x8x16xf32, #tpu.memory_space<vmem>>, %arg2: memref<16x96xf32, #tpu.memory_space<vmem>>, %arg3: memref<1x96xf32, #tpu.memory_space<vmem>>, %arg4: memref<32x96xf32, #tpu.memory_space<vmem>>, %arg5: memref<1x96xf32, #tpu.memory_space<vmem>>, %arg6: memref<32x96xf32, #tpu.memory_space<vmem>>, %arg7: memref<1x96xf32, #tpu.memory_space<vmem>>, %arg8: memref<32x96xf32, #tpu.memory_space<vmem>>, %arg9: memref<1x96xf32, #tpu.memory_space<vmem>>, %arg10: memref<32x32xf32, #tpu.memory_space<vmem>>, %arg11: memref<1x32xf32, #tpu.memory_space<vmem>>, %arg12: memref<32x32xf32, #tpu.memory_space<vmem>>, %arg13: memref<1x32xf32, #tpu.memory_space<vmem>>, %arg14: memref<32x32xf32, #tpu.memory_space<vmem>>, %arg15: memref<1x32xf32, #tpu.memory_space<vmem>>, %arg16: memref<32x32xf32, #tpu.memory_space<vmem>>, %arg17: memref<1x32xf32, #tpu.memory_space<vmem>>, %arg18: memref<32x128xf32, #tpu.memory_space<vmem>>, %arg19: memref<1x128xf32, #tpu.memory_space<vmem>>, %arg20: memref<8x128xf32, #tpu.memory_space<vmem>>) attributes {dimension_semantics = [#tpu.dimension_semantics<arbitrary>], iteration_bounds = array<i64: 1>, scalar_prefetch = 0 : i64, scratch_operands = 0 : i64, tpu.core_type = #tpu.core_type<tc>, window_params = [{pipeline_mode = #tpu.pipeline_mode<synchronous>, transform_indices = @transform_0, window_bounds = array<i64: 8, 8, 16>}, {pipeline_mode = #tpu.pipeline_mode<synchronous>, transform_indices = @transform_1, window_bounds = array<i64: 16, 96>}, {pipeline_mode = #tpu.pipeline_mode<synchronous>, transform_indices = @transform_2, window_bounds = array<i64: 1, 96>}, {pipeline_mode = #tpu.pipeline_mode<synchronous>, transform_indices = @transform_3, window_bounds = array<i64: 32, 96>}, {pipeline_mode = #tpu.pipeline_mode<synchronous>, transform_indices = @transform_4, window_bounds = array<i64: 1, 96>}, {pipeline_mode = #tpu.pipeline_mode<synchronous>, transform_indices = @transform_5, window_bounds = array<i64: 32, 96>}, {pipeline_mode = #tpu.pipeline_mode<synchronous>, transform_indices = @transform_6, window_bounds = array<i64: 1, 96>}, {pipeline_mode = #tpu.pipeline_mode<synchronous>, transform_indices = @transform_7, window_bounds = array<i64: 32, 96>}, {pipeline_mode = #tpu.pipeline_mode<synchronous>, transform_indices = @transform_8, window_bounds = array<i64: 1, 96>}, {pipeline_mode = #tpu.pipeline_mode<synchronous>, transform_indices = @transform_9, window_bounds = array<i64: 32, 32>}, {pipeline_mode = #tpu.pipeline_mode<synchronous>, transform_indices = @transform_10, window_bounds = array<i64: 1, 32>}, {pipeline_mode = #tpu.pipeline_mode<synchronous>, transform_indices = @transform_11, window_bounds = array<i64: 32, 32>}, {pipeline_mode = #tpu.pipeline_mode<synchronous>, transform_indices = @transform_12, window_bounds = array<i64: 1, 32>}, {pipeline_mode = #tpu.pipeline_mode<synchronous>, transform_indices = @transform_13, window_bounds = array<i64: 32, 32>}, {pipeline_mode = #tpu.pipeline_mode<synchronous>, transform_indices = @transform_14, window_bounds = array<i64: 1, 32>}, {pipeline_mode = #tpu.pipeline_mode<synchronous>, transform_indices = @transform_15, window_bounds = array<i64: 32, 32>}, {pipeline_mode = #tpu.pipeline_mode<synchronous>, transform_indices = @transform_16, window_bounds = array<i64: 1, 32>}, {pipeline_mode = #tpu.pipeline_mode<synchronous>, transform_indices = @transform_17, window_bounds = array<i64: 32, 128>}, {pipeline_mode = #tpu.pipeline_mode<synchronous>, transform_indices = @transform_18, window_bounds = array<i64: 1, 128>}, {pipeline_mode = #tpu.pipeline_mode<synchronous>, transform_indices = @transform_19, window_bounds = array<i64: 8, 128>}]} {
    %c0 = arith.constant 0 : index
    %c0_0 = arith.constant 0 : index
    %c0_1 = arith.constant 0 : index
    %0 = vector.load %arg1[%c0, %c0_0, %c0_1] : memref<8x8x16xf32, #tpu.memory_space<vmem>>, vector<8x8x16xf32>
    %1 = vector.shape_cast %0 : vector<8x8x16xf32> to vector<64x16xf32>
    %c0_2 = arith.constant 0 : index
    %c0_3 = arith.constant 0 : index
    %2 = vector.load %arg2[%c0_2, %c0_3] : memref<16x96xf32, #tpu.memory_space<vmem>>, vector<16x96xf32>
    %cst = arith.constant dense<0.000000e+00> : vector<64x96xf32>
    %3 = tpu.matmul %1, %2, %cst {dimension_numbers = #tpu.dot_dimension_numbers<[1], [0], [0], [1], [0, 0, 1, 1], [], []>} : vector<64x16xf32>, vector<16x96xf32>, vector<64x96xf32> -> vector<64x96xf32>
    %c0_4 = arith.constant 0 : index
    %c0_5 = arith.constant 0 : index
    %4 = vector.load %arg3[%c0_4, %c0_5] : memref<1x96xf32, #tpu.memory_space<vmem>>, vector<1x96xf32>
    %5 = vector.broadcast %4 : vector<1x96xf32> to vector<64x96xf32>
    %6 = arith.addf %3, %5 : vector<64x96xf32>
    %7 = vector.shape_cast %6 : vector<64x96xf32> to vector<8x8x96xf32>
    %c0_6 = arith.constant 0 : index
    %c0_7 = arith.constant 0 : index
    %8 = vector.load %arg4[%c0_6, %c0_7] : memref<32x96xf32, #tpu.memory_space<vmem>>, vector<32x96xf32>
    %c0_8 = arith.constant 0 : index
    %c0_9 = arith.constant 0 : index
    %9 = vector.load %arg5[%c0_8, %c0_9] : memref<1x96xf32, #tpu.memory_space<vmem>>, vector<1x96xf32>
    %cst_10 = arith.constant 0.000000e+00 : f32
    %10 = vector.broadcast %cst_10 : f32 to vector<8x32xf32>
    %cst_11 = arith.constant dense<0.000000e+00> : vector<8x96xf32>
    %11 = tpu.matmul %10, %8, %cst_11 {dimension_numbers = #tpu.dot_dimension_numbers<[1], [0], [0], [1], [0, 0, 1, 1], [], []>} : vector<8x32xf32>, vector<32x96xf32>, vector<8x96xf32> -> vector<8x96xf32>
    %12 = vector.broadcast %9 : vector<1x96xf32> to vector<8x96xf32>
    %13 = arith.addf %11, %12 : vector<8x96xf32>
    %14 = vector.extract_strided_slice %7 {offsets = [0, 0, 0], sizes = [8, 1, 96], strides = [1, 1, 1]} : vector<8x8x96xf32> to vector<8x1x96xf32>
    %15 = vector.shape_cast %14 : vector<8x1x96xf32> to vector<8x96xf32>
    %16 = vector.extract_strided_slice %15 {offsets = [0, 0], sizes = [8, 32], strides = [1, 1]} : vector<8x96xf32> to vector<8x32xf32>
    %17 = vector.extract_strided_slice %13 {offsets = [0, 0], sizes = [8, 32], strides = [1, 1]} : vector<8x96xf32> to vector<8x32xf32>
    %18 = arith.addf %16, %17 : vector<8x32xf32>
    %cst_12 = arith.constant 0.000000e+00 : f32
    %19 = vector.broadcast %cst_12 : f32 to vector<8x32xf32>
    %20 = arith.subf %19, %18 : vector<8x32xf32>
    %21 = math.exp %20 : vector<8x32xf32>
    %cst_13 = arith.constant 1.000000e+00 : f32
    %22 = vector.broadcast %cst_13 : f32 to vector<8x32xf32>
    %23 = arith.addf %22, %21 : vector<8x32xf32>
    %cst_14 = arith.constant 1.000000e+00 : f32
    %24 = vector.broadcast %cst_14 : f32 to vector<8x32xf32>
    %25 = arith.divf %24, %23 : vector<8x32xf32>
    %26 = vector.extract_strided_slice %15 {offsets = [0, 32], sizes = [8, 32], strides = [1, 1]} : vector<8x96xf32> to vector<8x32xf32>
    %27 = vector.extract_strided_slice %13 {offsets = [0, 32], sizes = [8, 32], strides = [1, 1]} : vector<8x96xf32> to vector<8x32xf32>
    %28 = arith.addf %26, %27 : vector<8x32xf32>
    %cst_15 = arith.constant 0.000000e+00 : f32
    %29 = vector.broadcast %cst_15 : f32 to vector<8x32xf32>
    %30 = arith.subf %29, %28 : vector<8x32xf32>
    %31 = math.exp %30 : vector<8x32xf32>
    %cst_16 = arith.constant 1.000000e+00 : f32
    %32 = vector.broadcast %cst_16 : f32 to vector<8x32xf32>
    %33 = arith.addf %32, %31 : vector<8x32xf32>
    %cst_17 = arith.constant 1.000000e+00 : f32
    %34 = vector.broadcast %cst_17 : f32 to vector<8x32xf32>
    %35 = arith.divf %34, %33 : vector<8x32xf32>
    %36 = vector.extract_strided_slice %15 {offsets = [0, 64], sizes = [8, 32], strides = [1, 1]} : vector<8x96xf32> to vector<8x32xf32>
    %37 = vector.extract_strided_slice %13 {offsets = [0, 64], sizes = [8, 32], strides = [1, 1]} : vector<8x96xf32> to vector<8x32xf32>
    %38 = arith.mulf %25, %37 : vector<8x32xf32>
    %39 = arith.addf %36, %38 : vector<8x32xf32>
    %40 = math.tanh %39 : vector<8x32xf32>
    %cst_18 = arith.constant 1.000000e+00 : f32
    %41 = vector.broadcast %cst_18 : f32 to vector<8x32xf32>
    %42 = arith.subf %41, %35 : vector<8x32xf32>
    %43 = arith.mulf %42, %40 : vector<8x32xf32>
    %44 = arith.mulf %35, %10 : vector<8x32xf32>
    %45 = arith.addf %43, %44 : vector<8x32xf32>
    %cst_19 = arith.constant dense<0.000000e+00> : vector<8x96xf32>
    %46 = tpu.matmul %45, %8, %cst_19 {dimension_numbers = #tpu.dot_dimension_numbers<[1], [0], [0], [1], [0, 0, 1, 1], [], []>} : vector<8x32xf32>, vector<32x96xf32>, vector<8x96xf32> -> vector<8x96xf32>
    %47 = vector.broadcast %9 : vector<1x96xf32> to vector<8x96xf32>
    %48 = arith.addf %46, %47 : vector<8x96xf32>
    %49 = vector.extract_strided_slice %7 {offsets = [0, 1, 0], sizes = [8, 1, 96], strides = [1, 1, 1]} : vector<8x8x96xf32> to vector<8x1x96xf32>
    %50 = vector.shape_cast %49 : vector<8x1x96xf32> to vector<8x96xf32>
    %51 = vector.extract_strided_slice %50 {offsets = [0, 0], sizes = [8, 32], strides = [1, 1]} : vector<8x96xf32> to vector<8x32xf32>
    %52 = vector.extract_strided_slice %48 {offsets = [0, 0], sizes = [8, 32], strides = [1, 1]} : vector<8x96xf32> to vector<8x32xf32>
    %53 = arith.addf %51, %52 : vector<8x32xf32>
    %cst_20 = arith.constant 0.000000e+00 : f32
    %54 = vector.broadcast %cst_20 : f32 to vector<8x32xf32>
    %55 = arith.subf %54, %53 : vector<8x32xf32>
    %56 = math.exp %55 : vector<8x32xf32>
    %cst_21 = arith.constant 1.000000e+00 : f32
    %57 = vector.broadcast %cst_21 : f32 to vector<8x32xf32>
    %58 = arith.addf %57, %56 : vector<8x32xf32>
    %cst_22 = arith.constant 1.000000e+00 : f32
    %59 = vector.broadcast %cst_22 : f32 to vector<8x32xf32>
    %60 = arith.divf %59, %58 : vector<8x32xf32>
    %61 = vector.extract_strided_slice %50 {offsets = [0, 32], sizes = [8, 32], strides = [1, 1]} : vector<8x96xf32> to vector<8x32xf32>
    %62 = vector.extract_strided_slice %48 {offsets = [0, 32], sizes = [8, 32], strides = [1, 1]} : vector<8x96xf32> to vector<8x32xf32>
    %63 = arith.addf %61, %62 : vector<8x32xf32>
    %cst_23 = arith.constant 0.000000e+00 : f32
    %64 = vector.broadcast %cst_23 : f32 to vector<8x32xf32>
    %65 = arith.subf %64, %63 : vector<8x32xf32>
    %66 = math.exp %65 : vector<8x32xf32>
    %cst_24 = arith.constant 1.000000e+00 : f32
    %67 = vector.broadcast %cst_24 : f32 to vector<8x32xf32>
    %68 = arith.addf %67, %66 : vector<8x32xf32>
    %cst_25 = arith.constant 1.000000e+00 : f32
    %69 = vector.broadcast %cst_25 : f32 to vector<8x32xf32>
    %70 = arith.divf %69, %68 : vector<8x32xf32>
    %71 = vector.extract_strided_slice %50 {offsets = [0, 64], sizes = [8, 32], strides = [1, 1]} : vector<8x96xf32> to vector<8x32xf32>
    %72 = vector.extract_strided_slice %48 {offsets = [0, 64], sizes = [8, 32], strides = [1, 1]} : vector<8x96xf32> to vector<8x32xf32>
    %73 = arith.mulf %60, %72 : vector<8x32xf32>
    %74 = arith.addf %71, %73 : vector<8x32xf32>
    %75 = math.tanh %74 : vector<8x32xf32>
    %cst_26 = arith.constant 1.000000e+00 : f32
    %76 = vector.broadcast %cst_26 : f32 to vector<8x32xf32>
    %77 = arith.subf %76, %70 : vector<8x32xf32>
    %78 = arith.mulf %77, %75 : vector<8x32xf32>
    %79 = arith.mulf %70, %45 : vector<8x32xf32>
    %80 = arith.addf %78, %79 : vector<8x32xf32>
    %cst_27 = arith.constant dense<0.000000e+00> : vector<8x96xf32>
    %81 = tpu.matmul %80, %8, %cst_27 {dimension_numbers = #tpu.dot_dimension_numbers<[1], [0], [0], [1], [0, 0, 1, 1], [], []>} : vector<8x32xf32>, vector<32x96xf32>, vector<8x96xf32> -> vector<8x96xf32>
    %82 = vector.broadcast %9 : vector<1x96xf32> to vector<8x96xf32>
    %83 = arith.addf %81, %82 : vector<8x96xf32>
    %84 = vector.extract_strided_slice %7 {offsets = [0, 2, 0], sizes = [8, 1, 96], strides = [1, 1, 1]} : vector<8x8x96xf32> to vector<8x1x96xf32>
    %85 = vector.shape_cast %84 : vector<8x1x96xf32> to vector<8x96xf32>
    %86 = vector.extract_strided_slice %85 {offsets = [0, 0], sizes = [8, 32], strides = [1, 1]} : vector<8x96xf32> to vector<8x32xf32>
    %87 = vector.extract_strided_slice %83 {offsets = [0, 0], sizes = [8, 32], strides = [1, 1]} : vector<8x96xf32> to vector<8x32xf32>
    %88 = arith.addf %86, %87 : vector<8x32xf32>
    %cst_28 = arith.constant 0.000000e+00 : f32
    %89 = vector.broadcast %cst_28 : f32 to vector<8x32xf32>
    %90 = arith.subf %89, %88 : vector<8x32xf32>
    %91 = math.exp %90 : vector<8x32xf32>
    %cst_29 = arith.constant 1.000000e+00 : f32
    %92 = vector.broadcast %cst_29 : f32 to vector<8x32xf32>
    %93 = arith.addf %92, %91 : vector<8x32xf32>
    %cst_30 = arith.constant 1.000000e+00 : f32
    %94 = vector.broadcast %cst_30 : f32 to vector<8x32xf32>
    %95 = arith.divf %94, %93 : vector<8x32xf32>
    %96 = vector.extract_strided_slice %85 {offsets = [0, 32], sizes = [8, 32], strides = [1, 1]} : vector<8x96xf32> to vector<8x32xf32>
    %97 = vector.extract_strided_slice %83 {offsets = [0, 32], sizes = [8, 32], strides = [1, 1]} : vector<8x96xf32> to vector<8x32xf32>
    %98 = arith.addf %96, %97 : vector<8x32xf32>
    %cst_31 = arith.constant 0.000000e+00 : f32
    %99 = vector.broadcast %cst_31 : f32 to vector<8x32xf32>
    %100 = arith.subf %99, %98 : vector<8x32xf32>
    %101 = math.exp %100 : vector<8x32xf32>
    %cst_32 = arith.constant 1.000000e+00 : f32
    %102 = vector.broadcast %cst_32 : f32 to vector<8x32xf32>
    %103 = arith.addf %102, %101 : vector<8x32xf32>
    %cst_33 = arith.constant 1.000000e+00 : f32
    %104 = vector.broadcast %cst_33 : f32 to vector<8x32xf32>
    %105 = arith.divf %104, %103 : vector<8x32xf32>
    %106 = vector.extract_strided_slice %85 {offsets = [0, 64], sizes = [8, 32], strides = [1, 1]} : vector<8x96xf32> to vector<8x32xf32>
    %107 = vector.extract_strided_slice %83 {offsets = [0, 64], sizes = [8, 32], strides = [1, 1]} : vector<8x96xf32> to vector<8x32xf32>
    %108 = arith.mulf %95, %107 : vector<8x32xf32>
    %109 = arith.addf %106, %108 : vector<8x32xf32>
    %110 = math.tanh %109 : vector<8x32xf32>
    %cst_34 = arith.constant 1.000000e+00 : f32
    %111 = vector.broadcast %cst_34 : f32 to vector<8x32xf32>
    %112 = arith.subf %111, %105 : vector<8x32xf32>
    %113 = arith.mulf %112, %110 : vector<8x32xf32>
    %114 = arith.mulf %105, %80 : vector<8x32xf32>
    %115 = arith.addf %113, %114 : vector<8x32xf32>
    %cst_35 = arith.constant dense<0.000000e+00> : vector<8x96xf32>
    %116 = tpu.matmul %115, %8, %cst_35 {dimension_numbers = #tpu.dot_dimension_numbers<[1], [0], [0], [1], [0, 0, 1, 1], [], []>} : vector<8x32xf32>, vector<32x96xf32>, vector<8x96xf32> -> vector<8x96xf32>
    %117 = vector.broadcast %9 : vector<1x96xf32> to vector<8x96xf32>
    %118 = arith.addf %116, %117 : vector<8x96xf32>
    %119 = vector.extract_strided_slice %7 {offsets = [0, 3, 0], sizes = [8, 1, 96], strides = [1, 1, 1]} : vector<8x8x96xf32> to vector<8x1x96xf32>
    %120 = vector.shape_cast %119 : vector<8x1x96xf32> to vector<8x96xf32>
    %121 = vector.extract_strided_slice %120 {offsets = [0, 0], sizes = [8, 32], strides = [1, 1]} : vector<8x96xf32> to vector<8x32xf32>
    %122 = vector.extract_strided_slice %118 {offsets = [0, 0], sizes = [8, 32], strides = [1, 1]} : vector<8x96xf32> to vector<8x32xf32>
    %123 = arith.addf %121, %122 : vector<8x32xf32>
    %cst_36 = arith.constant 0.000000e+00 : f32
    %124 = vector.broadcast %cst_36 : f32 to vector<8x32xf32>
    %125 = arith.subf %124, %123 : vector<8x32xf32>
    %126 = math.exp %125 : vector<8x32xf32>
    %cst_37 = arith.constant 1.000000e+00 : f32
    %127 = vector.broadcast %cst_37 : f32 to vector<8x32xf32>
    %128 = arith.addf %127, %126 : vector<8x32xf32>
    %cst_38 = arith.constant 1.000000e+00 : f32
    %129 = vector.broadcast %cst_38 : f32 to vector<8x32xf32>
    %130 = arith.divf %129, %128 : vector<8x32xf32>
    %131 = vector.extract_strided_slice %120 {offsets = [0, 32], sizes = [8, 32], strides = [1, 1]} : vector<8x96xf32> to vector<8x32xf32>
    %132 = vector.extract_strided_slice %118 {offsets = [0, 32], sizes = [8, 32], strides = [1, 1]} : vector<8x96xf32> to vector<8x32xf32>
    %133 = arith.addf %131, %132 : vector<8x32xf32>
    %cst_39 = arith.constant 0.000000e+00 : f32
    %134 = vector.broadcast %cst_39 : f32 to vector<8x32xf32>
    %135 = arith.subf %134, %133 : vector<8x32xf32>
    %136 = math.exp %135 : vector<8x32xf32>
    %cst_40 = arith.constant 1.000000e+00 : f32
    %137 = vector.broadcast %cst_40 : f32 to vector<8x32xf32>
    %138 = arith.addf %137, %136 : vector<8x32xf32>
    %cst_41 = arith.constant 1.000000e+00 : f32
    %139 = vector.broadcast %cst_41 : f32 to vector<8x32xf32>
    %140 = arith.divf %139, %138 : vector<8x32xf32>
    %141 = vector.extract_strided_slice %120 {offsets = [0, 64], sizes = [8, 32], strides = [1, 1]} : vector<8x96xf32> to vector<8x32xf32>
    %142 = vector.extract_strided_slice %118 {offsets = [0, 64], sizes = [8, 32], strides = [1, 1]} : vector<8x96xf32> to vector<8x32xf32>
    %143 = arith.mulf %130, %142 : vector<8x32xf32>
    %144 = arith.addf %141, %143 : vector<8x32xf32>
    %145 = math.tanh %144 : vector<8x32xf32>
    %cst_42 = arith.constant 1.000000e+00 : f32
    %146 = vector.broadcast %cst_42 : f32 to vector<8x32xf32>
    %147 = arith.subf %146, %140 : vector<8x32xf32>
    %148 = arith.mulf %147, %145 : vector<8x32xf32>
    %149 = arith.mulf %140, %115 : vector<8x32xf32>
    %150 = arith.addf %148, %149 : vector<8x32xf32>
    %cst_43 = arith.constant dense<0.000000e+00> : vector<8x96xf32>
    %151 = tpu.matmul %150, %8, %cst_43 {dimension_numbers = #tpu.dot_dimension_numbers<[1], [0], [0], [1], [0, 0, 1, 1], [], []>} : vector<8x32xf32>, vector<32x96xf32>, vector<8x96xf32> -> vector<8x96xf32>
    %152 = vector.broadcast %9 : vector<1x96xf32> to vector<8x96xf32>
    %153 = arith.addf %151, %152 : vector<8x96xf32>
    %154 = vector.extract_strided_slice %7 {offsets = [0, 4, 0], sizes = [8, 1, 96], strides = [1, 1, 1]} : vector<8x8x96xf32> to vector<8x1x96xf32>
    %155 = vector.shape_cast %154 : vector<8x1x96xf32> to vector<8x96xf32>
    %156 = vector.extract_strided_slice %155 {offsets = [0, 0], sizes = [8, 32], strides = [1, 1]} : vector<8x96xf32> to vector<8x32xf32>
    %157 = vector.extract_strided_slice %153 {offsets = [0, 0], sizes = [8, 32], strides = [1, 1]} : vector<8x96xf32> to vector<8x32xf32>
    %158 = arith.addf %156, %157 : vector<8x32xf32>
    %cst_44 = arith.constant 0.000000e+00 : f32
    %159 = vector.broadcast %cst_44 : f32 to vector<8x32xf32>
    %160 = arith.subf %159, %158 : vector<8x32xf32>
    %161 = math.exp %160 : vector<8x32xf32>
    %cst_45 = arith.constant 1.000000e+00 : f32
    %162 = vector.broadcast %cst_45 : f32 to vector<8x32xf32>
    %163 = arith.addf %162, %161 : vector<8x32xf32>
    %cst_46 = arith.constant 1.000000e+00 : f32
    %164 = vector.broadcast %cst_46 : f32 to vector<8x32xf32>
    %165 = arith.divf %164, %163 : vector<8x32xf32>
    %166 = vector.extract_strided_slice %155 {offsets = [0, 32], sizes = [8, 32], strides = [1, 1]} : vector<8x96xf32> to vector<8x32xf32>
    %167 = vector.extract_strided_slice %153 {offsets = [0, 32], sizes = [8, 32], strides = [1, 1]} : vector<8x96xf32> to vector<8x32xf32>
    %168 = arith.addf %166, %167 : vector<8x32xf32>
    %cst_47 = arith.constant 0.000000e+00 : f32
    %169 = vector.broadcast %cst_47 : f32 to vector<8x32xf32>
    %170 = arith.subf %169, %168 : vector<8x32xf32>
    %171 = math.exp %170 : vector<8x32xf32>
    %cst_48 = arith.constant 1.000000e+00 : f32
    %172 = vector.broadcast %cst_48 : f32 to vector<8x32xf32>
    %173 = arith.addf %172, %171 : vector<8x32xf32>
    %cst_49 = arith.constant 1.000000e+00 : f32
    %174 = vector.broadcast %cst_49 : f32 to vector<8x32xf32>
    %175 = arith.divf %174, %173 : vector<8x32xf32>
    %176 = vector.extract_strided_slice %155 {offsets = [0, 64], sizes = [8, 32], strides = [1, 1]} : vector<8x96xf32> to vector<8x32xf32>
    %177 = vector.extract_strided_slice %153 {offsets = [0, 64], sizes = [8, 32], strides = [1, 1]} : vector<8x96xf32> to vector<8x32xf32>
    %178 = arith.mulf %165, %177 : vector<8x32xf32>
    %179 = arith.addf %176, %178 : vector<8x32xf32>
    %180 = math.tanh %179 : vector<8x32xf32>
    %cst_50 = arith.constant 1.000000e+00 : f32
    %181 = vector.broadcast %cst_50 : f32 to vector<8x32xf32>
    %182 = arith.subf %181, %175 : vector<8x32xf32>
    %183 = arith.mulf %182, %180 : vector<8x32xf32>
    %184 = arith.mulf %175, %150 : vector<8x32xf32>
    %185 = arith.addf %183, %184 : vector<8x32xf32>
    %cst_51 = arith.constant dense<0.000000e+00> : vector<8x96xf32>
    %186 = tpu.matmul %185, %8, %cst_51 {dimension_numbers = #tpu.dot_dimension_numbers<[1], [0], [0], [1], [0, 0, 1, 1], [], []>} : vector<8x32xf32>, vector<32x96xf32>, vector<8x96xf32> -> vector<8x96xf32>
    %187 = vector.broadcast %9 : vector<1x96xf32> to vector<8x96xf32>
    %188 = arith.addf %186, %187 : vector<8x96xf32>
    %189 = vector.extract_strided_slice %7 {offsets = [0, 5, 0], sizes = [8, 1, 96], strides = [1, 1, 1]} : vector<8x8x96xf32> to vector<8x1x96xf32>
    %190 = vector.shape_cast %189 : vector<8x1x96xf32> to vector<8x96xf32>
    %191 = vector.extract_strided_slice %190 {offsets = [0, 0], sizes = [8, 32], strides = [1, 1]} : vector<8x96xf32> to vector<8x32xf32>
    %192 = vector.extract_strided_slice %188 {offsets = [0, 0], sizes = [8, 32], strides = [1, 1]} : vector<8x96xf32> to vector<8x32xf32>
    %193 = arith.addf %191, %192 : vector<8x32xf32>
    %cst_52 = arith.constant 0.000000e+00 : f32
    %194 = vector.broadcast %cst_52 : f32 to vector<8x32xf32>
    %195 = arith.subf %194, %193 : vector<8x32xf32>
    %196 = math.exp %195 : vector<8x32xf32>
    %cst_53 = arith.constant 1.000000e+00 : f32
    %197 = vector.broadcast %cst_53 : f32 to vector<8x32xf32>
    %198 = arith.addf %197, %196 : vector<8x32xf32>
    %cst_54 = arith.constant 1.000000e+00 : f32
    %199 = vector.broadcast %cst_54 : f32 to vector<8x32xf32>
    %200 = arith.divf %199, %198 : vector<8x32xf32>
    %201 = vector.extract_strided_slice %190 {offsets = [0, 32], sizes = [8, 32], strides = [1, 1]} : vector<8x96xf32> to vector<8x32xf32>
    %202 = vector.extract_strided_slice %188 {offsets = [0, 32], sizes = [8, 32], strides = [1, 1]} : vector<8x96xf32> to vector<8x32xf32>
    %203 = arith.addf %201, %202 : vector<8x32xf32>
    %cst_55 = arith.constant 0.000000e+00 : f32
    %204 = vector.broadcast %cst_55 : f32 to vector<8x32xf32>
    %205 = arith.subf %204, %203 : vector<8x32xf32>
    %206 = math.exp %205 : vector<8x32xf32>
    %cst_56 = arith.constant 1.000000e+00 : f32
    %207 = vector.broadcast %cst_56 : f32 to vector<8x32xf32>
    %208 = arith.addf %207, %206 : vector<8x32xf32>
    %cst_57 = arith.constant 1.000000e+00 : f32
    %209 = vector.broadcast %cst_57 : f32 to vector<8x32xf32>
    %210 = arith.divf %209, %208 : vector<8x32xf32>
    %211 = vector.extract_strided_slice %190 {offsets = [0, 64], sizes = [8, 32], strides = [1, 1]} : vector<8x96xf32> to vector<8x32xf32>
    %212 = vector.extract_strided_slice %188 {offsets = [0, 64], sizes = [8, 32], strides = [1, 1]} : vector<8x96xf32> to vector<8x32xf32>
    %213 = arith.mulf %200, %212 : vector<8x32xf32>
    %214 = arith.addf %211, %213 : vector<8x32xf32>
    %215 = math.tanh %214 : vector<8x32xf32>
    %cst_58 = arith.constant 1.000000e+00 : f32
    %216 = vector.broadcast %cst_58 : f32 to vector<8x32xf32>
    %217 = arith.subf %216, %210 : vector<8x32xf32>
    %218 = arith.mulf %217, %215 : vector<8x32xf32>
    %219 = arith.mulf %210, %185 : vector<8x32xf32>
    %220 = arith.addf %218, %219 : vector<8x32xf32>
    %cst_59 = arith.constant dense<0.000000e+00> : vector<8x96xf32>
    %221 = tpu.matmul %220, %8, %cst_59 {dimension_numbers = #tpu.dot_dimension_numbers<[1], [0], [0], [1], [0, 0, 1, 1], [], []>} : vector<8x32xf32>, vector<32x96xf32>, vector<8x96xf32> -> vector<8x96xf32>
    %222 = vector.broadcast %9 : vector<1x96xf32> to vector<8x96xf32>
    %223 = arith.addf %221, %222 : vector<8x96xf32>
    %224 = vector.extract_strided_slice %7 {offsets = [0, 6, 0], sizes = [8, 1, 96], strides = [1, 1, 1]} : vector<8x8x96xf32> to vector<8x1x96xf32>
    %225 = vector.shape_cast %224 : vector<8x1x96xf32> to vector<8x96xf32>
    %226 = vector.extract_strided_slice %225 {offsets = [0, 0], sizes = [8, 32], strides = [1, 1]} : vector<8x96xf32> to vector<8x32xf32>
    %227 = vector.extract_strided_slice %223 {offsets = [0, 0], sizes = [8, 32], strides = [1, 1]} : vector<8x96xf32> to vector<8x32xf32>
    %228 = arith.addf %226, %227 : vector<8x32xf32>
    %cst_60 = arith.constant 0.000000e+00 : f32
    %229 = vector.broadcast %cst_60 : f32 to vector<8x32xf32>
    %230 = arith.subf %229, %228 : vector<8x32xf32>
    %231 = math.exp %230 : vector<8x32xf32>
    %cst_61 = arith.constant 1.000000e+00 : f32
    %232 = vector.broadcast %cst_61 : f32 to vector<8x32xf32>
    %233 = arith.addf %232, %231 : vector<8x32xf32>
    %cst_62 = arith.constant 1.000000e+00 : f32
    %234 = vector.broadcast %cst_62 : f32 to vector<8x32xf32>
    %235 = arith.divf %234, %233 : vector<8x32xf32>
    %236 = vector.extract_strided_slice %225 {offsets = [0, 32], sizes = [8, 32], strides = [1, 1]} : vector<8x96xf32> to vector<8x32xf32>
    %237 = vector.extract_strided_slice %223 {offsets = [0, 32], sizes = [8, 32], strides = [1, 1]} : vector<8x96xf32> to vector<8x32xf32>
    %238 = arith.addf %236, %237 : vector<8x32xf32>
    %cst_63 = arith.constant 0.000000e+00 : f32
    %239 = vector.broadcast %cst_63 : f32 to vector<8x32xf32>
    %240 = arith.subf %239, %238 : vector<8x32xf32>
    %241 = math.exp %240 : vector<8x32xf32>
    %cst_64 = arith.constant 1.000000e+00 : f32
    %242 = vector.broadcast %cst_64 : f32 to vector<8x32xf32>
    %243 = arith.addf %242, %241 : vector<8x32xf32>
    %cst_65 = arith.constant 1.000000e+00 : f32
    %244 = vector.broadcast %cst_65 : f32 to vector<8x32xf32>
    %245 = arith.divf %244, %243 : vector<8x32xf32>
    %246 = vector.extract_strided_slice %225 {offsets = [0, 64], sizes = [8, 32], strides = [1, 1]} : vector<8x96xf32> to vector<8x32xf32>
    %247 = vector.extract_strided_slice %223 {offsets = [0, 64], sizes = [8, 32], strides = [1, 1]} : vector<8x96xf32> to vector<8x32xf32>
    %248 = arith.mulf %235, %247 : vector<8x32xf32>
    %249 = arith.addf %246, %248 : vector<8x32xf32>
    %250 = math.tanh %249 : vector<8x32xf32>
    %cst_66 = arith.constant 1.000000e+00 : f32
    %251 = vector.broadcast %cst_66 : f32 to vector<8x32xf32>
    %252 = arith.subf %251, %245 : vector<8x32xf32>
    %253 = arith.mulf %252, %250 : vector<8x32xf32>
    %254 = arith.mulf %245, %220 : vector<8x32xf32>
    %255 = arith.addf %253, %254 : vector<8x32xf32>
    %cst_67 = arith.constant dense<0.000000e+00> : vector<8x96xf32>
    %256 = tpu.matmul %255, %8, %cst_67 {dimension_numbers = #tpu.dot_dimension_numbers<[1], [0], [0], [1], [0, 0, 1, 1], [], []>} : vector<8x32xf32>, vector<32x96xf32>, vector<8x96xf32> -> vector<8x96xf32>
    %257 = vector.broadcast %9 : vector<1x96xf32> to vector<8x96xf32>
    %258 = arith.addf %256, %257 : vector<8x96xf32>
    %259 = vector.extract_strided_slice %7 {offsets = [0, 7, 0], sizes = [8, 1, 96], strides = [1, 1, 1]} : vector<8x8x96xf32> to vector<8x1x96xf32>
    %260 = vector.shape_cast %259 : vector<8x1x96xf32> to vector<8x96xf32>
    %261 = vector.extract_strided_slice %260 {offsets = [0, 0], sizes = [8, 32], strides = [1, 1]} : vector<8x96xf32> to vector<8x32xf32>
    %262 = vector.extract_strided_slice %258 {offsets = [0, 0], sizes = [8, 32], strides = [1, 1]} : vector<8x96xf32> to vector<8x32xf32>
    %263 = arith.addf %261, %262 : vector<8x32xf32>
    %cst_68 = arith.constant 0.000000e+00 : f32
    %264 = vector.broadcast %cst_68 : f32 to vector<8x32xf32>
    %265 = arith.subf %264, %263 : vector<8x32xf32>
    %266 = math.exp %265 : vector<8x32xf32>
    %cst_69 = arith.constant 1.000000e+00 : f32
    %267 = vector.broadcast %cst_69 : f32 to vector<8x32xf32>
    %268 = arith.addf %267, %266 : vector<8x32xf32>
    %cst_70 = arith.constant 1.000000e+00 : f32
    %269 = vector.broadcast %cst_70 : f32 to vector<8x32xf32>
    %270 = arith.divf %269, %268 : vector<8x32xf32>
    %271 = vector.extract_strided_slice %260 {offsets = [0, 32], sizes = [8, 32], strides = [1, 1]} : vector<8x96xf32> to vector<8x32xf32>
    %272 = vector.extract_strided_slice %258 {offsets = [0, 32], sizes = [8, 32], strides = [1, 1]} : vector<8x96xf32> to vector<8x32xf32>
    %273 = arith.addf %271, %272 : vector<8x32xf32>
    %cst_71 = arith.constant 0.000000e+00 : f32
    %274 = vector.broadcast %cst_71 : f32 to vector<8x32xf32>
    %275 = arith.subf %274, %273 : vector<8x32xf32>
    %276 = math.exp %275 : vector<8x32xf32>
    %cst_72 = arith.constant 1.000000e+00 : f32
    %277 = vector.broadcast %cst_72 : f32 to vector<8x32xf32>
    %278 = arith.addf %277, %276 : vector<8x32xf32>
    %cst_73 = arith.constant 1.000000e+00 : f32
    %279 = vector.broadcast %cst_73 : f32 to vector<8x32xf32>
    %280 = arith.divf %279, %278 : vector<8x32xf32>
    %281 = vector.extract_strided_slice %260 {offsets = [0, 64], sizes = [8, 32], strides = [1, 1]} : vector<8x96xf32> to vector<8x32xf32>
    %282 = vector.extract_strided_slice %258 {offsets = [0, 64], sizes = [8, 32], strides = [1, 1]} : vector<8x96xf32> to vector<8x32xf32>
    %283 = arith.mulf %270, %282 : vector<8x32xf32>
    %284 = arith.addf %281, %283 : vector<8x32xf32>
    %285 = math.tanh %284 : vector<8x32xf32>
    %cst_74 = arith.constant 1.000000e+00 : f32
    %286 = vector.broadcast %cst_74 : f32 to vector<8x32xf32>
    %287 = arith.subf %286, %280 : vector<8x32xf32>
    %288 = arith.mulf %287, %285 : vector<8x32xf32>
    %289 = arith.mulf %280, %255 : vector<8x32xf32>
    %290 = arith.addf %288, %289 : vector<8x32xf32>
    %291 = vector.shape_cast %45 : vector<8x32xf32> to vector<8x1x32xf32>
    %292 = vector.shape_cast %80 : vector<8x32xf32> to vector<8x1x32xf32>
    %293 = vector.shape_cast %115 : vector<8x32xf32> to vector<8x1x32xf32>
    %294 = vector.shape_cast %150 : vector<8x32xf32> to vector<8x1x32xf32>
    %295 = vector.shape_cast %185 : vector<8x32xf32> to vector<8x1x32xf32>
    %296 = vector.shape_cast %220 : vector<8x32xf32> to vector<8x1x32xf32>
    %297 = vector.shape_cast %255 : vector<8x32xf32> to vector<8x1x32xf32>
    %298 = vector.shape_cast %290 : vector<8x32xf32> to vector<8x1x32xf32>
    %299 = tpu.concatenate %291, %292, %293, %294, %295, %296, %297, %298 in 1 : vector<8x1x32xf32>, vector<8x1x32xf32>, vector<8x1x32xf32>, vector<8x1x32xf32>, vector<8x1x32xf32>, vector<8x1x32xf32>, vector<8x1x32xf32>, vector<8x1x32xf32> -> vector<8x8x32xf32>
    %300 = vector.shape_cast %299 : vector<8x8x32xf32> to vector<64x32xf32>
    %c0_75 = arith.constant 0 : index
    %c0_76 = arith.constant 0 : index
    %301 = vector.load %arg6[%c0_75, %c0_76] : memref<32x96xf32, #tpu.memory_space<vmem>>, vector<32x96xf32>
    %cst_77 = arith.constant dense<0.000000e+00> : vector<64x96xf32>
    %302 = tpu.matmul %300, %301, %cst_77 {dimension_numbers = #tpu.dot_dimension_numbers<[1], [0], [0], [1], [0, 0, 1, 1], [], []>} : vector<64x32xf32>, vector<32x96xf32>, vector<64x96xf32> -> vector<64x96xf32>
    %c0_78 = arith.constant 0 : index
    %c0_79 = arith.constant 0 : index
    %303 = vector.load %arg7[%c0_78, %c0_79] : memref<1x96xf32, #tpu.memory_space<vmem>>, vector<1x96xf32>
    %304 = vector.broadcast %303 : vector<1x96xf32> to vector<64x96xf32>
    %305 = arith.addf %302, %304 : vector<64x96xf32>
    %306 = vector.shape_cast %305 : vector<64x96xf32> to vector<8x8x96xf32>
    %c0_80 = arith.constant 0 : index
    %c0_81 = arith.constant 0 : index
    %307 = vector.load %arg8[%c0_80, %c0_81] : memref<32x96xf32, #tpu.memory_space<vmem>>, vector<32x96xf32>
    %c0_82 = arith.constant 0 : index
    %c0_83 = arith.constant 0 : index
    %308 = vector.load %arg9[%c0_82, %c0_83] : memref<1x96xf32, #tpu.memory_space<vmem>>, vector<1x96xf32>
    %cst_84 = arith.constant 0.000000e+00 : f32
    %309 = vector.broadcast %cst_84 : f32 to vector<8x32xf32>
    %cst_85 = arith.constant dense<0.000000e+00> : vector<8x96xf32>
    %310 = tpu.matmul %309, %307, %cst_85 {dimension_numbers = #tpu.dot_dimension_numbers<[1], [0], [0], [1], [0, 0, 1, 1], [], []>} : vector<8x32xf32>, vector<32x96xf32>, vector<8x96xf32> -> vector<8x96xf32>
    %311 = vector.broadcast %308 : vector<1x96xf32> to vector<8x96xf32>
    %312 = arith.addf %310, %311 : vector<8x96xf32>
    %313 = vector.extract_strided_slice %306 {offsets = [0, 0, 0], sizes = [8, 1, 96], strides = [1, 1, 1]} : vector<8x8x96xf32> to vector<8x1x96xf32>
    %314 = vector.shape_cast %313 : vector<8x1x96xf32> to vector<8x96xf32>
    %315 = vector.extract_strided_slice %314 {offsets = [0, 0], sizes = [8, 32], strides = [1, 1]} : vector<8x96xf32> to vector<8x32xf32>
    %316 = vector.extract_strided_slice %312 {offsets = [0, 0], sizes = [8, 32], strides = [1, 1]} : vector<8x96xf32> to vector<8x32xf32>
    %317 = arith.addf %315, %316 : vector<8x32xf32>
    %cst_86 = arith.constant 0.000000e+00 : f32
    %318 = vector.broadcast %cst_86 : f32 to vector<8x32xf32>
    %319 = arith.subf %318, %317 : vector<8x32xf32>
    %320 = math.exp %319 : vector<8x32xf32>
    %cst_87 = arith.constant 1.000000e+00 : f32
    %321 = vector.broadcast %cst_87 : f32 to vector<8x32xf32>
    %322 = arith.addf %321, %320 : vector<8x32xf32>
    %cst_88 = arith.constant 1.000000e+00 : f32
    %323 = vector.broadcast %cst_88 : f32 to vector<8x32xf32>
    %324 = arith.divf %323, %322 : vector<8x32xf32>
    %325 = vector.extract_strided_slice %314 {offsets = [0, 32], sizes = [8, 32], strides = [1, 1]} : vector<8x96xf32> to vector<8x32xf32>
    %326 = vector.extract_strided_slice %312 {offsets = [0, 32], sizes = [8, 32], strides = [1, 1]} : vector<8x96xf32> to vector<8x32xf32>
    %327 = arith.addf %325, %326 : vector<8x32xf32>
    %cst_89 = arith.constant 0.000000e+00 : f32
    %328 = vector.broadcast %cst_89 : f32 to vector<8x32xf32>
    %329 = arith.subf %328, %327 : vector<8x32xf32>
    %330 = math.exp %329 : vector<8x32xf32>
    %cst_90 = arith.constant 1.000000e+00 : f32
    %331 = vector.broadcast %cst_90 : f32 to vector<8x32xf32>
    %332 = arith.addf %331, %330 : vector<8x32xf32>
    %cst_91 = arith.constant 1.000000e+00 : f32
    %333 = vector.broadcast %cst_91 : f32 to vector<8x32xf32>
    %334 = arith.divf %333, %332 : vector<8x32xf32>
    %335 = vector.extract_strided_slice %314 {offsets = [0, 64], sizes = [8, 32], strides = [1, 1]} : vector<8x96xf32> to vector<8x32xf32>
    %336 = vector.extract_strided_slice %312 {offsets = [0, 64], sizes = [8, 32], strides = [1, 1]} : vector<8x96xf32> to vector<8x32xf32>
    %337 = arith.mulf %324, %336 : vector<8x32xf32>
    %338 = arith.addf %335, %337 : vector<8x32xf32>
    %339 = math.tanh %338 : vector<8x32xf32>
    %cst_92 = arith.constant 1.000000e+00 : f32
    %340 = vector.broadcast %cst_92 : f32 to vector<8x32xf32>
    %341 = arith.subf %340, %334 : vector<8x32xf32>
    %342 = arith.mulf %341, %339 : vector<8x32xf32>
    %343 = arith.mulf %334, %309 : vector<8x32xf32>
    %344 = arith.addf %342, %343 : vector<8x32xf32>
    %cst_93 = arith.constant dense<0.000000e+00> : vector<8x96xf32>
    %345 = tpu.matmul %344, %307, %cst_93 {dimension_numbers = #tpu.dot_dimension_numbers<[1], [0], [0], [1], [0, 0, 1, 1], [], []>} : vector<8x32xf32>, vector<32x96xf32>, vector<8x96xf32> -> vector<8x96xf32>
    %346 = vector.broadcast %308 : vector<1x96xf32> to vector<8x96xf32>
    %347 = arith.addf %345, %346 : vector<8x96xf32>
    %348 = vector.extract_strided_slice %306 {offsets = [0, 1, 0], sizes = [8, 1, 96], strides = [1, 1, 1]} : vector<8x8x96xf32> to vector<8x1x96xf32>
    %349 = vector.shape_cast %348 : vector<8x1x96xf32> to vector<8x96xf32>
    %350 = vector.extract_strided_slice %349 {offsets = [0, 0], sizes = [8, 32], strides = [1, 1]} : vector<8x96xf32> to vector<8x32xf32>
    %351 = vector.extract_strided_slice %347 {offsets = [0, 0], sizes = [8, 32], strides = [1, 1]} : vector<8x96xf32> to vector<8x32xf32>
    %352 = arith.addf %350, %351 : vector<8x32xf32>
    %cst_94 = arith.constant 0.000000e+00 : f32
    %353 = vector.broadcast %cst_94 : f32 to vector<8x32xf32>
    %354 = arith.subf %353, %352 : vector<8x32xf32>
    %355 = math.exp %354 : vector<8x32xf32>
    %cst_95 = arith.constant 1.000000e+00 : f32
    %356 = vector.broadcast %cst_95 : f32 to vector<8x32xf32>
    %357 = arith.addf %356, %355 : vector<8x32xf32>
    %cst_96 = arith.constant 1.000000e+00 : f32
    %358 = vector.broadcast %cst_96 : f32 to vector<8x32xf32>
    %359 = arith.divf %358, %357 : vector<8x32xf32>
    %360 = vector.extract_strided_slice %349 {offsets = [0, 32], sizes = [8, 32], strides = [1, 1]} : vector<8x96xf32> to vector<8x32xf32>
    %361 = vector.extract_strided_slice %347 {offsets = [0, 32], sizes = [8, 32], strides = [1, 1]} : vector<8x96xf32> to vector<8x32xf32>
    %362 = arith.addf %360, %361 : vector<8x32xf32>
    %cst_97 = arith.constant 0.000000e+00 : f32
    %363 = vector.broadcast %cst_97 : f32 to vector<8x32xf32>
    %364 = arith.subf %363, %362 : vector<8x32xf32>
    %365 = math.exp %364 : vector<8x32xf32>
    %cst_98 = arith.constant 1.000000e+00 : f32
    %366 = vector.broadcast %cst_98 : f32 to vector<8x32xf32>
    %367 = arith.addf %366, %365 : vector<8x32xf32>
    %cst_99 = arith.constant 1.000000e+00 : f32
    %368 = vector.broadcast %cst_99 : f32 to vector<8x32xf32>
    %369 = arith.divf %368, %367 : vector<8x32xf32>
    %370 = vector.extract_strided_slice %349 {offsets = [0, 64], sizes = [8, 32], strides = [1, 1]} : vector<8x96xf32> to vector<8x32xf32>
    %371 = vector.extract_strided_slice %347 {offsets = [0, 64], sizes = [8, 32], strides = [1, 1]} : vector<8x96xf32> to vector<8x32xf32>
    %372 = arith.mulf %359, %371 : vector<8x32xf32>
    %373 = arith.addf %370, %372 : vector<8x32xf32>
    %374 = math.tanh %373 : vector<8x32xf32>
    %cst_100 = arith.constant 1.000000e+00 : f32
    %375 = vector.broadcast %cst_100 : f32 to vector<8x32xf32>
    %376 = arith.subf %375, %369 : vector<8x32xf32>
    %377 = arith.mulf %376, %374 : vector<8x32xf32>
    %378 = arith.mulf %369, %344 : vector<8x32xf32>
    %379 = arith.addf %377, %378 : vector<8x32xf32>
    %cst_101 = arith.constant dense<0.000000e+00> : vector<8x96xf32>
    %380 = tpu.matmul %379, %307, %cst_101 {dimension_numbers = #tpu.dot_dimension_numbers<[1], [0], [0], [1], [0, 0, 1, 1], [], []>} : vector<8x32xf32>, vector<32x96xf32>, vector<8x96xf32> -> vector<8x96xf32>
    %381 = vector.broadcast %308 : vector<1x96xf32> to vector<8x96xf32>
    %382 = arith.addf %380, %381 : vector<8x96xf32>
    %383 = vector.extract_strided_slice %306 {offsets = [0, 2, 0], sizes = [8, 1, 96], strides = [1, 1, 1]} : vector<8x8x96xf32> to vector<8x1x96xf32>
    %384 = vector.shape_cast %383 : vector<8x1x96xf32> to vector<8x96xf32>
    %385 = vector.extract_strided_slice %384 {offsets = [0, 0], sizes = [8, 32], strides = [1, 1]} : vector<8x96xf32> to vector<8x32xf32>
    %386 = vector.extract_strided_slice %382 {offsets = [0, 0], sizes = [8, 32], strides = [1, 1]} : vector<8x96xf32> to vector<8x32xf32>
    %387 = arith.addf %385, %386 : vector<8x32xf32>
    %cst_102 = arith.constant 0.000000e+00 : f32
    %388 = vector.broadcast %cst_102 : f32 to vector<8x32xf32>
    %389 = arith.subf %388, %387 : vector<8x32xf32>
    %390 = math.exp %389 : vector<8x32xf32>
    %cst_103 = arith.constant 1.000000e+00 : f32
    %391 = vector.broadcast %cst_103 : f32 to vector<8x32xf32>
    %392 = arith.addf %391, %390 : vector<8x32xf32>
    %cst_104 = arith.constant 1.000000e+00 : f32
    %393 = vector.broadcast %cst_104 : f32 to vector<8x32xf32>
    %394 = arith.divf %393, %392 : vector<8x32xf32>
    %395 = vector.extract_strided_slice %384 {offsets = [0, 32], sizes = [8, 32], strides = [1, 1]} : vector<8x96xf32> to vector<8x32xf32>
    %396 = vector.extract_strided_slice %382 {offsets = [0, 32], sizes = [8, 32], strides = [1, 1]} : vector<8x96xf32> to vector<8x32xf32>
    %397 = arith.addf %395, %396 : vector<8x32xf32>
    %cst_105 = arith.constant 0.000000e+00 : f32
    %398 = vector.broadcast %cst_105 : f32 to vector<8x32xf32>
    %399 = arith.subf %398, %397 : vector<8x32xf32>
    %400 = math.exp %399 : vector<8x32xf32>
    %cst_106 = arith.constant 1.000000e+00 : f32
    %401 = vector.broadcast %cst_106 : f32 to vector<8x32xf32>
    %402 = arith.addf %401, %400 : vector<8x32xf32>
    %cst_107 = arith.constant 1.000000e+00 : f32
    %403 = vector.broadcast %cst_107 : f32 to vector<8x32xf32>
    %404 = arith.divf %403, %402 : vector<8x32xf32>
    %405 = vector.extract_strided_slice %384 {offsets = [0, 64], sizes = [8, 32], strides = [1, 1]} : vector<8x96xf32> to vector<8x32xf32>
    %406 = vector.extract_strided_slice %382 {offsets = [0, 64], sizes = [8, 32], strides = [1, 1]} : vector<8x96xf32> to vector<8x32xf32>
    %407 = arith.mulf %394, %406 : vector<8x32xf32>
    %408 = arith.addf %405, %407 : vector<8x32xf32>
    %409 = math.tanh %408 : vector<8x32xf32>
    %cst_108 = arith.constant 1.000000e+00 : f32
    %410 = vector.broadcast %cst_108 : f32 to vector<8x32xf32>
    %411 = arith.subf %410, %404 : vector<8x32xf32>
    %412 = arith.mulf %411, %409 : vector<8x32xf32>
    %413 = arith.mulf %404, %379 : vector<8x32xf32>
    %414 = arith.addf %412, %413 : vector<8x32xf32>
    %cst_109 = arith.constant dense<0.000000e+00> : vector<8x96xf32>
    %415 = tpu.matmul %414, %307, %cst_109 {dimension_numbers = #tpu.dot_dimension_numbers<[1], [0], [0], [1], [0, 0, 1, 1], [], []>} : vector<8x32xf32>, vector<32x96xf32>, vector<8x96xf32> -> vector<8x96xf32>
    %416 = vector.broadcast %308 : vector<1x96xf32> to vector<8x96xf32>
    %417 = arith.addf %415, %416 : vector<8x96xf32>
    %418 = vector.extract_strided_slice %306 {offsets = [0, 3, 0], sizes = [8, 1, 96], strides = [1, 1, 1]} : vector<8x8x96xf32> to vector<8x1x96xf32>
    %419 = vector.shape_cast %418 : vector<8x1x96xf32> to vector<8x96xf32>
    %420 = vector.extract_strided_slice %419 {offsets = [0, 0], sizes = [8, 32], strides = [1, 1]} : vector<8x96xf32> to vector<8x32xf32>
    %421 = vector.extract_strided_slice %417 {offsets = [0, 0], sizes = [8, 32], strides = [1, 1]} : vector<8x96xf32> to vector<8x32xf32>
    %422 = arith.addf %420, %421 : vector<8x32xf32>
    %cst_110 = arith.constant 0.000000e+00 : f32
    %423 = vector.broadcast %cst_110 : f32 to vector<8x32xf32>
    %424 = arith.subf %423, %422 : vector<8x32xf32>
    %425 = math.exp %424 : vector<8x32xf32>
    %cst_111 = arith.constant 1.000000e+00 : f32
    %426 = vector.broadcast %cst_111 : f32 to vector<8x32xf32>
    %427 = arith.addf %426, %425 : vector<8x32xf32>
    %cst_112 = arith.constant 1.000000e+00 : f32
    %428 = vector.broadcast %cst_112 : f32 to vector<8x32xf32>
    %429 = arith.divf %428, %427 : vector<8x32xf32>
    %430 = vector.extract_strided_slice %419 {offsets = [0, 32], sizes = [8, 32], strides = [1, 1]} : vector<8x96xf32> to vector<8x32xf32>
    %431 = vector.extract_strided_slice %417 {offsets = [0, 32], sizes = [8, 32], strides = [1, 1]} : vector<8x96xf32> to vector<8x32xf32>
    %432 = arith.addf %430, %431 : vector<8x32xf32>
    %cst_113 = arith.constant 0.000000e+00 : f32
    %433 = vector.broadcast %cst_113 : f32 to vector<8x32xf32>
    %434 = arith.subf %433, %432 : vector<8x32xf32>
    %435 = math.exp %434 : vector<8x32xf32>
    %cst_114 = arith.constant 1.000000e+00 : f32
    %436 = vector.broadcast %cst_114 : f32 to vector<8x32xf32>
    %437 = arith.addf %436, %435 : vector<8x32xf32>
    %cst_115 = arith.constant 1.000000e+00 : f32
    %438 = vector.broadcast %cst_115 : f32 to vector<8x32xf32>
    %439 = arith.divf %438, %437 : vector<8x32xf32>
    %440 = vector.extract_strided_slice %419 {offsets = [0, 64], sizes = [8, 32], strides = [1, 1]} : vector<8x96xf32> to vector<8x32xf32>
    %441 = vector.extract_strided_slice %417 {offsets = [0, 64], sizes = [8, 32], strides = [1, 1]} : vector<8x96xf32> to vector<8x32xf32>
    %442 = arith.mulf %429, %441 : vector<8x32xf32>
    %443 = arith.addf %440, %442 : vector<8x32xf32>
    %444 = math.tanh %443 : vector<8x32xf32>
    %cst_116 = arith.constant 1.000000e+00 : f32
    %445 = vector.broadcast %cst_116 : f32 to vector<8x32xf32>
    %446 = arith.subf %445, %439 : vector<8x32xf32>
    %447 = arith.mulf %446, %444 : vector<8x32xf32>
    %448 = arith.mulf %439, %414 : vector<8x32xf32>
    %449 = arith.addf %447, %448 : vector<8x32xf32>
    %cst_117 = arith.constant dense<0.000000e+00> : vector<8x96xf32>
    %450 = tpu.matmul %449, %307, %cst_117 {dimension_numbers = #tpu.dot_dimension_numbers<[1], [0], [0], [1], [0, 0, 1, 1], [], []>} : vector<8x32xf32>, vector<32x96xf32>, vector<8x96xf32> -> vector<8x96xf32>
    %451 = vector.broadcast %308 : vector<1x96xf32> to vector<8x96xf32>
    %452 = arith.addf %450, %451 : vector<8x96xf32>
    %453 = vector.extract_strided_slice %306 {offsets = [0, 4, 0], sizes = [8, 1, 96], strides = [1, 1, 1]} : vector<8x8x96xf32> to vector<8x1x96xf32>
    %454 = vector.shape_cast %453 : vector<8x1x96xf32> to vector<8x96xf32>
    %455 = vector.extract_strided_slice %454 {offsets = [0, 0], sizes = [8, 32], strides = [1, 1]} : vector<8x96xf32> to vector<8x32xf32>
    %456 = vector.extract_strided_slice %452 {offsets = [0, 0], sizes = [8, 32], strides = [1, 1]} : vector<8x96xf32> to vector<8x32xf32>
    %457 = arith.addf %455, %456 : vector<8x32xf32>
    %cst_118 = arith.constant 0.000000e+00 : f32
    %458 = vector.broadcast %cst_118 : f32 to vector<8x32xf32>
    %459 = arith.subf %458, %457 : vector<8x32xf32>
    %460 = math.exp %459 : vector<8x32xf32>
    %cst_119 = arith.constant 1.000000e+00 : f32
    %461 = vector.broadcast %cst_119 : f32 to vector<8x32xf32>
    %462 = arith.addf %461, %460 : vector<8x32xf32>
    %cst_120 = arith.constant 1.000000e+00 : f32
    %463 = vector.broadcast %cst_120 : f32 to vector<8x32xf32>
    %464 = arith.divf %463, %462 : vector<8x32xf32>
    %465 = vector.extract_strided_slice %454 {offsets = [0, 32], sizes = [8, 32], strides = [1, 1]} : vector<8x96xf32> to vector<8x32xf32>
    %466 = vector.extract_strided_slice %452 {offsets = [0, 32], sizes = [8, 32], strides = [1, 1]} : vector<8x96xf32> to vector<8x32xf32>
    %467 = arith.addf %465, %466 : vector<8x32xf32>
    %cst_121 = arith.constant 0.000000e+00 : f32
    %468 = vector.broadcast %cst_121 : f32 to vector<8x32xf32>
    %469 = arith.subf %468, %467 : vector<8x32xf32>
    %470 = math.exp %469 : vector<8x32xf32>
    %cst_122 = arith.constant 1.000000e+00 : f32
    %471 = vector.broadcast %cst_122 : f32 to vector<8x32xf32>
    %472 = arith.addf %471, %470 : vector<8x32xf32>
    %cst_123 = arith.constant 1.000000e+00 : f32
    %473 = vector.broadcast %cst_123 : f32 to vector<8x32xf32>
    %474 = arith.divf %473, %472 : vector<8x32xf32>
    %475 = vector.extract_strided_slice %454 {offsets = [0, 64], sizes = [8, 32], strides = [1, 1]} : vector<8x96xf32> to vector<8x32xf32>
    %476 = vector.extract_strided_slice %452 {offsets = [0, 64], sizes = [8, 32], strides = [1, 1]} : vector<8x96xf32> to vector<8x32xf32>
    %477 = arith.mulf %464, %476 : vector<8x32xf32>
    %478 = arith.addf %475, %477 : vector<8x32xf32>
    %479 = math.tanh %478 : vector<8x32xf32>
    %cst_124 = arith.constant 1.000000e+00 : f32
    %480 = vector.broadcast %cst_124 : f32 to vector<8x32xf32>
    %481 = arith.subf %480, %474 : vector<8x32xf32>
    %482 = arith.mulf %481, %479 : vector<8x32xf32>
    %483 = arith.mulf %474, %449 : vector<8x32xf32>
    %484 = arith.addf %482, %483 : vector<8x32xf32>
    %cst_125 = arith.constant dense<0.000000e+00> : vector<8x96xf32>
    %485 = tpu.matmul %484, %307, %cst_125 {dimension_numbers = #tpu.dot_dimension_numbers<[1], [0], [0], [1], [0, 0, 1, 1], [], []>} : vector<8x32xf32>, vector<32x96xf32>, vector<8x96xf32> -> vector<8x96xf32>
    %486 = vector.broadcast %308 : vector<1x96xf32> to vector<8x96xf32>
    %487 = arith.addf %485, %486 : vector<8x96xf32>
    %488 = vector.extract_strided_slice %306 {offsets = [0, 5, 0], sizes = [8, 1, 96], strides = [1, 1, 1]} : vector<8x8x96xf32> to vector<8x1x96xf32>
    %489 = vector.shape_cast %488 : vector<8x1x96xf32> to vector<8x96xf32>
    %490 = vector.extract_strided_slice %489 {offsets = [0, 0], sizes = [8, 32], strides = [1, 1]} : vector<8x96xf32> to vector<8x32xf32>
    %491 = vector.extract_strided_slice %487 {offsets = [0, 0], sizes = [8, 32], strides = [1, 1]} : vector<8x96xf32> to vector<8x32xf32>
    %492 = arith.addf %490, %491 : vector<8x32xf32>
    %cst_126 = arith.constant 0.000000e+00 : f32
    %493 = vector.broadcast %cst_126 : f32 to vector<8x32xf32>
    %494 = arith.subf %493, %492 : vector<8x32xf32>
    %495 = math.exp %494 : vector<8x32xf32>
    %cst_127 = arith.constant 1.000000e+00 : f32
    %496 = vector.broadcast %cst_127 : f32 to vector<8x32xf32>
    %497 = arith.addf %496, %495 : vector<8x32xf32>
    %cst_128 = arith.constant 1.000000e+00 : f32
    %498 = vector.broadcast %cst_128 : f32 to vector<8x32xf32>
    %499 = arith.divf %498, %497 : vector<8x32xf32>
    %500 = vector.extract_strided_slice %489 {offsets = [0, 32], sizes = [8, 32], strides = [1, 1]} : vector<8x96xf32> to vector<8x32xf32>
    %501 = vector.extract_strided_slice %487 {offsets = [0, 32], sizes = [8, 32], strides = [1, 1]} : vector<8x96xf32> to vector<8x32xf32>
    %502 = arith.addf %500, %501 : vector<8x32xf32>
    %cst_129 = arith.constant 0.000000e+00 : f32
    %503 = vector.broadcast %cst_129 : f32 to vector<8x32xf32>
    %504 = arith.subf %503, %502 : vector<8x32xf32>
    %505 = math.exp %504 : vector<8x32xf32>
    %cst_130 = arith.constant 1.000000e+00 : f32
    %506 = vector.broadcast %cst_130 : f32 to vector<8x32xf32>
    %507 = arith.addf %506, %505 : vector<8x32xf32>
    %cst_131 = arith.constant 1.000000e+00 : f32
    %508 = vector.broadcast %cst_131 : f32 to vector<8x32xf32>
    %509 = arith.divf %508, %507 : vector<8x32xf32>
    %510 = vector.extract_strided_slice %489 {offsets = [0, 64], sizes = [8, 32], strides = [1, 1]} : vector<8x96xf32> to vector<8x32xf32>
    %511 = vector.extract_strided_slice %487 {offsets = [0, 64], sizes = [8, 32], strides = [1, 1]} : vector<8x96xf32> to vector<8x32xf32>
    %512 = arith.mulf %499, %511 : vector<8x32xf32>
    %513 = arith.addf %510, %512 : vector<8x32xf32>
    %514 = math.tanh %513 : vector<8x32xf32>
    %cst_132 = arith.constant 1.000000e+00 : f32
    %515 = vector.broadcast %cst_132 : f32 to vector<8x32xf32>
    %516 = arith.subf %515, %509 : vector<8x32xf32>
    %517 = arith.mulf %516, %514 : vector<8x32xf32>
    %518 = arith.mulf %509, %484 : vector<8x32xf32>
    %519 = arith.addf %517, %518 : vector<8x32xf32>
    %cst_133 = arith.constant dense<0.000000e+00> : vector<8x96xf32>
    %520 = tpu.matmul %519, %307, %cst_133 {dimension_numbers = #tpu.dot_dimension_numbers<[1], [0], [0], [1], [0, 0, 1, 1], [], []>} : vector<8x32xf32>, vector<32x96xf32>, vector<8x96xf32> -> vector<8x96xf32>
    %521 = vector.broadcast %308 : vector<1x96xf32> to vector<8x96xf32>
    %522 = arith.addf %520, %521 : vector<8x96xf32>
    %523 = vector.extract_strided_slice %306 {offsets = [0, 6, 0], sizes = [8, 1, 96], strides = [1, 1, 1]} : vector<8x8x96xf32> to vector<8x1x96xf32>
    %524 = vector.shape_cast %523 : vector<8x1x96xf32> to vector<8x96xf32>
    %525 = vector.extract_strided_slice %524 {offsets = [0, 0], sizes = [8, 32], strides = [1, 1]} : vector<8x96xf32> to vector<8x32xf32>
    %526 = vector.extract_strided_slice %522 {offsets = [0, 0], sizes = [8, 32], strides = [1, 1]} : vector<8x96xf32> to vector<8x32xf32>
    %527 = arith.addf %525, %526 : vector<8x32xf32>
    %cst_134 = arith.constant 0.000000e+00 : f32
    %528 = vector.broadcast %cst_134 : f32 to vector<8x32xf32>
    %529 = arith.subf %528, %527 : vector<8x32xf32>
    %530 = math.exp %529 : vector<8x32xf32>
    %cst_135 = arith.constant 1.000000e+00 : f32
    %531 = vector.broadcast %cst_135 : f32 to vector<8x32xf32>
    %532 = arith.addf %531, %530 : vector<8x32xf32>
    %cst_136 = arith.constant 1.000000e+00 : f32
    %533 = vector.broadcast %cst_136 : f32 to vector<8x32xf32>
    %534 = arith.divf %533, %532 : vector<8x32xf32>
    %535 = vector.extract_strided_slice %524 {offsets = [0, 32], sizes = [8, 32], strides = [1, 1]} : vector<8x96xf32> to vector<8x32xf32>
    %536 = vector.extract_strided_slice %522 {offsets = [0, 32], sizes = [8, 32], strides = [1, 1]} : vector<8x96xf32> to vector<8x32xf32>
    %537 = arith.addf %535, %536 : vector<8x32xf32>
    %cst_137 = arith.constant 0.000000e+00 : f32
    %538 = vector.broadcast %cst_137 : f32 to vector<8x32xf32>
    %539 = arith.subf %538, %537 : vector<8x32xf32>
    %540 = math.exp %539 : vector<8x32xf32>
    %cst_138 = arith.constant 1.000000e+00 : f32
    %541 = vector.broadcast %cst_138 : f32 to vector<8x32xf32>
    %542 = arith.addf %541, %540 : vector<8x32xf32>
    %cst_139 = arith.constant 1.000000e+00 : f32
    %543 = vector.broadcast %cst_139 : f32 to vector<8x32xf32>
    %544 = arith.divf %543, %542 : vector<8x32xf32>
    %545 = vector.extract_strided_slice %524 {offsets = [0, 64], sizes = [8, 32], strides = [1, 1]} : vector<8x96xf32> to vector<8x32xf32>
    %546 = vector.extract_strided_slice %522 {offsets = [0, 64], sizes = [8, 32], strides = [1, 1]} : vector<8x96xf32> to vector<8x32xf32>
    %547 = arith.mulf %534, %546 : vector<8x32xf32>
    %548 = arith.addf %545, %547 : vector<8x32xf32>
    %549 = math.tanh %548 : vector<8x32xf32>
    %cst_140 = arith.constant 1.000000e+00 : f32
    %550 = vector.broadcast %cst_140 : f32 to vector<8x32xf32>
    %551 = arith.subf %550, %544 : vector<8x32xf32>
    %552 = arith.mulf %551, %549 : vector<8x32xf32>
    %553 = arith.mulf %544, %519 : vector<8x32xf32>
    %554 = arith.addf %552, %553 : vector<8x32xf32>
    %cst_141 = arith.constant dense<0.000000e+00> : vector<8x96xf32>
    %555 = tpu.matmul %554, %307, %cst_141 {dimension_numbers = #tpu.dot_dimension_numbers<[1], [0], [0], [1], [0, 0, 1, 1], [], []>} : vector<8x32xf32>, vector<32x96xf32>, vector<8x96xf32> -> vector<8x96xf32>
    %556 = vector.broadcast %308 : vector<1x96xf32> to vector<8x96xf32>
    %557 = arith.addf %555, %556 : vector<8x96xf32>
    %558 = vector.extract_strided_slice %306 {offsets = [0, 7, 0], sizes = [8, 1, 96], strides = [1, 1, 1]} : vector<8x8x96xf32> to vector<8x1x96xf32>
    %559 = vector.shape_cast %558 : vector<8x1x96xf32> to vector<8x96xf32>
    %560 = vector.extract_strided_slice %559 {offsets = [0, 0], sizes = [8, 32], strides = [1, 1]} : vector<8x96xf32> to vector<8x32xf32>
    %561 = vector.extract_strided_slice %557 {offsets = [0, 0], sizes = [8, 32], strides = [1, 1]} : vector<8x96xf32> to vector<8x32xf32>
    %562 = arith.addf %560, %561 : vector<8x32xf32>
    %cst_142 = arith.constant 0.000000e+00 : f32
    %563 = vector.broadcast %cst_142 : f32 to vector<8x32xf32>
    %564 = arith.subf %563, %562 : vector<8x32xf32>
    %565 = math.exp %564 : vector<8x32xf32>
    %cst_143 = arith.constant 1.000000e+00 : f32
    %566 = vector.broadcast %cst_143 : f32 to vector<8x32xf32>
    %567 = arith.addf %566, %565 : vector<8x32xf32>
    %cst_144 = arith.constant 1.000000e+00 : f32
    %568 = vector.broadcast %cst_144 : f32 to vector<8x32xf32>
    %569 = arith.divf %568, %567 : vector<8x32xf32>
    %570 = vector.extract_strided_slice %559 {offsets = [0, 32], sizes = [8, 32], strides = [1, 1]} : vector<8x96xf32> to vector<8x32xf32>
    %571 = vector.extract_strided_slice %557 {offsets = [0, 32], sizes = [8, 32], strides = [1, 1]} : vector<8x96xf32> to vector<8x32xf32>
    %572 = arith.addf %570, %571 : vector<8x32xf32>
    %cst_145 = arith.constant 0.000000e+00 : f32
    %573 = vector.broadcast %cst_145 : f32 to vector<8x32xf32>
    %574 = arith.subf %573, %572 : vector<8x32xf32>
    %575 = math.exp %574 : vector<8x32xf32>
    %cst_146 = arith.constant 1.000000e+00 : f32
    %576 = vector.broadcast %cst_146 : f32 to vector<8x32xf32>
    %577 = arith.addf %576, %575 : vector<8x32xf32>
    %cst_147 = arith.constant 1.000000e+00 : f32
    %578 = vector.broadcast %cst_147 : f32 to vector<8x32xf32>
    %579 = arith.divf %578, %577 : vector<8x32xf32>
    %580 = vector.extract_strided_slice %559 {offsets = [0, 64], sizes = [8, 32], strides = [1, 1]} : vector<8x96xf32> to vector<8x32xf32>
    %581 = vector.extract_strided_slice %557 {offsets = [0, 64], sizes = [8, 32], strides = [1, 1]} : vector<8x96xf32> to vector<8x32xf32>
    %582 = arith.mulf %569, %581 : vector<8x32xf32>
    %583 = arith.addf %580, %582 : vector<8x32xf32>
    %584 = math.tanh %583 : vector<8x32xf32>
    %cst_148 = arith.constant 1.000000e+00 : f32
    %585 = vector.broadcast %cst_148 : f32 to vector<8x32xf32>
    %586 = arith.subf %585, %579 : vector<8x32xf32>
    %587 = arith.mulf %586, %584 : vector<8x32xf32>
    %588 = arith.mulf %579, %554 : vector<8x32xf32>
    %589 = arith.addf %587, %588 : vector<8x32xf32>
    %590 = vector.shape_cast %344 : vector<8x32xf32> to vector<8x1x32xf32>
    %591 = vector.shape_cast %379 : vector<8x32xf32> to vector<8x1x32xf32>
    %592 = vector.shape_cast %414 : vector<8x32xf32> to vector<8x1x32xf32>
    %593 = vector.shape_cast %449 : vector<8x32xf32> to vector<8x1x32xf32>
    %594 = vector.shape_cast %484 : vector<8x32xf32> to vector<8x1x32xf32>
    %595 = vector.shape_cast %519 : vector<8x32xf32> to vector<8x1x32xf32>
    %596 = vector.shape_cast %554 : vector<8x32xf32> to vector<8x1x32xf32>
    %597 = vector.shape_cast %589 : vector<8x32xf32> to vector<8x1x32xf32>
    %598 = tpu.concatenate %590, %591, %592, %593, %594, %595, %596, %597 in 1 : vector<8x1x32xf32>, vector<8x1x32xf32>, vector<8x1x32xf32>, vector<8x1x32xf32>, vector<8x1x32xf32>, vector<8x1x32xf32>, vector<8x1x32xf32>, vector<8x1x32xf32> -> vector<8x8x32xf32>
    %599 = vector.shape_cast %598 : vector<8x8x32xf32> to vector<64x32xf32>
    %c0_149 = arith.constant 0 : index
    %c0_150 = arith.constant 0 : index
    %600 = vector.load %arg10[%c0_149, %c0_150] : memref<32x32xf32, #tpu.memory_space<vmem>>, vector<32x32xf32>
    %cst_151 = arith.constant dense<0.000000e+00> : vector<64x32xf32>
    %601 = tpu.matmul %599, %600, %cst_151 {dimension_numbers = #tpu.dot_dimension_numbers<[1], [0], [0], [1], [0, 0, 1, 1], [], []>} : vector<64x32xf32>, vector<32x32xf32>, vector<64x32xf32> -> vector<64x32xf32>
    %c0_152 = arith.constant 0 : index
    %c0_153 = arith.constant 0 : index
    %602 = vector.load %arg11[%c0_152, %c0_153] : memref<1x32xf32, #tpu.memory_space<vmem>>, vector<1x32xf32>
    %603 = vector.broadcast %602 : vector<1x32xf32> to vector<64x32xf32>
    %604 = arith.addf %601, %603 : vector<64x32xf32>
    %605 = vector.shape_cast %604 : vector<64x32xf32> to vector<8x8x32xf32>
    %c0_154 = arith.constant 0 : index
    %c0_155 = arith.constant 0 : index
    %606 = vector.load %arg12[%c0_154, %c0_155] : memref<32x32xf32, #tpu.memory_space<vmem>>, vector<32x32xf32>
    %cst_156 = arith.constant dense<0.000000e+00> : vector<64x32xf32>
    %607 = tpu.matmul %599, %606, %cst_156 {dimension_numbers = #tpu.dot_dimension_numbers<[1], [0], [0], [1], [0, 0, 1, 1], [], []>} : vector<64x32xf32>, vector<32x32xf32>, vector<64x32xf32> -> vector<64x32xf32>
    %c0_157 = arith.constant 0 : index
    %c0_158 = arith.constant 0 : index
    %608 = vector.load %arg13[%c0_157, %c0_158] : memref<1x32xf32, #tpu.memory_space<vmem>>, vector<1x32xf32>
    %609 = vector.broadcast %608 : vector<1x32xf32> to vector<64x32xf32>
    %610 = arith.addf %607, %609 : vector<64x32xf32>
    %611 = vector.shape_cast %610 : vector<64x32xf32> to vector<8x8x32xf32>
    %c0_159 = arith.constant 0 : index
    %c0_160 = arith.constant 0 : index
    %612 = vector.load %arg14[%c0_159, %c0_160] : memref<32x32xf32, #tpu.memory_space<vmem>>, vector<32x32xf32>
    %cst_161 = arith.constant dense<0.000000e+00> : vector<64x32xf32>
    %613 = tpu.matmul %599, %612, %cst_161 {dimension_numbers = #tpu.dot_dimension_numbers<[1], [0], [0], [1], [0, 0, 1, 1], [], []>} : vector<64x32xf32>, vector<32x32xf32>, vector<64x32xf32> -> vector<64x32xf32>
    %c0_162 = arith.constant 0 : index
    %c0_163 = arith.constant 0 : index
    %614 = vector.load %arg15[%c0_162, %c0_163] : memref<1x32xf32, #tpu.memory_space<vmem>>, vector<1x32xf32>
    %615 = vector.broadcast %614 : vector<1x32xf32> to vector<64x32xf32>
    %616 = arith.addf %613, %615 : vector<64x32xf32>
    %617 = vector.shape_cast %616 : vector<64x32xf32> to vector<8x8x32xf32>
    %618 = vector.extract_strided_slice %605 {offsets = [0, 0, 0], sizes = [8, 8, 8], strides = [1, 1, 1]} : vector<8x8x32xf32> to vector<8x8x8xf32>
    %619 = vector.extract_strided_slice %611 {offsets = [0, 0, 0], sizes = [8, 8, 8], strides = [1, 1, 1]} : vector<8x8x32xf32> to vector<8x8x8xf32>
    %620 = vector.extract_strided_slice %617 {offsets = [0, 0, 0], sizes = [8, 8, 8], strides = [1, 1, 1]} : vector<8x8x32xf32> to vector<8x8x8xf32>
    "tpu.trace_start"() <{level = 10 : i32, message = "btd,bsd->bts"}> : () -> ()
    %cst_164 = arith.constant dense<0.000000e+00> : vector<8x8x8xf32>
    %621 = tpu.matmul %618, %619, %cst_164 {dimension_numbers = #tpu.dot_dimension_numbers<[2], [2], [1], [1], [0, 0, 0, 1, 1, 1], [0], [0]>} : vector<8x8x8xf32>, vector<8x8x8xf32>, vector<8x8x8xf32> -> vector<8x8x8xf32>
    "tpu.trace_stop"() : () -> ()
    %cst_165 = arith.constant 0.353553385 : f32
    %622 = vector.broadcast %cst_165 : f32 to vector<8x8x8xf32>
    %623 = arith.mulf %621, %622 : vector<8x8x8xf32>
    %cst_166 = arith.constant dense<0xFF800000> : vector<8x8xf32>
    %624 = vector.multi_reduction <maximumf>, %623, %cst_166 [2] : vector<8x8x8xf32> to vector<8x8xf32>
    %625 = vector.shape_cast %624 : vector<8x8xf32> to vector<8x8x1xf32>
    %626 = vector.broadcast %625 : vector<8x8x1xf32> to vector<8x8x8xf32>
    %627 = arith.subf %623, %626 : vector<8x8x8xf32>
    %628 = math.exp %627 : vector<8x8x8xf32>
    %cst_167 = arith.constant dense<0.000000e+00> : vector<8x8xf32>
    %629 = vector.multi_reduction <add>, %628, %cst_167 [2] : vector<8x8x8xf32> to vector<8x8xf32>
    %630 = vector.shape_cast %629 : vector<8x8xf32> to vector<8x8x1xf32>
    %631 = vector.broadcast %630 : vector<8x8x1xf32> to vector<8x8x8xf32>
    %632 = arith.divf %628, %631 : vector<8x8x8xf32>
    "tpu.trace_start"() <{level = 10 : i32, message = "bts,bsd->btd"}> : () -> ()
    %cst_168 = arith.constant dense<0.000000e+00> : vector<8x8x8xf32>
    %633 = tpu.matmul %632, %620, %cst_168 {dimension_numbers = #tpu.dot_dimension_numbers<[2], [1], [1], [2], [0, 0, 0, 1, 1, 2], [0], [0]>} : vector<8x8x8xf32>, vector<8x8x8xf32>, vector<8x8x8xf32> -> vector<8x8x8xf32>
    "tpu.trace_stop"() : () -> ()
    %634 = vector.extract_strided_slice %605 {offsets = [0, 0, 8], sizes = [8, 8, 8], strides = [1, 1, 1]} : vector<8x8x32xf32> to vector<8x8x8xf32>
    %635 = vector.extract_strided_slice %611 {offsets = [0, 0, 8], sizes = [8, 8, 8], strides = [1, 1, 1]} : vector<8x8x32xf32> to vector<8x8x8xf32>
    %636 = vector.extract_strided_slice %617 {offsets = [0, 0, 8], sizes = [8, 8, 8], strides = [1, 1, 1]} : vector<8x8x32xf32> to vector<8x8x8xf32>
    "tpu.trace_start"() <{level = 10 : i32, message = "btd,bsd->bts"}> : () -> ()
    %cst_169 = arith.constant dense<0.000000e+00> : vector<8x8x8xf32>
    %637 = tpu.matmul %634, %635, %cst_169 {dimension_numbers = #tpu.dot_dimension_numbers<[2], [2], [1], [1], [0, 0, 0, 1, 1, 1], [0], [0]>} : vector<8x8x8xf32>, vector<8x8x8xf32>, vector<8x8x8xf32> -> vector<8x8x8xf32>
    "tpu.trace_stop"() : () -> ()
    %cst_170 = arith.constant 0.353553385 : f32
    %638 = vector.broadcast %cst_170 : f32 to vector<8x8x8xf32>
    %639 = arith.mulf %637, %638 : vector<8x8x8xf32>
    %cst_171 = arith.constant dense<0xFF800000> : vector<8x8xf32>
    %640 = vector.multi_reduction <maximumf>, %639, %cst_171 [2] : vector<8x8x8xf32> to vector<8x8xf32>
    %641 = vector.shape_cast %640 : vector<8x8xf32> to vector<8x8x1xf32>
    %642 = vector.broadcast %641 : vector<8x8x1xf32> to vector<8x8x8xf32>
    %643 = arith.subf %639, %642 : vector<8x8x8xf32>
    %644 = math.exp %643 : vector<8x8x8xf32>
    %cst_172 = arith.constant dense<0.000000e+00> : vector<8x8xf32>
    %645 = vector.multi_reduction <add>, %644, %cst_172 [2] : vector<8x8x8xf32> to vector<8x8xf32>
    %646 = vector.shape_cast %645 : vector<8x8xf32> to vector<8x8x1xf32>
    %647 = vector.broadcast %646 : vector<8x8x1xf32> to vector<8x8x8xf32>
    %648 = arith.divf %644, %647 : vector<8x8x8xf32>
    "tpu.trace_start"() <{level = 10 : i32, message = "bts,bsd->btd"}> : () -> ()
    %cst_173 = arith.constant dense<0.000000e+00> : vector<8x8x8xf32>
    %649 = tpu.matmul %648, %636, %cst_173 {dimension_numbers = #tpu.dot_dimension_numbers<[2], [1], [1], [2], [0, 0, 0, 1, 1, 2], [0], [0]>} : vector<8x8x8xf32>, vector<8x8x8xf32>, vector<8x8x8xf32> -> vector<8x8x8xf32>
    "tpu.trace_stop"() : () -> ()
    %650 = vector.extract_strided_slice %605 {offsets = [0, 0, 16], sizes = [8, 8, 8], strides = [1, 1, 1]} : vector<8x8x32xf32> to vector<8x8x8xf32>
    %651 = vector.extract_strided_slice %611 {offsets = [0, 0, 16], sizes = [8, 8, 8], strides = [1, 1, 1]} : vector<8x8x32xf32> to vector<8x8x8xf32>
    %652 = vector.extract_strided_slice %617 {offsets = [0, 0, 16], sizes = [8, 8, 8], strides = [1, 1, 1]} : vector<8x8x32xf32> to vector<8x8x8xf32>
    "tpu.trace_start"() <{level = 10 : i32, message = "btd,bsd->bts"}> : () -> ()
    %cst_174 = arith.constant dense<0.000000e+00> : vector<8x8x8xf32>
    %653 = tpu.matmul %650, %651, %cst_174 {dimension_numbers = #tpu.dot_dimension_numbers<[2], [2], [1], [1], [0, 0, 0, 1, 1, 1], [0], [0]>} : vector<8x8x8xf32>, vector<8x8x8xf32>, vector<8x8x8xf32> -> vector<8x8x8xf32>
    "tpu.trace_stop"() : () -> ()
    %cst_175 = arith.constant 0.353553385 : f32
    %654 = vector.broadcast %cst_175 : f32 to vector<8x8x8xf32>
    %655 = arith.mulf %653, %654 : vector<8x8x8xf32>
    %cst_176 = arith.constant dense<0xFF800000> : vector<8x8xf32>
    %656 = vector.multi_reduction <maximumf>, %655, %cst_176 [2] : vector<8x8x8xf32> to vector<8x8xf32>
    %657 = vector.shape_cast %656 : vector<8x8xf32> to vector<8x8x1xf32>
    %658 = vector.broadcast %657 : vector<8x8x1xf32> to vector<8x8x8xf32>
    %659 = arith.subf %655, %658 : vector<8x8x8xf32>
    %660 = math.exp %659 : vector<8x8x8xf32>
    %cst_177 = arith.constant dense<0.000000e+00> : vector<8x8xf32>
    %661 = vector.multi_reduction <add>, %660, %cst_177 [2] : vector<8x8x8xf32> to vector<8x8xf32>
    %662 = vector.shape_cast %661 : vector<8x8xf32> to vector<8x8x1xf32>
    %663 = vector.broadcast %662 : vector<8x8x1xf32> to vector<8x8x8xf32>
    %664 = arith.divf %660, %663 : vector<8x8x8xf32>
    "tpu.trace_start"() <{level = 10 : i32, message = "bts,bsd->btd"}> : () -> ()
    %cst_178 = arith.constant dense<0.000000e+00> : vector<8x8x8xf32>
    %665 = tpu.matmul %664, %652, %cst_178 {dimension_numbers = #tpu.dot_dimension_numbers<[2], [1], [1], [2], [0, 0, 0, 1, 1, 2], [0], [0]>} : vector<8x8x8xf32>, vector<8x8x8xf32>, vector<8x8x8xf32> -> vector<8x8x8xf32>
    "tpu.trace_stop"() : () -> ()
    %666 = vector.extract_strided_slice %605 {offsets = [0, 0, 24], sizes = [8, 8, 8], strides = [1, 1, 1]} : vector<8x8x32xf32> to vector<8x8x8xf32>
    %667 = vector.extract_strided_slice %611 {offsets = [0, 0, 24], sizes = [8, 8, 8], strides = [1, 1, 1]} : vector<8x8x32xf32> to vector<8x8x8xf32>
    %668 = vector.extract_strided_slice %617 {offsets = [0, 0, 24], sizes = [8, 8, 8], strides = [1, 1, 1]} : vector<8x8x32xf32> to vector<8x8x8xf32>
    "tpu.trace_start"() <{level = 10 : i32, message = "btd,bsd->bts"}> : () -> ()
    %cst_179 = arith.constant dense<0.000000e+00> : vector<8x8x8xf32>
    %669 = tpu.matmul %666, %667, %cst_179 {dimension_numbers = #tpu.dot_dimension_numbers<[2], [2], [1], [1], [0, 0, 0, 1, 1, 1], [0], [0]>} : vector<8x8x8xf32>, vector<8x8x8xf32>, vector<8x8x8xf32> -> vector<8x8x8xf32>
    "tpu.trace_stop"() : () -> ()
    %cst_180 = arith.constant 0.353553385 : f32
    %670 = vector.broadcast %cst_180 : f32 to vector<8x8x8xf32>
    %671 = arith.mulf %669, %670 : vector<8x8x8xf32>
    %cst_181 = arith.constant dense<0xFF800000> : vector<8x8xf32>
    %672 = vector.multi_reduction <maximumf>, %671, %cst_181 [2] : vector<8x8x8xf32> to vector<8x8xf32>
    %673 = vector.shape_cast %672 : vector<8x8xf32> to vector<8x8x1xf32>
    %674 = vector.broadcast %673 : vector<8x8x1xf32> to vector<8x8x8xf32>
    %675 = arith.subf %671, %674 : vector<8x8x8xf32>
    %676 = math.exp %675 : vector<8x8x8xf32>
    %cst_182 = arith.constant dense<0.000000e+00> : vector<8x8xf32>
    %677 = vector.multi_reduction <add>, %676, %cst_182 [2] : vector<8x8x8xf32> to vector<8x8xf32>
    %678 = vector.shape_cast %677 : vector<8x8xf32> to vector<8x8x1xf32>
    %679 = vector.broadcast %678 : vector<8x8x1xf32> to vector<8x8x8xf32>
    %680 = arith.divf %676, %679 : vector<8x8x8xf32>
    "tpu.trace_start"() <{level = 10 : i32, message = "bts,bsd->btd"}> : () -> ()
    %cst_183 = arith.constant dense<0.000000e+00> : vector<8x8x8xf32>
    %681 = tpu.matmul %680, %668, %cst_183 {dimension_numbers = #tpu.dot_dimension_numbers<[2], [1], [1], [2], [0, 0, 0, 1, 1, 2], [0], [0]>} : vector<8x8x8xf32>, vector<8x8x8xf32>, vector<8x8x8xf32> -> vector<8x8x8xf32>
    "tpu.trace_stop"() : () -> ()
    %682 = tpu.concatenate %633, %649, %665, %681 in 2 : vector<8x8x8xf32>, vector<8x8x8xf32>, vector<8x8x8xf32>, vector<8x8x8xf32> -> vector<8x8x32xf32>
    %683 = vector.shape_cast %682 : vector<8x8x32xf32> to vector<64x32xf32>
    %c0_184 = arith.constant 0 : index
    %c0_185 = arith.constant 0 : index
    %684 = vector.load %arg16[%c0_184, %c0_185] : memref<32x32xf32, #tpu.memory_space<vmem>>, vector<32x32xf32>
    %cst_186 = arith.constant dense<0.000000e+00> : vector<64x32xf32>
    %685 = tpu.matmul %683, %684, %cst_186 {dimension_numbers = #tpu.dot_dimension_numbers<[1], [0], [0], [1], [0, 0, 1, 1], [], []>} : vector<64x32xf32>, vector<32x32xf32>, vector<64x32xf32> -> vector<64x32xf32>
    %c0_187 = arith.constant 0 : index
    %c0_188 = arith.constant 0 : index
    %686 = vector.load %arg17[%c0_187, %c0_188] : memref<1x32xf32, #tpu.memory_space<vmem>>, vector<1x32xf32>
    %687 = vector.broadcast %686 : vector<1x32xf32> to vector<64x32xf32>
    %688 = arith.addf %685, %687 : vector<64x32xf32>
    %689 = vector.shape_cast %688 : vector<64x32xf32> to vector<8x8x32xf32>
    %690 = vector.extract_strided_slice %689 {offsets = [0, 0, 0], sizes = [8, 1, 32], strides = [1, 1, 1]} : vector<8x8x32xf32> to vector<8x1x32xf32>
    %691 = vector.shape_cast %690 : vector<8x1x32xf32> to vector<8x32xf32>
    %692 = vector.extract_strided_slice %689 {offsets = [0, 1, 0], sizes = [8, 1, 32], strides = [1, 1, 1]} : vector<8x8x32xf32> to vector<8x1x32xf32>
    %693 = vector.shape_cast %692 : vector<8x1x32xf32> to vector<8x32xf32>
    %694 = arith.maximumf %691, %693 : vector<8x32xf32>
    %695 = vector.extract_strided_slice %689 {offsets = [0, 2, 0], sizes = [8, 1, 32], strides = [1, 1, 1]} : vector<8x8x32xf32> to vector<8x1x32xf32>
    %696 = vector.shape_cast %695 : vector<8x1x32xf32> to vector<8x32xf32>
    %697 = arith.maximumf %694, %696 : vector<8x32xf32>
    %698 = vector.extract_strided_slice %689 {offsets = [0, 3, 0], sizes = [8, 1, 32], strides = [1, 1, 1]} : vector<8x8x32xf32> to vector<8x1x32xf32>
    %699 = vector.shape_cast %698 : vector<8x1x32xf32> to vector<8x32xf32>
    %700 = arith.maximumf %697, %699 : vector<8x32xf32>
    %701 = vector.extract_strided_slice %689 {offsets = [0, 4, 0], sizes = [8, 1, 32], strides = [1, 1, 1]} : vector<8x8x32xf32> to vector<8x1x32xf32>
    %702 = vector.shape_cast %701 : vector<8x1x32xf32> to vector<8x32xf32>
    %703 = arith.maximumf %700, %702 : vector<8x32xf32>
    %704 = vector.extract_strided_slice %689 {offsets = [0, 5, 0], sizes = [8, 1, 32], strides = [1, 1, 1]} : vector<8x8x32xf32> to vector<8x1x32xf32>
    %705 = vector.shape_cast %704 : vector<8x1x32xf32> to vector<8x32xf32>
    %706 = arith.maximumf %703, %705 : vector<8x32xf32>
    %707 = vector.extract_strided_slice %689 {offsets = [0, 6, 0], sizes = [8, 1, 32], strides = [1, 1, 1]} : vector<8x8x32xf32> to vector<8x1x32xf32>
    %708 = vector.shape_cast %707 : vector<8x1x32xf32> to vector<8x32xf32>
    %709 = arith.maximumf %706, %708 : vector<8x32xf32>
    %710 = vector.extract_strided_slice %689 {offsets = [0, 7, 0], sizes = [8, 1, 32], strides = [1, 1, 1]} : vector<8x8x32xf32> to vector<8x1x32xf32>
    %711 = vector.shape_cast %710 : vector<8x1x32xf32> to vector<8x32xf32>
    %712 = arith.maximumf %709, %711 : vector<8x32xf32>
    %713 = math.tanh %712 : vector<8x32xf32>
    %c0_189 = arith.constant 0 : index
    %c0_190 = arith.constant 0 : index
    %714 = vector.load %arg18[%c0_189, %c0_190] : memref<32x128xf32, #tpu.memory_space<vmem>>, vector<32x128xf32>
    %cst_191 = arith.constant dense<0.000000e+00> : vector<8x128xf32>
    %715 = tpu.matmul %713, %714, %cst_191 {dimension_numbers = #tpu.dot_dimension_numbers<[1], [0], [0], [1], [0, 0, 1, 1], [], []>} : vector<8x32xf32>, vector<32x128xf32>, vector<8x128xf32> -> vector<8x128xf32>
    %c0_192 = arith.constant 0 : index
    %c0_193 = arith.constant 0 : index
    %716 = vector.load %arg19[%c0_192, %c0_193] : memref<1x128xf32, #tpu.memory_space<vmem>>, vector<1x128xf32>
    %717 = vector.broadcast %716 : vector<1x128xf32> to vector<8x128xf32>
    %718 = arith.addf %715, %717 : vector<8x128xf32>
    %c0_194 = arith.constant 0 : index
    %c0_195 = arith.constant 0 : index
    %719 = vector.load %arg20[%c0_194, %c0_195] : memref<8x128xf32, #tpu.memory_space<vmem>>, vector<8x128xf32>
    tpu.vector_store %arg20[%c0_194, %c0_195], %718 {strides = array<i32>} : memref<8x128xf32, #tpu.memory_space<vmem>>, vector<8x128xf32>,
    return
  }
  func.func @transform_0(%arg0: i32) -> (i32, i32, i32) {
    %c0_i32 = arith.constant 0 : i32
    %c0_i32_0 = arith.constant 0 : i32
    %c0_i32_1 = arith.constant 0 : i32
    %c0_i32_2 = arith.constant 0 : i32
    return %c0_i32, %c0_i32_0, %c0_i32_1 : i32, i32, i32
  }
  func.func @transform_1(%arg0: i32) -> (i32, i32) {
    %c0_i32 = arith.constant 0 : i32
    %c0_i32_0 = arith.constant 0 : i32
    %c0_i32_1 = arith.constant 0 : i32
    return %c0_i32, %c0_i32_0 : i32, i32
  }
  func.func @transform_2(%arg0: i32) -> (i32, i32) {
    %c0_i32 = arith.constant 0 : i32
    %c0_i32_0 = arith.constant 0 : i32
    %c0_i32_1 = arith.constant 0 : i32
    return %c0_i32, %c0_i32_0 : i32, i32
  }
  func.func @transform_3(%arg0: i32) -> (i32, i32) {
    %c0_i32 = arith.constant 0 : i32
    %c0_i32_0 = arith.constant 0 : i32
    %c0_i32_1 = arith.constant 0 : i32
    return %c0_i32, %c0_i32_0 : i32, i32
  }
  func.func @transform_4(%arg0: i32) -> (i32, i32) {
    %c0_i32 = arith.constant 0 : i32
    %c0_i32_0 = arith.constant 0 : i32
    %c0_i32_1 = arith.constant 0 : i32
    return %c0_i32, %c0_i32_0 : i32, i32
  }
  func.func @transform_5(%arg0: i32) -> (i32, i32) {
    %c0_i32 = arith.constant 0 : i32
    %c0_i32_0 = arith.constant 0 : i32
    %c0_i32_1 = arith.constant 0 : i32
    return %c0_i32, %c0_i32_0 : i32, i32
  }
  func.func @transform_6(%arg0: i32) -> (i32, i32) {
    %c0_i32 = arith.constant 0 : i32
    %c0_i32_0 = arith.constant 0 : i32
    %c0_i32_1 = arith.constant 0 : i32
    return %c0_i32, %c0_i32_0 : i32, i32
  }
  func.func @transform_7(%arg0: i32) -> (i32, i32) {
    %c0_i32 = arith.constant 0 : i32
    %c0_i32_0 = arith.constant 0 : i32
    %c0_i32_1 = arith.constant 0 : i32
    return %c0_i32, %c0_i32_0 : i32, i32
  }
  func.func @transform_8(%arg0: i32) -> (i32, i32) {
    %c0_i32 = arith.constant 0 : i32
    %c0_i32_0 = arith.constant 0 : i32
    %c0_i32_1 = arith.constant 0 : i32
    return %c0_i32, %c0_i32_0 : i32, i32
  }
  func.func @transform_9(%arg0: i32) -> (i32, i32) {
    %c0_i32 = arith.constant 0 : i32
    %c0_i32_0 = arith.constant 0 : i32
    %c0_i32_1 = arith.constant 0 : i32
    return %c0_i32, %c0_i32_0 : i32, i32
  }
  func.func @transform_10(%arg0: i32) -> (i32, i32) {
    %c0_i32 = arith.constant 0 : i32
    %c0_i32_0 = arith.constant 0 : i32
    %c0_i32_1 = arith.constant 0 : i32
    return %c0_i32, %c0_i32_0 : i32, i32
  }
  func.func @transform_11(%arg0: i32) -> (i32, i32) {
    %c0_i32 = arith.constant 0 : i32
    %c0_i32_0 = arith.constant 0 : i32
    %c0_i32_1 = arith.constant 0 : i32
    return %c0_i32, %c0_i32_0 : i32, i32
  }
  func.func @transform_12(%arg0: i32) -> (i32, i32) {
    %c0_i32 = arith.constant 0 : i32
    %c0_i32_0 = arith.constant 0 : i32
    %c0_i32_1 = arith.constant 0 : i32
    return %c0_i32, %c0_i32_0 : i32, i32
  }
  func.func @transform_13(%arg0: i32) -> (i32, i32) {
    %c0_i32 = arith.constant 0 : i32
    %c0_i32_0 = arith.constant 0 : i32
    %c0_i32_1 = arith.constant 0 : i32
    return %c0_i32, %c0_i32_0 : i32, i32
  }
  func.func @transform_14(%arg0: i32) -> (i32, i32) {
    %c0_i32 = arith.constant 0 : i32
    %c0_i32_0 = arith.constant 0 : i32
    %c0_i32_1 = arith.constant 0 : i32
    return %c0_i32, %c0_i32_0 : i32, i32
  }
  func.func @transform_15(%arg0: i32) -> (i32, i32) {
    %c0_i32 = arith.constant 0 : i32
    %c0_i32_0 = arith.constant 0 : i32
    %c0_i32_1 = arith.constant 0 : i32
    return %c0_i32, %c0_i32_0 : i32, i32
  }
  func.func @transform_16(%arg0: i32) -> (i32, i32) {
    %c0_i32 = arith.constant 0 : i32
    %c0_i32_0 = arith.constant 0 : i32
    %c0_i32_1 = arith.constant 0 : i32
    return %c0_i32, %c0_i32_0 : i32, i32
  }
  func.func @transform_17(%arg0: i32) -> (i32, i32) {
    %c0_i32 = arith.constant 0 : i32
    %c0_i32_0 = arith.constant 0 : i32
    %c0_i32_1 = arith.constant 0 : i32
    return %c0_i32, %c0_i32_0 : i32, i32
  }
  func.func @transform_18(%arg0: i32) -> (i32, i32) {
    %c0_i32 = arith.constant 0 : i32
    %c0_i32_0 = arith.constant 0 : i32
    %c0_i32_1 = arith.constant 0 : i32
    return %c0_i32, %c0_i32_0 : i32, i32
  }
  func.func @transform_19(%arg0: i32) -> (i32, i32) {
    %c0_i32 = arith.constant 0 : i32
    %c0_i32_0 = arith.constant 0 : i32
    %c0_i32_1 = arith.constant 0 : i32
    return %c0_i32, %c0_i32_0 : i32, i32
  }
}

</mosaic_0001>

<bundles_post_ra>
// kernel: tpu_custom_call.1
= control target key start
LH: loop header
LB: loop body
LE: loop exit
PB: predicated region body
PF: predicated region fallthrough
CT: control target
= control target key end

     0   :  { %s18637_s0 = inlined_call_operand.hbm [shape: f32[8,8,16], index: 0, kind: input, shape index: {}]   ;;  %s18638_s1 = inlined_call_operand.hbm [shape: f32[16,96], index: 1, kind: input, shape index: {}]   ;;  %s18639_s2 = inlined_call_operand.hbm [shape: f32[1,96], index: 2, kind: input, shape index: {}]   ;;  %s18640_s3 = inlined_call_operand.hbm [shape: f32[32,96], index: 3, kind: input, shape index: {}]   ;;  %s18641_s4 = inlined_call_operand.hbm [shape: f32[1,96], index: 4, kind: input, shape index: {}]   ;;  %s18642_s5 = inlined_call_operand.hbm [shape: f32[32,96], index: 5, kind: input, shape index: {}]   ;;  %s18643_s6 = inlined_call_operand.hbm [shape: f32[1,96], index: 6, kind: input, shape index: {}]   ;;  %s18644_s7 = inlined_call_operand.hbm [shape: f32[32,96], index: 7, kind: input, shape index: {}]   ;;  %s18645_s8 = inlined_call_operand.hbm [shape: f32[1,96], index: 8, kind: input, shape index: {}]   ;;  %s18646_s9 = inlined_call_operand.vmem [shape: f32[32,32], index: 9, kind: input, shape index: {}]   ;;  %s18647_s10 = inlined_call_operand.hbm [shape: f32[1,32], index: 10, kind: input, shape index: {}]   ;;  %s18648_s11 = inlined_call_operand.hbm [shape: f32[32,32], index: 11, kind: input, shape index: {}]   ;;  %s18649_s12 = inlined_call_operand.hbm [shape: f32[1,32], index: 12, kind: input, shape index: {}]   ;;  %s18650_s13 = inlined_call_operand.hbm [shape: f32[32,32], index: 13, kind: input, shape index: {}]   ;;  %s18651_s14 = inlined_call_operand.hbm [shape: f32[1,32], index: 14, kind: input, shape index: {}]   ;;  %s18652_s15 = inlined_call_operand.hbm [shape: f32[32,32], index: 15, kind: input, shape index: {}]   ;;  %s18653_s16 = inlined_call_operand.hbm [shape: f32[1,32], index: 16, kind: input, shape index: {}]   ;;  %s18654_s17 = inlined_call_operand.vmem [shape: f32[32,128], index: 17, kind: input, shape index: {}]   ;;  %s18655_s18 = inlined_call_operand.vmem [shape: f32[1,128], index: 18, kind: input, shape index: {}]   ;;  %s18656_s19 = inlined_call_operand.hbm [shape: f32[8,128], index: 19, kind: output, shape index: {}]  }
   0x1   :  { %18667 = sst [smem:[#allocation43_spill]] %s18637_s0 }
   0x2   :  { %18668 = sst [smem:[#allocation44_spill]] %s18638_s1 }
   0x3   :  { %18669 = sst [smem:[#allocation45_spill]] %s18639_s2 }
   0x4   :  { %18670 = sst [smem:[#allocation46_spill]] %s18640_s3 }
   0x5   :  { %18671 = sst [smem:[#allocation47_spill]] %s18655_s18 }
   0x6   :  { %18672 = sst [smem:[#allocation48_spill]] %s18656_s19 }
   0x7   :  { %24 = vsyncpa [#allocation3], 0 }
   0x8   :  { %25 = vsyncpa [#allocation6], 0 }
   0x9   :  { %26 = vsyncpa [#allocation9], 0 }
   0xa   :  { %27 = vsyncpa [#allocation12], 0 }
   0xb   :  { %28 = vsyncpa [#allocation15], 0 }
   0xc   :  { %29 = vsyncpa [#allocation18], 0 }
   0xd   :  { %30 = vsyncpa [#allocation21], 0 }
   0xe   :  { %31 = vsyncpa [#allocation24], 0 }
   0xf   :  { %32 = vsyncpa [#allocation27], 0 }
  0x10   :  { %33 = vsyncpa [#allocation4], 0  ;;  %s14671_s0 = smov [#allocation5]   ;;  %s14672_s20 = smov [#allocation8]  }
  0x11   :  { %s51_s30 = sshll.u32 %s14671_s0, 4  ;;  %s73_s21 = sshll.u32 %s14672_s20, 4  ;;  %s52_s30 = int_to_ptr.vmem [resolvable:$true] %s51_s30  ;;  %s14800_s21 = int_to_ptr.vmem [resolvable:$true] %s73_s21 }
  0x12   :  { %s18673_s2 = sld [smem:[#allocation44_spill]] }
  0x18   :  { %s14277_s23 = scalar_lea.hbm %s18673_s2, 256 }
  0x19   :  { %p14278_p0 = scmp.ne.s32.totalorder %s18673_s2, %s14277_s23  ;;  %p14281_p1 = scmp.lt.u32.totalorder %s14277_s23, %s18673_s2 }
  0x1b   :  { %p14283_p2 = pnand %p14281_p1, %p14278_p0 }
  0x1d   :  { %14286 = shalt.err (!%p14283_p2)
}
  0x1e   :  { %s14287_s27 = scalar_lea.vmem %s52_s30, 256  ;;  %p14292_p4 = scmp.lt.s32.totalorder %s52_s30, %s52_s30 }
  0x1f   :  { %p14288_p3 = scmp.ne.s32.totalorder %s52_s30, %s14287_s27  ;;  %p14293_p5 = scmp.lt.s32.totalorder %s14287_s27, %s14287_s27 }
  0x21   :  { %p14294_p6 = por %p14293_p5, %p14292_p4 }
  0x23   :  { %p14295_p7 = pnand %p14294_p6, %p14288_p3 }
  0x25   :  { %14298 = shalt.err (!%p14295_p7)
}
  0x26   :  { %s14673_s28 = smov 128   ;;  %s14674_s29 = smov 8  }
  0x27   :  { %57 = dma.hbm_to_vmem [thread:$0]  %s18673_s2, 256, %s52_s30, [#allocation6], %s14673_s28, %s14673_s28, %s14674_s29  }
  0x28   :  { %s18674_s23 = sld [smem:[#allocation46_spill]] }
  0x2e   :  { %s14299_s24 = scalar_lea.hbm %s18674_s23, 512 }
  0x2f   :  { %p14300_p8 = scmp.ne.s32.totalorder %s18674_s23, %s14299_s24  ;;  %p14303_p9 = scmp.lt.u32.totalorder %s14299_s24, %s18674_s23 }
  0x31   :  { %p14305_p10 = pnand %p14303_p9, %p14300_p8 }
  0x33   :  { %14308 = shalt.err (!%p14305_p10)
}
  0x34   :  { %s14309_s19 = scalar_lea.vmem %s14800_s21, 512  ;;  %p14314_p12 = scmp.lt.s32.totalorder %s14800_s21, %s14800_s21 }
  0x35   :  { %p14310_p11 = scmp.ne.s32.totalorder %s14800_s21, %s14309_s19  ;;  %p14315_p13 = scmp.lt.s32.totalorder %s14309_s19, %s14309_s19 }
  0x37   :  { %p14316_p0 = por %p14315_p13, %p14314_p12 }
  0x39   :  { %p14317_p1 = pnand %p14316_p0, %p14310_p11 }
  0x3b   :  { %14320 = shalt.err (!%p14317_p1)
}
  0x3c   :  { %79 = dma.hbm_to_vmem [thread:$0]  %s18674_s23, 512, %s14800_s21, [#allocation9], %s14673_s28, %s14673_s28, %s14674_s29  }
  0x3d   :  { %s14675_s0 = smov [#allocation11]   ;;  %s14676_s1 = smov [#allocation14]  }
  0x3e   :  { %s95_s20 = sshll.u32 %s14675_s0, 4  ;;  %s117_s22 = sshll.u32 %s14676_s1, 4  ;;  %s96_s20 = int_to_ptr.vmem [resolvable:$true] %s95_s20  ;;  %s14837_s22 = int_to_ptr.vmem [resolvable:$true] %s117_s22 }
  0x3f   :  { %s14321_s25 = scalar_lea.hbm %s18642_s5, 512 }
  0x40   :  { %p14322_p2 = scmp.ne.s32.totalorder %s18642_s5, %s14321_s25  ;;  %p14325_p3 = scmp.lt.u32.totalorder %s14321_s25, %s18642_s5 }
  0x42   :  { %p14327_p4 = pnand %p14325_p3, %p14322_p2 }
  0x44   :  { %14330 = shalt.err (!%p14327_p4)
}
  0x45   :  { %s14331_s21 = scalar_lea.vmem %s96_s20, 512  ;;  %p14336_p6 = scmp.lt.s32.totalorder %s96_s20, %s96_s20 }
  0x46   :  { %p14332_p5 = scmp.ne.s32.totalorder %s96_s20, %s14331_s21  ;;  %p14337_p7 = scmp.lt.s32.totalorder %s14331_s21, %s14331_s21 }
  0x48   :  { %p14338_p8 = por %p14337_p7, %p14336_p6 }
  0x4a   :  { %p14339_p9 = pnand %p14338_p8, %p14332_p5 }
  0x4c   :  { %14342 = shalt.err (!%p14339_p9)
}
  0x4d   :  { %101 = dma.hbm_to_vmem [thread:$0]  %s18642_s5, 512, %s96_s20, [#allocation12], %s14673_s28, %s14673_s28, %s14674_s29  }
  0x4e   :  { %s14343_s18 = scalar_lea.hbm %s18644_s7, 512 }
  0x4f   :  { %p14344_p10 = scmp.ne.s32.totalorder %s18644_s7, %s14343_s18  ;;  %p14347_p11 = scmp.lt.u32.totalorder %s14343_s18, %s18644_s7 }
  0x51   :  { %p14349_p12 = pnand %p14347_p11, %p14344_p10 }
  0x53   :  { %14352 = shalt.err (!%p14349_p12)
}
  0x54   :  { %s14353_s3 = scalar_lea.vmem %s14837_s22, 512  ;;  %p14358_p0 = scmp.lt.s32.totalorder %s14837_s22, %s14837_s22 }
  0x55   :  { %p14354_p13 = scmp.ne.s32.totalorder %s14837_s22, %s14353_s3  ;;  %p14359_p1 = scmp.lt.s32.totalorder %s14353_s3, %s14353_s3 }
  0x57   :  { %p14360_p2 = por %p14359_p1, %p14358_p0 }
  0x59   :  { %p14361_p3 = pnand %p14360_p2, %p14354_p13 }
  0x5b   :  { %14364 = shalt.err (!%p14361_p3)
}
  0x5c   :  { %123 = dma.hbm_to_vmem [thread:$0]  %s18644_s7, 512, %s14837_s22, [#allocation15], %s14673_s28, %s14673_s28, %s14674_s29  }
  0x5d   :  { %s14677_s26 = smov [#allocation17]   ;;  %s14678_s21 = smov [#allocation20]  }
  0x5e   :  { %s142_s27 = sshll.u32 %s14677_s26, 4  ;;  %s164_s23 = sshll.u32 %s14678_s21, 4  ;;  %s143_s27 = int_to_ptr.vmem [resolvable:$true] %s142_s27  ;;  %s165_s23 = int_to_ptr.vmem [resolvable:$true] %s164_s23 }
  0x5f   :  { %s14365_s0 = scalar_lea.hbm %s18647_s10, 16 }
  0x60   :  { %p14366_p4 = scmp.ne.s32.totalorder %s18647_s10, %s14365_s0  ;;  %p14369_p5 = scmp.lt.u32.totalorder %s14365_s0, %s18647_s10 }
  0x62   :  { %p14371_p6 = pnand %p14369_p5, %p14366_p4 }
  0x64   :  { %14374 = shalt.err (!%p14371_p6)
}
  0x65   :  { %s14375_s7 = scalar_lea.vmem %s143_s27, 16  ;;  %s14379_s22 = scalar_lea.vmem %s143_s27, 32 }
  0x66   :  { %p14376_p7 = scmp.ne.s32.totalorder %s143_s27, %s14375_s7  ;;  %p14380_p8 = scmp.lt.s32.totalorder %s143_s27, %s143_s27 }
  0x67   :  { %p14381_p9 = scmp.lt.s32.totalorder %s14379_s22, %s14375_s7 }
  0x69   :  { %p14382_p10 = por %p14381_p9, %p14380_p8 }
  0x6b   :  { %p14383_p11 = pnand %p14382_p10, %p14376_p7 }
  0x6d   :  { %14386 = shalt.err (!%p14383_p11)
}
  0x6e   :  { %145 = dma.hbm_to_vmem [thread:$0]  %s18647_s10, 16, %s143_s27, [#allocation18]  }
  0x6f   :  { %s14387_s26 = scalar_lea.hbm %s18649_s12, 16 }
  0x70   :  { %p14388_p12 = scmp.ne.s32.totalorder %s18649_s12, %s14387_s26  ;;  %p14391_p13 = scmp.lt.u32.totalorder %s14387_s26, %s18649_s12 }
  0x72   :  { %p14393_p0 = pnand %p14391_p13, %p14388_p12 }
  0x74   :  { %14396 = shalt.err (!%p14393_p0)
}
  0x75   :  { %s14397_s18 = scalar_lea.vmem %s165_s23, 16  ;;  %s14401_s1 = scalar_lea.vmem %s165_s23, 32 }
  0x76   :  { %p14398_p1 = scmp.ne.s32.totalorder %s165_s23, %s14397_s18  ;;  %p14402_p2 = scmp.lt.s32.totalorder %s165_s23, %s165_s23 }
  0x77   :  { %p14403_p3 = scmp.lt.s32.totalorder %s14401_s1, %s14397_s18 }
  0x79   :  { %p14404_p4 = por %p14403_p3, %p14402_p2 }
  0x7b   :  { %p14405_p5 = pnand %p14404_p4, %p14398_p1 }
  0x7d   :  { %14408 = shalt.err (!%p14405_p5)
}
  0x7e   :  { %167 = dma.hbm_to_vmem [thread:$0]  %s18649_s12, 16, %s165_s23, [#allocation21]  }
  0x7f   :  { %s14679_s24 = smov [#allocation23]   ;;  %s14680_s7 = smov [#allocation2]  }
  0x80   :  { %s186_s19 = sshll.u32 %s14679_s24, 4  ;;  %s39_s22 = sshll.u32 %s14680_s7, 4  ;;  %s187_s19 = int_to_ptr.vmem [resolvable:$true] %s186_s19  ;;  %s14898_s22 = int_to_ptr.vmem [resolvable:$true] %s39_s22 }
  0x81   :  { %s14409_s5 = scalar_lea.hbm %s18651_s14, 16 }
  0x82   :  { %p14410_p6 = scmp.ne.s32.totalorder %s18651_s14, %s14409_s5  ;;  %p14413_p7 = scmp.lt.u32.totalorder %s14409_s5, %s18651_s14 }
  0x84   :  { %p14415_p8 = pnand %p14413_p7, %p14410_p6 }
  0x86   :  { %14418 = shalt.err (!%p14415_p8)
}
  0x87   :  { %s14419_s12 = scalar_lea.vmem %s187_s19, 16  ;;  %s14423_s23 = scalar_lea.vmem %s187_s19, 32 }
  0x88   :  { %p14420_p9 = scmp.ne.s32.totalorder %s187_s19, %s14419_s12  ;;  %p14424_p10 = scmp.lt.s32.totalorder %s187_s19, %s187_s19 }
  0x89   :  { %p14425_p11 = scmp.lt.s32.totalorder %s14423_s23, %s14419_s12 }
  0x8b   :  { %p14426_p12 = por %p14425_p11, %p14424_p10 }
  0x8d   :  { %p14427_p13 = pnand %p14426_p12, %p14420_p9 }
  0x8f   :  { %14430 = shalt.err (!%p14427_p13)
}
  0x90   :  { %189 = dma.hbm_to_vmem [thread:$0]  %s18651_s14, 16, %s187_s19, [#allocation24]  }
  0x91   :  { %s18675_s10 = sld [smem:[#allocation43_spill]] }
  0x97   :  { %s14431_s27 = scalar_lea.hbm %s18675_s10, 1024 }
  0x98   :  { %p14432_p0 = scmp.ne.s32.totalorder %s18675_s10, %s14431_s27  ;;  %p14435_p1 = scmp.lt.u32.totalorder %s14431_s27, %s18675_s10 }
  0x9a   :  { %p14437_p2 = pnand %p14435_p1, %p14432_p0 }
  0x9c   :  { %14440 = shalt.err (!%p14437_p2)
}
  0x9d   :  { %s14441_s5 = scalar_lea.vmem %s14898_s22, 1024  ;;  %p14446_p4 = scmp.lt.s32.totalorder %s14898_s22, %s14898_s22 }
  0x9e   :  { %p14442_p3 = scmp.ne.s32.totalorder %s14898_s22, %s14441_s5  ;;  %p14447_p5 = scmp.lt.s32.totalorder %s14441_s5, %s14441_s5 }
  0xa0   :  { %p14448_p6 = por %p14447_p5, %p14446_p4 }
  0xa2   :  { %p14449_p7 = pnand %p14448_p6, %p14442_p3 }
  0xa4   :  { %14452 = shalt.err (!%p14449_p7)
}
  0xa5   :  { %45 = dma.hbm_to_vmem [thread:$0]  %s18675_s10, 1024, %s14898_s22, [#allocation3], %s14673_s28, %s14673_s28, %s14674_s29  }
  0xa6   :  { %s14681_s20 = smov [#allocation7]   ;;  %s14682_s21 = smov [#allocation10]  }
  0xa7   :  { %s64_s26 = sshll.u32 %s14681_s20, 4  ;;  %s86_s30 = sshll.u32 %s14682_s21, 4  ;;  %s65_s26 = int_to_ptr.vmem [resolvable:$true] %s64_s26  ;;  %s87_s30 = int_to_ptr.vmem [resolvable:$true] %s86_s30 }
  0xa8   :  { %s18676_s2 = sld [smem:[#allocation45_spill]] }
  0xae   :  { %s14453_s0 = scalar_lea.hbm %s18676_s2, 16 }
  0xaf   :  { %p14454_p8 = scmp.ne.s32.totalorder %s18676_s2, %s14453_s0  ;;  %p14457_p9 = scmp.lt.u32.totalorder %s14453_s0, %s18676_s2 }
  0xb1   :  { %p14459_p10 = pnand %p14457_p9, %p14454_p8 }
  0xb3   :  { %14462 = shalt.err (!%p14459_p10)
}
  0xb4   :  { %s14463_s22 = scalar_lea.vmem %s65_s26, 16  ;;  %s14467_s10 = scalar_lea.vmem %s65_s26, 32 }
  0xb5   :  { %p14464_p11 = scmp.ne.s32.totalorder %s65_s26, %s14463_s22  ;;  %p14468_p12 = scmp.lt.s32.totalorder %s65_s26, %s65_s26 }
  0xb6   :  { %p14469_p13 = scmp.lt.s32.totalorder %s14467_s10, %s14463_s22 }
  0xb8   :  { %p14470_p0 = por %p14469_p13, %p14468_p12 }
  0xba   :  { %p14471_p1 = pnand %p14470_p0, %p14464_p11 }
  0xbc   :  { %14474 = shalt.err (!%p14471_p1)
}
  0xbd   :  { %67 = dma.hbm_to_vmem [thread:$0]  %s18676_s2, 16, %s65_s26, [#allocation6]  }
  0xbe   :  { %s14475_s14 = scalar_lea.hbm %s18641_s4, 16 }
  0xbf   :  { %p14476_p2 = scmp.ne.s32.totalorder %s18641_s4, %s14475_s14  ;;  %p14479_p3 = scmp.lt.u32.totalorder %s14475_s14, %s18641_s4 }
  0xc1   :  { %p14481_p4 = pnand %p14479_p3, %p14476_p2 }
  0xc3   :  { %14484 = shalt.err (!%p14481_p4)
}
  0xc4   :  { %s14485_s23 = scalar_lea.vmem %s87_s30, 16  ;;  %s14489_s0 = scalar_lea.vmem %s87_s30, 32 }
  0xc5   :  { %p14486_p5 = scmp.ne.s32.totalorder %s87_s30, %s14485_s23  ;;  %p14490_p6 = scmp.lt.s32.totalorder %s87_s30, %s87_s30 }
  0xc6   :  { %p14491_p7 = scmp.lt.s32.totalorder %s14489_s0, %s14485_s23 }
  0xc8   :  { %p14492_p8 = por %p14491_p7, %p14490_p6 }
  0xca   :  { %p14493_p9 = pnand %p14492_p8, %p14486_p5 }
  0xcc   :  { %14496 = shalt.err (!%p14493_p9)
}
  0xcd   :  { %89 = dma.hbm_to_vmem [thread:$0]  %s18641_s4, 16, %s87_s30, [#allocation9]  }
  0xce   :  { %s14683_s18 = smov [#allocation13]   ;;  %s14684_s27 = smov [#allocation16]  }
  0xcf   :  { %s108_s1 = sshll.u32 %s14683_s18, 4  ;;  %s130_s24 = sshll.u32 %s14684_s27, 4  ;;  %s109_s1 = int_to_ptr.vmem [resolvable:$true] %s108_s1  ;;  %s131_s24 = int_to_ptr.vmem [resolvable:$true] %s130_s24 }
  0xd0   :  { %s14497_s7 = scalar_lea.hbm %s18643_s6, 16 }
  0xd1   :  { %p14498_p10 = scmp.ne.s32.totalorder %s18643_s6, %s14497_s7  ;;  %p14501_p11 = scmp.lt.u32.totalorder %s14497_s7, %s18643_s6 }
  0xd3   :  { %p14503_p12 = pnand %p14501_p11, %p14498_p10 }
  0xd5   :  { %14506 = shalt.err (!%p14503_p12)
}
  0xd6   :  { %s14507_s4 = scalar_lea.vmem %s109_s1, 16  ;;  %s14511_s30 = scalar_lea.vmem %s109_s1, 32 }
  0xd7   :  { %p14508_p13 = scmp.ne.s32.totalorder %s109_s1, %s14507_s4  ;;  %p14512_p0 = scmp.lt.s32.totalorder %s109_s1, %s109_s1 }
  0xd8   :  { %p14513_p1 = scmp.lt.s32.totalorder %s14511_s30, %s14507_s4 }
  0xda   :  { %p14514_p2 = por %p14513_p1, %p14512_p0 }
  0xdc   :  { %p14515_p3 = pnand %p14514_p2, %p14508_p13 }
  0xde   :  { %14518 = shalt.err (!%p14515_p3)
}
  0xdf   :  { %111 = dma.hbm_to_vmem [thread:$0]  %s18643_s6, 16, %s109_s1, [#allocation12]  }
  0xe0   :  { %s14519_s23 = scalar_lea.hbm %s18645_s8, 16 }
  0xe1   :  { %p14520_p4 = scmp.ne.s32.totalorder %s18645_s8, %s14519_s23  ;;  %p14523_p5 = scmp.lt.u32.totalorder %s14519_s23, %s18645_s8 }
  0xe3   :  { %p14525_p6 = pnand %p14523_p5, %p14520_p4 }
  0xe5   :  { %14528 = shalt.err (!%p14525_p6)
}
  0xe6   :  { %s14529_s27 = scalar_lea.vmem %s131_s24, 16  ;;  %s14533_s22 = scalar_lea.vmem %s131_s24, 32 }
  0xe7   :  { %p14530_p7 = scmp.ne.s32.totalorder %s131_s24, %s14529_s27  ;;  %p14534_p8 = scmp.lt.s32.totalorder %s131_s24, %s131_s24 }
  0xe8   :  { %p14535_p9 = scmp.lt.s32.totalorder %s14533_s22, %s14529_s27 }
  0xea   :  { %p14536_p10 = por %p14535_p9, %p14534_p8 }
  0xec   :  { %p14537_p11 = pnand %p14536_p10, %p14530_p7 }
  0xee   :  { %14540 = shalt.err (!%p14537_p11)
}
  0xef   :  { %133 = dma.hbm_to_vmem [thread:$0]  %s18645_s8, 16, %s131_s24, [#allocation15]  }
  0xf0   :  { %s14685_s10 = smov [#allocation19]   ;;  %s14686_s25 = smov [#allocation22]  }
  0xf1   :  { %s151_s7 = sshll.u32 %s14685_s10, 4  ;;  %s173_s3 = sshll.u32 %s14686_s25, 4  ;;  %s152_s7 = int_to_ptr.vmem [resolvable:$true] %s151_s7  ;;  %s14980_s3 = int_to_ptr.vmem [resolvable:$true] %s173_s3 }
  0xf2   :  { %s14541_s4 = scalar_lea.hbm %s18648_s11, 512 }
  0xf3   :  { %p14542_p12 = scmp.ne.s32.totalorder %s18648_s11, %s14541_s4  ;;  %p14545_p13 = scmp.lt.u32.totalorder %s14541_s4, %s18648_s11 }
  0xf5   :  { %p14547_p0 = pnand %p14545_p13, %p14542_p12 }
  0xf7   :  { %14550 = shalt.err (!%p14547_p0)
}
  0xf8   :  { %s14551_s8 = scalar_lea.vmem %s152_s7, 512  ;;  %p14556_p2 = scmp.lt.s32.totalorder %s152_s7, %s152_s7 }
  0xf9   :  { %p14552_p1 = scmp.ne.s32.totalorder %s152_s7, %s14551_s8  ;;  %p14557_p3 = scmp.lt.s32.totalorder %s14551_s8, %s14551_s8 }
  0xfb   :  { %p14558_p4 = por %p14557_p3, %p14556_p2 }
  0xfd   :  { %p14559_p5 = pnand %p14558_p4, %p14552_p1 }
  0xff   :  { %14562 = shalt.err (!%p14559_p5)
}
 0x100   :  { %157 = dma.hbm_to_vmem [thread:$0]  %s18648_s11, 512, %s152_s7, [#allocation18], %s14673_s28, %s14673_s28, %s14674_s29  }
 0x101   :  { %s14563_s26 = scalar_lea.hbm %s18650_s13, 512 }
 0x102   :  { %p14564_p6 = scmp.ne.s32.totalorder %s18650_s13, %s14563_s26  ;;  %p14567_p7 = scmp.lt.u32.totalorder %s14563_s26, %s18650_s13 }
 0x104   :  { %p14569_p8 = pnand %p14567_p7, %p14564_p6 }
 0x106   :  { %14572 = shalt.err (!%p14569_p8)
}
 0x107   :  { %s14573_s6 = scalar_lea.vmem %s14980_s3, 512  ;;  %p14578_p10 = scmp.lt.s32.totalorder %s14980_s3, %s14980_s3 }
 0x108   :  { %p14574_p9 = scmp.ne.s32.totalorder %s14980_s3, %s14573_s6  ;;  %p14579_p11 = scmp.lt.s32.totalorder %s14573_s6, %s14573_s6 }
 0x10a   :  { %p14580_p12 = por %p14579_p11, %p14578_p10 }
 0x10c   :  { %p14581_p13 = pnand %p14580_p12, %p14574_p9 }
 0x10e   :  { %14584 = shalt.err (!%p14581_p13)
}
 0x10f   :  { %179 = dma.hbm_to_vmem [thread:$0]  %s18650_s13, 512, %s14980_s3, [#allocation21], %s14673_s28, %s14673_s28, %s14674_s29  }
 0x110   :  { %s14687_s10 = smov [#allocation25]   ;;  %s14688_s25 = smov [#allocation26]  }
 0x111   :  { %s195_s7 = sshll.u32 %s14687_s10, 4  ;;  %s208_s5 = sshll.u32 %s14688_s25, 4  ;;  %s196_s7 = int_to_ptr.vmem [resolvable:$true] %s195_s7  ;;  %s209_s5 = int_to_ptr.vmem [resolvable:$true] %s208_s5 }
 0x112   :  { %s14585_s30 = scalar_lea.hbm %s18652_s15, 512 }
 0x113   :  { %p14586_p0 = scmp.ne.s32.totalorder %s18652_s15, %s14585_s30  ;;  %p14589_p1 = scmp.lt.u32.totalorder %s14585_s30, %s18652_s15 }
 0x115   :  { %p14591_p2 = pnand %p14589_p1, %p14586_p0 }
 0x117   :  { %14594 = shalt.err (!%p14591_p2)
}
 0x118   :  { %s14595_s13 = scalar_lea.vmem %s196_s7, 512  ;;  %p14600_p4 = scmp.lt.s32.totalorder %s196_s7, %s196_s7 }
 0x119   :  { %p14596_p3 = scmp.ne.s32.totalorder %s196_s7, %s14595_s13  ;;  %p14601_p5 = scmp.lt.s32.totalorder %s14595_s13, %s14595_s13 }
 0x11b   :  { %p14602_p6 = por %p14601_p5, %p14600_p4 }
 0x11d   :  { %p14603_p7 = pnand %p14602_p6, %p14596_p3 }
 0x11f   :  { %14606 = shalt.err (!%p14603_p7)
}
 0x120   :  { %201 = dma.hbm_to_vmem [thread:$0]  %s18652_s15, 512, %s196_s7, [#allocation24], %s14673_s28, %s14673_s28, %s14674_s29  }
 0x121   :  { %s14607_s0 = scalar_lea.hbm %s18653_s16, 16 }
 0x122   :  { %p14608_p8 = scmp.ne.s32.totalorder %s18653_s16, %s14607_s0  ;;  %p14611_p9 = scmp.lt.u32.totalorder %s14607_s0, %s18653_s16 }
 0x124   :  { %p14613_p10 = pnand %p14611_p9, %p14608_p8 }
 0x126   :  { %14616 = shalt.err (!%p14613_p10)
}
 0x127   :  { %s14617_s22 = scalar_lea.vmem %s209_s5, 16  ;;  %s14621_s6 = scalar_lea.vmem %s209_s5, 32 }
 0x128   :  { %p14618_p11 = scmp.ne.s32.totalorder %s209_s5, %s14617_s22  ;;  %p14622_p12 = scmp.lt.s32.totalorder %s209_s5, %s209_s5 }
 0x129   :  { %p14623_p13 = scmp.lt.s32.totalorder %s14621_s6, %s14617_s22 }
 0x12b   :  { %p14624_p0 = por %p14623_p13, %p14622_p12 }
 0x12d   :  { %p14625_p1 = pnand %p14624_p0, %p14618_p11 }
 0x12f   :  { %14628 = shalt.err (!%p14625_p1)
}
 0x130   :  { %211 = dma.hbm_to_vmem [thread:$0]  %s18653_s16, 16, %s209_s5, [#allocation27]  }
 0x131   :  { %14651 = dma.done.wait [#allocation3], 1024  }
 0x132   :  { %14652 = vsyncadd [#allocation3], 4294966272 }
 0x133   :  { %14653 = dma.done.wait [#allocation6], 272  }
 0x134   :  { %14654 = vsyncadd [#allocation6], 4294967024 }
 0x135   :  { %14655 = dma.done.wait [#allocation9], 528  }
 0x136   :  { %14656 = vsyncadd [#allocation9], 4294966768 }
 0x137   :  { %14657 = dma.done.wait [#allocation12], 528  }
 0x138   :  { %14658 = vsyncadd [#allocation12], 4294966768 }
 0x139   :  { %14659 = dma.done.wait [#allocation15], 528  }
 0x13a   :  { %14660 = vsyncadd [#allocation15], 4294966768 }
 0x13b   :  { %14661 = dma.done.wait [#allocation18], 528  }
 0x13c   :  { %14662 = vsyncadd [#allocation18], 4294966768 }
 0x13d   :  { %14663 = dma.done.wait [#allocation21], 528  }
 0x13e   :  { %14664 = vsyncadd [#allocation21], 4294966768 }
 0x13f   :  { %14665 = dma.done.wait [#allocation24], 528  }
 0x140   :  { %14666 = vsyncadd [#allocation24], 4294966768 }
 0x141   :  { %14667 = dma.done.wait [#allocation27], 16  }
 0x142   :  { %14668 = vsyncadd [#allocation27], 4294967280  ;;  %v18663_v0 = vmov 0.0|0.0   ;;  %vm14690_vm0 = vmmov 0   ;;  %v18665_v1 = vmov 0.0   ;;  %vm18662_vm1 = vcmask 130048  }
 0x143   :  { %13190 = vmatprep.subr.bf16.mxu1 %v18663_v0  ;;  %12587 = vmatprep.mubr.msk.f32.mxu1 %vm14690_vm0, %v18665_v1  ;;  %v272_v2 = vld [vmem:[#allocation5] sm:$0xff]  ;;  %v273_v3 = vld [vmem:[#allocation5 + $0x8] sm:$0xff]  ;;  %v411_v4 = vld [vmem:[#allocation8] sm:$0xff]  ;;  %s14692_s16 = smov 64   ;;  %s14693_s11 = smov 96   ;;  %vm721_vm2 = vcmask 1041409  }
 0x144   :  { %v13186_v5 = vpack.c.bf16 %v273_v3, %v272_v2  ;;  %v412_v6 = vld [vmem:[#allocation8 + $0x8] sm:$0xff]  ;;  %v413_v9 = vld [vmem:[#allocation8 + $0x10] sm:$0xff]  ;;  %v414_v10 = vld [vmem:[#allocation8 + $0x18] sm:$0xff]  ;;  %vm724_vm3 = vcmask 1042434   ;;  %vm727_vm4 = vcmask 1043459   ;;  %vm730_vm5 = vcmask 1044484  }
 0x145   :  { %v264_v7 = vld [vmem:[#allocation2] sm:$0xff]  ;;  %v15047_v8 = vpack.c.bf16 %v412_v6, %v411_v4  ;;  %v265_v11 = vld [vmem:[#allocation2 + $0x8] sm:$0xff]  ;;  %v15051_v12 = vpack.c.bf16 %v414_v10, %v413_v9  ;;  %v266_v13 = vld [vmem:[#allocation2 + $0x10] sm:$0xff]  ;;  %vm733_vm6 = vcmask 1045509   ;;  %vm736_vm7 = vcmask 1046534   ;;  %s14695_s19 = smov 112  }
 0x146   :  { %12567 = vmatprep.mubr.msk.f32.mxu0 %vm18662_vm1, %v264_v7  ;;  %13187 = vmatprep.subr.bf16.mxu0 %v13186_v5  ;;  %v267_v14 = vld [vmem:[#allocation2 + $0x18] sm:$0xff]  ;;  %v268_v15 = vld [vmem:[#allocation2 + $0x20] sm:$0xff]  ;;  %v269_v16 = vld [vmem:[#allocation2 + $0x28] sm:$0xff]  ;;  %vm739_vm8 = vcmask 1047559   ;;  %vm422_vm9 = vcmask 261120   ;;  %vm3008_vm10 = vcmask 1040384  }
 0x147   :  { %13192 = vmatpush3.bf16.msra.mxu1 %v15047_v8  ;;  %13189 = vmatpush3.bf16.msra.mxu0 %v13186_v5  ;;  %v270_v17 = vld [vmem:[#allocation2 + $0x30] sm:$0xff]  ;;  %v271_v18 = vld [vmem:[#allocation2 + $0x38] sm:$0xff]  ;;  %vm3017_vm11 = vcmask 1041408   ;;  %vm3026_vm12 = vcmask 1042432   ;;  %vm3035_vm13 = vcmask 1043456   ;;  %vm3044_vm14 = vcmask 1044480  }
 0x148   :  { %13193 = vmatprep.subr.bf16.mxu1 %v18663_v0  ;;  %13202 = vmatprep.subr.bf16.mxu0 %v18663_v0  ;;  %v15077_v21 = vld [vmem:[#allocation10] ss:$0 sm:$0xff]  ;;  %v12112_v38 = vld [vmem:[#allocation7] ss:$0 sm:$0xff]  ;;  %vm3053_vm15 = vcmask 1045504   ;;  %s14696_s20 = smov 104  }
 0x149   :  { %s14697_s21 = smov 16   ;;  %s18694_s18 = sld [smem:[#allocation47_spill]] }
 0x14a   :  { %12568 = vmatmul.mubr.msk.f32.vlgmr.msra.gmra.mrb[0].mxu0 %vm18662_vm1, %v265_v11  ;;  %s14699_s27 = smov [#allocation28]  }
 0x14b   :  { %13195 = vmatpush3.bf16.msra.mxu1 %v15051_v12  ;;  %12570 = vmatprep.mubr.msk.f32.mxu0 %vm18662_vm1, %v266_v13  ;;  %s12095_s22 = sshll.u32 %s14699_s27, 4  ;;  %s12096_s22 = int_to_ptr.vmem [resolvable:$true] %s12095_s22 }
 0x14c   :  { %13196 = vmatprep.subr.bf16.mxu1 %v18663_v0  ;;  %13204 = vmatpush3.bf16.msra.mxu0 %v15047_v8  ;;  %s14629_s6 = scalar_lea.vmem %s12096_s22, 128  ;;  %p14634_p3 = scmp.lt.s32.totalorder %s12096_s22, %s12096_s22 }
 0x14d   :  { %13205 = vmatprep.subr.bf16.mxu0 %v18663_v0  ;;  %p14630_p2 = scmp.ne.s32.totalorder %s12096_s22, %s14629_s6  ;;  %p14635_p4 = scmp.lt.s32.totalorder %s14629_s6, %s14629_s6 }
 0x14e   :  { %12588 = vmatmul.mubr.f32.vlgmr.msra.gmra.mrb[0].mxu1 %v18665_v1  ;;  %12571 = vmatmul.mubr.msk.f32.gmra.mrb[2].mxu0 %vm18662_vm1, %v267_v14 }
 0x14f   :  { %12573 = vmatprep.mubr.msk.f32.mxu0 %vm18662_vm1, %v268_v15  ;;  %13198 = vmatpush3.bf16.msra.mxu1 %v15047_v8  ;;  %p14636_p5 = por %p14635_p4, %p14634_p3 }
 0x150   :  { %13199 = vmatprep.subr.bf16.mxu1 %v18663_v0  ;;  %12598 = vmatprep.mubr.msk.f32.mxu1 %vm14690_vm0, %v18665_v1 }
 0x151   :  { %13207 = vmatpush3.bf16.msra.mxu0 %v15051_v12  ;;  %p14637_p6 = pnand %p14636_p5, %p14630_p2 }
 0x152   :  { %12574 = vmatmul.mubr.msk.f32.gmra.mrb[4].mxu0 %vm18662_vm1, %v269_v16  ;;  %13214 = vmatprep.subr.bf16.mxu0 %v18663_v0 }
 0x153   :  { %12576 = vmatprep.mubr.msk.f32.mxu0 %vm18662_vm1, %v270_v17  ;;  %13201 = vmatpush3.bf16.msra.mxu1 %v15051_v12 }
 0x154   :  { %13208 = vmatprep.subr.bf16.mxu1 %v18663_v0 }
 0x156   :  { %12577 = vmatmul.mubr.msk.f32.gmra.mrb[6].mxu0 %vm18662_vm1, %v271_v18  ;;  %vm3062_vm1 = vcmask 1046528  }
 0x157   :  { %12609 = vmatprep.mubr.msk.f32.mxu0 %vm14690_vm0, %v18665_v1 }
 0x21d   :  { %v12569_v19 = vpop.f32.mrb[0].mxu0 }
 0x21e   :  { %v372_v20 = vpop.f32.mrb[1].mxu0  ;;  %v15090_v40 = vadd.f32 %v12569_v19, %v12112_v38 }
 0x21f   :  { %v15088_v39 = vadd.f32 %v12112_v38, %v372_v20 }
 0x221   :  { %v492_v22 = vpop.f32.mrb[0].mxu1  ;;  %v12572_v23 = vpop.f32.mrb[2].mxu0 }
 0x222   :  { %v493_v24 = vadd.f32 %v15077_v21, %v492_v22  ;;  %v12589_v25 = vpop.f32.mrb[1].mxu1  ;;  %v382_v26 = vpop.f32.mrb[3].mxu0  ;;  %v15096_v45 = vadd.f32 %v12572_v23, %v12112_v38 }
 0x223   :  { %v15093_v42 = vadd.f32 %v12112_v38, %v382_v26 }
 0x224   :  { %568 = vrot.lane.b32.xlu1 %v493_v24, %s14692_s16  ;;  %v497_v27 = vrot.slane %v493_v24, 1  ;;  %v499_v30 = vrot.slane %v493_v24, 3  ;;  %v498_v31 = vrot.slane %v493_v24, 2  ;;  %v501_v33 = vrot.slane %v493_v24, 5 }
 0x225   :  { %v12575_v28 = vpop.f32.mrb[4].mxu0  ;;  %v500_v35 = vrot.slane %v493_v24, 4  ;;  %v503_v36 = vrot.slane %v493_v24, 7  ;;  %v502_v37 = vrot.slane %v493_v24, 6  ;;  %v512_v41 = vadd.f32 %v493_v24, %v15088_v39 }
 0x226   :  { %570 = vrot.lane.b32.xlu0 %v497_v27, %s14692_s16  ;;  %v392_v29 = vpop.f32.mrb[5].mxu0  ;;  %v513_v43 = vadd.f32 %v497_v27, %v15090_v40  ;;  %v514_v47 = vadd.f32 %v498_v31, %v15093_v42  ;;  %v15101_v50 = vadd.f32 %v12575_v28, %v12112_v38  ;;  %v515_v51 = vadd.f32 %v499_v30, %v15096_v45 }
 0x227   :  { %v520_v44 = vsub.f32 0.0, %v512_v41  ;;  %v15098_v46 = vadd.f32 %v12112_v38, %v392_v29 }
 0x228   :  { %574 = vrot.lane.b32.xlu1 %v499_v30, %s14692_s16  ;;  %v521_v48 = vsub.f32 0.0, %v513_v43  ;;  %v522_v52 = vsub.f32 0.0, %v514_v47  ;;  %v523_v56 = vsub.f32 0.0, %v515_v51  ;;  %v517_v57 = vadd.f32 %v501_v33, %v15101_v50 }
 0x229   :  { %v12578_v32 = vpop.f32.mrb[6].mxu0  ;;  %v528_v49 = vmul.f32 1.442695, %v520_v44  ;;  %v516_v54 = vadd.f32 %v500_v35, %v15098_v46 }
 0x22a   :  { %572 = vrot.lane.b32.xlu0 %v498_v31, %s14692_s16  ;;  %v402_v34 = vpop.f32.mrb[7].mxu0  ;;  %v530_v55 = vmul.f32 1.442695, %v521_v48  ;;  %v532_v58 = vmul.f32 1.442695, %v522_v52  ;;  %v15108_v59 = vadd.f32 %v12578_v32, %v12112_v38  ;;  %v525_v63 = vsub.f32 0.0, %v517_v57 }
 0x22b   :  { %v15104_v53 = vadd.f32 %v12112_v38, %v402_v34  ;;  %13361 = vpow2.f32 %v528_v49  ;;  %v524_v60 = vsub.f32 0.0, %v516_v54  ;;  %v534_v62 = vmul.f32 1.442695, %v523_v56 }
 0x22c   :  { %578 = vrot.lane.b32.xlu1 %v501_v33, %s14692_s16  ;;  %13363 = vpow2.f32 %v530_v55  ;;  %v519_v3 = vadd.f32 %v503_v36, %v15108_v59  ;;  %v538_v5 = vmul.f32 1.442695, %v525_v63 }
 0x22d   :  { %v518_v61 = vadd.f32 %v502_v37, %v15104_v53  ;;  %13365 = vpow2.f32 %v532_v58  ;;  %v536_v2 = vmul.f32 1.442695, %v524_v60 }
 0x22e   :  { %576 = vrot.lane.b32.xlu0 %v500_v35, %s14692_s16  ;;  %13367 = vpow2.f32 %v534_v62  ;;  %v527_v7 = vsub.f32 0.0, %v519_v3 }
 0x22f   :  { %v526_v4 = vsub.f32 0.0, %v518_v61  ;;  %13369 = vpow2.f32 %v536_v2 }
 0x230   :  { %582 = vrot.lane.b32.xlu1 %v503_v36, %s14692_s16  ;;  %13371 = vpow2.f32 %v538_v5  ;;  %v542_v13 = vmul.f32 1.442695, %v527_v7 }
 0x231   :  { %v540_v9 = vmul.f32 1.442695, %v526_v4 }
 0x232   :  { %580 = vrot.lane.b32.xlu0 %v502_v37, %s14692_s16 }
 0x233   :  { %13373 = vpow2.f32 %v540_v9 }
 0x235   :  { %v13362_v6 = vpop.eup %13361 }
 0x236   :  { %v544_v10 = vadd.f32 1.0, %v13362_v6  ;;  %v13364_v11 = vpop.eup %13363 }
 0x237   :  { %v13366_v14 = vpop.eup %13365  ;;  %v545_v15 = vadd.f32 1.0, %v13364_v11 }
 0x238   :  { %13375 = vrcp.f32 %v544_v10  ;;  %v13368_v16 = vpop.eup %13367  ;;  %v546_v17 = vadd.f32 1.0, %v13366_v14 }
 0x239   :  { %13377 = vpow2.f32 %v542_v13  ;;  %v13370_v18 = vpop.eup %13369  ;;  %v547_v19 = vadd.f32 1.0, %v13368_v16 }
 0x23a   :  { %13379 = vrcp.f32 %v545_v15  ;;  %v13372_v20 = vpop.eup %13371  ;;  %v548_v22 = vadd.f32 1.0, %v13370_v18 }
 0x23b   :  { %13381 = vrcp.f32 %v546_v17  ;;  %v549_v24 = vadd.f32 1.0, %v13372_v20 }
 0x23c   :  { %13383 = vrcp.f32 %v547_v19 }
 0x23d   :  { %v13374_v23 = vpop.eup %13373  ;;  %13385 = vrcp.f32 %v548_v22 }
 0x23e   :  { %v550_v26 = vadd.f32 1.0, %v13374_v23  ;;  %13387 = vrcp.f32 %v549_v24 }
 0x240   :  { %13389 = vrcp.f32 %v550_v26 }
 0x242   :  { %v15112_v25 = vpop.eup %13375 }
 0x243   :  { %v13378_v28 = vpop.eup %13377 }
 0x244   :  { %v15116_v31 = vpop.eup %13379  ;;  %v551_v32 = vadd.f32 1.0, %v13378_v28 }
 0x245   :  { %v15119_v35 = vpop.eup %13381 }
 0x246   :  { %13391 = vrcp.f32 %v551_v32  ;;  %v15123_v38 = vpop.eup %13383 }
 0x247   :  { %v15126_v41 = vpop.eup %13385 }
 0x248   :  { %v15130_v49 = vpop.eup %13387 }
 0x24a   :  { %v15134_v51 = vpop.eup %13389 }
 0x250   :  { %v15140_v57 = vpop.eup %13391 }
 0x296   :  { %v569_v27 = vpop.permute.xlu1 %568 }
 0x297   :  { %v592_v29 = vmul.f32 %v15112_v25, %v569_v27  ;;  %v649_v27 = vsub.f32 1.0, %v15116_v31 }
 0x298   :  { %v571_v30 = vpop.permute.xlu0 %570 }
 0x299   :  { %608 = vrot.lane.b32.xlu0 %v592_v29, %s14692_s16  ;;  %v593_v34 = vmul.f32 %v15116_v31, %v571_v30  ;;  %v648_v29 = vsub.f32 1.0, %v15112_v25  ;;  %v697_v30 = vmul.f32 0.0, %v15116_v31 }
 0x29a   :  { %v575_v33 = vpop.permute.xlu1 %574 }
 0x29b   :  { %v595_v47 = vmul.f32 %v15123_v38, %v575_v33  ;;  %v650_v33 = vsub.f32 1.0, %v15119_v35 }
 0x29c   :  { %v573_v36 = vpop.permute.xlu0 %572 }
 0x29d   :  { %v594_v37 = vmul.f32 %v15119_v35, %v573_v36  ;;  %610 = vrot.lane.b32.xlu0 %v593_v34, %s14692_s16 }
 0x29e   :  { %v579_v43 = vpop.permute.xlu1 %578 }
 0x29f   :  { %612 = vrot.lane.b32.xlu1 %v594_v37, %s14692_s16  ;;  %v597_v54 = vmul.f32 %v15130_v49, %v579_v43  ;;  %v698_v43 = vmul.f32 0.0, %v15119_v35 }
 0x2a0   :  { %v577_v44 = vpop.permute.xlu0 %576 }
 0x2a1   :  { %v596_v48 = vmul.f32 %v15126_v41, %v577_v44 }
 0x2a2   :  { %v583_v56 = vpop.permute.xlu1 %582 }
 0x2a3   :  { %614 = vrot.lane.b32.xlu1 %v595_v47, %s14692_s16  ;;  %616 = vrot.lane.b32.xlu0 %v596_v48, %s14692_s16  ;;  %v599_v58 = vmul.f32 %v15140_v57, %v583_v56  ;;  %v696_v47 = vmul.f32 0.0, %v15112_v25  ;;  %v700_v25 = vmul.f32 0.0, %v15126_v41 }
 0x2a4   :  { %v581_v52 = vpop.permute.xlu0 %580 }
 0x2a5   :  { %v598_v55 = vmul.f32 %v15134_v51, %v581_v52 }
 0x2a7   :  { %618 = vrot.lane.b32.xlu1 %v597_v54, %s14692_s16  ;;  %620 = vrot.lane.b32.xlu0 %v598_v55, %s14692_s16  ;;  %v651_v54 = vsub.f32 1.0, %v15123_v38  ;;  %v652_v55 = vsub.f32 1.0, %v15126_v41  ;;  %v701_v41 = vmul.f32 0.0, %v15130_v49 }
 0x2ab   :  { %622 = vrot.lane.b32.xlu1 %v599_v58, %s14692_s16  ;;  %v699_v58 = vmul.f32 0.0, %v15123_v38 }
 0x30b   :  { %v609_v60 = vpop.permute.xlu0 %608 }
 0x30c   :  { %v632_v61 = vadd.f32 %v609_v60, %v15088_v39 }
 0x30e   :  { %13393 = vtanh.f32 %v632_v61 }
 0x30f   :  { %v611_v62 = vpop.permute.xlu0 %610 }
 0x310   :  { %v633_v63 = vadd.f32 %v611_v62, %v15090_v40 }
 0x311   :  { %v613_v2 = vpop.permute.xlu1 %612 }
 0x312   :  { %13395 = vtanh.f32 %v633_v63  ;;  %v634_v3 = vadd.f32 %v613_v2, %v15093_v42 }
 0x314   :  { %13397 = vtanh.f32 %v634_v3  ;;  %v653_v3 = vsub.f32 1.0, %v15130_v49 }
 0x315   :  { %v615_v4 = vpop.permute.xlu1 %614  ;;  %v617_v5 = vpop.permute.xlu0 %616 }
 0x316   :  { %v635_v6 = vadd.f32 %v615_v4, %v15096_v45  ;;  %v636_v7 = vadd.f32 %v617_v5, %v15098_v46  ;;  %v654_v5 = vsub.f32 1.0, %v15134_v51 }
 0x318   :  { %v13394_v9 = vpop.eup %13393  ;;  %13399 = vtanh.f32 %v635_v6 }
 0x319   :  { %13401 = vtanh.f32 %v636_v7  ;;  %v619_v10 = vpop.permute.xlu1 %618  ;;  %664 = vrot.lane.b32.xlu0 %v13394_v9, %s14693_s11  ;;  %v621_v11 = vpop.permute.xlu0 %620 }
 0x31a   :  { %v637_v13 = vadd.f32 %v619_v10, %v15101_v50  ;;  %v638_v14 = vadd.f32 %v621_v11, %v15104_v53 }
 0x31c   :  { %v13396_v15 = vpop.eup %13395  ;;  %13403 = vtanh.f32 %v637_v13  ;;  %v702_v13 = vmul.f32 0.0, %v15134_v51 }
 0x31d   :  { %13405 = vtanh.f32 %v638_v14  ;;  %v623_v16 = vpop.permute.xlu1 %622  ;;  %666 = vrot.lane.b32.xlu0 %v13396_v15, %s14693_s11 }
 0x31e   :  { %v13398_v17 = vpop.eup %13397  ;;  %v639_v18 = vadd.f32 %v623_v16, %v15108_v59  ;;  %v655_v16 = vsub.f32 1.0, %v15140_v57 }
 0x31f   :  { %668 = vrot.lane.b32.xlu1 %v13398_v17, %s14693_s11 }
 0x320   :  { %13407 = vtanh.f32 %v639_v18 }
 0x322   :  { %v13400_v19 = vpop.eup %13399 }
 0x323   :  { %v13402_v20 = vpop.eup %13401  ;;  %670 = vrot.lane.b32.xlu1 %v13400_v19, %s14693_s11 }
 0x324   :  { %672 = vrot.lane.b32.xlu0 %v13402_v20, %s14693_s11  ;;  %v703_v20 = vmul.f32 0.0, %v15140_v57 }
 0x326   :  { %v13404_v22 = vpop.eup %13403 }
 0x327   :  { %v13406_v23 = vpop.eup %13405  ;;  %674 = vrot.lane.b32.xlu1 %v13404_v22, %s14693_s11 }
 0x328   :  { %676 = vrot.lane.b32.xlu0 %v13406_v23, %s14693_s11 }
 0x32a   :  { %v13408_v24 = vpop.eup %13407 }
 0x32b   :  { %678 = vrot.lane.b32.xlu1 %v13408_v24, %s14693_s11 }
 0x38b   :  { %v665_v26 = vpop.permute.xlu0 %664 }
 0x38c   :  { %v688_v36 = vmul.f32 %v665_v26, %v648_v29 }
 0x38e   :  { %v15173_v56 = vadd.f32 %v696_v47, %v688_v36 }
 0x38f   :  { %v667_v28 = vpop.permute.xlu0 %666 }
 0x390   :  { %v689_v32 = vmul.f32 %v667_v28, %v649_v27 }
 0x391   :  { %v669_v34 = vpop.permute.xlu1 %668 }
 0x392   :  { %v15164_v37 = vadd.f32 %v697_v30, %v689_v32  ;;  %v690_v44 = vmul.f32 %v669_v34, %v650_v33 }
 0x394   :  { %v720_v48 = vrot.slane %v15164_v37, 7  ;;  %v15169_v52 = vadd.f32 %v698_v43, %v690_v44 }
 0x395   :  { %v671_v31 = vpop.permute.xlu1 %670 }
 0x396   :  { %v691_v60 = vmul.f32 %v671_v31, %v651_v54  ;;  %v673_v61 = vpop.permute.xlu0 %672  ;;  %v723_v35 = vrot.slane %v15169_v52, 6  ;;  %v722_v63 = vsel %vm721_vm2, %v720_v48, %v15173_v56 }
 0x397   :  { %v692_v62 = vmul.f32 %v673_v61, %v652_v55 }
 0x398   :  { %v15182_v2 = vadd.f32 %v699_v58, %v691_v60  ;;  %v725_v10 = vsel %vm724_vm3, %v723_v35, %v722_v63 }
 0x399   :  { %v15185_v4 = vadd.f32 %v700_v25, %v692_v62  ;;  %v675_v38 = vpop.permute.xlu1 %674 }
 0x39a   :  { %v726_v6 = vrot.slane %v15182_v2, 5  ;;  %v693_v7 = vmul.f32 %v675_v38, %v653_v3  ;;  %v677_v9 = vpop.permute.xlu0 %676 }
 0x39b   :  { %v729_v11 = vrot.slane %v15185_v4, 4  ;;  %v694_v14 = vmul.f32 %v677_v9, %v654_v5 }
 0x39c   :  { %v15193_v15 = vadd.f32 %v701_v41, %v693_v7  ;;  %v728_v17 = vsel %vm727_vm4, %v726_v6, %v725_v10 }
 0x39d   :  { %v15197_v18 = vadd.f32 %v702_v13, %v694_v14  ;;  %v679_v19 = vpop.permute.xlu1 %678  ;;  %v731_v51 = vsel %vm730_vm5, %v729_v11, %v728_v17 }
 0x39e   :  { %v732_v49 = vrot.slane %v15193_v15, 3  ;;  %v695_v22 = vmul.f32 %v679_v19, %v655_v16 }
 0x39f   :  { %v735_v23 = vrot.slane %v15197_v18, 2 }
 0x3a0   :  { %v15203_v24 = vadd.f32 %v703_v20, %v695_v22  ;;  %v734_v26 = vsel %vm733_vm6, %v732_v49, %v731_v51 }
 0x3a1   :  { %v737_v28 = vsel %vm736_vm7, %v735_v23, %v734_v26 }
 0x3a2   :  { %v738_v27 = vrot.slane %v15203_v24, 1 }
 0x3a4   :  { %v740_v29 = vsel %vm739_vm8, %v738_v27, %v737_v28 }
 0x3a5   :  { %741 = vrot.lane.b32.xlu0 %v740_v29, %s14693_s11 }
 0x417   :  { %v742_v57 = vpop.permute.xlu0 %741 }
 0x418   :  { %12599 = vmatmul.mubr.msk.f32.vlgmr.msra.gmra.mrb[2].mxu1 %vm422_vm9, %v742_v57 }
 0x419   :  { %13210 = vmatpush3.bf16.msra.mxu1 %v15047_v8  ;;  %12620 = vmatprep.mubr.msk.f32.mxu1 %vm14690_vm0, %v18665_v1 }
 0x41a   :  { %13211 = vmatprep.subr.bf16.mxu1 %v18663_v0 }
 0x41d   :  { %13213 = vmatpush3.bf16.msra.mxu1 %v15051_v12 }
 0x41e   :  { %13220 = vmatprep.subr.bf16.mxu1 %v18663_v0 }
 0x4eb   :  { %v811_v30 = vpop.f32.mrb[2].mxu1 }
 0x4ec   :  { %v812_v32 = vadd.f32 %v15077_v21, %v811_v30  ;;  %v12600_v33 = vpop.f32.mrb[3].mxu1 }
 0x4ee   :  { %889 = vrot.lane.b32.xlu1 %v812_v32, %s14692_s16  ;;  %v817_v34 = vrot.slane %v812_v32, 1  ;;  %v816_v36 = vrot.slane %v812_v32, 7  ;;  %v818_v43 = vrot.slane %v812_v32, 2  ;;  %v819_v44 = vrot.slane %v812_v32, 3 }
 0x4ef   :  { %v820_v47 = vrot.slane %v812_v32, 4  ;;  %v821_v54 = vrot.slane %v812_v32, 5  ;;  %v822_v31 = vrot.slane %v812_v32, 6  ;;  %v832_v55 = vadd.f32 %v812_v32, %v15090_v40 }
 0x4f0   :  { %891 = vrot.lane.b32.xlu0 %v817_v34, %s14692_s16  ;;  %v833_v58 = vadd.f32 %v817_v34, %v15093_v42  ;;  %v831_v60 = vadd.f32 %v816_v36, %v15088_v39  ;;  %v834_v25 = vadd.f32 %v818_v43, %v15096_v45  ;;  %v835_v63 = vadd.f32 %v819_v44, %v15098_v46 }
 0x4f1   :  { %v840_v61 = vsub.f32 0.0, %v832_v55  ;;  %v836_v6 = vadd.f32 %v820_v47, %v15101_v50  ;;  %v837_v9 = vadd.f32 %v821_v54, %v15104_v53  ;;  %v838_v13 = vadd.f32 %v822_v31, %v15108_v59 }
 0x4f2   :  { %887 = vrot.lane.b32.xlu1 %v816_v36, %s14692_s16  ;;  %v841_v35 = vsub.f32 0.0, %v833_v58  ;;  %v839_v62 = vsub.f32 0.0, %v831_v60  ;;  %v842_v5 = vsub.f32 0.0, %v834_v25  ;;  %v843_v7 = vsub.f32 0.0, %v835_v63 }
 0x4f3   :  { %v849_v3 = vmul.f32 1.442695, %v840_v61  ;;  %v844_v11 = vsub.f32 0.0, %v836_v6  ;;  %v845_v16 = vsub.f32 0.0, %v837_v9  ;;  %v846_v19 = vsub.f32 0.0, %v838_v13 }
 0x4f4   :  { %893 = vrot.lane.b32.xlu0 %v818_v43, %s14692_s16  ;;  %v851_v38 = vmul.f32 1.442695, %v841_v35  ;;  %v847_v41 = vmul.f32 1.442695, %v839_v62  ;;  %v853_v10 = vmul.f32 1.442695, %v842_v5 }
 0x4f5   :  { %13409 = vpow2.f32 %v849_v3  ;;  %v855_v14 = vmul.f32 1.442695, %v843_v7  ;;  %v857_v17 = vmul.f32 1.442695, %v844_v11  ;;  %v859_v49 = vmul.f32 1.442695, %v845_v16 }
 0x4f6   :  { %895 = vrot.lane.b32.xlu1 %v819_v44, %s14692_s16  ;;  %13411 = vpow2.f32 %v851_v38  ;;  %v861_v22 = vmul.f32 1.442695, %v846_v19 }
 0x4f7   :  { %13413 = vpow2.f32 %v847_v41 }
 0x4f8   :  { %897 = vrot.lane.b32.xlu0 %v820_v47, %s14692_s16  ;;  %13415 = vpow2.f32 %v853_v10 }
 0x4f9   :  { %13417 = vpow2.f32 %v855_v14 }
 0x4fa   :  { %899 = vrot.lane.b32.xlu1 %v821_v54, %s14692_s16  ;;  %13419 = vpow2.f32 %v857_v17 }
 0x4fb   :  { %13421 = vpow2.f32 %v859_v49 }
 0x4fc   :  { %901 = vrot.lane.b32.xlu0 %v822_v31, %s14692_s16  ;;  %13423 = vpow2.f32 %v861_v22 }
 0x4ff   :  { %v13410_v20 = vpop.eup %13409 }
 0x500   :  { %v13412_v23 = vpop.eup %13411  ;;  %v864_v51 = vadd.f32 1.0, %v13410_v20 }
 0x501   :  { %v13414_v26 = vpop.eup %13413  ;;  %v865_v27 = vadd.f32 1.0, %v13412_v23 }
 0x502   :  { %v13416_v28 = vpop.eup %13415  ;;  %v863_v29 = vadd.f32 1.0, %v13414_v26  ;;  %13425 = vrcp.f32 %v864_v51 }
 0x503   :  { %v13418_v57 = vpop.eup %13417  ;;  %13427 = vrcp.f32 %v865_v27  ;;  %v866_v30 = vadd.f32 1.0, %v13416_v28 }
 0x504   :  { %v13420_v32 = vpop.eup %13419  ;;  %13429 = vrcp.f32 %v863_v29  ;;  %v867_v33 = vadd.f32 1.0, %v13418_v57 }
 0x505   :  { %v13422_v34 = vpop.eup %13421  ;;  %13431 = vrcp.f32 %v866_v30  ;;  %v868_v36 = vadd.f32 1.0, %v13420_v32 }
 0x506   :  { %v13424_v43 = vpop.eup %13423  ;;  %13433 = vrcp.f32 %v867_v33  ;;  %v869_v44 = vadd.f32 1.0, %v13422_v34 }
 0x507   :  { %13435 = vrcp.f32 %v868_v36  ;;  %v870_v54 = vadd.f32 1.0, %v13424_v43 }
 0x508   :  { %13437 = vrcp.f32 %v869_v44 }
 0x509   :  { %13439 = vrcp.f32 %v870_v54 }
 0x50c   :  { %v15234_v47 = vpop.eup %13425 }
 0x50d   :  { %v15237_v58 = vpop.eup %13427 }
 0x50e   :  { %v15241_v35 = vpop.eup %13429 }
 0x50f   :  { %v15245_v63 = vpop.eup %13431 }
 0x510   :  { %v15249_v5 = vpop.eup %13433 }
 0x511   :  { %v15253_v7 = vpop.eup %13435 }
 0x512   :  { %v15257_v11 = vpop.eup %13437 }
 0x513   :  { %v15261_v16 = vpop.eup %13439 }
 0x560   :  { %v890_v31 = vpop.permute.xlu1 %889 }
 0x561   :  { %v912_v55 = vmul.f32 %v15234_v47, %v890_v31 }
 0x562   :  { %v892_v60 = vpop.permute.xlu0 %891 }
 0x563   :  { %v913_v61 = vmul.f32 %v15237_v58, %v892_v60  ;;  %929 = vrot.lane.b32.xlu1 %v912_v55, %s14692_s16 }
 0x564   :  { %v888_v25 = vpop.permute.xlu1 %887 }
 0x565   :  { %v911_v62 = vmul.f32 %v15241_v35, %v888_v25  ;;  %931 = vrot.lane.b32.xlu0 %v913_v61, %s14692_s16 }
 0x566   :  { %v894_v3 = vpop.permute.xlu0 %893 }
 0x567   :  { %v914_v38 = vmul.f32 %v15245_v63, %v894_v3  ;;  %927 = vrot.lane.b32.xlu1 %v911_v62, %s14692_s16 }
 0x568   :  { %v896_v6 = vpop.permute.xlu1 %895 }
 0x569   :  { %v915_v41 = vmul.f32 %v15249_v5, %v896_v6  ;;  %933 = vrot.lane.b32.xlu0 %v914_v38, %s14692_s16  ;;  %v969_v38 = vsub.f32 1.0, %v15237_v58  ;;  %v1016_v6 = vrot.slane %v15169_v52, 7 }
 0x56a   :  { %v898_v9 = vpop.permute.xlu0 %897 }
 0x56b   :  { %v916_v10 = vmul.f32 %v15253_v7, %v898_v9  ;;  %935 = vrot.lane.b32.xlu1 %v915_v41, %s14692_s16  ;;  %v968_v9 = vsub.f32 1.0, %v15234_v47 }
 0x56c   :  { %v900_v13 = vpop.permute.xlu1 %899 }
 0x56d   :  { %v917_v14 = vmul.f32 %v15257_v11, %v900_v13  ;;  %937 = vrot.lane.b32.xlu0 %v916_v10, %s14692_s16  ;;  %v967_v13 = vsub.f32 1.0, %v15241_v35 }
 0x56e   :  { %v902_v17 = vpop.permute.xlu0 %901 }
 0x56f   :  { %v918_v19 = vmul.f32 %v15261_v16, %v902_v17  ;;  %939 = vrot.lane.b32.xlu1 %v917_v14, %s14692_s16  ;;  %v1015_v14 = vrot.slane %v15173_v56, 7  ;;  %v1032_v17 = vmul.f32 %v15237_v58, %v1016_v6 }
 0x571   :  { %941 = vrot.lane.b32.xlu0 %v918_v19, %s14692_s16 }
 0x5d5   :  { %v930_v49 = vpop.permute.xlu1 %929 }
 0x5d6   :  { %v952_v20 = vadd.f32 %v930_v49, %v15090_v40  ;;  %v1017_v49 = vrot.slane %v15182_v2, 7 }
 0x5d7   :  { %v932_v22 = vpop.permute.xlu0 %931 }
 0x5d8   :  { %13441 = vtanh.f32 %v952_v20  ;;  %v953_v23 = vadd.f32 %v932_v22, %v15093_v42  ;;  %v1030_v22 = vmul.f32 %v15241_v35, %v1015_v14  ;;  %v1033_v58 = vmul.f32 %v15245_v63, %v1017_v49 }
 0x5d9   :  { %v928_v51 = vpop.permute.xlu1 %927 }
 0x5da   :  { %13443 = vtanh.f32 %v953_v23  ;;  %v951_v26 = vadd.f32 %v928_v51, %v15088_v39  ;;  %v970_v51 = vsub.f32 1.0, %v15245_v63 }
 0x5db   :  { %v934_v27 = vpop.permute.xlu0 %933 }
 0x5dc   :  { %13445 = vtanh.f32 %v951_v26  ;;  %v954_v28 = vadd.f32 %v934_v27, %v15096_v45  ;;  %v1031_v26 = vmul.f32 %v15234_v47, %v720_v48 }
 0x5dd   :  { %v936_v29 = vpop.permute.xlu1 %935 }
 0x5de   :  { %13447 = vtanh.f32 %v954_v28  ;;  %v955_v57 = vadd.f32 %v936_v29, %v15098_v46  ;;  %v1018_v29 = vrot.slane %v15185_v4, 7 }
 0x5df   :  { %v938_v30 = vpop.permute.xlu0 %937 }
 0x5e0   :  { %13449 = vtanh.f32 %v955_v57  ;;  %v956_v32 = vadd.f32 %v938_v30, %v15101_v50  ;;  %v1034_v35 = vmul.f32 %v15249_v5, %v1018_v29 }
 0x5e1   :  { %v940_v33 = vpop.permute.xlu1 %939 }
 0x5e2   :  { %v13442_v34 = vpop.eup %13441  ;;  %13451 = vtanh.f32 %v956_v32  ;;  %v957_v36 = vadd.f32 %v940_v33, %v15104_v53  ;;  %v971_v32 = vsub.f32 1.0, %v15249_v5 }
 0x5e3   :  { %v942_v43 = vpop.permute.xlu0 %941  ;;  %985 = vrot.lane.b32.xlu1 %v13442_v34, %s14693_s11  ;;  %v1019_v34 = vrot.slane %v15193_v15, 7 }
 0x5e4   :  { %v13444_v44 = vpop.eup %13443  ;;  %13453 = vtanh.f32 %v957_v36  ;;  %v958_v54 = vadd.f32 %v942_v43, %v15108_v59 }
 0x5e5   :  { %987 = vrot.lane.b32.xlu0 %v13444_v44, %s14693_s11 }
 0x5e6   :  { %v13446_v31 = vpop.eup %13445  ;;  %13455 = vtanh.f32 %v958_v54  ;;  %v972_v54 = vsub.f32 1.0, %v15253_v7 }
 0x5e7   :  { %983 = vrot.lane.b32.xlu1 %v13446_v31, %s14693_s11  ;;  %v1020_v31 = vrot.slane %v15197_v18, 7 }
 0x5e8   :  { %v13448_v55 = vpop.eup %13447 }
 0x5e9   :  { %989 = vrot.lane.b32.xlu0 %v13448_v55, %s14693_s11  ;;  %v1021_v55 = vrot.slane %v15203_v24, 7 }
 0x5ea   :  { %v13450_v60 = vpop.eup %13449 }
 0x5eb   :  { %991 = vrot.lane.b32.xlu1 %v13450_v60, %s14693_s11 }
 0x5ec   :  { %v13452_v61 = vpop.eup %13451 }
 0x5ed   :  { %993 = vrot.lane.b32.xlu0 %v13452_v61, %s14693_s11 }
 0x5ee   :  { %v13454_v25 = vpop.eup %13453 }
 0x5ef   :  { %995 = vrot.lane.b32.xlu1 %v13454_v25, %s14693_s11  ;;  %v973_v25 = vsub.f32 1.0, %v15257_v11 }
 0x5f0   :  { %v13456_v62 = vpop.eup %13455 }
 0x5f1   :  { %997 = vrot.lane.b32.xlu0 %v13456_v62, %s14693_s11  ;;  %v1035_v62 = vmul.f32 %v15253_v7, %v1019_v34  ;;  %v1037_v7 = vmul.f32 %v15261_v16, %v1021_v55 }
 0x655   :  { %v986_v3 = vpop.permute.xlu1 %985 }
 0x656   :  { %v1008_v20 = vmul.f32 %v986_v3, %v968_v9 }
 0x657   :  { %v988_v41 = vpop.permute.xlu0 %987 }
 0x658   :  { %v1009_v10 = vmul.f32 %v988_v41, %v969_v38  ;;  %v15303_v36 = vadd.f32 %v1031_v26, %v1008_v20  ;;  %v1036_v38 = vmul.f32 %v15257_v11, %v1020_v31 }
 0x659   :  { %v984_v19 = vpop.permute.xlu1 %983 }
 0x65a   :  { %v1007_v23 = vmul.f32 %v984_v19, %v967_v13  ;;  %v15294_v27 = vadd.f32 %v1032_v17, %v1009_v10  ;;  %v974_v13 = vsub.f32 1.0, %v15261_v16 }
 0x65b   :  { %v990_v28 = vpop.permute.xlu0 %989 }
 0x65c   :  { %v15297_v57 = vadd.f32 %v1030_v22, %v1007_v23  ;;  %v1010_v30 = vmul.f32 %v990_v28, %v970_v51  ;;  %v1056_v44 = vrot.slane %v15294_v27, 7 }
 0x65d   :  { %v992_v33 = vpop.permute.xlu1 %991 }
 0x65e   :  { %v1054_v48 = vrot.slane %v15297_v57, 1  ;;  %v15306_v47 = vadd.f32 %v1033_v58, %v1010_v30  ;;  %v1011_v43 = vmul.f32 %v992_v33, %v971_v32 }
 0x65f   :  { %v994_v63 = vpop.permute.xlu0 %993 }
 0x660   :  { %v1055_v5 = vsel %vm721_vm2, %v15303_v36, %v1054_v48  ;;  %v1058_v60 = vrot.slane %v15306_v47, 6  ;;  %v15315_v61 = vadd.f32 %v1034_v35, %v1011_v43  ;;  %v1012_v3 = vmul.f32 %v994_v63, %v972_v54 }
 0x661   :  { %v996_v6 = vpop.permute.xlu1 %995  ;;  %v1057_v41 = vsel %vm724_vm3, %v1056_v44, %v1055_v5 }
 0x662   :  { %v1060_v9 = vrot.slane %v15315_v61, 5  ;;  %v1013_v10 = vmul.f32 %v996_v6, %v973_v25  ;;  %v1059_v14 = vsel %vm727_vm4, %v1058_v60, %v1057_v41  ;;  %v15326_v17 = vadd.f32 %v1035_v62, %v1012_v3 }
 0x663   :  { %v998_v19 = vpop.permute.xlu0 %997 }
 0x664   :  { %v15328_v49 = vadd.f32 %v1036_v38, %v1013_v10  ;;  %v1014_v11 = vmul.f32 %v998_v19, %v974_v13  ;;  %v1061_v20 = vsel %vm730_vm5, %v1060_v9, %v1059_v14  ;;  %v1062_v22 = vrot.slane %v15326_v17, 4 }
 0x666   :  { %v1064_v23 = vrot.slane %v15328_v49, 3  ;;  %v15334_v51 = vadd.f32 %v1037_v7, %v1014_v11  ;;  %v1063_v26 = vsel %vm733_vm6, %v1062_v22, %v1061_v20 }
 0x668   :  { %v1065_v28 = vsel %vm736_vm7, %v1064_v23, %v1063_v26  ;;  %v1066_v29 = vrot.slane %v15334_v51, 2 }
 0x66a   :  { %v1067_v58 = vsel %vm739_vm8, %v1066_v29, %v1065_v28 }
 0x66b   :  { %1068 = vrot.lane.b32.xlu1 %v1067_v58, %s14693_s11 }
 0x6dd   :  { %v1069_v16 = vpop.permute.xlu1 %1068 }
 0x6de   :  { %12610 = vmatmul.mubr.msk.f32.vlgmr.msra.gmra.mrb[8].mxu0 %vm422_vm9, %v1069_v16 }
 0x6df   :  { %13216 = vmatpush3.bf16.msra.mxu0 %v15047_v8  ;;  %12631 = vmatprep.mubr.msk.f32.mxu0 %vm14690_vm0, %v18665_v1 }
 0x6e0   :  { %13217 = vmatprep.subr.bf16.mxu0 %v18663_v0 }
 0x6e3   :  { %13219 = vmatpush3.bf16.msra.mxu0 %v15051_v12 }
 0x6e4   :  { %13226 = vmatprep.subr.bf16.mxu0 %v18663_v0 }
 0x7b1   :  { %v1138_v30 = vpop.f32.mrb[8].mxu0 }
 0x7b2   :  { %v1139_v32 = vadd.f32 %v15077_v21, %v1138_v30  ;;  %v12611_v35 = vpop.f32.mrb[9].mxu0 }
 0x7b4   :  { %1218 = vrot.lane.b32.xlu1 %v1139_v32, %s14692_s16  ;;  %v1143_v33 = vrot.slane %v1139_v32, 6  ;;  %v1144_v34 = vrot.slane %v1139_v32, 7  ;;  %v1145_v48 = vrot.slane %v1139_v32, 1  ;;  %v1147_v43 = vrot.slane %v1139_v32, 3 }
 0x7b5   :  { %v1146_v54 = vrot.slane %v1139_v32, 2  ;;  %v1149_v63 = vrot.slane %v1139_v32, 5  ;;  %v1148_v21 = vrot.slane %v1139_v32, 4  ;;  %v1160_v31 = vadd.f32 %v1139_v32, %v15093_v42 }
 0x7b6   :  { %1214 = vrot.lane.b32.xlu0 %v1143_v33, %s14692_s16  ;;  %v1158_v55 = vadd.f32 %v1143_v33, %v15088_v39  ;;  %v1159_v5 = vadd.f32 %v1144_v34, %v15090_v40  ;;  %v1161_v62 = vadd.f32 %v1145_v48, %v15096_v45  ;;  %v1163_v38 = vadd.f32 %v1147_v43, %v15101_v50 }
 0x7b7   :  { %v1168_v60 = vsub.f32 0.0, %v1160_v31  ;;  %v1162_v10 = vadd.f32 %v1146_v54, %v15098_v46  ;;  %v1165_v19 = vadd.f32 %v1149_v63, %v15108_v59  ;;  %v1164_v20 = vadd.f32 %v1148_v21, %v15104_v53 }
 0x7b8   :  { %1216 = vrot.lane.b32.xlu1 %v1144_v34, %s14692_s16  ;;  %v1166_v25 = vsub.f32 0.0, %v1158_v55  ;;  %v1167_v3 = vsub.f32 0.0, %v1159_v5  ;;  %v1169_v9 = vsub.f32 0.0, %v1161_v62  ;;  %v1171_v14 = vsub.f32 0.0, %v1163_v38 }
 0x7b9   :  { %v1178_v6 = vmul.f32 1.442695, %v1168_v60  ;;  %v1170_v11 = vsub.f32 0.0, %v1162_v10  ;;  %v1173_v23 = vsub.f32 0.0, %v1165_v19  ;;  %v1172_v28 = vsub.f32 0.0, %v1164_v20 }
 0x7ba   :  { %1220 = vrot.lane.b32.xlu0 %v1145_v48, %s14692_s16  ;;  %v1174_v41 = vmul.f32 1.442695, %v1166_v25  ;;  %v1176_v13 = vmul.f32 1.442695, %v1167_v3  ;;  %v1180_v7 = vmul.f32 1.442695, %v1169_v9 }
 0x7bb   :  { %13457 = vpow2.f32 %v1178_v6  ;;  %v1184_v22 = vmul.f32 1.442695, %v1171_v14  ;;  %v1182_v26 = vmul.f32 1.442695, %v1170_v11  ;;  %v1188_v29 = vmul.f32 1.442695, %v1173_v23 }
 0x7bc   :  { %1224 = vrot.lane.b32.xlu1 %v1147_v43, %s14692_s16  ;;  %13459 = vpow2.f32 %v1174_v41  ;;  %v1186_v16 = vmul.f32 1.442695, %v1172_v28 }
 0x7bd   :  { %13461 = vpow2.f32 %v1176_v13 }
 0x7be   :  { %1222 = vrot.lane.b32.xlu0 %v1146_v54, %s14692_s16  ;;  %13463 = vpow2.f32 %v1180_v7 }
 0x7bf   :  { %13465 = vpow2.f32 %v1184_v22 }
 0x7c0   :  { %1228 = vrot.lane.b32.xlu1 %v1149_v63, %s14692_s16  ;;  %13467 = vpow2.f32 %v1182_v26 }
 0x7c1   :  { %13469 = vpow2.f32 %v1188_v29 }
 0x7c2   :  { %1226 = vrot.lane.b32.xlu0 %v1148_v21, %s14692_s16  ;;  %13471 = vpow2.f32 %v1186_v16 }
 0x7c5   :  { %v13458_v58 = vpop.eup %13457 }
 0x7c6   :  { %v13460_v30 = vpop.eup %13459  ;;  %v1192_v32 = vadd.f32 1.0, %v13458_v58 }
 0x7c7   :  { %v13462_v35 = vpop.eup %13461  ;;  %v1190_v33 = vadd.f32 1.0, %v13460_v30 }
 0x7c8   :  { %v13464_v34 = vpop.eup %13463  ;;  %v1191_v48 = vadd.f32 1.0, %v13462_v35  ;;  %13473 = vrcp.f32 %v1192_v32 }
 0x7c9   :  { %v13466_v43 = vpop.eup %13465  ;;  %13475 = vrcp.f32 %v1190_v33  ;;  %v1193_v54 = vadd.f32 1.0, %v13464_v34 }
 0x7ca   :  { %v13468_v63 = vpop.eup %13467  ;;  %13477 = vrcp.f32 %v1191_v48  ;;  %v1195_v21 = vadd.f32 1.0, %v13466_v43 }
 0x7cb   :  { %v13470_v31 = vpop.eup %13469  ;;  %13479 = vrcp.f32 %v1193_v54  ;;  %v1194_v55 = vadd.f32 1.0, %v13468_v63 }
 0x7cc   :  { %v13472_v5 = vpop.eup %13471  ;;  %13481 = vrcp.f32 %v1195_v21  ;;  %v1197_v60 = vadd.f32 1.0, %v13470_v31 }
 0x7cd   :  { %13483 = vrcp.f32 %v1194_v55  ;;  %v1196_v62 = vadd.f32 1.0, %v13472_v5 }
 0x7ce   :  { %13485 = vrcp.f32 %v1197_v60 }
 0x7cf   :  { %13487 = vrcp.f32 %v1196_v62 }
 0x7d2   :  { %v15365_v25 = vpop.eup %13473 }
 0x7d3   :  { %v15368_v6 = vpop.eup %13475 }
 0x7d4   :  { %v15372_v10 = vpop.eup %13477 }
 0x7d5   :  { %v15376_v19 = vpop.eup %13479 }
 0x7d6   :  { %v15380_v20 = vpop.eup %13481 }
 0x7d7   :  { %v15384_v26 = vpop.eup %13483 }
 0x7d8   :  { %v15388_v58 = vpop.eup %13485 }
 0x7d9   :  { %v15392_v32 = vpop.eup %13487 }
 0x826   :  { %v1219_v3 = vpop.permute.xlu1 %1218 }
 0x827   :  { %v1240_v38 = vmul.f32 %v15365_v25, %v1219_v3 }
 0x828   :  { %v1215_v41 = vpop.permute.xlu0 %1214 }
 0x829   :  { %v1238_v9 = vmul.f32 %v15368_v6, %v1215_v41  ;;  %1258 = vrot.lane.b32.xlu1 %v1240_v38, %s14692_s16 }
 0x82a   :  { %v1217_v13 = vpop.permute.xlu1 %1216 }
 0x82b   :  { %v1239_v14 = vmul.f32 %v15372_v10, %v1217_v13  ;;  %1254 = vrot.lane.b32.xlu0 %v1238_v9, %s14692_s16 }
 0x82c   :  { %v1221_v7 = vpop.permute.xlu0 %1220 }
 0x82d   :  { %v1241_v11 = vmul.f32 %v15376_v19, %v1221_v7  ;;  %1256 = vrot.lane.b32.xlu1 %v1239_v14, %s14692_s16 }
 0x82e   :  { %v1225_v22 = vpop.permute.xlu1 %1224 }
 0x82f   :  { %v1243_v23 = vmul.f32 %v15380_v20, %v1225_v22  ;;  %1260 = vrot.lane.b32.xlu0 %v1241_v11, %s14692_s16 }
 0x830   :  { %v1223_v28 = vpop.permute.xlu0 %1222 }
 0x831   :  { %v1242_v29 = vmul.f32 %v15384_v26, %v1223_v28  ;;  %1264 = vrot.lane.b32.xlu1 %v1243_v23, %s14692_s16 }
 0x832   :  { %v1229_v16 = vpop.permute.xlu1 %1228 }
 0x833   :  { %v1245_v30 = vmul.f32 %v15388_v58, %v1229_v16  ;;  %1262 = vrot.lane.b32.xlu0 %v1242_v29, %s14692_s16 }
 0x834   :  { %v1227_v35 = vpop.permute.xlu0 %1226 }
 0x835   :  { %v1244_v33 = vmul.f32 %v15392_v32, %v1227_v35  ;;  %1268 = vrot.lane.b32.xlu1 %v1245_v30, %s14692_s16  ;;  %v1296_v30 = vsub.f32 1.0, %v15365_v25 }
 0x837   :  { %1266 = vrot.lane.b32.xlu0 %v1244_v33, %s14692_s16  ;;  %v1359_v33 = vmul.f32 %v15365_v25, %v1056_v44  ;;  %v3011_v44 = vsel %vm3008_vm10, %v15169_v52, %v15294_v27 }
 0x89b   :  { %v1259_v34 = vpop.permute.xlu1 %1258 }
 0x89c   :  { %v1280_v48 = vadd.f32 %v1259_v34, %v15093_v42 }
 0x89d   :  { %v1255_v43 = vpop.permute.xlu0 %1254 }
 0x89e   :  { %13489 = vtanh.f32 %v1280_v48  ;;  %v1278_v54 = vadd.f32 %v1255_v43, %v15088_v39  ;;  %v1294_v48 = vsub.f32 1.0, %v15368_v6  ;;  %v1342_v43 = vrot.slane %v15297_v57, 7 }
 0x89f   :  { %v1257_v63 = vpop.permute.xlu1 %1256 }
 0x8a0   :  { %13491 = vtanh.f32 %v1278_v54  ;;  %v1279_v21 = vadd.f32 %v1257_v63, %v15090_v40  ;;  %v1343_v63 = vrot.slane %v15303_v36, 7 }
 0x8a1   :  { %v1261_v31 = vpop.permute.xlu0 %1260 }
 0x8a2   :  { %13493 = vtanh.f32 %v1279_v21  ;;  %v1281_v55 = vadd.f32 %v1261_v31, %v15096_v45  ;;  %v1357_v31 = vmul.f32 %v15368_v6, %v1342_v43  ;;  %v1358_v25 = vmul.f32 %v15372_v10, %v1343_v63 }
 0x8a3   :  { %v1265_v5 = vpop.permute.xlu1 %1264  ;;  %v1297_v6 = vsub.f32 1.0, %v15376_v19  ;;  %v1347_v63 = vrot.slane %v15328_v49, 7 }
 0x8a4   :  { %13495 = vtanh.f32 %v1281_v55  ;;  %v1283_v60 = vadd.f32 %v1265_v5, %v15101_v50  ;;  %v1295_v5 = vsub.f32 1.0, %v15372_v10  ;;  %v1346_v10 = vrot.slane %v15326_v17, 7 }
 0x8a5   :  { %v1263_v62 = vpop.permute.xlu0 %1262 }
 0x8a6   :  { %13497 = vtanh.f32 %v1283_v60  ;;  %v1282_v3 = vadd.f32 %v1263_v62, %v15098_v46  ;;  %v1344_v62 = vrot.slane %v15306_v47, 7 }
 0x8a7   :  { %v1269_v38 = vpop.permute.xlu1 %1268 }
 0x8a8   :  { %v13490_v41 = vpop.eup %13489  ;;  %13499 = vtanh.f32 %v1282_v3  ;;  %v1285_v9 = vadd.f32 %v1269_v38, %v15108_v59  ;;  %v1360_v52 = vmul.f32 %v15376_v19, %v1344_v62  ;;  %v1362_v19 = vmul.f32 %v15380_v20, %v1346_v10 }
 0x8a9   :  { %1314 = vrot.lane.b32.xlu1 %v13490_v41, %s14693_s11  ;;  %v1267_v13 = vpop.permute.xlu0 %1266 }
 0x8aa   :  { %v13492_v14 = vpop.eup %13491  ;;  %13501 = vtanh.f32 %v1285_v9  ;;  %v1284_v7 = vadd.f32 %v1267_v13, %v15104_v53  ;;  %v3009_v9 = vsel %vm3008_vm10, %v15173_v56, %v15297_v57  ;;  %v3012_v56 = vsel %vm3008_vm10, %v15182_v2, %v15306_v47 }
 0x8ab   :  { %1310 = vrot.lane.b32.xlu0 %v13492_v14, %s14693_s11  ;;  %v1298_v2 = vsub.f32 1.0, %v15384_v26 }
 0x8ac   :  { %v13494_v11 = vpop.eup %13493  ;;  %13503 = vtanh.f32 %v1284_v7 }
 0x8ad   :  { %1312 = vrot.lane.b32.xlu1 %v13494_v11, %s14693_s11  ;;  %v1299_v11 = vsub.f32 1.0, %v15380_v20  ;;  %v1348_v20 = vrot.slane %v15334_v51, 7 }
 0x8ae   :  { %v13496_v22 = vpop.eup %13495 }
 0x8af   :  { %1316 = vrot.lane.b32.xlu0 %v13496_v22, %s14693_s11  ;;  %v3010_v22 = vsel %vm3008_vm10, %v15164_v37, %v15303_v36  ;;  %v3014_v37 = vsel %vm3008_vm10, %v15193_v15, %v15326_v17  ;;  %v1345_v36 = vrot.slane %v15315_v61, 7  ;;  %v1364_v17 = vmul.f32 %v15388_v58, %v1348_v20 }
 0x8b0   :  { %v13498_v23 = vpop.eup %13497 }
 0x8b1   :  { %1320 = vrot.lane.b32.xlu1 %v13498_v23, %s14693_s11  ;;  %v1361_v43 = vmul.f32 %v15384_v26, %v1345_v36 }
 0x8b2   :  { %v13500_v28 = vpop.eup %13499 }
 0x8b3   :  { %1318 = vrot.lane.b32.xlu0 %v13500_v28, %s14693_s11 }
 0x8b4   :  { %v13502_v29 = vpop.eup %13501 }
 0x8b5   :  { %1324 = vrot.lane.b32.xlu1 %v13502_v29, %s14693_s11 }
 0x8b6   :  { %v13504_v16 = vpop.eup %13503 }
 0x8b7   :  { %1322 = vrot.lane.b32.xlu0 %v13504_v16, %s14693_s11 }
 0x91b   :  { %v1315_v35 = vpop.permute.xlu1 %1314 }
 0x91c   :  { %v1336_v34 = vmul.f32 %v1315_v35, %v1296_v30 }
 0x91d   :  { %v1311_v54 = vpop.permute.xlu0 %1310 }
 0x91e   :  { %v15420_v21 = vadd.f32 %v1359_v33, %v1336_v34  ;;  %v1334_v55 = vmul.f32 %v1311_v54, %v1294_v48  ;;  %v1301_v48 = vsub.f32 1.0, %v15388_v58  ;;  %v3013_v58 = vsel %vm3008_vm10, %v15185_v4, %v15315_v61 }
 0x91f   :  { %v1313_v60 = vpop.permute.xlu1 %1312 }
 0x920   :  { %v15431_v3 = vsel %vm3017_vm11, %v3011_v44, %v15420_v21  ;;  %v15433_v38 = vadd.f32 %v1357_v31, %v1334_v55  ;;  %v1335_v41 = vmul.f32 %v1313_v60, %v1295_v5  ;;  %v1300_v44 = vsub.f32 1.0, %v15392_v32 }
 0x921   :  { %v1317_v27 = vpop.permute.xlu0 %1316 }
 0x922   :  { %v15443_v13 = vsel %vm3017_vm11, %v3009_v9, %v15433_v38  ;;  %v15445_v14 = vadd.f32 %v1358_v25, %v1335_v41  ;;  %v1337_v7 = vmul.f32 %v1317_v27, %v1297_v6  ;;  %v1381_v57 = vrot.slane %v15433_v38, 2 }
 0x923   :  { %v1321_v23 = vpop.permute.xlu1 %1320  ;;  %v1363_v41 = vmul.f32 %v15392_v32, %v1347_v63  ;;  %v3016_v9 = vsel %vm3008_vm10, %v15203_v24, %v15334_v51  ;;  %v3015_v24 = vsel %vm3008_vm10, %v15197_v18, %v15328_v49  ;;  %v15535_v49 = vld [vmem:[#allocation10] ss:$0 sm:$0xff] }
 0x924   :  { %v1382_v28 = vrot.slane %v15445_v14, 1  ;;  %v15459_v29 = vsel %vm3017_vm11, %v3010_v22, %v15445_v14  ;;  %v15461_v16 = vadd.f32 %v1360_v52, %v1337_v7  ;;  %v1339_v30 = vmul.f32 %v1321_v23, %v1299_v11 }
 0x925   :  { %v1319_v47 = vpop.permute.xlu0 %1318 }
 0x926   :  { %v1383_v35 = vsel %vm721_vm2, %v1382_v28, %v1381_v57  ;;  %v15472_v33 = vsel %vm3017_vm11, %v3012_v56, %v15461_v16  ;;  %v15474_v34 = vadd.f32 %v1362_v19, %v1339_v30  ;;  %v1338_v15 = vmul.f32 %v1319_v47, %v1298_v2 }
 0x927   :  { %v1325_v54 = vpop.permute.xlu1 %1324  ;;  %v1385_v31 = vrot.slane %v15461_v16, 7  ;;  %v1384_v25 = vsel %vm724_vm3, %v15420_v21, %v1383_v35 }
 0x928   :  { %v15483_v55 = vsel %vm3017_vm11, %v3014_v37, %v15474_v34  ;;  %v1341_v5 = vmul.f32 %v1325_v54, %v1301_v48  ;;  %v15488_v60 = vadd.f32 %v1361_v43, %v1338_v15  ;;  %v1389_v4 = vrot.slane %v15474_v34, 5 }
 0x929   :  { %v1323_v26 = vpop.permute.xlu0 %1322  ;;  %v1386_v10 = vsel %vm727_vm4, %v1385_v31, %v1384_v25 }
 0x92a   :  { %v15493_v62 = vadd.f32 %v1364_v17, %v1341_v5  ;;  %v1340_v6 = vmul.f32 %v1323_v26, %v1300_v44  ;;  %v1387_v52 = vrot.slane %v15488_v60, 6  ;;  %v15502_v27 = vsel %vm3017_vm11, %v3013_v58, %v15488_v60 }
 0x92c   :  { %v15510_v61 = vsel %vm3017_vm11, %v3016_v9, %v15493_v62  ;;  %v15512_v32 = vadd.f32 %v1363_v41, %v1340_v6  ;;  %v1388_v51 = vsel %vm730_vm5, %v1387_v52, %v1386_v10  ;;  %v1393_v56 = vrot.slane %v15493_v62, 3 }
 0x92d   :  { %v1390_v22 = vsel %vm733_vm6, %v1389_v4, %v1388_v51 }
 0x92e   :  { %v1391_v7 = vrot.slane %v15512_v32, 4  ;;  %v15521_v11 = vsel %vm3017_vm11, %v3015_v24, %v15512_v32 }
 0x930   :  { %v1392_v57 = vsel %vm736_vm7, %v1391_v7, %v1390_v22 }
 0x931   :  { %v1394_v19 = vsel %vm739_vm8, %v1393_v56, %v1392_v57 }
 0x932   :  { %1395 = vrot.lane.b32.xlu0 %v1394_v19, %s14693_s11 }
 0x9a4   :  { %v1396_v23 = vpop.permute.xlu0 %1395 }
 0x9a5   :  { %12621 = vmatmul.mubr.msk.f32.vlgmr.msra.gmra.mrb[4].mxu1 %vm422_vm9, %v1396_v23 }
 0x9a6   :  { %13222 = vmatpush3.bf16.msra.mxu1 %v15047_v8  ;;  %12642 = vmatprep.mubr.msk.f32.mxu1 %vm14690_vm0, %v18665_v1 }
 0x9a7   :  { %13223 = vmatprep.subr.bf16.mxu1 %v18663_v0 }
 0x9aa   :  { %13225 = vmatpush3.bf16.msra.mxu1 %v15051_v12 }
 0x9ab   :  { %13232 = vmatprep.subr.bf16.mxu1 %v18663_v0 }
 0xa78   :  { %v1465_v18 = vpop.f32.mrb[4].mxu1 }
 0xa79   :  { %v1466_v28 = vadd.f32 %v15535_v49, %v1465_v18  ;;  %v12622_v30 = vpop.f32.mrb[5].mxu1 }
 0xa7b   :  { %1547 = vrot.lane.b32.xlu1 %v1466_v28, %s14692_s16  ;;  %v1471_v37 = vrot.slane %v1466_v28, 6  ;;  %v1470_v2 = vrot.slane %v1466_v28, 5  ;;  %v1473_v36 = vrot.slane %v1466_v28, 1  ;;  %v1472_v47 = vrot.slane %v1466_v28, 7 }
 0xa7c   :  { %v1474_v20 = vrot.slane %v1466_v28, 2  ;;  %v1475_v35 = vrot.slane %v1466_v28, 3  ;;  %v1476_v48 = vrot.slane %v1466_v28, 4  ;;  %v1488_v43 = vadd.f32 %v1466_v28, %v15096_v45 }
 0xa7d   :  { %1543 = vrot.lane.b32.xlu0 %v1471_v37, %s14692_s16  ;;  %v1486_v15 = vadd.f32 %v1471_v37, %v15090_v40  ;;  %v1485_v17 = vadd.f32 %v1470_v2, %v15088_v39  ;;  %v1489_v5 = vadd.f32 %v1473_v36, %v15098_v46  ;;  %v1487_v25 = vadd.f32 %v1472_v47, %v15093_v42 }
 0xa7e   :  { %v1496_v54 = vsub.f32 0.0, %v1488_v43  ;;  %v1490_v6 = vadd.f32 %v1474_v20, %v15101_v50  ;;  %v1491_v10 = vadd.f32 %v1475_v35, %v15104_v53  ;;  %v1492_v51 = vadd.f32 %v1476_v48, %v15108_v59 }
 0xa7f   :  { %1541 = vrot.lane.b32.xlu1 %v1470_v2, %s14692_s16  ;;  %v1494_v63 = vsub.f32 0.0, %v1486_v15  ;;  %v1493_v44 = vsub.f32 0.0, %v1485_v17  ;;  %v1497_v41 = vsub.f32 0.0, %v1489_v5  ;;  %v1495_v52 = vsub.f32 0.0, %v1487_v25 }
 0xa80   :  { %v1507_v26 = vmul.f32 1.442695, %v1496_v54  ;;  %v1498_v24 = vsub.f32 0.0, %v1490_v6  ;;  %v1499_v22 = vsub.f32 0.0, %v1491_v10  ;;  %v1500_v57 = vsub.f32 0.0, %v1492_v51 }
 0xa81   :  { %1549 = vrot.lane.b32.xlu0 %v1473_v36, %s14692_s16  ;;  %v1503_v58 = vmul.f32 1.442695, %v1494_v63  ;;  %v1501_v9 = vmul.f32 1.442695, %v1493_v44  ;;  %v1509_v4 = vmul.f32 1.442695, %v1497_v41 }
 0xa82   :  { %13505 = vpow2.f32 %v1507_v26  ;;  %v1505_v7 = vmul.f32 1.442695, %v1495_v52  ;;  %v1511_v56 = vmul.f32 1.442695, %v1498_v24  ;;  %v1513_v19 = vmul.f32 1.442695, %v1499_v22 }
 0xa83   :  { %1545 = vrot.lane.b32.xlu1 %v1472_v47, %s14692_s16  ;;  %13507 = vpow2.f32 %v1503_v58  ;;  %v1515_v18 = vmul.f32 1.442695, %v1500_v57 }
 0xa84   :  { %13509 = vpow2.f32 %v1501_v9 }
 0xa85   :  { %1551 = vrot.lane.b32.xlu0 %v1474_v20, %s14692_s16  ;;  %13511 = vpow2.f32 %v1509_v4 }
 0xa86   :  { %13513 = vpow2.f32 %v1505_v7 }
 0xa87   :  { %1553 = vrot.lane.b32.xlu1 %v1475_v35, %s14692_s16  ;;  %13515 = vpow2.f32 %v1511_v56 }
 0xa88   :  { %13517 = vpow2.f32 %v1513_v19 }
 0xa89   :  { %1555 = vrot.lane.b32.xlu0 %v1476_v48, %s14692_s16  ;;  %13519 = vpow2.f32 %v1515_v18 }
 0xa8c   :  { %v13506_v23 = vpop.eup %13505 }
 0xa8d   :  { %v13508_v28 = vpop.eup %13507  ;;  %v1520_v30 = vadd.f32 1.0, %v13506_v23 }
 0xa8e   :  { %v13510_v37 = vpop.eup %13509  ;;  %v1518_v2 = vadd.f32 1.0, %v13508_v28 }
 0xa8f   :  { %v13512_v36 = vpop.eup %13511  ;;  %v1517_v47 = vadd.f32 1.0, %v13510_v37  ;;  %13521 = vrcp.f32 %v1520_v30 }
 0xa90   :  { %v13514_v20 = vpop.eup %13513  ;;  %13523 = vrcp.f32 %v1518_v2  ;;  %v1521_v35 = vadd.f32 1.0, %v13512_v36 }
 0xa91   :  { %v13516_v48 = vpop.eup %13515  ;;  %13525 = vrcp.f32 %v1517_v47  ;;  %v1519_v43 = vadd.f32 1.0, %v13514_v20 }
 0xa92   :  { %v13518_v15 = vpop.eup %13517  ;;  %13527 = vrcp.f32 %v1521_v35  ;;  %v1522_v17 = vadd.f32 1.0, %v13516_v48 }
 0xa93   :  { %v13520_v54 = vpop.eup %13519  ;;  %13529 = vrcp.f32 %v1519_v43  ;;  %v1523_v63 = vadd.f32 1.0, %v13518_v15 }
 0xa94   :  { %13531 = vrcp.f32 %v1522_v17  ;;  %v1524_v44 = vadd.f32 1.0, %v13520_v54 }
 0xa95   :  { %13533 = vrcp.f32 %v1523_v63 }
 0xa96   :  { %13535 = vrcp.f32 %v1524_v44 }
 0xa99   :  { %v15554_v5 = vpop.eup %13521 }
 0xa9a   :  { %v15557_v58 = vpop.eup %13523 }
 0xa9b   :  { %v15561_v9 = vpop.eup %13525 }
 0xa9c   :  { %v15565_v4 = vpop.eup %13527 }
 0xa9d   :  { %v15569_v7 = vpop.eup %13529 }
 0xa9e   :  { %v15573_v57 = vpop.eup %13531 }
 0xa9f   :  { %v15577_v18 = vpop.eup %13533 }
 0xaa0   :  { %v15581_v37 = vpop.eup %13535 }
 0xaed   :  { %v1548_v25 = vpop.permute.xlu1 %1547 }
 0xaee   :  { %v1568_v26 = vmul.f32 %v15554_v5, %v1548_v25 }
 0xaef   :  { %v1544_v41 = vpop.permute.xlu0 %1543 }
 0xaf0   :  { %v1566_v6 = vmul.f32 %v15557_v58, %v1544_v41  ;;  %1587 = vrot.lane.b32.xlu1 %v1568_v26, %s14692_s16 }
 0xaf1   :  { %v1542_v52 = vpop.permute.xlu1 %1541 }
 0xaf2   :  { %v1565_v10 = vmul.f32 %v15561_v9, %v1542_v52  ;;  %1583 = vrot.lane.b32.xlu0 %v1566_v6, %s14692_s16 }
 0xaf3   :  { %v1550_v24 = vpop.permute.xlu0 %1549 }
 0xaf4   :  { %v1569_v51 = vmul.f32 %v15565_v4, %v1550_v24  ;;  %1581 = vrot.lane.b32.xlu1 %v1565_v10, %s14692_s16 }
 0xaf5   :  { %v1546_v22 = vpop.permute.xlu1 %1545 }
 0xaf6   :  { %v1567_v56 = vmul.f32 %v15569_v7, %v1546_v22  ;;  %1589 = vrot.lane.b32.xlu0 %v1569_v51, %s14692_s16 }
 0xaf7   :  { %v1552_v19 = vpop.permute.xlu0 %1551 }
 0xaf8   :  { %v1570_v23 = vmul.f32 %v15573_v57, %v1552_v19  ;;  %1585 = vrot.lane.b32.xlu1 %v1567_v56, %s14692_s16 }
 0xaf9   :  { %v1554_v28 = vpop.permute.xlu1 %1553 }
 0xafa   :  { %v1571_v30 = vmul.f32 %v15577_v18, %v1554_v28  ;;  %1591 = vrot.lane.b32.xlu0 %v1570_v23, %s14692_s16 }
 0xafb   :  { %v1556_v2 = vpop.permute.xlu0 %1555 }
 0xafc   :  { %v1572_v36 = vmul.f32 %v15581_v37, %v1556_v2  ;;  %1593 = vrot.lane.b32.xlu1 %v1571_v30, %s14692_s16  ;;  %v1624_v2 = vsub.f32 1.0, %v15554_v5 }
 0xafe   :  { %1595 = vrot.lane.b32.xlu0 %v1572_v36, %s14692_s16 }
 0xb62   :  { %v1588_v47 = vpop.permute.xlu1 %1587 }
 0xb63   :  { %v1608_v20 = vadd.f32 %v1588_v47, %v15096_v45  ;;  %v1687_v47 = vmul.f32 %v15554_v5, %v1385_v31  ;;  %v1672_v31 = vrot.slane %v15488_v60, 7 }
 0xb64   :  { %v1584_v35 = vpop.permute.xlu0 %1583 }
 0xb65   :  { %13537 = vtanh.f32 %v1608_v20  ;;  %v1606_v48 = vadd.f32 %v1584_v35, %v15090_v40  ;;  %v1622_v35 = vsub.f32 1.0, %v15557_v58 }
 0xb66   :  { %v1582_v43 = vpop.permute.xlu1 %1581 }
 0xb67   :  { %13539 = vtanh.f32 %v1606_v48  ;;  %v1605_v15 = vadd.f32 %v1582_v43, %v15088_v39  ;;  %v1670_v48 = vrot.slane %v15445_v14, 7 }
 0xb68   :  { %v1590_v17 = vpop.permute.xlu0 %1589 }
 0xb69   :  { %13541 = vtanh.f32 %v1605_v15  ;;  %v1609_v54 = vadd.f32 %v1590_v17, %v15098_v46  ;;  %v1669_v15 = vrot.slane %v15433_v38, 7 }
 0xb6a   :  { %v1586_v63 = vpop.permute.xlu1 %1585 }
 0xb6b   :  { %13543 = vtanh.f32 %v1609_v54  ;;  %v1607_v44 = vadd.f32 %v1586_v63, %v15093_v42  ;;  %v1685_v54 = vmul.f32 %v15557_v58, %v1670_v48  ;;  %v1684_v16 = vmul.f32 %v15561_v9, %v1669_v15 }
 0xb6c   :  { %v1592_v25 = vpop.permute.xlu0 %1591  ;;  %v1688_v58 = vmul.f32 %v15565_v4, %v1672_v31 }
 0xb6d   :  { %13545 = vtanh.f32 %v1607_v44  ;;  %v1610_v26 = vadd.f32 %v1592_v25, %v15101_v50  ;;  %v1621_v44 = vsub.f32 1.0, %v15561_v9 }
 0xb6e   :  { %v1594_v41 = vpop.permute.xlu1 %1593 }
 0xb6f   :  { %v13538_v6 = vpop.eup %13537  ;;  %13547 = vtanh.f32 %v1610_v26  ;;  %v1611_v52 = vadd.f32 %v1594_v41, %v15104_v53  ;;  %v1625_v26 = vsub.f32 1.0, %v15565_v4 }
 0xb70   :  { %v1596_v10 = vpop.permute.xlu0 %1595  ;;  %1643 = vrot.lane.b32.xlu1 %v13538_v6, %s14693_s11  ;;  %v1671_v6 = vrot.slane %v15420_v21, 7 }
 0xb71   :  { %v13540_v24 = vpop.eup %13539  ;;  %13549 = vtanh.f32 %v1611_v52  ;;  %v1612_v51 = vadd.f32 %v1596_v10, %v15108_v59 }
 0xb72   :  { %1639 = vrot.lane.b32.xlu0 %v13540_v24, %s14693_s11  ;;  %v1686_v24 = vmul.f32 %v15569_v7, %v1671_v6 }
 0xb73   :  { %v13542_v22 = vpop.eup %13541  ;;  %13551 = vtanh.f32 %v1612_v51 }
 0xb74   :  { %1637 = vrot.lane.b32.xlu1 %v13542_v22, %s14693_s11 }
 0xb75   :  { %v13544_v56 = vpop.eup %13543 }
 0xb76   :  { %1645 = vrot.lane.b32.xlu0 %v13544_v56, %s14693_s11  ;;  %v1626_v56 = vsub.f32 1.0, %v15573_v57 }
 0xb77   :  { %v13546_v19 = vpop.eup %13545 }
 0xb78   :  { %1641 = vrot.lane.b32.xlu1 %v13546_v19, %s14693_s11  ;;  %v1673_v19 = vrot.slane %v15474_v34, 7 }
 0xb79   :  { %v13548_v23 = vpop.eup %13547 }
 0xb7a   :  { %1647 = vrot.lane.b32.xlu0 %v13548_v23, %s14693_s11 }
 0xb7b   :  { %v13550_v28 = vpop.eup %13549 }
 0xb7c   :  { %1649 = vrot.lane.b32.xlu1 %v13550_v28, %s14693_s11  ;;  %v1674_v28 = vrot.slane %v15512_v32, 7 }
 0xb7d   :  { %v13552_v30 = vpop.eup %13551 }
 0xb7e   :  { %1651 = vrot.lane.b32.xlu0 %v13552_v30, %s14693_s11 }
 0xbe2   :  { %v1644_v36 = vpop.permute.xlu1 %1643 }
 0xbe3   :  { %v1664_v20 = vmul.f32 %v1644_v36, %v1624_v2  ;;  %v1689_v36 = vmul.f32 %v15573_v57, %v1673_v19 }
 0xbe4   :  { %v1640_v43 = vpop.permute.xlu0 %1639 }
 0xbe5   :  { %v15609_v17 = vadd.f32 %v1687_v47, %v1664_v20  ;;  %v1662_v63 = vmul.f32 %v1640_v43, %v1622_v35  ;;  %v1690_v20 = vmul.f32 %v15577_v18, %v1674_v28  ;;  %v1675_v35 = vrot.slane %v15493_v62, 7 }
 0xbe6   :  { %v1638_v25 = vpop.permute.xlu1 %1637  ;;  %v1628_v43 = vsub.f32 1.0, %v15581_v37 }
 0xbe7   :  { %v15618_v14 = vsel %vm3026_vm12, %v15472_v33, %v15609_v17  ;;  %v15620_v5 = vadd.f32 %v1685_v54, %v1662_v63  ;;  %v1661_v38 = vmul.f32 %v1638_v25, %v1621_v44  ;;  %v1623_v33 = vsub.f32 1.0, %v15569_v7 }
 0xbe8   :  { %v1646_v41 = vpop.permute.xlu0 %1645  ;;  %v1691_v57 = vmul.f32 %v15581_v37, %v1675_v35 }
 0xbe9   :  { %v15628_v9 = vsel %vm3026_vm12, %v15459_v29, %v15620_v5  ;;  %v15630_v60 = vadd.f32 %v1684_v16, %v1661_v38  ;;  %v1665_v52 = vmul.f32 %v1646_v41, %v1625_v26  ;;  %v1709_v10 = vrot.slane %v15620_v5, 2 }
 0xbea   :  { %v1642_v51 = vpop.permute.xlu1 %1641 }
 0xbeb   :  { %v1708_v4 = vrot.slane %v15630_v60, 3  ;;  %v15639_v21 = vsel %vm3026_vm12, %v15443_v13, %v15630_v60  ;;  %v15641_v22 = vadd.f32 %v1688_v58, %v1665_v52  ;;  %v1663_v29 = vmul.f32 %v1642_v51, %v1623_v33 }
 0xbec   :  { %v1648_v23 = vpop.permute.xlu0 %1647  ;;  %v1627_v13 = vsub.f32 1.0, %v15577_v18 }
 0xbed   :  { %v1710_v7 = vsel %vm721_vm2, %v1709_v10, %v1708_v4  ;;  %v15650_v30 = vsel %vm3026_vm12, %v15502_v27, %v15641_v22  ;;  %v15652_v2 = vadd.f32 %v1686_v24, %v1663_v29  ;;  %v1666_v47 = vmul.f32 %v1648_v23, %v1626_v56 }
 0xbee   :  { %v1650_v34 = vpop.permute.xlu1 %1649  ;;  %v1714_v18 = vrot.slane %v15641_v22, 7 }
 0xbef   :  { %v1711_v32 = vrot.slane %v15652_v2, 1  ;;  %v15662_v48 = vsel %vm3026_vm12, %v15431_v3, %v15652_v2  ;;  %v1667_v27 = vmul.f32 %v1650_v34, %v1627_v13  ;;  %v15665_v15 = vadd.f32 %v1689_v36, %v1666_v47 }
 0xbf0   :  { %v1652_v54 = vpop.permute.xlu0 %1651 }
 0xbf1   :  { %v1712_v63 = vsel %vm724_vm3, %v1711_v32, %v1710_v7  ;;  %v15670_v62 = vadd.f32 %v1690_v20, %v1667_v27  ;;  %v1668_v44 = vmul.f32 %v1652_v54, %v1628_v43  ;;  %v1716_v16 = vrot.slane %v15665_v15, 6 }
 0xbf2   :  { %v15676_v3 = vsel %vm3026_vm12, %v15483_v55, %v15665_v15  ;;  %v1713_v25 = vsel %vm727_vm4, %v15609_v17, %v1712_v63 }
 0xbf3   :  { %v1718_v37 = vrot.slane %v15670_v62, 5  ;;  %v15684_v31 = vsel %vm3026_vm12, %v15521_v11, %v15670_v62  ;;  %v15686_v38 = vadd.f32 %v1691_v57, %v1668_v44  ;;  %v1715_v26 = vsel %vm730_vm5, %v1714_v18, %v1713_v25 }
 0xbf4   :  { %v1717_v58 = vsel %vm733_vm6, %v1716_v16, %v1715_v26 }
 0xbf5   :  { %v15695_v55 = vsel %vm3026_vm12, %v15510_v61, %v15686_v38  ;;  %v1719_v41 = vsel %vm736_vm7, %v1718_v37, %v1717_v58  ;;  %v1720_v6 = vrot.slane %v15686_v38, 4 }
 0xbf7   :  { %v1721_v11 = vsel %vm739_vm8, %v1720_v6, %v1719_v41 }
 0xbf8   :  { %1722 = vrot.lane.b32.xlu1 %v1721_v11, %s14693_s11 }
 0xc6a   :  { %v1723_v52 = vpop.permute.xlu1 %1722 }
 0xc6b   :  { %12632 = vmatmul.mubr.msk.f32.vlgmr.msra.gmra.mrb[10].mxu0 %vm422_vm9, %v1723_v52 }
 0xc6c   :  { %13228 = vmatpush3.bf16.msra.mxu0 %v15047_v8  ;;  %12653 = vmatprep.mubr.msk.f32.mxu0 %vm14690_vm0, %v18665_v1 }
 0xc6d   :  { %13229 = vmatprep.subr.bf16.mxu0 %v18663_v0 }
 0xc70   :  { %13231 = vmatpush3.bf16.msra.mxu0 %v15051_v12 }
 0xd3e   :  { %v1792_v61 = vpop.f32.mrb[10].mxu0 }
 0xd3f   :  { %v1793_v33 = vadd.f32 %v15535_v49, %v1792_v61  ;;  %v12633_v10 = vpop.f32.mrb[11].mxu0 }
 0xd41   :  { %1876 = vrot.lane.b32.xlu1 %v1793_v33, %s14692_s16  ;;  %v1797_v24 = vrot.slane %v1793_v33, 4  ;;  %v1798_v51 = vrot.slane %v1793_v33, 5  ;;  %v1799_v4 = vrot.slane %v1793_v33, 6  ;;  %v1800_v29 = vrot.slane %v1793_v33, 7 }
 0xd42   :  { %v1801_v56 = vrot.slane %v1793_v33, 1  ;;  %v1803_v19 = vrot.slane %v1793_v33, 3  ;;  %v1802_v23 = vrot.slane %v1793_v33, 2  ;;  %v1816_v28 = vadd.f32 %v1793_v33, %v15098_v46 }
 0xd43   :  { %1868 = vrot.lane.b32.xlu0 %v1797_v24, %s14692_s16  ;;  %v1812_v7 = vadd.f32 %v1797_v24, %v15088_v39  ;;  %v1813_v13 = vadd.f32 %v1798_v51, %v15090_v40  ;;  %v1814_v20 = vadd.f32 %v1799_v4, %v15093_v42  ;;  %v1815_v35 = vadd.f32 %v1800_v29, %v15096_v45 }
 0xd44   :  { %v1824_v36 = vsub.f32 0.0, %v1816_v28  ;;  %v1817_v57 = vadd.f32 %v1801_v56, %v15101_v50  ;;  %v1819_v44 = vadd.f32 %v1803_v19, %v15108_v59  ;;  %v1818_v37 = vadd.f32 %v1802_v23, %v15104_v53 }
 0xd45   :  { %1870 = vrot.lane.b32.xlu1 %v1798_v51, %s14692_s16  ;;  %v1820_v47 = vsub.f32 0.0, %v1812_v7  ;;  %v1821_v34 = vsub.f32 0.0, %v1813_v13  ;;  %v1822_v43 = vsub.f32 0.0, %v1814_v20  ;;  %v1823_v63 = vsub.f32 0.0, %v1815_v35 }
 0xd46   :  { %v1836_v32 = vmul.f32 1.442695, %v1824_v36  ;;  %v1825_v25 = vsub.f32 0.0, %v1817_v57  ;;  %v1827_v58 = vsub.f32 0.0, %v1819_v44  ;;  %v1826_v6 = vsub.f32 0.0, %v1818_v37 }
 0xd47   :  { %1872 = vrot.lane.b32.xlu0 %v1799_v4, %s14692_s16  ;;  %v1828_v27 = vmul.f32 1.442695, %v1820_v47  ;;  %v1830_v54 = vmul.f32 1.442695, %v1821_v34  ;;  %v1832_v16 = vmul.f32 1.442695, %v1822_v43 }
 0xd48   :  { %13553 = vpow2.f32 %v1836_v32  ;;  %v1834_v26 = vmul.f32 1.442695, %v1823_v63  ;;  %v1838_v41 = vmul.f32 1.442695, %v1825_v25  ;;  %v1842_v11 = vmul.f32 1.442695, %v1827_v58 }
 0xd49   :  { %1874 = vrot.lane.b32.xlu1 %v1800_v29, %s14692_s16  ;;  %13555 = vpow2.f32 %v1828_v27  ;;  %v1840_v61 = vmul.f32 1.442695, %v1826_v6 }
 0xd4a   :  { %13557 = vpow2.f32 %v1830_v54 }
 0xd4b   :  { %1878 = vrot.lane.b32.xlu0 %v1801_v56, %s14692_s16  ;;  %13559 = vpow2.f32 %v1832_v16 }
 0xd4c   :  { %13561 = vpow2.f32 %v1834_v26 }
 0xd4d   :  { %1882 = vrot.lane.b32.xlu1 %v1803_v19, %s14692_s16  ;;  %13563 = vpow2.f32 %v1838_v41 }
 0xd4e   :  { %13565 = vpow2.f32 %v1842_v11 }
 0xd4f   :  { %1880 = vrot.lane.b32.xlu0 %v1802_v23, %s14692_s16  ;;  %13567 = vpow2.f32 %v1840_v61 }
 0xd52   :  { %v13554_v52 = vpop.eup %13553 }
 0xd53   :  { %v13556_v33 = vpop.eup %13555  ;;  %v1848_v10 = vadd.f32 1.0, %v13554_v52 }
 0xd54   :  { %v13558_v24 = vpop.eup %13557  ;;  %v1844_v51 = vadd.f32 1.0, %v13556_v33 }
 0xd55   :  { %v13560_v4 = vpop.eup %13559  ;;  %v1845_v29 = vadd.f32 1.0, %v13558_v24  ;;  %13569 = vrcp.f32 %v1848_v10 }
 0xd56   :  { %v13562_v56 = vpop.eup %13561  ;;  %13571 = vrcp.f32 %v1844_v51  ;;  %v1846_v19 = vadd.f32 1.0, %v13560_v4 }
 0xd57   :  { %v13564_v23 = vpop.eup %13563  ;;  %13573 = vrcp.f32 %v1845_v29  ;;  %v1847_v28 = vadd.f32 1.0, %v13562_v56 }
 0xd58   :  { %v13566_v7 = vpop.eup %13565  ;;  %13575 = vrcp.f32 %v1846_v19  ;;  %v1849_v13 = vadd.f32 1.0, %v13564_v23 }
 0xd59   :  { %v13568_v36 = vpop.eup %13567  ;;  %13577 = vrcp.f32 %v1847_v28  ;;  %v1851_v47 = vadd.f32 1.0, %v13566_v7 }
 0xd5a   :  { %13579 = vrcp.f32 %v1849_v13  ;;  %v1850_v34 = vadd.f32 1.0, %v13568_v36 }
 0xd5b   :  { %13581 = vrcp.f32 %v1851_v47 }
 0xd5c   :  { %13583 = vrcp.f32 %v1850_v34 }
 0xd5f   :  { %v15724_v20 = vpop.eup %13569 }
 0xd60   :  { %v15727_v27 = vpop.eup %13571 }
 0xd61   :  { %v15731_v54 = vpop.eup %13573 }
 0xd62   :  { %v15735_v16 = vpop.eup %13575 }
 0xd63   :  { %v15739_v26 = vpop.eup %13577 }
 0xd64   :  { %v15743_v6 = vpop.eup %13579 }
 0xd65   :  { %v15747_v61 = vpop.eup %13581 }
 0xd66   :  { %v15751_v24 = vpop.eup %13583 }
 0xdb3   :  { %v1877_v35 = vpop.permute.xlu1 %1876 }
 0xdb4   :  { %v1896_v32 = vmul.f32 %v15724_v20, %v1877_v35 }
 0xdb5   :  { %v1869_v43 = vpop.permute.xlu0 %1868 }
 0xdb6   :  { %v1892_v57 = vmul.f32 %v15727_v27, %v1869_v43  ;;  %1916 = vrot.lane.b32.xlu1 %v1896_v32, %s14692_s16 }
 0xdb7   :  { %v1871_v63 = vpop.permute.xlu1 %1870 }
 0xdb8   :  { %v1893_v44 = vmul.f32 %v15731_v54, %v1871_v63  ;;  %1908 = vrot.lane.b32.xlu0 %v1892_v57, %s14692_s16 }
 0xdb9   :  { %v1873_v25 = vpop.permute.xlu0 %1872 }
 0xdba   :  { %v1894_v37 = vmul.f32 %v15735_v16, %v1873_v25  ;;  %1910 = vrot.lane.b32.xlu1 %v1893_v44, %s14692_s16 }
 0xdbb   :  { %v1875_v58 = vpop.permute.xlu1 %1874 }
 0xdbc   :  { %v1895_v41 = vmul.f32 %v15739_v26, %v1875_v58  ;;  %1912 = vrot.lane.b32.xlu0 %v1894_v37, %s14692_s16 }
 0xdbd   :  { %v1879_v11 = vpop.permute.xlu0 %1878 }
 0xdbe   :  { %v1897_v52 = vmul.f32 %v15743_v6, %v1879_v11  ;;  %1914 = vrot.lane.b32.xlu1 %v1895_v41, %s14692_s16 }
 0xdbf   :  { %v1883_v33 = vpop.permute.xlu1 %1882 }
 0xdc0   :  { %v1899_v10 = vmul.f32 %v15747_v61, %v1883_v33  ;;  %1918 = vrot.lane.b32.xlu0 %v1897_v52, %s14692_s16 }
 0xdc1   :  { %v1881_v51 = vpop.permute.xlu0 %1880 }
 0xdc2   :  { %v1898_v4 = vmul.f32 %v15751_v24, %v1881_v51  ;;  %1922 = vrot.lane.b32.xlu1 %v1899_v10, %s14692_s16  ;;  %v1952_v51 = vsub.f32 1.0, %v15724_v20 }
 0xdc4   :  { %1920 = vrot.lane.b32.xlu0 %v1898_v4, %s14692_s16 }
 0xe28   :  { %v1917_v29 = vpop.permute.xlu1 %1916 }
 0xe29   :  { %v1936_v56 = vadd.f32 %v1917_v29, %v15098_v46  ;;  %v2015_v29 = vmul.f32 %v15724_v20, %v1714_v18  ;;  %v1998_v18 = vrot.slane %v15652_v2, 7 }
 0xe2a   :  { %v1909_v19 = vpop.permute.xlu0 %1908 }
 0xe2b   :  { %13585 = vtanh.f32 %v1936_v56  ;;  %v1932_v23 = vadd.f32 %v1909_v19, %v15088_v39  ;;  %v1948_v19 = vsub.f32 1.0, %v15727_v27 }
 0xe2c   :  { %v1911_v28 = vpop.permute.xlu1 %1910 }
 0xe2d   :  { %13587 = vtanh.f32 %v1932_v23  ;;  %v1933_v7 = vadd.f32 %v1911_v28, %v15090_v40  ;;  %v1996_v23 = vrot.slane %v15630_v60, 7 }
 0xe2e   :  { %v1913_v13 = vpop.permute.xlu0 %1912 }
 0xe2f   :  { %13589 = vtanh.f32 %v1933_v7  ;;  %v1934_v36 = vadd.f32 %v1913_v13, %v15093_v42  ;;  %v1997_v7 = vrot.slane %v15620_v5, 7 }
 0xe30   :  { %v1915_v47 = vpop.permute.xlu1 %1914 }
 0xe31   :  { %13591 = vtanh.f32 %v1934_v36  ;;  %v1935_v34 = vadd.f32 %v1915_v47, %v15096_v45  ;;  %v2011_v36 = vmul.f32 %v15727_v27, %v1996_v23  ;;  %v2012_v22 = vmul.f32 %v15731_v54, %v1997_v7 }
 0xe32   :  { %v1919_v35 = vpop.permute.xlu0 %1918  ;;  %v2013_v27 = vmul.f32 %v15735_v16, %v1998_v18 }
 0xe33   :  { %13593 = vtanh.f32 %v1935_v34  ;;  %v1937_v32 = vadd.f32 %v1919_v35, %v15101_v50  ;;  %v1949_v34 = vsub.f32 1.0, %v15731_v54 }
 0xe34   :  { %v1923_v43 = vpop.permute.xlu1 %1922 }
 0xe35   :  { %v13586_v57 = vpop.eup %13585  ;;  %13595 = vtanh.f32 %v1937_v32  ;;  %v1939_v63 = vadd.f32 %v1923_v43, %v15108_v59  ;;  %v1950_v32 = vsub.f32 1.0, %v15735_v16  ;;  %v2000_v16 = vrot.slane %v15665_v15, 7 }
 0xe36   :  { %1972 = vrot.lane.b32.xlu1 %v13586_v57, %s14693_s11  ;;  %v1921_v44 = vpop.permute.xlu0 %1920  ;;  %v1999_v57 = vrot.slane %v15609_v17, 7 }
 0xe37   :  { %v13588_v25 = vpop.eup %13587  ;;  %13597 = vtanh.f32 %v1939_v63  ;;  %v1938_v37 = vadd.f32 %v1921_v44, %v15104_v53 }
 0xe38   :  { %1964 = vrot.lane.b32.xlu0 %v13588_v25, %s14693_s11  ;;  %v2014_v25 = vmul.f32 %v15739_v26, %v1999_v57 }
 0xe39   :  { %v13590_v58 = vpop.eup %13589  ;;  %13599 = vtanh.f32 %v1938_v37 }
 0xe3a   :  { %1966 = vrot.lane.b32.xlu1 %v13590_v58, %s14693_s11 }
 0xe3b   :  { %v13592_v41 = vpop.eup %13591 }
 0xe3c   :  { %1968 = vrot.lane.b32.xlu0 %v13592_v41, %s14693_s11 }
 0xe3d   :  { %v13594_v11 = vpop.eup %13593 }
 0xe3e   :  { %1970 = vrot.lane.b32.xlu1 %v13594_v11, %s14693_s11  ;;  %v1953_v11 = vsub.f32 1.0, %v15743_v6 }
 0xe3f   :  { %v13596_v52 = vpop.eup %13595 }
 0xe40   :  { %1974 = vrot.lane.b32.xlu0 %v13596_v52, %s14693_s11 }
 0xe41   :  { %v13598_v33 = vpop.eup %13597 }
 0xe42   :  { %1978 = vrot.lane.b32.xlu1 %v13598_v33, %s14693_s11  ;;  %v1955_v33 = vsub.f32 1.0, %v15747_v61 }
 0xe43   :  { %v13600_v10 = vpop.eup %13599 }
 0xe44   :  { %1976 = vrot.lane.b32.xlu0 %v13600_v10, %s14693_s11  ;;  %v2001_v10 = vrot.slane %v15670_v62, 7 }
 0xea8   :  { %v1973_v4 = vpop.permute.xlu1 %1972 }
 0xea9   :  { %v1992_v56 = vmul.f32 %v1973_v4, %v1952_v51 }
 0xeaa   :  { %v1965_v28 = vpop.permute.xlu0 %1964 }
 0xeab   :  { %v15779_v13 = vadd.f32 %v2015_v29, %v1992_v56  ;;  %v1988_v47 = vmul.f32 %v1965_v28, %v1948_v19  ;;  %v2016_v29 = vmul.f32 %v15743_v6, %v2000_v16 }
 0xeac   :  { %v1967_v35 = vpop.permute.xlu1 %1966 }
 0xead   :  { %v15788_v60 = vsel %vm3035_vm13, %v15650_v30, %v15779_v13  ;;  %v15790_v20 = vadd.f32 %v2011_v36, %v1988_v47  ;;  %v1989_v5 = vmul.f32 %v1967_v35, %v1949_v34  ;;  %v1951_v30 = vsub.f32 1.0, %v15739_v26 }
 0xeae   :  { %v1969_v43 = vpop.permute.xlu0 %1968  ;;  %v2002_v26 = vrot.slane %v15686_v38, 7  ;;  %v1954_v38 = vsub.f32 1.0, %v15751_v24 }
 0xeaf   :  { %v15798_v54 = vsel %vm3035_vm13, %v15639_v21, %v15790_v20  ;;  %v15800_v2 = vadd.f32 %v2012_v22, %v1989_v5  ;;  %v1990_v63 = vmul.f32 %v1969_v43, %v1950_v32  ;;  %v2035_v44 = vrot.slane %v15790_v20, 4 }
 0xeb0   :  { %v1971_v37 = vpop.permute.xlu1 %1970  ;;  %v2018_v19 = vmul.f32 %v15747_v61, %v2002_v26  ;;  %v2017_v61 = vmul.f32 %v15751_v24, %v2001_v10 }
 0xeb1   :  { %v2036_v58 = vrot.slane %v15800_v2, 3  ;;  %v15810_v17 = vsel %vm3035_vm13, %v15628_v9, %v15800_v2  ;;  %v15812_v21 = vadd.f32 %v2013_v27, %v1990_v63  ;;  %v1991_v41 = vmul.f32 %v1971_v37, %v1951_v30 }
 0xeb2   :  { %v1975_v52 = vpop.permute.xlu0 %1974 }
 0xeb3   :  { %v2037_v15 = vsel %vm721_vm2, %v2036_v58, %v2035_v44  ;;  %v2038_v51 = vrot.slane %v15812_v21, 2  ;;  %v15823_v9 = vsel %vm3035_vm13, %v15662_v48, %v15812_v21  ;;  %v15825_v4 = vadd.f32 %v2014_v25, %v1991_v41 }
 0xeb4   :  { %v1993_v56 = vmul.f32 %v1975_v52, %v1953_v11  ;;  %v1979_v23 = vpop.permute.xlu1 %1978 }
 0xeb5   :  { %v2039_v62 = vsel %vm724_vm3, %v2038_v51, %v2037_v15  ;;  %v2040_v28 = vrot.slane %v15825_v4, 1  ;;  %v15835_v7 = vsel %vm3035_vm13, %v15618_v14, %v15825_v4  ;;  %v1995_v48 = vmul.f32 %v1979_v23, %v1955_v33 }
 0xeb6   :  { %v15837_v36 = vadd.f32 %v2016_v29, %v1993_v56  ;;  %v1977_v47 = vpop.permute.xlu0 %1976 }
 0xeb7   :  { %v15839_v6 = vadd.f32 %v2018_v19, %v1995_v48  ;;  %v1994_v34 = vmul.f32 %v1977_v47, %v1954_v38  ;;  %v2041_v22 = vsel %vm727_vm4, %v2040_v28, %v2039_v62 }
 0xeb8   :  { %v2043_v35 = vrot.slane %v15837_v36, 7  ;;  %v15847_v18 = vsel %vm3035_vm13, %v15676_v3, %v15837_v36  ;;  %v2042_v24 = vsel %vm730_vm5, %v15779_v13, %v2041_v22 }
 0xeb9   :  { %v15852_v14 = vsel %vm3035_vm13, %v15695_v55, %v15839_v6  ;;  %v15854_v5 = vadd.f32 %v2017_v61, %v1994_v34  ;;  %v2047_v43 = vrot.slane %v15839_v6, 5 }
 0xeba   :  { %v2044_v3 = vsel %vm733_vm6, %v2043_v35, %v2042_v24 }
 0xebb   :  { %v2045_v32 = vrot.slane %v15854_v5, 6  ;;  %v15862_v27 = vsel %vm3035_vm13, %v15684_v31, %v15854_v5 }
 0xebd   :  { %v2046_v55 = vsel %vm736_vm7, %v2045_v32, %v2044_v3 }
 0xebe   :  { %v2048_v57 = vsel %vm739_vm8, %v2047_v43, %v2046_v55 }
 0xebf   :  { %2049 = vrot.lane.b32.xlu0 %v2048_v57, %s14693_s11 }
 0xf31   :  { %v2050_v63 = vpop.permute.xlu0 %2049 }
 0xf32   :  { %12643 = vmatmul.mubr.msk.f32.vlgmr.msra.gmra.mrb[6].mxu1 %vm422_vm9, %v2050_v63 }
 0xf33   :  { %13234 = vmatpush3.bf16.msra.mxu1 %v15047_v8  ;;  %12664 = vmatprep.mubr.msk.f32.mxu1 %vm14690_vm0, %v18665_v1 }
 0xf34   :  { %13235 = vmatprep.subr.bf16.mxu1 %v18663_v0 }
 0xf37   :  { %13237 = vmatpush3.bf16.msra.mxu1 %v15051_v12 }
 0xf38   :  { %13246 = vmatprep.subr.bf16.mxu1 %v18663_v0 }
0x1005   :  { %v2119_v31 = vpop.f32.mrb[6].mxu1 }
0x1006   :  { %v2120_v30 = vadd.f32 %v15535_v49, %v2119_v31  ;;  %v12644_v44 = vpop.f32.mrb[7].mxu1 }
0x1008   :  { %v2125_v25 = vrot.slane %v2120_v30, 4  ;;  %v2124_v37 = vrot.slane %v2120_v30, 3  ;;  %v2127_v8 = vrot.slane %v2120_v30, 6  ;;  %v2126_v16 = vrot.slane %v2120_v30, 5 }
0x1009   :  { %v2129_v58 = vrot.slane %v2120_v30, 1  ;;  %v2128_v12 = vrot.slane %v2120_v30, 7  ;;  %v2130_v49 = vrot.slane %v2120_v30, 2  ;;  %v2144_v61 = vadd.f32 %v2120_v30, %v15101_v50 }
0x100a   :  { %2197 = vrot.lane.b32.xlu0 %v2125_v25, %s14692_s16  ;;  %2195 = vrot.lane.b32.xlu1 %v2124_v37, %s14692_s16  ;;  %v2140_v41 = vadd.f32 %v2125_v25, %v15090_v40  ;;  %v2139_v11 = vadd.f32 %v2124_v37, %v15088_v39  ;;  %v2142_v33 = vadd.f32 %v2127_v8, %v15096_v45 }
0x100b   :  { %v2141_v10 = vadd.f32 %v2126_v16, %v15093_v42  ;;  %v2145_v29 = vadd.f32 %v2129_v58, %v15104_v53  ;;  %v2143_v23 = vadd.f32 %v2128_v12, %v15098_v46  ;;  %v2146_v28 = vadd.f32 %v2130_v49, %v15108_v59 }
0x100c   :  { %v2148_v52 = vsub.f32 0.0, %v2140_v41  ;;  %v2147_v26 = vsub.f32 0.0, %v2139_v11  ;;  %v2150_v51 = vsub.f32 0.0, %v2142_v33  ;;  %v2152_v32 = vsub.f32 0.0, %v2144_v61 }
0x100d   :  { %v2149_v19 = vsub.f32 0.0, %v2141_v10  ;;  %v2153_v62 = vsub.f32 0.0, %v2145_v29  ;;  %v2151_v47 = vsub.f32 0.0, %v2143_v23  ;;  %v2154_v22 = vsub.f32 0.0, %v2146_v28 }
0x100e   :  { %2201 = vrot.lane.b32.xlu0 %v2127_v8, %s14692_s16  ;;  %2199 = vrot.lane.b32.xlu1 %v2126_v16, %s14692_s16  ;;  %v2157_v15 = vmul.f32 1.442695, %v2148_v52  ;;  %v2155_v56 = vmul.f32 1.442695, %v2147_v26  ;;  %v2161_v38 = vmul.f32 1.442695, %v2150_v51 }
0x100f   :  { %v2159_v48 = vmul.f32 1.442695, %v2149_v19  ;;  %v2167_v34 = vmul.f32 1.442695, %v2153_v62  ;;  %v2163_v24 = vmul.f32 1.442695, %v2151_v47 }
0x1010   :  { %13601 = vpow2.f32 %v2157_v15  ;;  %v2169_v3 = vmul.f32 1.442695, %v2154_v22  ;;  %v2165_v43 = vmul.f32 1.442695, %v2152_v32 }
0x1011   :  { %13603 = vpow2.f32 %v2155_v56 }
0x1012   :  { %2207 = vrot.lane.b32.xlu0 %v2129_v58, %s14692_s16  ;;  %2203 = vrot.lane.b32.xlu1 %v2128_v12, %s14692_s16  ;;  %13605 = vpow2.f32 %v2161_v38 }
0x1013   :  { %13607 = vpow2.f32 %v2159_v48 }
0x1014   :  { %13609 = vpow2.f32 %v2167_v34 }
0x1015   :  { %13611 = vpow2.f32 %v2163_v24 }
0x1016   :  { %2209 = vrot.lane.b32.xlu0 %v2130_v49, %s14692_s16  ;;  %2205 = vrot.lane.b32.xlu1 %v2120_v30, %s14692_s16  ;;  %13613 = vpow2.f32 %v2169_v3 }
0x1017   :  { %13615 = vpow2.f32 %v2165_v43 }
0x101a   :  { %v13602_v55 = vpop.eup %13601 }
0x101b   :  { %v13604_v57 = vpop.eup %13603  ;;  %v2172_v63 = vadd.f32 1.0, %v13602_v55 }
0x101c   :  { %v13606_v31 = vpop.eup %13605  ;;  %v2171_v44 = vadd.f32 1.0, %v13604_v57 }
0x101d   :  { %v13608_v25 = vpop.eup %13607  ;;  %13617 = vrcp.f32 %v2172_v63  ;;  %v2174_v30 = vadd.f32 1.0, %v13606_v31 }
0x101e   :  { %v13610_v37 = vpop.eup %13609  ;;  %13619 = vrcp.f32 %v2171_v44  ;;  %v2173_v8 = vadd.f32 1.0, %v13608_v25 }
0x101f   :  { %v13612_v16 = vpop.eup %13611  ;;  %13621 = vrcp.f32 %v2174_v30  ;;  %v2177_v58 = vadd.f32 1.0, %v13610_v37 }
0x1020   :  { %v13614_v12 = vpop.eup %13613  ;;  %13623 = vrcp.f32 %v2173_v8  ;;  %v2175_v49 = vadd.f32 1.0, %v13612_v16 }
0x1021   :  { %v13616_v41 = vpop.eup %13615  ;;  %13625 = vrcp.f32 %v2177_v58  ;;  %v2178_v11 = vadd.f32 1.0, %v13614_v12 }
0x1022   :  { %13627 = vrcp.f32 %v2175_v49  ;;  %v2176_v52 = vadd.f32 1.0, %v13616_v41 }
0x1023   :  { %13629 = vrcp.f32 %v2178_v11 }
0x1024   :  { %13631 = vrcp.f32 %v2176_v52 }
0x1027   :  { %v15895_v33 = vpop.eup %13617 }
0x1028   :  { %v15897_v26 = vpop.eup %13619 }
0x1029   :  { %v15901_v56 = vpop.eup %13621 }
0x102a   :  { %v15905_v19 = vpop.eup %13623 }
0x102b   :  { %v15909_v48 = vpop.eup %13625 }
0x102c   :  { %v15913_v47 = vpop.eup %13627 }
0x102d   :  { %v15917_v32 = vpop.eup %13629 }
0x102e   :  { %v15921_v3 = vpop.eup %13631 }
0x107c   :  { %v2198_v10 = vpop.permute.xlu0 %2197  ;;  %v2196_v15 = vpop.permute.xlu1 %2195 }
0x107d   :  { %v2220_v51 = vmul.f32 %v15895_v33, %v2198_v10  ;;  %v2219_v29 = vmul.f32 %v15897_v26, %v2196_v15 }
0x107f   :  { %2237 = vrot.lane.b32.xlu0 %v2220_v51, %s14692_s16  ;;  %2235 = vrot.lane.b32.xlu1 %v2219_v29, %s14692_s16 }
0x1080   :  { %v2202_v23 = vpop.permute.xlu0 %2201  ;;  %v2200_v38 = vpop.permute.xlu1 %2199 }
0x1081   :  { %v2222_v62 = vmul.f32 %v15901_v56, %v2202_v23  ;;  %v2221_v28 = vmul.f32 %v15905_v19, %v2200_v38 }
0x1083   :  { %2241 = vrot.lane.b32.xlu0 %v2222_v62, %s14692_s16  ;;  %2239 = vrot.lane.b32.xlu1 %v2221_v28, %s14692_s16 }
0x1084   :  { %v2208_v61 = vpop.permute.xlu0 %2207  ;;  %v2204_v34 = vpop.permute.xlu1 %2203 }
0x1085   :  { %v2225_v22 = vmul.f32 %v15909_v48, %v2208_v61  ;;  %v2223_v24 = vmul.f32 %v15913_v47, %v2204_v34 }
0x1087   :  { %2247 = vrot.lane.b32.xlu0 %v2225_v22, %s14692_s16  ;;  %2243 = vrot.lane.b32.xlu1 %v2223_v24, %s14692_s16  ;;  %v2276_v24 = vsub.f32 1.0, %v15895_v33 }
0x1088   :  { %v2210_v43 = vpop.permute.xlu0 %2209  ;;  %v2206_v55 = vpop.permute.xlu1 %2205 }
0x1089   :  { %v2226_v57 = vmul.f32 %v15917_v32, %v2210_v43  ;;  %v2224_v63 = vmul.f32 %v15921_v3, %v2206_v55  ;;  %v2324_v43 = vrot.slane %v15800_v2, 7 }
0x108b   :  { %2249 = vrot.lane.b32.xlu0 %v2226_v57, %s14692_s16  ;;  %2245 = vrot.lane.b32.xlu1 %v2224_v63, %s14692_s16  ;;  %v2275_v57 = vsub.f32 1.0, %v15897_v26  ;;  %v2323_v63 = vrot.slane %v15790_v20, 7  ;;  %v2325_v20 = vrot.slane %v15812_v21, 7 }
0x10f1   :  { %v2238_v31 = vpop.permute.xlu0 %2237  ;;  %v2236_v44 = vpop.permute.xlu1 %2235 }
0x10f2   :  { %v2260_v25 = vadd.f32 %v2238_v31, %v15090_v40  ;;  %v2259_v30 = vadd.f32 %v2236_v44, %v15088_v39  ;;  %v2339_v31 = vmul.f32 %v15895_v33, %v2324_v43 }
0x10f4   :  { %13633 = vtanh.f32 %v2260_v25 }
0x10f5   :  { %13635 = vtanh.f32 %v2259_v30  ;;  %v2242_v37 = vpop.permute.xlu0 %2241  ;;  %v2240_v8 = vpop.permute.xlu1 %2239  ;;  %v2338_v30 = vmul.f32 %v15897_v26, %v2323_v63 }
0x10f6   :  { %v2262_v16 = vadd.f32 %v2242_v37, %v15096_v45  ;;  %v2261_v58 = vadd.f32 %v2240_v8, %v15093_v42 }
0x10f8   :  { %13637 = vtanh.f32 %v2262_v16  ;;  %v2278_v16 = vsub.f32 1.0, %v15901_v56 }
0x10f9   :  { %13639 = vtanh.f32 %v2261_v58  ;;  %v2248_v12 = vpop.permute.xlu0 %2247  ;;  %v2244_v49 = vpop.permute.xlu1 %2243  ;;  %v2326_v58 = vrot.slane %v15825_v4, 7 }
0x10fa   :  { %v2265_v41 = vadd.f32 %v2248_v12, %v15104_v53  ;;  %v2263_v11 = vadd.f32 %v2244_v49, %v15098_v46  ;;  %v2277_v49 = vsub.f32 1.0, %v15905_v19 }
0x10fc   :  { %13641 = vtanh.f32 %v2265_v41  ;;  %v2341_v41 = vmul.f32 %v15901_v56, %v2326_v58  ;;  %v2281_v56 = vsub.f32 1.0, %v15909_v48 }
0x10fd   :  { %13643 = vtanh.f32 %v2263_v11  ;;  %v2250_v52 = vpop.permute.xlu0 %2249  ;;  %v2246_v10 = vpop.permute.xlu1 %2245 }
0x10fe   :  { %v13634_v15 = vpop.eup %13633  ;;  %v2266_v51 = vadd.f32 %v2250_v52, %v15108_v59  ;;  %v2264_v29 = vadd.f32 %v2246_v10, %v15101_v50  ;;  %v2340_v10 = vmul.f32 %v15905_v19, %v2325_v20  ;;  %v2327_v19 = vrot.slane %v15779_v13, 7 }
0x10ff   :  { %v13636_v23 = vpop.eup %13635  ;;  %2293 = vrot.lane.b32.xlu0 %v13634_v15, %s14693_s11 }
0x1100   :  { %13645 = vtanh.f32 %v2266_v51  ;;  %2291 = vrot.lane.b32.xlu1 %v13636_v23, %s14693_s11 }
0x1101   :  { %13647 = vtanh.f32 %v2264_v29  ;;  %v2328_v29 = vrot.slane %v15854_v5, 7 }
0x1102   :  { %v13638_v38 = vpop.eup %13637 }
0x1103   :  { %v13640_v62 = vpop.eup %13639  ;;  %2297 = vrot.lane.b32.xlu0 %v13638_v38, %s14693_s11 }
0x1104   :  { %2295 = vrot.lane.b32.xlu1 %v13640_v62, %s14693_s11  ;;  %v2279_v62 = vsub.f32 1.0, %v15913_v47 }
0x1106   :  { %v13642_v28 = vpop.eup %13641 }
0x1107   :  { %v13644_v61 = vpop.eup %13643  ;;  %2303 = vrot.lane.b32.xlu0 %v13642_v28, %s14693_s11 }
0x1108   :  { %2299 = vrot.lane.b32.xlu1 %v13644_v61, %s14693_s11 }
0x110a   :  { %v13646_v34 = vpop.eup %13645 }
0x110b   :  { %v13648_v22 = vpop.eup %13647  ;;  %2305 = vrot.lane.b32.xlu0 %v13646_v34, %s14693_s11 }
0x110c   :  { %2301 = vrot.lane.b32.xlu1 %v13648_v22, %s14693_s11 }
0x1171   :  { %v2294_v55 = vpop.permute.xlu0 %2293 }
0x1172   :  { %v2316_v44 = vmul.f32 %v2294_v55, %v2276_v24  ;;  %v2292_v25 = vpop.permute.xlu1 %2291  ;;  %v2342_v24 = vmul.f32 %v15913_v47, %v2327_v19 }
0x1173   :  { %v2315_v37 = vmul.f32 %v2292_v25, %v2275_v57  ;;  %v2329_v57 = vrot.slane %v15839_v6, 7 }
0x1174   :  { %v15949_v8 = vadd.f32 %v2339_v31, %v2316_v44  ;;  %v2280_v44 = vsub.f32 1.0, %v15921_v3 }
0x1175   :  { %v15953_v2 = vadd.f32 %v2338_v30, %v2315_v37  ;;  %v2298_v12 = vpop.permute.xlu0 %2297  ;;  %v2345_v47 = vmul.f32 %v15917_v32, %v2329_v57 }
0x1176   :  { %v2363_v33 = vrot.slane %v15949_v8, 4  ;;  %v2318_v26 = vmul.f32 %v2298_v12, %v2278_v16  ;;  %v2296_v11 = vpop.permute.xlu1 %2295  ;;  %v15962_v52 = vsel %vm3044_vm14, %v15810_v17, %v15949_v8  ;;  %v2343_v16 = vmul.f32 %v15921_v3, %v2043_v35 }
0x1177   :  { %v2362_v4 = vrot.slane %v15953_v2, 5  ;;  %v2317_v15 = vmul.f32 %v2296_v11, %v2277_v49  ;;  %v15969_v21 = vsel %vm3044_vm14, %v15798_v54, %v15953_v2  ;;  %v2344_v54 = vmul.f32 %v15909_v48, %v2328_v29  ;;  %v16043_v11 = vld [vmem:[#allocation10] ss:$0 sm:$0xff] }
0x1178   :  { %v15971_v51 = vadd.f32 %v2341_v41, %v2318_v26  ;;  %v2282_v48 = vsub.f32 1.0, %v15917_v32 }
0x1179   :  { %v2364_v23 = vsel %vm721_vm2, %v2363_v33, %v2362_v4  ;;  %v15976_v17 = vadd.f32 %v2340_v10, %v2317_v15  ;;  %v2304_v38 = vpop.permute.xlu0 %2303 }
0x117a   :  { %v2367_v28 = vrot.slane %v15971_v51, 2  ;;  %v2321_v61 = vmul.f32 %v2304_v38, %v2281_v56  ;;  %v2300_v34 = vpop.permute.xlu1 %2299  ;;  %v15985_v22 = vsel %vm3044_vm14, %v15835_v7, %v15971_v51 }
0x117b   :  { %v2365_v5 = vrot.slane %v15976_v17, 3  ;;  %v2319_v43 = vmul.f32 %v2300_v34, %v2279_v62  ;;  %v15992_v13 = vsel %vm3044_vm14, %v15823_v9, %v15976_v17 }
0x117c   :  { %v15994_v55 = vadd.f32 %v2344_v54, %v2321_v61 }
0x117d   :  { %v2366_v63 = vsel %vm724_vm3, %v2365_v5, %v2364_v23  ;;  %v15999_v7 = vadd.f32 %v2342_v24, %v2319_v43  ;;  %v2306_v31 = vpop.permute.xlu0 %2305 }
0x117e   :  { %v2322_v25 = vmul.f32 %v2306_v31, %v2282_v48  ;;  %v2302_v30 = vpop.permute.xlu1 %2301  ;;  %v2368_v9 = vsel %vm727_vm4, %v2367_v28, %v2366_v63  ;;  %v16007_v37 = vsel %vm3044_vm14, %v15862_v27, %v15994_v55  ;;  %v2372_v27 = vrot.slane %v15994_v55, 7 }
0x117f   :  { %v2369_v6 = vrot.slane %v15999_v7, 1  ;;  %v2320_v58 = vmul.f32 %v2302_v30, %v2280_v44  ;;  %v16016_v32 = vsel %vm3044_vm14, %v15788_v60, %v15999_v7 }
0x1180   :  { %v16018_v12 = vadd.f32 %v2345_v47, %v2322_v25 }
0x1181   :  { %v16020_v49 = vadd.f32 %v2343_v16, %v2320_v58  ;;  %v2370_v20 = vsel %vm730_vm5, %v2369_v6, %v2368_v9 }
0x1182   :  { %v2374_v33 = vrot.slane %v16018_v12, 6  ;;  %v16028_v36 = vsel %vm3044_vm14, %v15852_v14, %v16018_v12 }
0x1183   :  { %v2371_v35 = vsel %vm733_vm6, %v16020_v49, %v2370_v20  ;;  %v16035_v60 = vsel %vm3044_vm14, %v15847_v18, %v16020_v49 }
0x1184   :  { %v2373_v3 = vsel %vm736_vm7, %v2372_v27, %v2371_v35 }
0x1185   :  { %v2375_v41 = vsel %vm739_vm8, %v2374_v33, %v2373_v3 }
0x1186   :  { %2376 = vrot.lane.b32.xlu1 %v2375_v41, %s14693_s11 }
0x11f8   :  { %v2377_v26 = vpop.permute.xlu1 %2376 }
0x11f9   :  { %12654 = vmatmul.mubr.msk.f32.vlgmr.msra.gmra.mrb[12].mxu0 %vm422_vm9, %v2377_v26 }
0x12cc   :  { %v2446_v14 = vpop.f32.mrb[12].mxu0 }
0x12cd   :  { %v2447_v4 = vadd.f32 %v16043_v11, %v2446_v14  ;;  %v12655_v10 = vpop.f32.mrb[13].mxu0 }
0x12cf   :  { %v2452_v15 = vrot.slane %v2447_v4, 3  ;;  %v2451_v18 = vrot.slane %v2447_v4, 2  ;;  %v2454_v56 = vrot.slane %v2447_v4, 5  ;;  %v2453_v29 = vrot.slane %v2447_v4, 4 }
0x12d0   :  { %v2456_v23 = vrot.slane %v2447_v4, 7  ;;  %v2455_v38 = vrot.slane %v2447_v4, 6  ;;  %v2457_v62 = vrot.slane %v2447_v4, 1  ;;  %v2472_v6 = vadd.f32 %v2447_v4, %v15104_v53 }
0x12d1   :  { %2524 = vrot.lane.b32.xlu1 %v2452_v15, %s14692_s16  ;;  %2522 = vrot.lane.b32.xlu0 %v2451_v18, %s14692_s16  ;;  %v2467_v19 = vadd.f32 %v2452_v15, %v15090_v40  ;;  %v2466_v28 = vadd.f32 %v2451_v18, %v15088_v39  ;;  %v2469_v61 = vadd.f32 %v2454_v56, %v15096_v45 }
0x12d2   :  { %v2468_v5 = vadd.f32 %v2453_v29, %v15093_v42  ;;  %v2471_v48 = vadd.f32 %v2456_v23, %v15101_v50  ;;  %v2470_v31 = vadd.f32 %v2455_v38, %v15098_v46  ;;  %v2473_v25 = vadd.f32 %v2457_v62, %v15108_v59 }
0x12d3   :  { %v2475_v54 = vsub.f32 0.0, %v2467_v19  ;;  %v2474_v34 = vsub.f32 0.0, %v2466_v28  ;;  %v2477_v43 = vsub.f32 0.0, %v2469_v61  ;;  %v2480_v33 = vsub.f32 0.0, %v2472_v6 }
0x12d4   :  { %v2476_v63 = vsub.f32 0.0, %v2468_v5  ;;  %v2479_v47 = vsub.f32 0.0, %v2471_v48  ;;  %v2478_v9 = vsub.f32 0.0, %v2470_v31  ;;  %v2481_v58 = vsub.f32 0.0, %v2473_v25 }
0x12d5   :  { %2528 = vrot.lane.b32.xlu1 %v2454_v56, %s14692_s16  ;;  %2526 = vrot.lane.b32.xlu0 %v2453_v29, %s14692_s16  ;;  %v2484_v24 = vmul.f32 1.442695, %v2475_v54  ;;  %v2482_v57 = vmul.f32 1.442695, %v2474_v34  ;;  %v2488_v44 = vmul.f32 1.442695, %v2477_v43 }
0x12d6   :  { %v2486_v30 = vmul.f32 1.442695, %v2476_v63  ;;  %v2492_v16 = vmul.f32 1.442695, %v2479_v47  ;;  %v2490_v20 = vmul.f32 1.442695, %v2478_v9 }
0x12d7   :  { %13649 = vpow2.f32 %v2484_v24  ;;  %v2496_v35 = vmul.f32 1.442695, %v2481_v58  ;;  %v2494_v3 = vmul.f32 1.442695, %v2480_v33 }
0x12d8   :  { %13651 = vpow2.f32 %v2482_v57 }
0x12d9   :  { %2532 = vrot.lane.b32.xlu1 %v2456_v23, %s14692_s16  ;;  %2530 = vrot.lane.b32.xlu0 %v2455_v38, %s14692_s16  ;;  %13653 = vpow2.f32 %v2488_v44 }
0x12da   :  { %13655 = vpow2.f32 %v2486_v30 }
0x12db   :  { %13657 = vpow2.f32 %v2492_v16 }
0x12dc   :  { %13659 = vpow2.f32 %v2490_v20 }
0x12dd   :  { %2534 = vrot.lane.b32.xlu1 %v2447_v4, %s14692_s16  ;;  %2536 = vrot.lane.b32.xlu0 %v2457_v62, %s14692_s16  ;;  %13661 = vpow2.f32 %v2496_v35 }
0x12de   :  { %13663 = vpow2.f32 %v2494_v3 }
0x12e1   :  { %v13650_v41 = vpop.eup %13649 }
0x12e2   :  { %v13652_v26 = vpop.eup %13651  ;;  %v2499_v14 = vadd.f32 1.0, %v13650_v41 }
0x12e3   :  { %v13654_v10 = vpop.eup %13653  ;;  %v2498_v15 = vadd.f32 1.0, %v13652_v26 }
0x12e4   :  { %v13656_v18 = vpop.eup %13655  ;;  %13665 = vrcp.f32 %v2499_v14  ;;  %v2501_v4 = vadd.f32 1.0, %v13654_v10 }
0x12e5   :  { %v13658_v56 = vpop.eup %13657  ;;  %13667 = vrcp.f32 %v2498_v15  ;;  %v2500_v29 = vadd.f32 1.0, %v13656_v18 }
0x12e6   :  { %v13660_v23 = vpop.eup %13659  ;;  %13669 = vrcp.f32 %v2501_v4  ;;  %v2503_v38 = vadd.f32 1.0, %v13658_v56 }
0x12e7   :  { %v13662_v62 = vpop.eup %13661  ;;  %13671 = vrcp.f32 %v2500_v29  ;;  %v2502_v19 = vadd.f32 1.0, %v13660_v23 }
0x12e8   :  { %v13664_v28 = vpop.eup %13663  ;;  %13673 = vrcp.f32 %v2503_v38  ;;  %v2505_v54 = vadd.f32 1.0, %v13662_v62 }
0x12e9   :  { %13675 = vrcp.f32 %v2502_v19  ;;  %v2504_v61 = vadd.f32 1.0, %v13664_v28 }
0x12ea   :  { %13677 = vrcp.f32 %v2505_v54 }
0x12eb   :  { %13679 = vrcp.f32 %v2504_v61 }
0x12ee   :  { %v16062_v34 = vpop.eup %13665 }
0x12ef   :  { %v16064_v5 = vpop.eup %13667 }
0x12f0   :  { %v16068_v63 = vpop.eup %13669 }
0x12f1   :  { %v16072_v31 = vpop.eup %13671 }
0x12f2   :  { %v16076_v9 = vpop.eup %13673 }
0x12f3   :  { %v16080_v6 = vpop.eup %13675 }
0x12f4   :  { %v16084_v35 = vpop.eup %13677 }
0x12f5   :  { %v16088_v3 = vpop.eup %13679 }
0x1343   :  { %v2525_v24 = vpop.permute.xlu1 %2524  ;;  %v2523_v43 = vpop.permute.xlu0 %2522 }
0x1344   :  { %v2547_v48 = vmul.f32 %v16062_v34, %v2525_v24  ;;  %v2546_v57 = vmul.f32 %v16064_v5, %v2523_v43 }
0x1346   :  { %2564 = vrot.lane.b32.xlu1 %v2547_v48, %s14692_s16  ;;  %2562 = vrot.lane.b32.xlu0 %v2546_v57, %s14692_s16 }
0x1347   :  { %v2529_v44 = vpop.permute.xlu1 %2528  ;;  %v2527_v47 = vpop.permute.xlu0 %2526 }
0x1348   :  { %v2549_v25 = vmul.f32 %v16068_v63, %v2529_v44  ;;  %v2548_v30 = vmul.f32 %v16072_v31, %v2527_v47 }
0x134a   :  { %2568 = vrot.lane.b32.xlu1 %v2549_v25, %s14692_s16  ;;  %2566 = vrot.lane.b32.xlu0 %v2548_v30, %s14692_s16 }
0x134b   :  { %v2533_v16 = vpop.permute.xlu1 %2532  ;;  %v2531_v58 = vpop.permute.xlu0 %2530 }
0x134c   :  { %v2551_v20 = vmul.f32 %v16076_v9, %v2533_v16  ;;  %v2550_v33 = vmul.f32 %v16080_v6, %v2531_v58 }
0x134e   :  { %2572 = vrot.lane.b32.xlu1 %v2551_v20, %s14692_s16  ;;  %2570 = vrot.lane.b32.xlu0 %v2550_v33, %s14692_s16 }
0x134f   :  { %v2535_v41 = vpop.permute.xlu1 %2534  ;;  %v2537_v26 = vpop.permute.xlu0 %2536 }
0x1350   :  { %v2552_v14 = vmul.f32 %v16088_v3, %v2535_v41  ;;  %v2553_v10 = vmul.f32 %v16084_v35, %v2537_v26  ;;  %v2603_v41 = vsub.f32 1.0, %v16062_v34  ;;  %v2651_v26 = vrot.slane %v15949_v8, 7 }
0x1352   :  { %2574 = vrot.lane.b32.xlu1 %v2552_v14, %s14692_s16  ;;  %2576 = vrot.lane.b32.xlu0 %v2553_v10, %s14692_s16  ;;  %v2602_v10 = vsub.f32 1.0, %v16064_v5 }
0x13b8   :  { %v2565_v15 = vpop.permute.xlu1 %2564  ;;  %v2563_v18 = vpop.permute.xlu0 %2562 }
0x13b9   :  { %v2587_v4 = vadd.f32 %v2565_v15, %v15090_v40  ;;  %v2586_v56 = vadd.f32 %v2563_v18, %v15088_v39  ;;  %v2650_v15 = vrot.slane %v15953_v2, 7  ;;  %v2666_v18 = vmul.f32 %v16062_v34, %v2651_v26 }
0x13ba   :  { %v2652_v2 = vrot.slane %v15976_v17, 7 }
0x13bb   :  { %13681 = vtanh.f32 %v2587_v4 }
0x13bc   :  { %13683 = vtanh.f32 %v2586_v56  ;;  %v2569_v29 = vpop.permute.xlu1 %2568  ;;  %v2567_v23 = vpop.permute.xlu0 %2566 }
0x13bd   :  { %v2589_v38 = vadd.f32 %v2569_v29, %v15096_v45  ;;  %v2588_v62 = vadd.f32 %v2567_v23, %v15093_v42  ;;  %v2665_v29 = vmul.f32 %v16064_v5, %v2650_v15 }
0x13bf   :  { %13685 = vtanh.f32 %v2589_v38 }
0x13c0   :  { %13687 = vtanh.f32 %v2588_v62  ;;  %v2573_v19 = vpop.permute.xlu1 %2572  ;;  %v2571_v28 = vpop.permute.xlu0 %2570  ;;  %v2605_v62 = vsub.f32 1.0, %v16068_v63 }
0x13c1   :  { %v2591_v54 = vadd.f32 %v2573_v19, %v15101_v50  ;;  %v2590_v61 = vadd.f32 %v2571_v28, %v15098_v46  ;;  %v2653_v19 = vrot.slane %v15971_v51, 7 }
0x13c3   :  { %13689 = vtanh.f32 %v2591_v54  ;;  %v2604_v54 = vsub.f32 1.0, %v16072_v31 }
0x13c4   :  { %13691 = vtanh.f32 %v2590_v61  ;;  %v2575_v24 = vpop.permute.xlu1 %2574  ;;  %v2577_v43 = vpop.permute.xlu0 %2576  ;;  %v2668_v61 = vmul.f32 %v16068_v63, %v2653_v19  ;;  %v2607_v63 = vsub.f32 1.0, %v16076_v9 }
0x13c5   :  { %v13682_v48 = vpop.eup %13681  ;;  %v2592_v57 = vadd.f32 %v2575_v24, %v15104_v53  ;;  %v2593_v44 = vadd.f32 %v2577_v43, %v15108_v59 }
0x13c6   :  { %v13684_v47 = vpop.eup %13683  ;;  %2620 = vrot.lane.b32.xlu1 %v13682_v48, %s14693_s11  ;;  %v2667_v48 = vmul.f32 %v16072_v31, %v2652_v2  ;;  %v2654_v31 = vrot.slane %v15999_v7, 7 }
0x13c7   :  { %13693 = vtanh.f32 %v2592_v57  ;;  %2618 = vrot.lane.b32.xlu0 %v13684_v47, %s14693_s11  ;;  %v2655_v47 = vrot.slane %v16020_v49, 7 }
0x13c8   :  { %13695 = vtanh.f32 %v2593_v44  ;;  %v2669_v26 = vmul.f32 %v16080_v6, %v2654_v31 }
0x13c9   :  { %v13686_v25 = vpop.eup %13685 }
0x13ca   :  { %v13688_v30 = vpop.eup %13687  ;;  %2624 = vrot.lane.b32.xlu1 %v13686_v25, %s14693_s11 }
0x13cb   :  { %2622 = vrot.lane.b32.xlu0 %v13688_v30, %s14693_s11 }
0x13cd   :  { %v13690_v16 = vpop.eup %13689 }
0x13ce   :  { %v13692_v58 = vpop.eup %13691  ;;  %2628 = vrot.lane.b32.xlu1 %v13690_v16, %s14693_s11  ;;  %v2606_v16 = vsub.f32 1.0, %v16080_v6 }
0x13cf   :  { %2626 = vrot.lane.b32.xlu0 %v13692_v58, %s14693_s11 }
0x13d1   :  { %v13694_v20 = vpop.eup %13693 }
0x13d2   :  { %v13696_v33 = vpop.eup %13695  ;;  %2630 = vrot.lane.b32.xlu1 %v13694_v20, %s14693_s11 }
0x13d3   :  { %2632 = vrot.lane.b32.xlu0 %v13696_v33, %s14693_s11 }
0x1438   :  { %v2621_v14 = vpop.permute.xlu1 %2620 }
0x1439   :  { %v2643_v4 = vmul.f32 %v2621_v14, %v2603_v41  ;;  %v2619_v56 = vpop.permute.xlu0 %2618 }
0x143a   :  { %v2642_v23 = vmul.f32 %v2619_v56, %v2602_v10  ;;  %v2656_v56 = vrot.slane %v16018_v12, 7 }
0x143b   :  { %v16116_v38 = vadd.f32 %v2666_v18, %v2643_v4  ;;  %v2609_v4 = vsub.f32 1.0, %v16084_v35 }
0x143c   :  { %v16120_v8 = vadd.f32 %v2665_v29, %v2642_v23  ;;  %v2625_v28 = vpop.permute.xlu1 %2624 }
0x143d   :  { %v2690_v34 = vrot.slane %v16116_v38, 5  ;;  %v2645_v5 = vmul.f32 %v2625_v28, %v2605_v62  ;;  %v2623_v24 = vpop.permute.xlu0 %2622  ;;  %v16129_v43 = vsel %vm3053_vm15, %v15962_v52, %v16116_v38  ;;  %v2672_v28 = vmul.f32 %v16084_v35, %v2656_v56 }
0x143e   :  { %v2689_v51 = vrot.slane %v16120_v8, 6  ;;  %v2644_v57 = vmul.f32 %v2623_v24, %v2604_v54  ;;  %v16136_v17 = vsel %vm3053_vm15, %v15969_v21, %v16120_v8  ;;  %v2670_v21 = vmul.f32 %v16076_v9, %v2655_v47 }
0x143f   :  { %v16138_v44 = vadd.f32 %v2668_v61, %v2645_v5  ;;  %v2608_v9 = vsub.f32 1.0, %v16088_v3 }
0x1440   :  { %v2691_v25 = vsel %vm721_vm2, %v2690_v34, %v2689_v51  ;;  %v16143_v52 = vadd.f32 %v2667_v48, %v2644_v57  ;;  %v2629_v30 = vpop.permute.xlu1 %2628 }
0x1441   :  { %v2694_v58 = vrot.slane %v16138_v44, 3  ;;  %v2647_v20 = vmul.f32 %v2629_v30, %v2607_v63  ;;  %v2627_v33 = vpop.permute.xlu0 %2626  ;;  %v16152_v41 = vsel %vm3053_vm15, %v15985_v22, %v16138_v44 }
0x1442   :  { %v2692_v49 = vrot.slane %v16143_v52, 4  ;;  %v2646_v14 = vmul.f32 %v2627_v33, %v2606_v16  ;;  %v16159_v7 = vsel %vm3053_vm15, %v15992_v13, %v16143_v52  ;;  %v2671_v13 = vmul.f32 %v16088_v3, %v2372_v27 }
0x1443   :  { %v16161_v10 = vadd.f32 %v2670_v21, %v2647_v20 }
0x1444   :  { %v2693_v15 = vsel %vm724_vm3, %v2692_v49, %v2691_v25  ;;  %v16165_v18 = vadd.f32 %v2669_v26, %v2646_v14  ;;  %v2631_v22 = vpop.permute.xlu1 %2630 }
0x1445   :  { %v2698_v6 = vrot.slane %v16161_v10, 1  ;;  %v2648_v29 = vmul.f32 %v2631_v22, %v2608_v9  ;;  %v2633_v23 = vpop.permute.xlu0 %2632  ;;  %v2695_v62 = vsel %vm727_vm4, %v2694_v58, %v2693_v15  ;;  %v16179_v2 = vsel %vm3053_vm15, %v16035_v60, %v16161_v10 }
0x1446   :  { %v2696_v19 = vrot.slane %v16165_v18, 2  ;;  %v2649_v54 = vmul.f32 %v2633_v23, %v2609_v4  ;;  %v16186_v55 = vsel %vm3053_vm15, %v16016_v32, %v16165_v18 }
0x1447   :  { %v16181_v12 = vadd.f32 %v2671_v13, %v2648_v29 }
0x1448   :  { %v16188_v27 = vadd.f32 %v2672_v28, %v2649_v54  ;;  %v2697_v3 = vsel %vm730_vm5, %v2696_v19, %v2695_v62 }
0x1449   :  { %v2699_v34 = vsel %vm733_vm6, %v2698_v6, %v2697_v3  ;;  %v16195_v35 = vsel %vm3053_vm15, %v16007_v37, %v16181_v12 }
0x144a   :  { %v2701_v60 = vrot.slane %v16188_v27, 7  ;;  %v2700_v61 = vsel %vm736_vm7, %v16181_v12, %v2699_v34  ;;  %v16203_v32 = vsel %vm3053_vm15, %v16028_v36, %v16188_v27 }
0x144c   :  { %v2702_v5 = vsel %vm739_vm8, %v2701_v60, %v2700_v61 }
0x144d   :  { %2703 = vrot.lane.b32.xlu0 %v2702_v5, %s14693_s11 }
0x14bf   :  { %v2704_v24 = vpop.permute.xlu0 %2703 }
0x14c0   :  { %12665 = vmatmul.mubr.msk.f32.vlgmr.msra.gmra.mrb[8].mxu1 %vm422_vm9, %v2704_v24 }
0x14c1   :  { %12695 = vmatprep.mubr.msk.f32.mxu1 %vm14690_vm0, %v18665_v1 }
0x1593   :  { %v2773_v37 = vpop.f32.mrb[8].mxu1 }
0x1594   :  { %v2774_v51 = vadd.f32 %v16043_v11, %v2773_v37  ;;  %v12666_v48 = vpop.f32.mrb[9].mxu1 }
0x1596   :  { %v2779_v57 = vrot.slane %v2774_v51, 2  ;;  %v2778_v63 = vrot.slane %v2774_v51, 1  ;;  %v2781_v36 = vrot.slane %v2774_v51, 4  ;;  %v2780_v47 = vrot.slane %v2774_v51, 3 }
0x1597   :  { %v2783_v25 = vrot.slane %v2774_v51, 6  ;;  %v2782_v30 = vrot.slane %v2774_v51, 5  ;;  %v2784_v11 = vrot.slane %v2774_v51, 7  ;;  %v2800_v23 = vadd.f32 %v2774_v51, %v15108_v59 }
0x1598   :  { %2851 = vrot.lane.b32.xlu0 %v2779_v57, %s14692_s16  ;;  %2849 = vrot.lane.b32.xlu1 %v2778_v63, %s14692_s16  ;;  %v2794_v16 = vadd.f32 %v2779_v57, %v15090_v40  ;;  %v2793_v31 = vadd.f32 %v2778_v63, %v15088_v39  ;;  %v2796_v21 = vadd.f32 %v2781_v36, %v15096_v45 }
0x1599   :  { %v2795_v33 = vadd.f32 %v2780_v47, %v15093_v42  ;;  %v2798_v14 = vadd.f32 %v2783_v25, %v15101_v50  ;;  %v2797_v22 = vadd.f32 %v2782_v30, %v15098_v46  ;;  %v2799_v6 = vadd.f32 %v2784_v11, %v15104_v53 }
0x159a   :  { %v2802_v58 = vsub.f32 0.0, %v2794_v16  ;;  %v2801_v20 = vsub.f32 0.0, %v2793_v31  ;;  %v2804_v26 = vsub.f32 0.0, %v2796_v21  ;;  %v2808_v54 = vsub.f32 0.0, %v2800_v23 }
0x159b   :  { %v2803_v15 = vsub.f32 0.0, %v2795_v33  ;;  %v2806_v56 = vsub.f32 0.0, %v2798_v14  ;;  %v2805_v29 = vsub.f32 0.0, %v2797_v22  ;;  %v2807_v19 = vsub.f32 0.0, %v2799_v6 }
0x159c   :  { %2855 = vrot.lane.b32.xlu0 %v2781_v36, %s14692_s16  ;;  %2853 = vrot.lane.b32.xlu1 %v2780_v47, %s14692_s16  ;;  %v2811_v49 = vmul.f32 1.442695, %v2802_v58  ;;  %v2809_v9 = vmul.f32 1.442695, %v2801_v20  ;;  %v2815_v4 = vmul.f32 1.442695, %v2804_v26 }
0x159d   :  { %v2813_v13 = vmul.f32 1.442695, %v2803_v15  ;;  %v2819_v62 = vmul.f32 1.442695, %v2806_v56  ;;  %v2817_v28 = vmul.f32 1.442695, %v2805_v29 }
0x159e   :  { %13697 = vpow2.f32 %v2811_v49  ;;  %v2821_v3 = vmul.f32 1.442695, %v2807_v19  ;;  %v2823_v34 = vmul.f32 1.442695, %v2808_v54 }
0x159f   :  { %13699 = vpow2.f32 %v2809_v9 }
0x15a0   :  { %2859 = vrot.lane.b32.xlu0 %v2783_v25, %s14692_s16  ;;  %2857 = vrot.lane.b32.xlu1 %v2782_v30, %s14692_s16  ;;  %13701 = vpow2.f32 %v2815_v4 }
0x15a1   :  { %13703 = vpow2.f32 %v2813_v13 }
0x15a2   :  { %13705 = vpow2.f32 %v2819_v62 }
0x15a3   :  { %13707 = vpow2.f32 %v2817_v28 }
0x15a4   :  { %2863 = vrot.lane.b32.xlu0 %v2774_v51, %s14692_s16  ;;  %2861 = vrot.lane.b32.xlu1 %v2784_v11, %s14692_s16  ;;  %13709 = vpow2.f32 %v2821_v3 }
0x15a5   :  { %13711 = vpow2.f32 %v2823_v34 }
0x15a8   :  { %v13698_v61 = vpop.eup %13697 }
0x15a9   :  { %v13700_v5 = vpop.eup %13699  ;;  %v2826_v24 = vadd.f32 1.0, %v13698_v61 }
0x15aa   :  { %v13702_v37 = vpop.eup %13701  ;;  %v2825_v48 = vadd.f32 1.0, %v13700_v5 }
0x15ab   :  { %v13704_v57 = vpop.eup %13703  ;;  %13713 = vrcp.f32 %v2826_v24  ;;  %v2828_v51 = vadd.f32 1.0, %v13702_v37 }
0x15ac   :  { %v13706_v63 = vpop.eup %13705  ;;  %13715 = vrcp.f32 %v2825_v48  ;;  %v2827_v36 = vadd.f32 1.0, %v13704_v57 }
0x15ad   :  { %v13708_v47 = vpop.eup %13707  ;;  %13717 = vrcp.f32 %v2828_v51  ;;  %v2830_v25 = vadd.f32 1.0, %v13706_v63 }
0x15ae   :  { %v13710_v30 = vpop.eup %13709  ;;  %13719 = vrcp.f32 %v2827_v36  ;;  %v2829_v11 = vadd.f32 1.0, %v13708_v47 }
0x15af   :  { %v13712_v16 = vpop.eup %13711  ;;  %13721 = vrcp.f32 %v2830_v25  ;;  %v2831_v31 = vadd.f32 1.0, %v13710_v30 }
0x15b0   :  { %13723 = vrcp.f32 %v2829_v11  ;;  %v2832_v58 = vadd.f32 1.0, %v13712_v16 }
0x15b1   :  { %13725 = vrcp.f32 %v2831_v31 }
0x15b2   :  { %13727 = vrcp.f32 %v2832_v58 }
0x15b5   :  { %v16229_v21 = vpop.eup %13713 }
0x15b6   :  { %v16231_v20 = vpop.eup %13715 }
0x15b7   :  { %v16235_v9 = vpop.eup %13717 }
0x15b8   :  { %v16239_v15 = vpop.eup %13719 }
0x15b9   :  { %v16243_v13 = vpop.eup %13721 }
0x15ba   :  { %v16247_v29 = vpop.eup %13723 }
0x15bb   :  { %v16251_v54 = vpop.eup %13725 }
0x15bc   :  { %v16255_v3 = vpop.eup %13727 }
0x160a   :  { %v2852_v33 = vpop.permute.xlu0 %2851  ;;  %v2850_v49 = vpop.permute.xlu1 %2849 }
0x160b   :  { %v2874_v26 = vmul.f32 %v16229_v21, %v2852_v33  ;;  %v2873_v14 = vmul.f32 %v16231_v20, %v2850_v49 }
0x160d   :  { %2891 = vrot.lane.b32.xlu0 %v2874_v26, %s14692_s16  ;;  %2889 = vrot.lane.b32.xlu1 %v2873_v14, %s14692_s16 }
0x160e   :  { %v2856_v22 = vpop.permute.xlu0 %2855  ;;  %v2854_v4 = vpop.permute.xlu1 %2853 }
0x160f   :  { %v2876_v56 = vmul.f32 %v16235_v9, %v2856_v22  ;;  %v2875_v6 = vmul.f32 %v16239_v15, %v2854_v4  ;;  %v3071_v22 = vld [vmem:[#allocation11] sm:$0xff] }
0x1611   :  { %2895 = vrot.lane.b32.xlu0 %v2876_v56, %s14692_s16  ;;  %2893 = vrot.lane.b32.xlu1 %v2875_v6, %s14692_s16  ;;  %v3072_v56 = vld [vmem:[#allocation11 + $0x8] sm:$0xff]  ;;  %v3073_v6 = vld [vmem:[#allocation11 + $0x10] sm:$0xff] }
0x1612   :  { %v2860_v23 = vpop.permute.xlu0 %2859  ;;  %v2858_v62 = vpop.permute.xlu1 %2857 }
0x1613   :  { %v2878_v19 = vmul.f32 %v16243_v13, %v2860_v23  ;;  %v2877_v28 = vmul.f32 %v16247_v29, %v2858_v62  ;;  %v3074_v23 = vld [vmem:[#allocation11 + $0x18] sm:$0xff] }
0x1615   :  { %2899 = vrot.lane.b32.xlu0 %v2878_v19, %s14692_s16  ;;  %2897 = vrot.lane.b32.xlu1 %v2877_v28, %s14692_s16  ;;  %v13238_v19 = vpack.c.bf16 %v3072_v56, %v3071_v22 }
0x1616   :  { %v2864_v34 = vpop.permute.xlu0 %2863  ;;  %v2862_v61 = vpop.permute.xlu1 %2861 }
0x1617   :  { %v2880_v5 = vmul.f32 %v16255_v3, %v2864_v34  ;;  %v2879_v24 = vmul.f32 %v16251_v54, %v2862_v61  ;;  %v13242_v34 = vpack.c.bf16 %v3074_v23, %v3073_v6  ;;  %13239 = vmatprep.subr.bf16.mxu0 %v13238_v19 }
0x1618   :  { %13241 = vmatpush3.bf16.msra.mxu0 %v13238_v19  ;;  %v2983_v19 = vrot.slane %v16181_v12, 7 }
0x1619   :  { %2903 = vrot.lane.b32.xlu0 %v2880_v5, %s14692_s16  ;;  %2901 = vrot.lane.b32.xlu1 %v2879_v24, %s14692_s16  ;;  %v2930_v24 = vsub.f32 1.0, %v16229_v21 }
0x161a   :  { %13243 = vmatprep.subr.bf16.mxu0 %v13242_v34 }
0x161c   :  { %13245 = vmatpush3.bf16.msra.mxu0 %v13242_v34  ;;  %v2998_v34 = vmul.f32 %v16251_v54, %v2983_v19 }
0x161d   :  { %13258 = vmatprep.subr.bf16.mxu0 %v18663_v0 }
0x167f   :  { %v2892_v37 = vpop.permute.xlu0 %2891  ;;  %v2890_v48 = vpop.permute.xlu1 %2889 }
0x1680   :  { %v2914_v57 = vadd.f32 %v2892_v37, %v15090_v40  ;;  %v2913_v51 = vadd.f32 %v2890_v48, %v15088_v39  ;;  %v2978_v37 = vrot.slane %v16116_v38, 7 }
0x1682   :  { %13729 = vtanh.f32 %v2914_v57  ;;  %v2929_v57 = vsub.f32 1.0, %v16231_v20 }
0x1683   :  { %13731 = vtanh.f32 %v2913_v51  ;;  %v2896_v63 = vpop.permute.xlu0 %2895  ;;  %v2894_v36 = vpop.permute.xlu1 %2893  ;;  %v2977_v51 = vrot.slane %v16120_v8, 7 }
0x1684   :  { %v2916_v47 = vadd.f32 %v2896_v63, %v15096_v45  ;;  %v2915_v25 = vadd.f32 %v2894_v36, %v15093_v42  ;;  %v3227_v42 = vld [vmem:[#allocation14] sm:$0xff]  ;;  %v2993_v63 = vmul.f32 %v16229_v21, %v2978_v37 }
0x1686   :  { %13733 = vtanh.f32 %v2916_v47 }
0x1687   :  { %13735 = vtanh.f32 %v2915_v25  ;;  %v2900_v30 = vpop.permute.xlu0 %2899  ;;  %v2898_v11 = vpop.permute.xlu1 %2897  ;;  %v2992_v25 = vmul.f32 %v16231_v20, %v2977_v51 }
0x1688   :  { %v2918_v16 = vadd.f32 %v2900_v30, %v15101_v50  ;;  %v2917_v31 = vadd.f32 %v2898_v11, %v15098_v46  ;;  %v3228_v50 = vld [vmem:[#allocation14 + $0x8] sm:$0xff] }
0x1689   :  { %v16271_v46 = vpack.c.bf16 %v3228_v50, %v3227_v42 }
0x168a   :  { %13737 = vtanh.f32 %v2918_v16  ;;  %v2932_v16 = vsub.f32 1.0, %v16235_v9 }
0x168b   :  { %13739 = vtanh.f32 %v2917_v31  ;;  %v2904_v40 = vpop.permute.xlu0 %2903  ;;  %v2902_v39 = vpop.permute.xlu1 %2901  ;;  %13248 = vmatpush3.bf16.msra.mxu1 %v16271_v46  ;;  %v2980_v31 = vrot.slane %v16138_v44, 7 }
0x168c   :  { %v13730_v58 = vpop.eup %13729  ;;  %v2920_v33 = vadd.f32 %v2904_v40, %v15108_v59  ;;  %v2919_v49 = vadd.f32 %v2902_v39, %v15104_v53  ;;  %v3229_v53 = vld [vmem:[#allocation14 + $0x10] sm:$0xff]  ;;  %v3230_v59 = vld [vmem:[#allocation14 + $0x18] sm:$0xff]  ;;  %13249 = vmatprep.subr.bf16.mxu1 %v18663_v0  ;;  %v2931_v39 = vsub.f32 1.0, %v16239_v15 }
0x168d   :  { %v13732_v45 = vpop.eup %13731  ;;  %2947 = vrot.lane.b32.xlu0 %v13730_v58, %s14693_s11  ;;  %v16277_v4 = vpack.c.bf16 %v3230_v59, %v3229_v53  ;;  %v2979_v58 = vrot.slane %v16143_v52, 7  ;;  %v2995_v8 = vmul.f32 %v16235_v9, %v2980_v31  ;;  %v2934_v52 = vsub.f32 1.0, %v16243_v13 }
0x168e   :  { %13741 = vtanh.f32 %v2920_v33  ;;  %2945 = vrot.lane.b32.xlu1 %v13732_v45, %s14693_s11  ;;  %v2982_v9 = vrot.slane %v16161_v10, 7 }
0x168f   :  { %13743 = vtanh.f32 %v2919_v49  ;;  %13251 = vmatpush3.bf16.msra.mxu1 %v16277_v4  ;;  %v2994_v49 = vmul.f32 %v16239_v15, %v2979_v58 }
0x1690   :  { %v13734_v26 = vpop.eup %13733  ;;  %13252 = vmatprep.subr.bf16.mxu1 %v18663_v0  ;;  %v2997_v15 = vmul.f32 %v16243_v13, %v2982_v9 }
0x1691   :  { %v13736_v14 = vpop.eup %13735  ;;  %2951 = vrot.lane.b32.xlu0 %v13734_v26, %s14693_s11 }
0x1692   :  { %2949 = vrot.lane.b32.xlu1 %v13736_v14, %s14693_s11  ;;  %12696 = vmatmul.mubr.f32.vlgmr.msra.gmra.mrb[10].mxu1 %v18665_v1  ;;  %v2933_v14 = vsub.f32 1.0, %v16247_v29 }
0x1693   :  { %13254 = vmatpush3.bf16.msra.mxu1 %v16271_v46  ;;  %12706 = vmatprep.mubr.msk.f32.mxu1 %vm14690_vm0, %v18665_v1 }
0x1694   :  { %v13738_v62 = vpop.eup %13737  ;;  %13255 = vmatprep.subr.bf16.mxu1 %v18663_v0 }
0x1695   :  { %v13740_v28 = vpop.eup %13739  ;;  %2955 = vrot.lane.b32.xlu0 %v13738_v62, %s14693_s11  ;;  %v2935_v62 = vsub.f32 1.0, %v16251_v54 }
0x1696   :  { %2953 = vrot.lane.b32.xlu1 %v13740_v28, %s14693_s11 }
0x1697   :  { %13257 = vmatpush3.bf16.msra.mxu1 %v16277_v4 }
0x1698   :  { %v13742_v61 = vpop.eup %13741  ;;  %13264 = vmatprep.subr.bf16.mxu1 %v18663_v0 }
0x1699   :  { %v13744_v5 = vpop.eup %13743  ;;  %2959 = vrot.lane.b32.xlu0 %v13742_v61, %s14693_s11 }
0x169a   :  { %2957 = vrot.lane.b32.xlu1 %v13744_v5, %s14693_s11 }
0x16ff   :  { %v2948_v48 = vpop.permute.xlu0 %2947 }
0x1700   :  { %v2970_v36 = vmul.f32 %v2948_v48, %v2930_v24  ;;  %v2946_v47 = vpop.permute.xlu1 %2945 }
0x1701   :  { %v2969_v30 = vmul.f32 %v2946_v47, %v2929_v57 }
0x1702   :  { %v3001_v11 = vadd.f32 %v2993_v63, %v2970_v36 }
0x1703   :  { %v3000_v40 = vadd.f32 %v2992_v25, %v2969_v30  ;;  %v2952_v38 = vpop.permute.xlu0 %2951 }
0x1704   :  { %v2972_v21 = vmul.f32 %v2952_v38, %v2932_v16  ;;  %v2950_v33 = vpop.permute.xlu1 %2949  ;;  %v3064_v20 = vsel %vm3062_vm1, %v16129_v43, %v3001_v11  ;;  %v2981_v43 = vrot.slane %v16165_v18, 7  ;;  %v2936_v18 = vsub.f32 1.0, %v16255_v3  ;;  %v12129_v38 = vld [vmem:[#allocation13] ss:$0 sm:$0xff] }
0x1705   :  { %v2971_v45 = vmul.f32 %v2950_v33, %v2931_v39  ;;  %3092 = vrot.lane.b32.xlu0 %v3064_v20, %s14693_s11  ;;  %v3063_v44 = vsel %vm3062_vm1, %v16136_v17, %v3000_v40 }
0x1706   :  { %v3003_v42 = vadd.f32 %v2995_v8, %v2972_v21  ;;  %3090 = vrot.lane.b32.xlu1 %v3063_v44, %s14693_s11  ;;  %v2996_v22 = vmul.f32 %v16247_v29, %v2981_v43 }
0x1707   :  { %v3002_v50 = vadd.f32 %v2994_v49, %v2971_v45  ;;  %v2956_v26 = vpop.permute.xlu0 %2955 }
0x1708   :  { %v2974_v53 = vmul.f32 %v2956_v26, %v2934_v52  ;;  %v2954_v59 = vpop.permute.xlu1 %2953  ;;  %v3066_v17 = vsel %vm3062_vm1, %v16152_v41, %v3003_v42  ;;  %v2999_v41 = vmul.f32 %v16255_v3, %v2701_v60  ;;  %v16342_v60 = vld [vmem:[#allocation16] ss:$0 sm:$0xff] }
0x1709   :  { %v2973_v56 = vmul.f32 %v2954_v59, %v2933_v14  ;;  %3096 = vrot.lane.b32.xlu0 %v3066_v17, %s14693_s11  ;;  %v3065_v10 = vsel %vm3062_vm1, %v16159_v7, %v3002_v50 }
0x170a   :  { %v3005_v6 = vadd.f32 %v2997_v15, %v2974_v53  ;;  %3094 = vrot.lane.b32.xlu1 %v3065_v10, %s14693_s11 }
0x170b   :  { %v3004_v23 = vadd.f32 %v2996_v22, %v2973_v56  ;;  %v2960_v13 = vpop.permute.xlu0 %2959 }
0x170c   :  { %v2976_v29 = vmul.f32 %v2960_v13, %v2936_v18  ;;  %v2958_v28 = vpop.permute.xlu1 %2957  ;;  %v3068_v7 = vsel %vm3062_vm1, %v16179_v2, %v3005_v6 }
0x170d   :  { %v2975_v61 = vmul.f32 %v2958_v28, %v2935_v62  ;;  %3100 = vrot.lane.b32.xlu0 %v3068_v7, %s14693_s11  ;;  %v3067_v5 = vsel %vm3062_vm1, %v16186_v55, %v3004_v23 }
0x170e   :  { %v3007_v24 = vadd.f32 %v2999_v41, %v2976_v29  ;;  %3098 = vrot.lane.b32.xlu1 %v3067_v5, %s14693_s11 }
0x170f   :  { %v3006_v12 = vadd.f32 %v2998_v34, %v2975_v61 }
0x1710   :  { %v3070_v27 = vsel %vm3062_vm1, %v16203_v32, %v3007_v24 }
0x1711   :  { %3104 = vrot.lane.b32.xlu0 %v3070_v27, %s14693_s11  ;;  %v3069_v2 = vsel %vm3062_vm1, %v16195_v35, %v3006_v12 }
0x1712   :  { %3102 = vrot.lane.b32.xlu1 %v3069_v2, %s14693_s11 }
0x1765   :  { %v3304_v54 = vpop.f32.mrb[10].mxu1 }
0x1766   :  { %v16345_v3 = vadd.f32 %v16342_v60, %v3304_v54  ;;  %v12697_v55 = vpop.f32.mrb[11].mxu1 }
0x1768   :  { %v3310_v37 = vrot.slane %v16345_v3, 2  ;;  %v3309_v48 = vrot.slane %v16345_v3, 1  ;;  %v3311_v32 = vrot.slane %v16345_v3, 3  ;;  %v3313_v35 = vrot.slane %v16345_v3, 5 }
0x1769   :  { %v3312_v57 = vrot.slane %v16345_v3, 4  ;;  %v3315_v36 = vrot.slane %v16345_v3, 7  ;;  %v3314_v47 = vrot.slane %v16345_v3, 6 }
0x176a   :  { %3384 = vrot.lane.b32.xlu0 %v3310_v37, %s14692_s16  ;;  %3382 = vrot.lane.b32.xlu1 %v3309_v48, %s14692_s16 }
0x176e   :  { %3386 = vrot.lane.b32.xlu0 %v3311_v32, %s14692_s16  ;;  %3380 = vrot.lane.b32.xlu1 %v16345_v3, %s14692_s16 }
0x1772   :  { %3390 = vrot.lane.b32.xlu0 %v3313_v35, %s14692_s16  ;;  %3388 = vrot.lane.b32.xlu1 %v3312_v57, %s14692_s16 }
0x1776   :  { %3394 = vrot.lane.b32.xlu0 %v3315_v36, %s14692_s16  ;;  %3392 = vrot.lane.b32.xlu1 %v3314_v47, %s14692_s16 }
0x1777   :  { %v3093_v51 = vpop.permute.xlu0 %3092 }
0x1778   :  { %v3091_v63 = vpop.permute.xlu1 %3090 }
0x1779   :  { %12675 = vmatprep.mubr.msk.f32.mxu0 %vm422_vm9, %v3091_v63 }
0x177a   :  { %12676 = vmatmul.mubr.msk.f32.vlgmr.msra.gmra.mrb[14].mxu0 %vm422_vm9, %v3093_v51 }
0x177b   :  { %v3097_v25 = vpop.permute.xlu0 %3096  ;;  %13260 = vmatpush3.bf16.msra.mxu0 %v16271_v46 }
0x177c   :  { %v3095_v30 = vpop.permute.xlu1 %3094  ;;  %13261 = vmatprep.subr.bf16.mxu0 %v18663_v0 }
0x177d   :  { %12678 = vmatprep.mubr.msk.f32.mxu0 %vm422_vm9, %v3095_v30 }
0x177e   :  { %12679 = vmatmul.mubr.msk.f32.gmra.mrb[16].mxu0 %vm422_vm9, %v3097_v25 }
0x177f   :  { %v3101_v11 = vpop.permute.xlu0 %3100  ;;  %13263 = vmatpush3.bf16.msra.mxu0 %v16277_v4 }
0x1780   :  { %v3099_v16 = vpop.permute.xlu1 %3098  ;;  %13270 = vmatprep.subr.bf16.mxu0 %v18663_v0 }
0x1781   :  { %12681 = vmatprep.mubr.msk.f32.mxu0 %vm422_vm9, %v3099_v16 }
0x1782   :  { %12682 = vmatmul.mubr.msk.f32.gmra.mrb[18].mxu0 %vm422_vm9, %v3101_v11 }
0x1783   :  { %v3105_v31 = vpop.permute.xlu0 %3104 }
0x1784   :  { %v3103_v40 = vpop.permute.xlu1 %3102 }
0x1785   :  { %12684 = vmatprep.mubr.msk.f32.mxu0 %vm422_vm9, %v3103_v40 }
0x1786   :  { %12685 = vmatmul.mubr.msk.f32.gmra.mrb[20].mxu0 %vm422_vm9, %v3105_v31 }
0x1787   :  { %12717 = vmatprep.mubr.msk.f32.mxu0 %vm14690_vm0, %v18665_v1 }
0x17dc   :  { %v3385_v30 = vpop.permute.xlu0 %3384 }
0x184d   :  { %v12677_v39 = vpop.f32.mrb[14].mxu0 }
0x184e   :  { %v16377_v58 = vadd.f32 %v12677_v39, %v12129_v38  ;;  %v3188_v8 = vpop.f32.mrb[15].mxu0 }
0x184f   :  { %v16379_v21 = vadd.f32 %v12129_v38, %v3188_v8 }
0x1850   :  { %v3325_v33 = vadd.f32 %v3309_v48, %v16377_v58 }
0x1851   :  { %v12680_v20 = vpop.f32.mrb[16].mxu0  ;;  %v3324_v49 = vadd.f32 %v16345_v3, %v16379_v21 }
0x1852   :  { %v16384_v45 = vadd.f32 %v12680_v20, %v12129_v38  ;;  %v3198_v44 = vpop.f32.mrb[17].mxu0  ;;  %v3333_v42 = vsub.f32 0.0, %v3325_v33 }
0x1853   :  { %v16386_v52 = vadd.f32 %v12129_v38, %v3198_v44  ;;  %v3332_v9 = vsub.f32 0.0, %v3324_v49  ;;  %v3387_v49 = vpop.permute.xlu0 %3386 }
0x1854   :  { %v3342_v50 = vmul.f32 1.442695, %v3333_v42  ;;  %v3327_v26 = vadd.f32 %v3311_v32, %v16384_v45 }
0x1855   :  { %v12683_v14 = vpop.f32.mrb[18].mxu0  ;;  %v3326_v43 = vadd.f32 %v3310_v37, %v16386_v52  ;;  %v3340_v15 = vmul.f32 1.442695, %v3332_v9 }
0x1856   :  { %v16390_v53 = vadd.f32 %v12683_v14, %v12129_v38  ;;  %v3208_v59 = vpop.f32.mrb[19].mxu0  ;;  %13745 = vpow2.f32 %v3342_v50  ;;  %v3335_v17 = vsub.f32 0.0, %v3327_v26 }
0x1857   :  { %v16392_v22 = vadd.f32 %v12129_v38, %v3208_v59  ;;  %v3334_v56 = vsub.f32 0.0, %v3326_v43  ;;  %13747 = vpow2.f32 %v3340_v15  ;;  %v3391_v15 = vpop.permute.xlu0 %3390 }
0x1858   :  { %v3346_v10 = vmul.f32 1.442695, %v3335_v17  ;;  %v3329_v6 = vadd.f32 %v3313_v35, %v16390_v53 }
0x1859   :  { %v12686_v18 = vpop.f32.mrb[20].mxu0  ;;  %v3344_v23 = vmul.f32 1.442695, %v3334_v56  ;;  %v3328_v13 = vadd.f32 %v3312_v57, %v16392_v22 }
0x185a   :  { %v16396_v62 = vadd.f32 %v12686_v18, %v12129_v38  ;;  %v3218_v19 = vpop.f32.mrb[21].mxu0  ;;  %13749 = vpow2.f32 %v3346_v10  ;;  %v3337_v41 = vsub.f32 0.0, %v3329_v6 }
0x185b   :  { %v16398_v29 = vadd.f32 %v12129_v38, %v3218_v19  ;;  %13751 = vpow2.f32 %v3344_v23  ;;  %v3336_v28 = vsub.f32 0.0, %v3328_v13  ;;  %v3395_v18 = vpop.permute.xlu0 %3394 }
0x185c   :  { %v3350_v7 = vmul.f32 1.442695, %v3337_v41  ;;  %v3331_v34 = vadd.f32 %v3315_v36, %v16396_v62 }
0x185d   :  { %v3348_v61 = vmul.f32 1.442695, %v3336_v28  ;;  %v3330_v5 = vadd.f32 %v3314_v47, %v16398_v29  ;;  %v3383_v47 = vpop.permute.xlu1 %3382 }
0x185e   :  { %13753 = vpow2.f32 %v3350_v7  ;;  %v3339_v24 = vsub.f32 0.0, %v3331_v34 }
0x185f   :  { %13755 = vpow2.f32 %v3348_v61  ;;  %v3338_v12 = vsub.f32 0.0, %v3330_v5 }
0x1860   :  { %v13746_v27 = vpop.eup %13745  ;;  %v3354_v2 = vmul.f32 1.442695, %v3339_v24 }
0x1861   :  { %v13748_v54 = vpop.eup %13747  ;;  %v3357_v3 = vadd.f32 1.0, %v13746_v27  ;;  %v3352_v55 = vmul.f32 1.442695, %v3338_v12  ;;  %v3381_v8 = vpop.permute.xlu1 %3380 }
0x1862   :  { %v3356_v37 = vadd.f32 1.0, %v13748_v54  ;;  %13757 = vpow2.f32 %v3354_v2 }
0x1863   :  { %13759 = vrcp.f32 %v3357_v3 }
0x1864   :  { %v13750_v48 = vpop.eup %13749  ;;  %13761 = vrcp.f32 %v3356_v37 }
0x1865   :  { %v13752_v32 = vpop.eup %13751  ;;  %v3359_v35 = vadd.f32 1.0, %v13750_v48  ;;  %13763 = vpow2.f32 %v3352_v55  ;;  %v3389_v14 = vpop.permute.xlu1 %3388 }
0x1866   :  { %v3358_v57 = vadd.f32 1.0, %v13752_v32 }
0x1867   :  { %13765 = vrcp.f32 %v3359_v35 }
0x1868   :  { %v13754_v51 = vpop.eup %13753  ;;  %13767 = vrcp.f32 %v3358_v57 }
0x1869   :  { %v13756_v63 = vpop.eup %13755  ;;  %v3361_v36 = vadd.f32 1.0, %v13754_v51  ;;  %v3393_v6 = vpop.permute.xlu1 %3392 }
0x186a   :  { %v3360_v25 = vadd.f32 1.0, %v13756_v63 }
0x186c   :  { %v13758_v11 = vpop.eup %13757  ;;  %13769 = vrcp.f32 %v3360_v25 }
0x186d   :  { %v16402_v16 = vpop.eup %13759  ;;  %13771 = vrcp.f32 %v3361_v36  ;;  %v3363_v31 = vadd.f32 1.0, %v13758_v11 }
0x186e   :  { %v16404_v40 = vpop.eup %13761  ;;  %v3405_v38 = vmul.f32 %v16402_v16, %v3383_v47  ;;  %v3461_v11 = vsub.f32 1.0, %v16402_v16 }
0x186f   :  { %v13764_v39 = vpop.eup %13763  ;;  %13773 = vrcp.f32 %v3363_v31  ;;  %v3404_v42 = vmul.f32 %v16404_v40, %v3381_v8  ;;  %v3460_v8 = vsub.f32 1.0, %v16404_v40 }
0x1870   :  { %v3362_v33 = vadd.f32 1.0, %v13764_v39  ;;  %3422 = vrot.lane.b32.xlu1 %v3405_v38, %s14692_s16 }
0x1871   :  { %v16408_v20 = vpop.eup %13765 }
0x1872   :  { %v3407_v44 = vmul.f32 %v16408_v20, %v3387_v49  ;;  %13775 = vrcp.f32 %v3362_v33  ;;  %v16412_v9 = vpop.eup %13767  ;;  %v3463_v38 = vsub.f32 1.0, %v16408_v20  ;;  %v3509_v49 = vmul.f32 0.0, %v16402_v16 }
0x1873   :  { %v3406_v26 = vmul.f32 %v16412_v9, %v3385_v30 }
0x1874   :  { %3426 = vrot.lane.b32.xlu0 %v3407_v44, %s14692_s16  ;;  %3420 = vrot.lane.b32.xlu1 %v3404_v42, %s14692_s16 }
0x1876   :  { %v16416_v50 = vpop.eup %13769 }
0x1877   :  { %v16419_v43 = vpop.eup %13771  ;;  %v3408_v59 = vmul.f32 %v16416_v50, %v3389_v14 }
0x1878   :  { %3424 = vrot.lane.b32.xlu0 %v3406_v26, %s14692_s16  ;;  %v3409_v17 = vmul.f32 %v16419_v43, %v3391_v15  ;;  %v3462_v26 = vsub.f32 1.0, %v16412_v9  ;;  %v3511_v15 = vmul.f32 0.0, %v16408_v20  ;;  %v3465_v20 = vsub.f32 1.0, %v16419_v43 }
0x1879   :  { %3428 = vrot.lane.b32.xlu1 %v3408_v59, %s14692_s16  ;;  %v16425_v56 = vpop.eup %13773  ;;  %v3508_v59 = vmul.f32 0.0, %v16404_v40 }
0x187a   :  { %v3411_v13 = vmul.f32 %v16425_v56, %v3395_v18  ;;  %v3510_v18 = vmul.f32 0.0, %v16412_v9 }
0x187c   :  { %v16427_v10 = vpop.eup %13775  ;;  %3430 = vrot.lane.b32.xlu0 %v3409_v17, %s14692_s16 }
0x187d   :  { %v3410_v23 = vmul.f32 %v16427_v10, %v3393_v6  ;;  %v3464_v6 = vsub.f32 1.0, %v16416_v50 }
0x187f   :  { %3432 = vrot.lane.b32.xlu1 %v3410_v23, %s14692_s16 }
0x1880   :  { %3434 = vrot.lane.b32.xlu0 %v3411_v13, %s14692_s16 }
0x18e2   :  { %v3423_v19 = vpop.permute.xlu1 %3422 }
0x18e3   :  { %v3445_v41 = vadd.f32 %v3423_v19, %v16377_v58 }
0x18e5   :  { %13777 = vtanh.f32 %v3445_v41  ;;  %v3512_v41 = vmul.f32 0.0, %v16416_v50 }
0x18e6   :  { %v3427_v28 = vpop.permute.xlu0 %3426  ;;  %v3421_v7 = vpop.permute.xlu1 %3420 }
0x18e7   :  { %v3447_v34 = vadd.f32 %v3427_v28, %v16384_v45  ;;  %v3444_v61 = vadd.f32 %v3421_v7, %v16379_v21 }
0x18e9   :  { %13779 = vtanh.f32 %v3447_v34 }
0x18ea   :  { %13781 = vtanh.f32 %v3444_v61  ;;  %v3425_v5 = vpop.permute.xlu0 %3424 }
0x18eb   :  { %v3446_v24 = vadd.f32 %v3425_v5, %v16386_v52  ;;  %v3429_v12 = vpop.permute.xlu1 %3428  ;;  %v3513_v5 = vmul.f32 0.0, %v16419_v43  ;;  %v3514_v43 = vmul.f32 0.0, %v16427_v10 }
0x18ec   :  { %v3448_v27 = vadd.f32 %v3429_v12, %v16392_v22 }
0x18ed   :  { %13783 = vtanh.f32 %v3446_v24 }
0x18ee   :  { %13785 = vtanh.f32 %v3448_v27  ;;  %v3431_v2 = vpop.permute.xlu0 %3430 }
0x18ef   :  { %v13778_v54 = vpop.eup %13777  ;;  %v3449_v3 = vadd.f32 %v3431_v2, %v16390_v53  ;;  %v3466_v2 = vsub.f32 1.0, %v16427_v10 }
0x18f0   :  { %3478 = vrot.lane.b32.xlu1 %v13778_v54, %s14693_s11 }
0x18f1   :  { %13787 = vtanh.f32 %v3449_v3  ;;  %v3433_v55 = vpop.permute.xlu1 %3432 }
0x18f2   :  { %v3450_v37 = vadd.f32 %v3433_v55, %v16398_v29  ;;  %v3435_v48 = vpop.permute.xlu0 %3434 }
0x18f3   :  { %v13780_v32 = vpop.eup %13779  ;;  %v3451_v35 = vadd.f32 %v3435_v48, %v16396_v62 }
0x18f4   :  { %v13782_v57 = vpop.eup %13781  ;;  %13789 = vtanh.f32 %v3450_v37  ;;  %3482 = vrot.lane.b32.xlu0 %v13780_v32, %s14693_s11  ;;  %v3467_v37 = vsub.f32 1.0, %v16425_v56 }
0x18f5   :  { %13791 = vtanh.f32 %v3451_v35  ;;  %3476 = vrot.lane.b32.xlu1 %v13782_v57, %s14693_s11 }
0x18f7   :  { %v13784_v51 = vpop.eup %13783 }
0x18f8   :  { %v13786_v63 = vpop.eup %13785  ;;  %3480 = vrot.lane.b32.xlu0 %v13784_v51, %s14693_s11  ;;  %v3515_v51 = vmul.f32 0.0, %v16425_v56 }
0x18f9   :  { %3484 = vrot.lane.b32.xlu1 %v13786_v63, %s14693_s11 }
0x18fb   :  { %v13788_v36 = vpop.eup %13787 }
0x18fc   :  { %3486 = vrot.lane.b32.xlu0 %v13788_v36, %s14693_s11 }
0x18fe   :  { %v13790_v47 = vpop.eup %13789 }
0x18ff   :  { %v13792_v25 = vpop.eup %13791  ;;  %3488 = vrot.lane.b32.xlu1 %v13790_v47, %s14693_s11 }
0x1900   :  { %3490 = vrot.lane.b32.xlu0 %v13792_v25, %s14693_s11 }
0x1962   :  { %v3479_v30 = vpop.permute.xlu1 %3478 }
0x1963   :  { %v3501_v31 = vmul.f32 %v3479_v30, %v3461_v11 }
0x1965   :  { %v16455_v14 = vadd.f32 %v3509_v49, %v3501_v31 }
0x1966   :  { %v3483_v39 = vpop.permute.xlu0 %3482 }
0x1967   :  { %v3477_v33 = vpop.permute.xlu1 %3476  ;;  %v3503_v44 = vmul.f32 %v3483_v39, %v3463_v38  ;;  %v3532_v40 = vrot.slane %v16455_v14, 7 }
0x1968   :  { %v3500_v42 = vmul.f32 %v3477_v33, %v3460_v8 }
0x1969   :  { %v16461_v19 = vadd.f32 %v3511_v15, %v3503_v44 }
0x196a   :  { %v3481_v17 = vpop.permute.xlu0 %3480  ;;  %v16463_v16 = vadd.f32 %v3508_v59, %v3500_v42 }
0x196b   :  { %v3502_v23 = vmul.f32 %v3481_v17, %v3462_v26  ;;  %v3485_v13 = vpop.permute.xlu1 %3484  ;;  %v3536_v12 = vrot.slane %v16461_v19, 5 }
0x196c   :  { %v3504_v28 = vmul.f32 %v3485_v13, %v3464_v6  ;;  %v3533_v50 = vsel %vm721_vm2, %v3532_v40, %v16463_v16 }
0x196d   :  { %v16466_v7 = vadd.f32 %v3510_v18, %v3502_v23 }
0x196e   :  { %v16470_v34 = vadd.f32 %v3512_v41, %v3504_v28  ;;  %v3487_v61 = vpop.permute.xlu0 %3486 }
0x196f   :  { %v3534_v9 = vrot.slane %v16466_v7, 6  ;;  %v3505_v24 = vmul.f32 %v3487_v61, %v3465_v20 }
0x1970   :  { %v3538_v27 = vrot.slane %v16470_v34, 4 }
0x1971   :  { %v3535_v54 = vsel %vm724_vm3, %v3534_v9, %v3533_v50  ;;  %v16482_v3 = vadd.f32 %v3513_v5, %v3505_v24  ;;  %v3489_v55 = vpop.permute.xlu1 %3488 }
0x1972   :  { %v3506_v48 = vmul.f32 %v3489_v55, %v3466_v2  ;;  %v3491_v32 = vpop.permute.xlu0 %3490  ;;  %v3537_v35 = vsel %vm727_vm4, %v3536_v12, %v3535_v54 }
0x1973   :  { %v3540_v57 = vrot.slane %v16482_v3, 3  ;;  %v3507_v63 = vmul.f32 %v3491_v32, %v3467_v37  ;;  %v3539_v36 = vsel %vm730_vm5, %v3538_v27, %v3537_v35 }
0x1974   :  { %v16490_v47 = vadd.f32 %v3514_v43, %v3506_v48 }
0x1975   :  { %v16492_v25 = vadd.f32 %v3515_v51, %v3507_v63  ;;  %v3541_v30 = vsel %vm733_vm6, %v3540_v57, %v3539_v36 }
0x1976   :  { %v3542_v11 = vrot.slane %v16490_v47, 2 }
0x1977   :  { %v3544_v10 = vrot.slane %v16492_v25, 1 }
0x1978   :  { %v3543_v31 = vsel %vm736_vm7, %v3542_v11, %v3541_v30 }
0x1979   :  { %v3545_v38 = vsel %vm739_vm8, %v3544_v10, %v3543_v31 }
0x197a   :  { %3546 = vrot.lane.b32.xlu1 %v3545_v38, %s14693_s11 }
0x19ec   :  { %v3547_v56 = vpop.permute.xlu1 %3546 }
0x19ed   :  { %12707 = vmatmul.mubr.msk.f32.vlgmr.msra.gmra.mrb[12].mxu1 %vm422_vm9, %v3547_v56 }
0x19ee   :  { %13266 = vmatpush3.bf16.msra.mxu1 %v16271_v46  ;;  %12728 = vmatprep.mubr.msk.f32.mxu1 %vm14690_vm0, %v18665_v1 }
0x19ef   :  { %13267 = vmatprep.subr.bf16.mxu1 %v18663_v0 }
0x19f2   :  { %13269 = vmatpush3.bf16.msra.mxu1 %v16277_v4 }
0x19f3   :  { %13276 = vmatprep.subr.bf16.mxu1 %v18663_v0 }
0x1ac0   :  { %v3616_v39 = vpop.f32.mrb[12].mxu1 }
0x1ac1   :  { %v3617_v8 = vadd.f32 %v16342_v60, %v3616_v39  ;;  %v12708_v33 = vpop.f32.mrb[13].mxu1 }
0x1ac3   :  { %3694 = vrot.lane.b32.xlu0 %v3617_v8, %s14692_s16  ;;  %v3622_v49 = vrot.slane %v3617_v8, 1  ;;  %v3621_v44 = vrot.slane %v3617_v8, 7  ;;  %v3623_v42 = vrot.slane %v3617_v8, 2  ;;  %v3624_v26 = vrot.slane %v3617_v8, 3 }
0x1ac4   :  { %v3625_v15 = vrot.slane %v3617_v8, 4  ;;  %v3626_v59 = vrot.slane %v3617_v8, 5  ;;  %v3627_v17 = vrot.slane %v3617_v8, 6  ;;  %v3637_v6 = vadd.f32 %v3617_v8, %v16377_v58 }
0x1ac5   :  { %3696 = vrot.lane.b32.xlu1 %v3622_v49, %s14692_s16  ;;  %v3638_v18 = vadd.f32 %v3622_v49, %v16386_v52  ;;  %v3636_v23 = vadd.f32 %v3621_v44, %v16379_v21  ;;  %v3639_v28 = vadd.f32 %v3623_v42, %v16384_v45  ;;  %v3640_v61 = vadd.f32 %v3624_v26, %v16392_v22 }
0x1ac6   :  { %v3645_v13 = vsub.f32 0.0, %v3637_v6  ;;  %v3641_v12 = vadd.f32 %v3625_v15, %v16390_v53  ;;  %v3642_v2 = vadd.f32 %v3626_v59, %v16398_v29  ;;  %v3643_v37 = vadd.f32 %v3627_v17, %v16396_v62 }
0x1ac7   :  { %3692 = vrot.lane.b32.xlu0 %v3621_v44, %s14692_s16  ;;  %v3646_v41 = vsub.f32 0.0, %v3638_v18  ;;  %v3644_v20 = vsub.f32 0.0, %v3636_v23  ;;  %v3647_v24 = vsub.f32 0.0, %v3639_v28  ;;  %v3648_v27 = vsub.f32 0.0, %v3640_v61 }
0x1ac8   :  { %v3654_v9 = vmul.f32 1.442695, %v3645_v13  ;;  %v3649_v55 = vsub.f32 0.0, %v3641_v12  ;;  %v3650_v48 = vsub.f32 0.0, %v3642_v2  ;;  %v3651_v35 = vsub.f32 0.0, %v3643_v37 }
0x1ac9   :  { %3698 = vrot.lane.b32.xlu1 %v3623_v42, %s14692_s16  ;;  %v3656_v5 = vmul.f32 1.442695, %v3646_v41  ;;  %v3652_v50 = vmul.f32 1.442695, %v3644_v20  ;;  %v3658_v54 = vmul.f32 1.442695, %v3647_v24 }
0x1aca   :  { %13793 = vpow2.f32 %v3654_v9  ;;  %v3660_v43 = vmul.f32 1.442695, %v3648_v27  ;;  %v3662_v32 = vmul.f32 1.442695, %v3649_v55  ;;  %v3664_v57 = vmul.f32 1.442695, %v3650_v48 }
0x1acb   :  { %3700 = vrot.lane.b32.xlu0 %v3624_v26, %s14692_s16  ;;  %13795 = vpow2.f32 %v3656_v5  ;;  %v3666_v63 = vmul.f32 1.442695, %v3651_v35 }
0x1acc   :  { %13797 = vpow2.f32 %v3652_v50 }
0x1acd   :  { %3702 = vrot.lane.b32.xlu1 %v3625_v15, %s14692_s16  ;;  %13799 = vpow2.f32 %v3658_v54 }
0x1ace   :  { %13801 = vpow2.f32 %v3660_v43 }
0x1acf   :  { %3704 = vrot.lane.b32.xlu0 %v3626_v59, %s14692_s16  ;;  %13803 = vpow2.f32 %v3662_v32 }
0x1ad0   :  { %13805 = vpow2.f32 %v3664_v57 }
0x1ad1   :  { %3706 = vrot.lane.b32.xlu1 %v3627_v17, %s14692_s16  ;;  %13807 = vpow2.f32 %v3666_v63 }
0x1ad4   :  { %v13794_v51 = vpop.eup %13793 }
0x1ad5   :  { %v13796_v36 = vpop.eup %13795  ;;  %v3669_v30 = vadd.f32 1.0, %v13794_v51 }
0x1ad6   :  { %v13798_v11 = vpop.eup %13797  ;;  %v3670_v10 = vadd.f32 1.0, %v13796_v36 }
0x1ad7   :  { %v13800_v31 = vpop.eup %13799  ;;  %v3668_v38 = vadd.f32 1.0, %v13798_v11  ;;  %13809 = vrcp.f32 %v3669_v30 }
0x1ad8   :  { %v13802_v56 = vpop.eup %13801  ;;  %13811 = vrcp.f32 %v3670_v10  ;;  %v3671_v39 = vadd.f32 1.0, %v13800_v31 }
0x1ad9   :  { %v13804_v8 = vpop.eup %13803  ;;  %13813 = vrcp.f32 %v3668_v38  ;;  %v3672_v33 = vadd.f32 1.0, %v13802_v56 }
0x1ada   :  { %v13806_v49 = vpop.eup %13805  ;;  %13815 = vrcp.f32 %v3671_v39  ;;  %v3673_v44 = vadd.f32 1.0, %v13804_v8 }
0x1adb   :  { %v13808_v42 = vpop.eup %13807  ;;  %13817 = vrcp.f32 %v3672_v33  ;;  %v3674_v26 = vadd.f32 1.0, %v13806_v49 }
0x1adc   :  { %13819 = vrcp.f32 %v3673_v44  ;;  %v3675_v59 = vadd.f32 1.0, %v13808_v42 }
0x1add   :  { %13821 = vrcp.f32 %v3674_v26 }
0x1ade   :  { %13823 = vrcp.f32 %v3675_v59 }
0x1ae1   :  { %v16524_v15 = vpop.eup %13809 }
0x1ae2   :  { %v16527_v18 = vpop.eup %13811 }
0x1ae3   :  { %v16531_v41 = vpop.eup %13813 }
0x1ae4   :  { %v16535_v61 = vpop.eup %13815 }
0x1ae5   :  { %v16539_v24 = vpop.eup %13817 }
0x1ae6   :  { %v16543_v27 = vpop.eup %13819 }
0x1ae7   :  { %v16547_v55 = vpop.eup %13821 }
0x1ae8   :  { %v16551_v48 = vpop.eup %13823 }
0x1b35   :  { %v3695_v17 = vpop.permute.xlu0 %3694 }
0x1b36   :  { %v3717_v6 = vmul.f32 %v16524_v15, %v3695_v17 }
0x1b37   :  { %v3697_v23 = vpop.permute.xlu1 %3696 }
0x1b38   :  { %v3718_v13 = vmul.f32 %v16527_v18, %v3697_v23  ;;  %3734 = vrot.lane.b32.xlu0 %v3717_v6, %s14692_s16 }
0x1b39   :  { %v3693_v28 = vpop.permute.xlu0 %3692 }
0x1b3a   :  { %v3716_v20 = vmul.f32 %v16531_v41, %v3693_v28  ;;  %3736 = vrot.lane.b32.xlu1 %v3718_v13, %s14692_s16 }
0x1b3b   :  { %v3699_v9 = vpop.permute.xlu1 %3698 }
0x1b3c   :  { %v3719_v5 = vmul.f32 %v16535_v61, %v3699_v9  ;;  %3732 = vrot.lane.b32.xlu0 %v3716_v20, %s14692_s16 }
0x1b3d   :  { %v3701_v12 = vpop.permute.xlu0 %3700 }
0x1b3e   :  { %v3720_v50 = vmul.f32 %v16539_v24, %v3701_v12  ;;  %3738 = vrot.lane.b32.xlu1 %v3719_v5, %s14692_s16  ;;  %v3774_v5 = vsub.f32 1.0, %v16527_v18  ;;  %v3821_v12 = vrot.slane %v16466_v7, 7 }
0x1b3f   :  { %v3703_v2 = vpop.permute.xlu1 %3702 }
0x1b40   :  { %v3721_v54 = vmul.f32 %v16543_v27, %v3703_v2  ;;  %3740 = vrot.lane.b32.xlu0 %v3720_v50, %s14692_s16  ;;  %v3773_v2 = vsub.f32 1.0, %v16524_v15 }
0x1b41   :  { %v3705_v37 = vpop.permute.xlu0 %3704 }
0x1b42   :  { %v3722_v43 = vmul.f32 %v16547_v55, %v3705_v37  ;;  %3742 = vrot.lane.b32.xlu1 %v3721_v54, %s14692_s16  ;;  %v3772_v37 = vsub.f32 1.0, %v16531_v41 }
0x1b43   :  { %v3707_v32 = vpop.permute.xlu1 %3706 }
0x1b44   :  { %v3723_v35 = vmul.f32 %v16551_v48, %v3707_v32  ;;  %3744 = vrot.lane.b32.xlu0 %v3722_v43, %s14692_s16  ;;  %v3820_v43 = vrot.slane %v16463_v16, 7  ;;  %v3837_v32 = vmul.f32 %v16527_v18, %v3821_v12 }
0x1b46   :  { %3746 = vrot.lane.b32.xlu1 %v3723_v35, %s14692_s16 }
0x1baa   :  { %v3735_v57 = vpop.permute.xlu0 %3734 }
0x1bab   :  { %v3757_v51 = vadd.f32 %v3735_v57, %v16377_v58  ;;  %v3822_v57 = vrot.slane %v16461_v19, 7 }
0x1bac   :  { %v3737_v63 = vpop.permute.xlu1 %3736 }
0x1bad   :  { %13825 = vtanh.f32 %v3757_v51  ;;  %v3758_v36 = vadd.f32 %v3737_v63, %v16386_v52  ;;  %v3835_v63 = vmul.f32 %v16531_v41, %v3820_v43  ;;  %v3838_v18 = vmul.f32 %v16535_v61, %v3822_v57 }
0x1bae   :  { %v3733_v30 = vpop.permute.xlu0 %3732 }
0x1baf   :  { %13827 = vtanh.f32 %v3758_v36  ;;  %v3756_v11 = vadd.f32 %v3733_v30, %v16379_v21  ;;  %v3775_v30 = vsub.f32 1.0, %v16535_v61 }
0x1bb0   :  { %v3739_v10 = vpop.permute.xlu1 %3738 }
0x1bb1   :  { %13829 = vtanh.f32 %v3756_v11  ;;  %v3759_v31 = vadd.f32 %v3739_v10, %v16384_v45  ;;  %v3836_v11 = vmul.f32 %v16524_v15, %v3532_v40 }
0x1bb2   :  { %v3741_v38 = vpop.permute.xlu0 %3740 }
0x1bb3   :  { %13831 = vtanh.f32 %v3759_v31  ;;  %v3760_v56 = vadd.f32 %v3741_v38, %v16392_v22  ;;  %v3823_v38 = vrot.slane %v16470_v34, 7 }
0x1bb4   :  { %v3743_v39 = vpop.permute.xlu1 %3742 }
0x1bb5   :  { %13833 = vtanh.f32 %v3760_v56  ;;  %v3761_v8 = vadd.f32 %v3743_v39, %v16390_v53  ;;  %v3839_v41 = vmul.f32 %v16539_v24, %v3823_v38 }
0x1bb6   :  { %v3745_v33 = vpop.permute.xlu0 %3744 }
0x1bb7   :  { %v13826_v49 = vpop.eup %13825  ;;  %13835 = vtanh.f32 %v3761_v8  ;;  %v3762_v44 = vadd.f32 %v3745_v33, %v16398_v29  ;;  %v3776_v8 = vsub.f32 1.0, %v16539_v24 }
0x1bb8   :  { %v3747_v42 = vpop.permute.xlu1 %3746  ;;  %3790 = vrot.lane.b32.xlu0 %v13826_v49, %s14693_s11  ;;  %v3824_v49 = vrot.slane %v16482_v3, 7 }
0x1bb9   :  { %v13828_v26 = vpop.eup %13827  ;;  %13837 = vtanh.f32 %v3762_v44  ;;  %v3763_v59 = vadd.f32 %v3747_v42, %v16396_v62 }
0x1bba   :  { %3792 = vrot.lane.b32.xlu1 %v13828_v26, %s14693_s11 }
0x1bbb   :  { %v13830_v17 = vpop.eup %13829  ;;  %13839 = vtanh.f32 %v3763_v59  ;;  %v3777_v59 = vsub.f32 1.0, %v16543_v27 }
0x1bbc   :  { %3788 = vrot.lane.b32.xlu0 %v13830_v17, %s14693_s11  ;;  %v3825_v17 = vrot.slane %v16490_v47, 7 }
0x1bbd   :  { %v13832_v6 = vpop.eup %13831 }
0x1bbe   :  { %3794 = vrot.lane.b32.xlu1 %v13832_v6, %s14693_s11  ;;  %v3826_v6 = vrot.slane %v16492_v25, 7 }
0x1bbf   :  { %v13834_v23 = vpop.eup %13833 }
0x1bc0   :  { %3796 = vrot.lane.b32.xlu0 %v13834_v23, %s14693_s11 }
0x1bc1   :  { %v13836_v13 = vpop.eup %13835 }
0x1bc2   :  { %3798 = vrot.lane.b32.xlu1 %v13836_v13, %s14693_s11 }
0x1bc3   :  { %v13838_v28 = vpop.eup %13837 }
0x1bc4   :  { %3800 = vrot.lane.b32.xlu0 %v13838_v28, %s14693_s11  ;;  %v3778_v28 = vsub.f32 1.0, %v16547_v55 }
0x1bc5   :  { %v13840_v20 = vpop.eup %13839 }
0x1bc6   :  { %3802 = vrot.lane.b32.xlu1 %v13840_v20, %s14693_s11  ;;  %v3840_v20 = vmul.f32 %v16543_v27, %v3824_v49  ;;  %v3842_v27 = vmul.f32 %v16551_v48, %v3826_v6 }
0x1c2a   :  { %v3791_v9 = vpop.permute.xlu0 %3790 }
0x1c2b   :  { %v3813_v51 = vmul.f32 %v3791_v9, %v3773_v2 }
0x1c2c   :  { %v3793_v50 = vpop.permute.xlu1 %3792 }
0x1c2d   :  { %v3814_v54 = vmul.f32 %v3793_v50, %v3774_v5  ;;  %v16593_v44 = vadd.f32 %v3836_v11, %v3813_v51  ;;  %v3841_v5 = vmul.f32 %v16547_v55, %v3825_v17 }
0x1c2e   :  { %v3789_v35 = vpop.permute.xlu0 %3788 }
0x1c2f   :  { %v3812_v36 = vmul.f32 %v3789_v35, %v3772_v37  ;;  %v16584_v10 = vadd.f32 %v3837_v32, %v3814_v54  ;;  %v3779_v37 = vsub.f32 1.0, %v16551_v48 }
0x1c30   :  { %v3795_v31 = vpop.permute.xlu1 %3794 }
0x1c31   :  { %v16587_v56 = vadd.f32 %v3835_v63, %v3812_v36  ;;  %v3815_v39 = vmul.f32 %v3795_v31, %v3775_v30  ;;  %v3861_v26 = vrot.slane %v16584_v10, 7 }
0x1c32   :  { %v3797_v33 = vpop.permute.xlu0 %3796 }
0x1c33   :  { %v3859_v40 = vrot.slane %v16587_v56, 1  ;;  %v16596_v15 = vadd.f32 %v3838_v18, %v3815_v39  ;;  %v3816_v42 = vmul.f32 %v3797_v33, %v3776_v8 }
0x1c34   :  { %v3799_v61 = vpop.permute.xlu1 %3798 }
0x1c35   :  { %v3860_v24 = vsel %vm721_vm2, %v16593_v44, %v3859_v40  ;;  %v3863_v23 = vrot.slane %v16596_v15, 6  ;;  %v16605_v13 = vadd.f32 %v3839_v41, %v3816_v42  ;;  %v3817_v9 = vmul.f32 %v3799_v61, %v3777_v59 }
0x1c36   :  { %v3801_v12 = vpop.permute.xlu0 %3800  ;;  %v3862_v50 = vsel %vm724_vm3, %v3861_v26, %v3860_v24 }
0x1c37   :  { %v3865_v2 = vrot.slane %v16605_v13, 5  ;;  %v3818_v54 = vmul.f32 %v3801_v12, %v3778_v28  ;;  %v3864_v43 = vsel %vm727_vm4, %v3863_v23, %v3862_v50  ;;  %v16616_v32 = vadd.f32 %v3840_v20, %v3817_v9 }
0x1c38   :  { %v3803_v35 = vpop.permute.xlu1 %3802 }
0x1c39   :  { %v16618_v57 = vadd.f32 %v3841_v5, %v3818_v54  ;;  %v3819_v55 = vmul.f32 %v3803_v35, %v3779_v37  ;;  %v3866_v51 = vsel %vm730_vm5, %v3865_v2, %v3864_v43  ;;  %v3867_v63 = vrot.slane %v16616_v32, 4 }
0x1c3b   :  { %v3869_v36 = vrot.slane %v16618_v57, 3  ;;  %v16624_v30 = vadd.f32 %v3842_v27, %v3819_v55  ;;  %v3868_v11 = vsel %vm733_vm6, %v3867_v63, %v3866_v51 }
0x1c3d   :  { %v3870_v31 = vsel %vm736_vm7, %v3869_v36, %v3868_v11  ;;  %v3871_v38 = vrot.slane %v16624_v30, 2 }
0x1c3f   :  { %v3872_v18 = vsel %vm739_vm8, %v3871_v38, %v3870_v31 }
0x1c40   :  { %3873 = vrot.lane.b32.xlu0 %v3872_v18, %s14693_s11 }
0x1cb2   :  { %v3874_v48 = vpop.permute.xlu0 %3873 }
0x1cb3   :  { %12718 = vmatmul.mubr.msk.f32.vlgmr.msra.gmra.mrb[22].mxu0 %vm422_vm9, %v3874_v48 }
0x1cb4   :  { %13272 = vmatpush3.bf16.msra.mxu0 %v16271_v46  ;;  %12739 = vmatprep.mubr.msk.f32.mxu0 %vm14690_vm0, %v18665_v1 }
0x1cb5   :  { %13273 = vmatprep.subr.bf16.mxu0 %v18663_v0 }
0x1cb8   :  { %13275 = vmatpush3.bf16.msra.mxu0 %v16277_v4 }
0x1cb9   :  { %13282 = vmatprep.subr.bf16.mxu0 %v18663_v0 }
0x1d86   :  { %v3943_v39 = vpop.f32.mrb[22].mxu0 }
0x1d87   :  { %v3944_v8 = vadd.f32 %v16342_v60, %v3943_v39  ;;  %v12719_v41 = vpop.f32.mrb[23].mxu0 }
0x1d89   :  { %4023 = vrot.lane.b32.xlu0 %v3944_v8, %s14692_s16  ;;  %v3948_v33 = vrot.slane %v3944_v8, 6  ;;  %v3949_v49 = vrot.slane %v3944_v8, 7  ;;  %v3950_v40 = vrot.slane %v3944_v8, 1  ;;  %v3952_v42 = vrot.slane %v3944_v8, 3 }
0x1d8a   :  { %v3951_v59 = vrot.slane %v3944_v8, 2  ;;  %v3954_v61 = vrot.slane %v3944_v8, 5  ;;  %v3953_v60 = vrot.slane %v3944_v8, 4  ;;  %v3965_v17 = vadd.f32 %v3944_v8, %v16386_v52 }
0x1d8b   :  { %4019 = vrot.lane.b32.xlu1 %v3948_v33, %s14692_s16  ;;  %v3963_v6 = vadd.f32 %v3948_v33, %v16379_v21  ;;  %v3964_v24 = vadd.f32 %v3949_v49, %v16377_v58  ;;  %v3966_v20 = vadd.f32 %v3950_v40, %v16384_v45  ;;  %v3968_v5 = vadd.f32 %v3952_v42, %v16390_v53 }
0x1d8c   :  { %v3973_v23 = vsub.f32 0.0, %v3965_v17  ;;  %v3967_v54 = vadd.f32 %v3951_v59, %v16392_v22  ;;  %v3970_v35 = vadd.f32 %v3954_v61, %v16396_v62  ;;  %v3969_v51 = vadd.f32 %v3953_v60, %v16398_v29 }
0x1d8d   :  { %4021 = vrot.lane.b32.xlu0 %v3949_v49, %s14692_s16  ;;  %v3971_v28 = vsub.f32 0.0, %v3963_v6  ;;  %v3972_v9 = vsub.f32 0.0, %v3964_v24  ;;  %v3974_v2 = vsub.f32 0.0, %v3966_v20  ;;  %v3976_v43 = vsub.f32 0.0, %v3968_v5 }
0x1d8e   :  { %v3983_v12 = vmul.f32 1.442695, %v3973_v23  ;;  %v3975_v55 = vsub.f32 0.0, %v3967_v54  ;;  %v3978_v36 = vsub.f32 0.0, %v3970_v35  ;;  %v3977_v31 = vsub.f32 0.0, %v3969_v51 }
0x1d8f   :  { %4025 = vrot.lane.b32.xlu1 %v3950_v40, %s14692_s16  ;;  %v3979_v50 = vmul.f32 1.442695, %v3971_v28  ;;  %v3981_v37 = vmul.f32 1.442695, %v3972_v9  ;;  %v3985_v27 = vmul.f32 1.442695, %v3974_v2 }
0x1d90   :  { %13841 = vpow2.f32 %v3983_v12  ;;  %v3989_v63 = vmul.f32 1.442695, %v3976_v43  ;;  %v3987_v11 = vmul.f32 1.442695, %v3975_v55  ;;  %v3993_v38 = vmul.f32 1.442695, %v3978_v36 }
0x1d91   :  { %4029 = vrot.lane.b32.xlu0 %v3952_v42, %s14692_s16  ;;  %13843 = vpow2.f32 %v3979_v50  ;;  %v3991_v48 = vmul.f32 1.442695, %v3977_v31 }
0x1d92   :  { %13845 = vpow2.f32 %v3981_v37 }
0x1d93   :  { %4027 = vrot.lane.b32.xlu1 %v3951_v59, %s14692_s16  ;;  %13847 = vpow2.f32 %v3985_v27 }
0x1d94   :  { %13849 = vpow2.f32 %v3989_v63 }
0x1d95   :  { %4033 = vrot.lane.b32.xlu0 %v3954_v61, %s14692_s16  ;;  %13851 = vpow2.f32 %v3987_v11 }
0x1d96   :  { %13853 = vpow2.f32 %v3993_v38 }
0x1d97   :  { %4031 = vrot.lane.b32.xlu1 %v3953_v60, %s14692_s16  ;;  %13855 = vpow2.f32 %v3991_v48 }
0x1d9a   :  { %v13842_v18 = vpop.eup %13841 }
0x1d9b   :  { %v13844_v39 = vpop.eup %13843  ;;  %v3997_v8 = vadd.f32 1.0, %v13842_v18 }
0x1d9c   :  { %v13846_v41 = vpop.eup %13845  ;;  %v3995_v33 = vadd.f32 1.0, %v13844_v39 }
0x1d9d   :  { %v13848_v49 = vpop.eup %13847  ;;  %v3996_v40 = vadd.f32 1.0, %v13846_v41  ;;  %13857 = vrcp.f32 %v3997_v8 }
0x1d9e   :  { %v13850_v42 = vpop.eup %13849  ;;  %13859 = vrcp.f32 %v3995_v33  ;;  %v3998_v59 = vadd.f32 1.0, %v13848_v49 }
0x1d9f   :  { %v13852_v61 = vpop.eup %13851  ;;  %13861 = vrcp.f32 %v3996_v40  ;;  %v4000_v60 = vadd.f32 1.0, %v13850_v42 }
0x1da0   :  { %v13854_v17 = vpop.eup %13853  ;;  %13863 = vrcp.f32 %v3998_v59  ;;  %v3999_v6 = vadd.f32 1.0, %v13852_v61 }
0x1da1   :  { %v13856_v24 = vpop.eup %13855  ;;  %13865 = vrcp.f32 %v4000_v60  ;;  %v4002_v23 = vadd.f32 1.0, %v13854_v17 }
0x1da2   :  { %13867 = vrcp.f32 %v3999_v6  ;;  %v4001_v20 = vadd.f32 1.0, %v13856_v24 }
0x1da3   :  { %13869 = vrcp.f32 %v4002_v23 }
0x1da4   :  { %13871 = vrcp.f32 %v4001_v20 }
0x1da7   :  { %v16655_v28 = vpop.eup %13857 }
0x1da8   :  { %v16658_v12 = vpop.eup %13859 }
0x1da9   :  { %v16662_v54 = vpop.eup %13861 }
0x1daa   :  { %v16666_v35 = vpop.eup %13863 }
0x1dab   :  { %v16670_v51 = vpop.eup %13865 }
0x1dac   :  { %v16674_v11 = vpop.eup %13867 }
0x1dad   :  { %v16678_v18 = vpop.eup %13869 }
0x1dae   :  { %v16682_v8 = vpop.eup %13871 }
0x1dfb   :  { %v4024_v9 = vpop.permute.xlu0 %4023 }
0x1dfc   :  { %v4045_v5 = vmul.f32 %v16655_v28, %v4024_v9 }
0x1dfd   :  { %v4020_v50 = vpop.permute.xlu1 %4019 }
0x1dfe   :  { %v4043_v2 = vmul.f32 %v16658_v12, %v4020_v50  ;;  %4063 = vrot.lane.b32.xlu0 %v4045_v5, %s14692_s16 }
0x1dff   :  { %v4022_v37 = vpop.permute.xlu0 %4021 }
0x1e00   :  { %v4044_v43 = vmul.f32 %v16662_v54, %v4022_v37  ;;  %4059 = vrot.lane.b32.xlu1 %v4043_v2, %s14692_s16 }
0x1e01   :  { %v4026_v27 = vpop.permute.xlu1 %4025 }
0x1e02   :  { %v4046_v55 = vmul.f32 %v16666_v35, %v4026_v27  ;;  %4061 = vrot.lane.b32.xlu0 %v4044_v43, %s14692_s16 }
0x1e03   :  { %v4030_v63 = vpop.permute.xlu0 %4029 }
0x1e04   :  { %v4048_v36 = vmul.f32 %v16670_v51, %v4030_v63  ;;  %4065 = vrot.lane.b32.xlu1 %v4046_v55, %s14692_s16 }
0x1e05   :  { %v4028_v31 = vpop.permute.xlu1 %4027 }
0x1e06   :  { %v4047_v38 = vmul.f32 %v16674_v11, %v4028_v31  ;;  %4069 = vrot.lane.b32.xlu0 %v4048_v36, %s14692_s16 }
0x1e07   :  { %v4034_v48 = vpop.permute.xlu0 %4033 }
0x1e08   :  { %v4050_v39 = vmul.f32 %v16678_v18, %v4034_v48  ;;  %4067 = vrot.lane.b32.xlu1 %v4047_v38, %s14692_s16 }
0x1e09   :  { %v4032_v41 = vpop.permute.xlu1 %4031 }
0x1e0a   :  { %v4049_v33 = vmul.f32 %v16682_v8, %v4032_v41  ;;  %4073 = vrot.lane.b32.xlu0 %v4050_v39, %s14692_s16  ;;  %v4101_v39 = vsub.f32 1.0, %v16655_v28 }
0x1e0c   :  { %4071 = vrot.lane.b32.xlu1 %v4049_v33, %s14692_s16  ;;  %v4164_v33 = vmul.f32 %v16655_v28, %v3861_v26 }
0x1e70   :  { %v4064_v49 = vpop.permute.xlu0 %4063 }
0x1e71   :  { %v4085_v40 = vadd.f32 %v4064_v49, %v16386_v52 }
0x1e72   :  { %v4060_v42 = vpop.permute.xlu1 %4059 }
0x1e73   :  { %13873 = vtanh.f32 %v4085_v40  ;;  %v4083_v59 = vadd.f32 %v4060_v42, %v16379_v21  ;;  %v4099_v40 = vsub.f32 1.0, %v16658_v12  ;;  %v4147_v42 = vrot.slane %v16587_v56, 7 }
0x1e74   :  { %v4062_v61 = vpop.permute.xlu0 %4061 }
0x1e75   :  { %13875 = vtanh.f32 %v4083_v59  ;;  %v4084_v60 = vadd.f32 %v4062_v61, %v16377_v58  ;;  %v4148_v61 = vrot.slane %v16593_v44, 7 }
0x1e76   :  { %v4066_v17 = vpop.permute.xlu1 %4065 }
0x1e77   :  { %13877 = vtanh.f32 %v4084_v60  ;;  %v4086_v6 = vadd.f32 %v4066_v17, %v16384_v45  ;;  %v4162_v17 = vmul.f32 %v16658_v12, %v4147_v42  ;;  %v4163_v26 = vmul.f32 %v16662_v54, %v4148_v61 }
0x1e78   :  { %v4070_v24 = vpop.permute.xlu0 %4069  ;;  %v4102_v12 = vsub.f32 1.0, %v16666_v35  ;;  %v4152_v61 = vrot.slane %v16618_v57, 7 }
0x1e79   :  { %13879 = vtanh.f32 %v4086_v6  ;;  %v4088_v23 = vadd.f32 %v4070_v24, %v16390_v53  ;;  %v4100_v24 = vsub.f32 1.0, %v16662_v54  ;;  %v4151_v54 = vrot.slane %v16616_v32, 7 }
0x1e7a   :  { %v4068_v20 = vpop.permute.xlu1 %4067 }
0x1e7b   :  { %13881 = vtanh.f32 %v4088_v23  ;;  %v4087_v9 = vadd.f32 %v4068_v20, %v16392_v22  ;;  %v5815_v23 = vsel %vm3008_vm10, %v16466_v7, %v16584_v10  ;;  %v4149_v20 = vrot.slane %v16596_v15, 7 }
0x1e7c   :  { %v4074_v5 = vpop.permute.xlu0 %4073 }
0x1e7d   :  { %v13874_v50 = vpop.eup %13873  ;;  %13883 = vtanh.f32 %v4087_v9  ;;  %v4090_v2 = vadd.f32 %v4074_v5, %v16396_v62  ;;  %v4165_v7 = vmul.f32 %v16666_v35, %v4149_v20  ;;  %v4167_v35 = vmul.f32 %v16670_v51, %v4151_v54 }
0x1e7e   :  { %4119 = vrot.lane.b32.xlu0 %v13874_v50, %s14693_s11  ;;  %v4072_v37 = vpop.permute.xlu1 %4071 }
0x1e7f   :  { %v13876_v43 = vpop.eup %13875  ;;  %13885 = vtanh.f32 %v4090_v2  ;;  %v4089_v27 = vadd.f32 %v4072_v37, %v16398_v29  ;;  %v5813_v2 = vsel %vm3008_vm10, %v16463_v16, %v16587_v56  ;;  %v5816_v16 = vsel %vm3008_vm10, %v16461_v19, %v16596_v15 }
0x1e80   :  { %4115 = vrot.lane.b32.xlu1 %v13876_v43, %s14693_s11  ;;  %v4103_v19 = vsub.f32 1.0, %v16674_v11 }
0x1e81   :  { %v13878_v55 = vpop.eup %13877  ;;  %13887 = vtanh.f32 %v4089_v27 }
0x1e82   :  { %4117 = vrot.lane.b32.xlu0 %v13878_v55, %s14693_s11  ;;  %v4104_v55 = vsub.f32 1.0, %v16670_v51  ;;  %v4153_v51 = vrot.slane %v16624_v30, 7 }
0x1e83   :  { %v13880_v63 = vpop.eup %13879 }
0x1e84   :  { %4121 = vrot.lane.b32.xlu1 %v13880_v63, %s14693_s11  ;;  %v5814_v63 = vsel %vm3008_vm10, %v16455_v14, %v16593_v44  ;;  %v5818_v14 = vsel %vm3008_vm10, %v16482_v3, %v16616_v32  ;;  %v4150_v44 = vrot.slane %v16605_v13, 7  ;;  %v4169_v32 = vmul.f32 %v16678_v18, %v4153_v51 }
0x1e85   :  { %v13882_v36 = vpop.eup %13881 }
0x1e86   :  { %4125 = vrot.lane.b32.xlu0 %v13882_v36, %s14693_s11  ;;  %v4166_v42 = vmul.f32 %v16674_v11, %v4150_v44 }
0x1e87   :  { %v13884_v31 = vpop.eup %13883 }
0x1e88   :  { %4123 = vrot.lane.b32.xlu1 %v13884_v31, %s14693_s11 }
0x1e89   :  { %v13886_v38 = vpop.eup %13885 }
0x1e8a   :  { %4129 = vrot.lane.b32.xlu0 %v13886_v38, %s14693_s11 }
0x1e8b   :  { %v13888_v48 = vpop.eup %13887 }
0x1e8c   :  { %4127 = vrot.lane.b32.xlu1 %v13888_v48, %s14693_s11 }
0x1ef0   :  { %v4120_v41 = vpop.permute.xlu0 %4119 }
0x1ef1   :  { %v4141_v49 = vmul.f32 %v4120_v41, %v4101_v39 }
0x1ef2   :  { %v4116_v59 = vpop.permute.xlu1 %4115 }
0x1ef3   :  { %v16710_v60 = vadd.f32 %v4164_v33, %v4141_v49  ;;  %v4139_v6 = vmul.f32 %v4116_v59, %v4099_v40  ;;  %v4106_v40 = vsub.f32 1.0, %v16678_v18  ;;  %v5817_v18 = vsel %vm3008_vm10, %v16470_v34, %v16605_v13 }
0x1ef4   :  { %v4118_v28 = vpop.permute.xlu0 %4117 }
0x1ef5   :  { %v16721_v9 = vsel %vm3017_vm11, %v5815_v23, %v16710_v60  ;;  %v16723_v5 = vadd.f32 %v4162_v17, %v4139_v6  ;;  %v4140_v50 = vmul.f32 %v4118_v28, %v4100_v24  ;;  %v4105_v23 = vsub.f32 1.0, %v16682_v8 }
0x1ef6   :  { %v4122_v10 = vpop.permute.xlu1 %4121 }
0x1ef7   :  { %v16733_v37 = vsel %vm3017_vm11, %v5813_v2, %v16723_v5  ;;  %v16735_v43 = vadd.f32 %v4163_v26, %v4140_v50  ;;  %v4142_v27 = vmul.f32 %v4122_v10, %v4102_v12  ;;  %v4186_v56 = vrot.slane %v16723_v5, 2 }
0x1ef8   :  { %v4126_v36 = vpop.permute.xlu0 %4125  ;;  %v4168_v50 = vmul.f32 %v16682_v8, %v4152_v61  ;;  %v5820_v2 = vsel %vm3008_vm10, %v16492_v25, %v16624_v30  ;;  %v5819_v25 = vsel %vm3008_vm10, %v16490_v47, %v16618_v57  ;;  %v16825_v57 = vld [vmem:[#allocation16] ss:$0 sm:$0xff]  ;;  %vm18683_vm10 = vcmask 130048  }
0x1ef9   :  { %v4187_v31 = vrot.slane %v16735_v43, 1  ;;  %v16749_v38 = vsel %vm3017_vm11, %v5814_v63, %v16735_v43  ;;  %v16751_v48 = vadd.f32 %v4165_v7, %v4142_v27  ;;  %v4144_v39 = vmul.f32 %v4126_v36, %v4104_v55 }
0x1efa   :  { %v4124_v15 = vpop.permute.xlu1 %4123 }
0x1efb   :  { %v4188_v41 = vsel %vm721_vm2, %v4187_v31, %v4186_v56  ;;  %v16762_v33 = vsel %vm3017_vm11, %v5816_v16, %v16751_v48  ;;  %v16764_v49 = vadd.f32 %v4167_v35, %v4144_v39  ;;  %v4143_v3 = vmul.f32 %v4124_v15, %v4103_v19 }
0x1efc   :  { %v4130_v59 = vpop.permute.xlu0 %4129  ;;  %v4190_v17 = vrot.slane %v16751_v48, 7  ;;  %v4189_v26 = vsel %vm724_vm3, %v16710_v60, %v4188_v41 }
0x1efd   :  { %v16773_v6 = vsel %vm3017_vm11, %v5818_v14, %v16764_v49  ;;  %v4146_v24 = vmul.f32 %v4130_v59, %v4106_v40  ;;  %v16778_v28 = vadd.f32 %v4166_v42, %v4143_v3  ;;  %v4194_v34 = vrot.slane %v16764_v49, 5 }
0x1efe   :  { %v4128_v11 = vpop.permute.xlu1 %4127  ;;  %v4191_v54 = vsel %vm727_vm4, %v4190_v17, %v4189_v26 }
0x1eff   :  { %v16783_v20 = vadd.f32 %v4169_v32, %v4146_v24  ;;  %v4145_v12 = vmul.f32 %v4128_v11, %v4105_v23  ;;  %v4192_v7 = vrot.slane %v16778_v28, 6  ;;  %v16792_v10 = vsel %vm3017_vm11, %v5817_v18, %v16778_v28 }
0x1f01   :  { %v16800_v13 = vsel %vm3017_vm11, %v5820_v2, %v16783_v20  ;;  %v16802_v8 = vadd.f32 %v4168_v50, %v4145_v12  ;;  %v4193_v30 = vsel %vm730_vm5, %v4192_v7, %v4191_v54  ;;  %v4198_v16 = vrot.slane %v16783_v20, 3 }
0x1f02   :  { %v4195_v63 = vsel %vm733_vm6, %v4194_v34, %v4193_v30 }
0x1f03   :  { %v4196_v27 = vrot.slane %v16802_v8, 4  ;;  %v16811_v55 = vsel %vm3017_vm11, %v5819_v25, %v16802_v8  ;;  %vm18684_vm11 = vmmov %vm18683_vm10 }
0x1f05   :  { %v4197_v56 = vsel %vm736_vm7, %v4196_v27, %v4195_v63 }
0x1f06   :  { %v4199_v35 = vsel %vm739_vm8, %v4198_v16, %v4197_v56 }
0x1f07   :  { %4200 = vrot.lane.b32.xlu1 %v4199_v35, %s14693_s11 }
0x1f79   :  { %v4201_v36 = vpop.permute.xlu1 %4200 }
0x1f7a   :  { %12729 = vmatmul.mubr.msk.f32.vlgmr.msra.gmra.mrb[14].mxu1 %vm422_vm9, %v4201_v36 }
0x1f7b   :  { %13278 = vmatpush3.bf16.msra.mxu1 %v16271_v46  ;;  %12750 = vmatprep.mubr.msk.f32.mxu1 %vm14690_vm0, %v18665_v1 }
0x1f7c   :  { %13279 = vmatprep.subr.bf16.mxu1 %v18663_v0 }
0x1f7f   :  { %13281 = vmatpush3.bf16.msra.mxu1 %v16277_v4 }
0x1f80   :  { %13288 = vmatprep.subr.bf16.mxu1 %v18663_v0 }
0x204d   :  { %v4270_v47 = vpop.f32.mrb[14].mxu1 }
0x204e   :  { %v4271_v31 = vadd.f32 %v16825_v57, %v4270_v47  ;;  %v12730_v39 = vpop.f32.mrb[15].mxu1 }
0x2050   :  { %4352 = vrot.lane.b32.xlu0 %v4271_v31, %s14692_s16  ;;  %v4276_v14 = vrot.slane %v4271_v31, 6  ;;  %v4275_v19 = vrot.slane %v4271_v31, 5  ;;  %v4278_v44 = vrot.slane %v4271_v31, 1  ;;  %v4277_v15 = vrot.slane %v4271_v31, 7 }
0x2051   :  { %v4279_v51 = vrot.slane %v4271_v31, 2  ;;  %v4280_v41 = vrot.slane %v4271_v31, 3  ;;  %v4281_v40 = vrot.slane %v4271_v31, 4  ;;  %v4293_v42 = vadd.f32 %v4271_v31, %v16384_v45 }
0x2052   :  { %4348 = vrot.lane.b32.xlu1 %v4276_v14, %s14692_s16  ;;  %v4291_v3 = vadd.f32 %v4276_v14, %v16377_v58  ;;  %v4290_v32 = vadd.f32 %v4275_v19, %v16379_v21  ;;  %v4294_v24 = vadd.f32 %v4278_v44, %v16392_v22  ;;  %v4292_v26 = vadd.f32 %v4277_v15, %v16386_v52 }
0x2053   :  { %v4301_v59 = vsub.f32 0.0, %v4293_v42  ;;  %v4295_v12 = vadd.f32 %v4279_v51, %v16390_v53  ;;  %v4296_v54 = vadd.f32 %v4280_v41, %v16398_v29  ;;  %v4297_v30 = vadd.f32 %v4281_v40, %v16396_v62 }
0x2054   :  { %4346 = vrot.lane.b32.xlu0 %v4275_v19, %s14692_s16  ;;  %v4299_v61 = vsub.f32 0.0, %v4291_v3  ;;  %v4298_v23 = vsub.f32 0.0, %v4290_v32  ;;  %v4302_v50 = vsub.f32 0.0, %v4294_v24  ;;  %v4300_v7 = vsub.f32 0.0, %v4292_v26 }
0x2055   :  { %v4312_v11 = vmul.f32 1.442695, %v4301_v59  ;;  %v4303_v25 = vsub.f32 0.0, %v4295_v12  ;;  %v4304_v63 = vsub.f32 0.0, %v4296_v54  ;;  %v4305_v56 = vsub.f32 0.0, %v4297_v30 }
0x2056   :  { %4354 = vrot.lane.b32.xlu1 %v4278_v44, %s14692_s16  ;;  %v4308_v18 = vmul.f32 1.442695, %v4299_v61  ;;  %v4306_v2 = vmul.f32 1.442695, %v4298_v23  ;;  %v4314_v34 = vmul.f32 1.442695, %v4302_v50 }
0x2057   :  { %13889 = vpow2.f32 %v4312_v11  ;;  %v4310_v27 = vmul.f32 1.442695, %v4300_v7  ;;  %v4316_v16 = vmul.f32 1.442695, %v4303_v25  ;;  %v4318_v35 = vmul.f32 1.442695, %v4304_v63 }
0x2058   :  { %4350 = vrot.lane.b32.xlu0 %v4277_v15, %s14692_s16  ;;  %13891 = vpow2.f32 %v4308_v18  ;;  %v4320_v47 = vmul.f32 1.442695, %v4305_v56 }
0x2059   :  { %13893 = vpow2.f32 %v4306_v2 }
0x205a   :  { %4356 = vrot.lane.b32.xlu1 %v4279_v51, %s14692_s16  ;;  %13895 = vpow2.f32 %v4314_v34 }
0x205b   :  { %13897 = vpow2.f32 %v4310_v27 }
0x205c   :  { %4358 = vrot.lane.b32.xlu0 %v4280_v41, %s14692_s16  ;;  %13899 = vpow2.f32 %v4316_v16 }
0x205d   :  { %13901 = vpow2.f32 %v4318_v35 }
0x205e   :  { %4360 = vrot.lane.b32.xlu1 %v4281_v40, %s14692_s16  ;;  %13903 = vpow2.f32 %v4320_v47 }
0x2061   :  { %v13890_v36 = vpop.eup %13889 }
0x2062   :  { %v13892_v31 = vpop.eup %13891  ;;  %v4325_v39 = vadd.f32 1.0, %v13890_v36 }
0x2063   :  { %v13894_v14 = vpop.eup %13893  ;;  %v4323_v19 = vadd.f32 1.0, %v13892_v31 }
0x2064   :  { %v13896_v44 = vpop.eup %13895  ;;  %v4322_v15 = vadd.f32 1.0, %v13894_v14  ;;  %13905 = vrcp.f32 %v4325_v39 }
0x2065   :  { %v13898_v51 = vpop.eup %13897  ;;  %13907 = vrcp.f32 %v4323_v19  ;;  %v4326_v41 = vadd.f32 1.0, %v13896_v44 }
0x2066   :  { %v13900_v40 = vpop.eup %13899  ;;  %13909 = vrcp.f32 %v4322_v15  ;;  %v4324_v42 = vadd.f32 1.0, %v13898_v51 }
0x2067   :  { %v13902_v3 = vpop.eup %13901  ;;  %13911 = vrcp.f32 %v4326_v41  ;;  %v4327_v32 = vadd.f32 1.0, %v13900_v40 }
0x2068   :  { %v13904_v59 = vpop.eup %13903  ;;  %13913 = vrcp.f32 %v4324_v42  ;;  %v4328_v61 = vadd.f32 1.0, %v13902_v3 }
0x2069   :  { %13915 = vrcp.f32 %v4327_v32  ;;  %v4329_v23 = vadd.f32 1.0, %v13904_v59 }
0x206a   :  { %13917 = vrcp.f32 %v4328_v61 }
0x206b   :  { %13919 = vrcp.f32 %v4329_v23 }
0x206e   :  { %v16844_v24 = vpop.eup %13905 }
0x206f   :  { %v16847_v18 = vpop.eup %13907 }
0x2070   :  { %v16851_v2 = vpop.eup %13909 }
0x2071   :  { %v16855_v34 = vpop.eup %13911 }
0x2072   :  { %v16859_v27 = vpop.eup %13913 }
0x2073   :  { %v16863_v56 = vpop.eup %13915 }
0x2074   :  { %v16867_v47 = vpop.eup %13917 }
0x2075   :  { %v16871_v14 = vpop.eup %13919 }
0x20c2   :  { %v4353_v26 = vpop.permute.xlu0 %4352 }
0x20c3   :  { %v4373_v11 = vmul.f32 %v16844_v24, %v4353_v26 }
0x20c4   :  { %v4349_v50 = vpop.permute.xlu1 %4348 }
0x20c5   :  { %v4371_v12 = vmul.f32 %v16847_v18, %v4349_v50  ;;  %4392 = vrot.lane.b32.xlu0 %v4373_v11, %s14692_s16 }
0x20c6   :  { %v4347_v7 = vpop.permute.xlu0 %4346 }
0x20c7   :  { %v4370_v54 = vmul.f32 %v16851_v2, %v4347_v7  ;;  %4388 = vrot.lane.b32.xlu1 %v4371_v12, %s14692_s16 }
0x20c8   :  { %v4355_v25 = vpop.permute.xlu1 %4354 }
0x20c9   :  { %v4374_v30 = vmul.f32 %v16855_v34, %v4355_v25  ;;  %4386 = vrot.lane.b32.xlu0 %v4370_v54, %s14692_s16 }
0x20ca   :  { %v4351_v63 = vpop.permute.xlu0 %4350 }
0x20cb   :  { %v4372_v16 = vmul.f32 %v16859_v27, %v4351_v63  ;;  %4394 = vrot.lane.b32.xlu1 %v4374_v30, %s14692_s16 }
0x20cc   :  { %v4357_v35 = vpop.permute.xlu1 %4356 }
0x20cd   :  { %v4375_v36 = vmul.f32 %v16863_v56, %v4357_v35  ;;  %4390 = vrot.lane.b32.xlu0 %v4372_v16, %s14692_s16 }
0x20ce   :  { %v4359_v31 = vpop.permute.xlu0 %4358 }
0x20cf   :  { %v4376_v39 = vmul.f32 %v16867_v47, %v4359_v31  ;;  %4396 = vrot.lane.b32.xlu1 %v4375_v36, %s14692_s16 }
0x20d0   :  { %v4361_v19 = vpop.permute.xlu1 %4360 }
0x20d1   :  { %v4377_v44 = vmul.f32 %v16871_v14, %v4361_v19  ;;  %4398 = vrot.lane.b32.xlu0 %v4376_v39, %s14692_s16  ;;  %v4429_v19 = vsub.f32 1.0, %v16844_v24 }
0x20d3   :  { %4400 = vrot.lane.b32.xlu1 %v4377_v44, %s14692_s16 }
0x2137   :  { %v4393_v15 = vpop.permute.xlu0 %4392 }
0x2138   :  { %v4413_v51 = vadd.f32 %v4393_v15, %v16384_v45  ;;  %v4492_v15 = vmul.f32 %v16844_v24, %v4190_v17  ;;  %v4477_v17 = vrot.slane %v16778_v28, 7 }
0x2139   :  { %v4389_v41 = vpop.permute.xlu1 %4388 }
0x213a   :  { %13921 = vtanh.f32 %v4413_v51  ;;  %v4411_v40 = vadd.f32 %v4389_v41, %v16377_v58  ;;  %v4427_v41 = vsub.f32 1.0, %v16847_v18 }
0x213b   :  { %v4387_v42 = vpop.permute.xlu0 %4386 }
0x213c   :  { %13923 = vtanh.f32 %v4411_v40  ;;  %v4410_v3 = vadd.f32 %v4387_v42, %v16379_v21  ;;  %v4475_v40 = vrot.slane %v16735_v43, 7 }
0x213d   :  { %v4395_v32 = vpop.permute.xlu1 %4394 }
0x213e   :  { %13925 = vtanh.f32 %v4410_v3  ;;  %v4414_v59 = vadd.f32 %v4395_v32, %v16392_v22  ;;  %v4474_v3 = vrot.slane %v16723_v5, 7 }
0x213f   :  { %v4391_v61 = vpop.permute.xlu0 %4390 }
0x2140   :  { %13927 = vtanh.f32 %v4414_v59  ;;  %v4412_v23 = vadd.f32 %v4391_v61, %v16386_v52  ;;  %v4490_v59 = vmul.f32 %v16847_v18, %v4475_v40  ;;  %v4493_v18 = vmul.f32 %v16855_v34, %v4477_v17 }
0x2141   :  { %v4397_v26 = vpop.permute.xlu1 %4396 }
0x2142   :  { %13929 = vtanh.f32 %v4412_v23  ;;  %v4415_v11 = vadd.f32 %v4397_v26, %v16390_v53  ;;  %v4426_v23 = vsub.f32 1.0, %v16851_v2  ;;  %v4489_v26 = vmul.f32 %v16851_v2, %v4474_v3 }
0x2143   :  { %v4399_v50 = vpop.permute.xlu0 %4398 }
0x2144   :  { %v13922_v12 = vpop.eup %13921  ;;  %13931 = vtanh.f32 %v4415_v11  ;;  %v4416_v7 = vadd.f32 %v4399_v50, %v16398_v29  ;;  %v4430_v11 = vsub.f32 1.0, %v16855_v34 }
0x2145   :  { %v4401_v54 = vpop.permute.xlu1 %4400  ;;  %4448 = vrot.lane.b32.xlu0 %v13922_v12, %s14693_s11  ;;  %v4476_v12 = vrot.slane %v16710_v60, 7 }
0x2146   :  { %v13924_v25 = vpop.eup %13923  ;;  %13933 = vtanh.f32 %v4416_v7  ;;  %v4417_v30 = vadd.f32 %v4401_v54, %v16396_v62 }
0x2147   :  { %4444 = vrot.lane.b32.xlu1 %v13924_v25, %s14693_s11  ;;  %v4491_v25 = vmul.f32 %v16859_v27, %v4476_v12 }
0x2148   :  { %v13926_v63 = vpop.eup %13925  ;;  %13935 = vtanh.f32 %v4417_v30 }
0x2149   :  { %4442 = vrot.lane.b32.xlu0 %v13926_v63, %s14693_s11 }
0x214a   :  { %v13928_v16 = vpop.eup %13927 }
0x214b   :  { %4450 = vrot.lane.b32.xlu1 %v13928_v16, %s14693_s11  ;;  %v4431_v16 = vsub.f32 1.0, %v16863_v56 }
0x214c   :  { %v13930_v35 = vpop.eup %13929 }
0x214d   :  { %4446 = vrot.lane.b32.xlu0 %v13930_v35, %s14693_s11  ;;  %v4478_v35 = vrot.slane %v16764_v49, 7 }
0x214e   :  { %v13932_v36 = vpop.eup %13931 }
0x214f   :  { %4452 = vrot.lane.b32.xlu1 %v13932_v36, %s14693_s11 }
0x2150   :  { %v13934_v31 = vpop.eup %13933 }
0x2151   :  { %4454 = vrot.lane.b32.xlu0 %v13934_v31, %s14693_s11  ;;  %v4479_v31 = vrot.slane %v16802_v8, 7 }
0x2152   :  { %v13936_v39 = vpop.eup %13935 }
0x2153   :  { %4456 = vrot.lane.b32.xlu1 %v13936_v39, %s14693_s11 }
0x21b7   :  { %v4449_v44 = vpop.permute.xlu0 %4448 }
0x21b8   :  { %v4469_v51 = vmul.f32 %v4449_v44, %v4429_v19  ;;  %v4494_v44 = vmul.f32 %v16863_v56, %v4478_v35 }
0x21b9   :  { %v4445_v42 = vpop.permute.xlu1 %4444 }
0x21ba   :  { %v16899_v32 = vadd.f32 %v4492_v15, %v4469_v51  ;;  %v4467_v61 = vmul.f32 %v4445_v42, %v4427_v41  ;;  %v4495_v51 = vmul.f32 %v16867_v47, %v4479_v31  ;;  %v4480_v41 = vrot.slane %v16783_v20, 7 }
0x21bb   :  { %v4443_v48 = vpop.permute.xlu0 %4442  ;;  %v4433_v42 = vsub.f32 1.0, %v16871_v14 }
0x21bc   :  { %v16908_v24 = vsel %vm3026_vm12, %v16762_v33, %v16899_v32  ;;  %v16910_v43 = vadd.f32 %v4490_v59, %v4467_v61  ;;  %v4466_v5 = vmul.f32 %v4443_v48, %v4426_v23  ;;  %v4428_v33 = vsub.f32 1.0, %v16859_v27 }
0x21bd   :  { %v4451_v50 = vpop.permute.xlu1 %4450  ;;  %v4496_v56 = vmul.f32 %v16871_v14, %v4480_v41 }
0x21be   :  { %v16918_v2 = vsel %vm3026_vm12, %v16749_v38, %v16910_v43  ;;  %v16920_v28 = vadd.f32 %v4489_v26, %v4466_v5  ;;  %v4470_v7 = vmul.f32 %v4451_v50, %v4430_v11  ;;  %v4514_v54 = vrot.slane %v16910_v43, 2 }
0x21bf   :  { %v4447_v30 = vpop.permute.xlu0 %4446 }
0x21c0   :  { %v4513_v34 = vrot.slane %v16920_v28, 3  ;;  %v16929_v60 = vsel %vm3026_vm12, %v16733_v37, %v16920_v28  ;;  %v16931_v63 = vadd.f32 %v4493_v18, %v4470_v7  ;;  %v4468_v38 = vmul.f32 %v4447_v30, %v4428_v33 }
0x21c1   :  { %v4453_v36 = vpop.permute.xlu1 %4452  ;;  %v4432_v37 = vsub.f32 1.0, %v16867_v47 }
0x21c2   :  { %v4515_v27 = vsel %vm721_vm2, %v4514_v54, %v4513_v34  ;;  %v16940_v39 = vsel %vm3026_vm12, %v16792_v10, %v16931_v63  ;;  %v16942_v19 = vadd.f32 %v4491_v25, %v4468_v38  ;;  %v4471_v15 = vmul.f32 %v4453_v36, %v4431_v16 }
0x21c3   :  { %v4455_v49 = vpop.permute.xlu0 %4454  ;;  %v4519_v47 = vrot.slane %v16931_v63, 7 }
0x21c4   :  { %v4516_v8 = vrot.slane %v16942_v19, 1  ;;  %v16952_v40 = vsel %vm3026_vm12, %v16721_v9, %v16942_v19  ;;  %v4472_v10 = vmul.f32 %v4455_v49, %v4432_v37  ;;  %v16955_v3 = vadd.f32 %v4494_v44, %v4471_v15 }
0x21c5   :  { %v4457_v59 = vpop.permute.xlu1 %4456 }
0x21c6   :  { %v4517_v61 = vsel %vm724_vm3, %v4516_v8, %v4515_v27  ;;  %v16960_v20 = vadd.f32 %v4495_v51, %v4472_v10  ;;  %v4473_v23 = vmul.f32 %v4457_v59, %v4433_v42  ;;  %v4521_v26 = vrot.slane %v16955_v3, 6 }
0x21c7   :  { %v16966_v9 = vsel %vm3026_vm12, %v16773_v6, %v16955_v3  ;;  %v4518_v48 = vsel %vm727_vm4, %v16899_v32, %v4517_v61 }
0x21c8   :  { %v4523_v14 = vrot.slane %v16960_v20, 5  ;;  %v16974_v17 = vsel %vm3026_vm12, %v16811_v55, %v16960_v20  ;;  %v16976_v5 = vadd.f32 %v4496_v56, %v4473_v23  ;;  %v4520_v11 = vsel %vm730_vm5, %v4519_v47, %v4518_v48 }
0x21c9   :  { %v4522_v18 = vsel %vm733_vm6, %v4521_v26, %v4520_v11 }
0x21ca   :  { %v16985_v6 = vsel %vm3026_vm12, %v16800_v13, %v16976_v5  ;;  %v4524_v50 = vsel %vm736_vm7, %v4523_v14, %v4522_v18  ;;  %v4525_v12 = vrot.slane %v16976_v5, 4  ;;  %vm18685_vm12 = vmmov %vm18683_vm10 }
0x21cc   :  { %v4526_v55 = vsel %vm739_vm8, %v4525_v12, %v4524_v50 }
0x21cd   :  { %4527 = vrot.lane.b32.xlu0 %v4526_v55, %s14693_s11 }
0x223f   :  { %v4528_v7 = vpop.permute.xlu0 %4527 }
0x2240   :  { %12740 = vmatmul.mubr.msk.f32.vlgmr.msra.gmra.mrb[24].mxu0 %vm422_vm9, %v4528_v7 }
0x2241   :  { %13284 = vmatpush3.bf16.msra.mxu0 %v16271_v46  ;;  %12761 = vmatprep.mubr.msk.f32.mxu0 %vm14690_vm0, %v18665_v1 }
0x2242   :  { %13285 = vmatprep.subr.bf16.mxu0 %v18663_v0 }
0x2245   :  { %13287 = vmatpush3.bf16.msra.mxu0 %v16277_v4 }
0x2313   :  { %v4597_v13 = vpop.f32.mrb[24].mxu0 }
0x2314   :  { %v4598_v33 = vadd.f32 %v16825_v57, %v4597_v13  ;;  %v12741_v54 = vpop.f32.mrb[25].mxu0 }
0x2316   :  { %4681 = vrot.lane.b32.xlu0 %v4598_v33, %s14692_s16  ;;  %v4602_v25 = vrot.slane %v4598_v33, 4  ;;  %v4603_v30 = vrot.slane %v4598_v33, 5  ;;  %v4604_v34 = vrot.slane %v4598_v33, 6  ;;  %v4605_v38 = vrot.slane %v4598_v33, 7 }
0x2317   :  { %v4606_v16 = vrot.slane %v4598_v33, 1  ;;  %v4608_v35 = vrot.slane %v4598_v33, 3  ;;  %v4607_v36 = vrot.slane %v4598_v33, 2  ;;  %v4621_v31 = vadd.f32 %v4598_v33, %v16392_v22 }
0x2318   :  { %4673 = vrot.lane.b32.xlu1 %v4602_v25, %s14692_s16  ;;  %v4617_v27 = vadd.f32 %v4602_v25, %v16379_v21  ;;  %v4618_v37 = vadd.f32 %v4603_v30, %v16377_v58  ;;  %v4619_v51 = vadd.f32 %v4604_v34, %v16386_v52  ;;  %v4620_v41 = vadd.f32 %v4605_v38, %v16384_v45 }
0x2319   :  { %v4629_v44 = vsub.f32 0.0, %v4621_v31  ;;  %v4622_v56 = vadd.f32 %v4606_v16, %v16390_v53  ;;  %v4624_v23 = vadd.f32 %v4608_v35, %v16396_v62  ;;  %v4623_v14 = vadd.f32 %v4607_v36, %v16398_v29 }
0x231a   :  { %4675 = vrot.lane.b32.xlu0 %v4603_v30, %s14692_s16  ;;  %v4625_v15 = vsub.f32 0.0, %v4617_v27  ;;  %v4626_v49 = vsub.f32 0.0, %v4618_v37  ;;  %v4627_v42 = vsub.f32 0.0, %v4619_v51  ;;  %v4628_v61 = vsub.f32 0.0, %v4620_v41 }
0x231b   :  { %v4641_v8 = vmul.f32 1.442695, %v4629_v44  ;;  %v4630_v48 = vsub.f32 0.0, %v4622_v56  ;;  %v4632_v18 = vsub.f32 0.0, %v4624_v23  ;;  %v4631_v12 = vsub.f32 0.0, %v4623_v14 }
0x231c   :  { %4677 = vrot.lane.b32.xlu1 %v4604_v34, %s14692_s16  ;;  %v4633_v10 = vmul.f32 1.442695, %v4625_v15  ;;  %v4635_v59 = vmul.f32 1.442695, %v4626_v49  ;;  %v4637_v26 = vmul.f32 1.442695, %v4627_v42 }
0x231d   :  { %13937 = vpow2.f32 %v4641_v8  ;;  %v4639_v11 = vmul.f32 1.442695, %v4628_v61  ;;  %v4643_v50 = vmul.f32 1.442695, %v4630_v48  ;;  %v4647_v55 = vmul.f32 1.442695, %v4632_v18 }
0x231e   :  { %4679 = vrot.lane.b32.xlu0 %v4605_v38, %s14692_s16  ;;  %13939 = vpow2.f32 %v4633_v10  ;;  %v4645_v13 = vmul.f32 1.442695, %v4631_v12 }
0x231f   :  { %13941 = vpow2.f32 %v4635_v59 }
0x2320   :  { %4683 = vrot.lane.b32.xlu1 %v4606_v16, %s14692_s16  ;;  %13943 = vpow2.f32 %v4637_v26 }
0x2321   :  { %13945 = vpow2.f32 %v4639_v11 }
0x2322   :  { %4687 = vrot.lane.b32.xlu0 %v4608_v35, %s14692_s16  ;;  %13947 = vpow2.f32 %v4643_v50 }
0x2323   :  { %13949 = vpow2.f32 %v4647_v55 }
0x2324   :  { %4685 = vrot.lane.b32.xlu1 %v4607_v36, %s14692_s16  ;;  %13951 = vpow2.f32 %v4645_v13 }
0x2327   :  { %v13938_v7 = vpop.eup %13937 }
0x2328   :  { %v13940_v33 = vpop.eup %13939  ;;  %v4653_v54 = vadd.f32 1.0, %v13938_v7 }
0x2329   :  { %v13942_v25 = vpop.eup %13941  ;;  %v4649_v30 = vadd.f32 1.0, %v13940_v33 }
0x232a   :  { %v13944_v34 = vpop.eup %13943  ;;  %v4650_v38 = vadd.f32 1.0, %v13942_v25  ;;  %13953 = vrcp.f32 %v4653_v54 }
0x232b   :  { %v13946_v16 = vpop.eup %13945  ;;  %13955 = vrcp.f32 %v4649_v30  ;;  %v4651_v35 = vadd.f32 1.0, %v13944_v34 }
0x232c   :  { %v13948_v36 = vpop.eup %13947  ;;  %13957 = vrcp.f32 %v4650_v38  ;;  %v4652_v31 = vadd.f32 1.0, %v13946_v16 }
0x232d   :  { %v13950_v27 = vpop.eup %13949  ;;  %13959 = vrcp.f32 %v4651_v35  ;;  %v4654_v37 = vadd.f32 1.0, %v13948_v36 }
0x232e   :  { %v13952_v44 = vpop.eup %13951  ;;  %13961 = vrcp.f32 %v4652_v31  ;;  %v4656_v15 = vadd.f32 1.0, %v13950_v27 }
0x232f   :  { %13963 = vrcp.f32 %v4654_v37  ;;  %v4655_v49 = vadd.f32 1.0, %v13952_v44 }
0x2330   :  { %13965 = vrcp.f32 %v4656_v15 }
0x2331   :  { %13967 = vrcp.f32 %v4655_v49 }
0x2334   :  { %v17014_v51 = vpop.eup %13953 }
0x2335   :  { %v17017_v10 = vpop.eup %13955 }
0x2336   :  { %v17021_v59 = vpop.eup %13957 }
0x2337   :  { %v17025_v26 = vpop.eup %13959 }
0x2338   :  { %v17029_v11 = vpop.eup %13961 }
0x2339   :  { %v17033_v12 = vpop.eup %13963 }
0x233a   :  { %v17037_v13 = vpop.eup %13965 }
0x233b   :  { %v17041_v25 = vpop.eup %13967 }
0x2388   :  { %v4682_v41 = vpop.permute.xlu0 %4681 }
0x2389   :  { %v4701_v8 = vmul.f32 %v17014_v51, %v4682_v41 }
0x238a   :  { %v4674_v42 = vpop.permute.xlu1 %4673 }
0x238b   :  { %v4697_v56 = vmul.f32 %v17017_v10, %v4674_v42  ;;  %4721 = vrot.lane.b32.xlu0 %v4701_v8, %s14692_s16 }
0x238c   :  { %v4676_v61 = vpop.permute.xlu0 %4675 }
0x238d   :  { %v4698_v23 = vmul.f32 %v17021_v59, %v4676_v61  ;;  %4713 = vrot.lane.b32.xlu1 %v4697_v56, %s14692_s16 }
0x238e   :  { %v4678_v48 = vpop.permute.xlu1 %4677 }
0x238f   :  { %v4699_v14 = vmul.f32 %v17025_v26, %v4678_v48  ;;  %4715 = vrot.lane.b32.xlu0 %v4698_v23, %s14692_s16 }
0x2390   :  { %v4680_v18 = vpop.permute.xlu0 %4679 }
0x2391   :  { %v4700_v50 = vmul.f32 %v17029_v11, %v4680_v18  ;;  %4717 = vrot.lane.b32.xlu1 %v4699_v14, %s14692_s16 }
0x2392   :  { %v4684_v55 = vpop.permute.xlu1 %4683 }
0x2393   :  { %v4702_v7 = vmul.f32 %v17033_v12, %v4684_v55  ;;  %4719 = vrot.lane.b32.xlu0 %v4700_v50, %s14692_s16 }
0x2394   :  { %v4688_v33 = vpop.permute.xlu0 %4687 }
0x2395   :  { %v4704_v54 = vmul.f32 %v17037_v13, %v4688_v33  ;;  %4723 = vrot.lane.b32.xlu1 %v4702_v7, %s14692_s16 }
0x2396   :  { %v4686_v30 = vpop.permute.xlu1 %4685 }
0x2397   :  { %v4703_v34 = vmul.f32 %v17041_v25, %v4686_v30  ;;  %4727 = vrot.lane.b32.xlu0 %v4704_v54, %s14692_s16  ;;  %v4757_v30 = vsub.f32 1.0, %v17014_v51 }
0x2399   :  { %4725 = vrot.lane.b32.xlu1 %v4703_v34, %s14692_s16 }
0x23fd   :  { %v4722_v38 = vpop.permute.xlu0 %4721 }
0x23fe   :  { %v4741_v16 = vadd.f32 %v4722_v38, %v16392_v22  ;;  %v4820_v38 = vmul.f32 %v17014_v51, %v4519_v47  ;;  %v4803_v47 = vrot.slane %v16942_v19, 7 }
0x23ff   :  { %v4714_v35 = vpop.permute.xlu1 %4713 }
0x2400   :  { %13969 = vtanh.f32 %v4741_v16  ;;  %v4737_v36 = vadd.f32 %v4714_v35, %v16379_v21  ;;  %v4753_v35 = vsub.f32 1.0, %v17017_v10 }
0x2401   :  { %v4716_v31 = vpop.permute.xlu0 %4715 }
0x2402   :  { %13971 = vtanh.f32 %v4737_v36  ;;  %v4738_v27 = vadd.f32 %v4716_v31, %v16377_v58  ;;  %v4801_v36 = vrot.slane %v16920_v28, 7 }
0x2403   :  { %v4718_v37 = vpop.permute.xlu1 %4717 }
0x2404   :  { %13973 = vtanh.f32 %v4738_v27  ;;  %v4739_v44 = vadd.f32 %v4718_v37, %v16386_v52  ;;  %v4802_v27 = vrot.slane %v16910_v43, 7 }
0x2405   :  { %v4720_v15 = vpop.permute.xlu0 %4719 }
0x2406   :  { %13975 = vtanh.f32 %v4739_v44  ;;  %v4740_v49 = vadd.f32 %v4720_v15, %v16384_v45  ;;  %v4816_v44 = vmul.f32 %v17017_v10, %v4801_v36  ;;  %v4818_v10 = vmul.f32 %v17025_v26, %v4803_v47 }
0x2407   :  { %v4724_v41 = vpop.permute.xlu1 %4723 }
0x2408   :  { %13977 = vtanh.f32 %v4740_v49  ;;  %v4742_v8 = vadd.f32 %v4724_v41, %v16390_v53  ;;  %v4754_v49 = vsub.f32 1.0, %v17021_v59  ;;  %v4817_v41 = vmul.f32 %v17021_v59, %v4802_v27 }
0x2409   :  { %v4728_v42 = vpop.permute.xlu0 %4727 }
0x240a   :  { %v13970_v56 = vpop.eup %13969  ;;  %13979 = vtanh.f32 %v4742_v8  ;;  %v4744_v61 = vadd.f32 %v4728_v42, %v16396_v62  ;;  %v4755_v8 = vsub.f32 1.0, %v17025_v26  ;;  %v4805_v26 = vrot.slane %v16955_v3, 7 }
0x240b   :  { %4777 = vrot.lane.b32.xlu0 %v13970_v56, %s14693_s11  ;;  %v4726_v23 = vpop.permute.xlu1 %4725  ;;  %v4804_v56 = vrot.slane %v16899_v32, 7 }
0x240c   :  { %v13972_v48 = vpop.eup %13971  ;;  %13981 = vtanh.f32 %v4744_v61  ;;  %v4743_v14 = vadd.f32 %v4726_v23, %v16398_v29 }
0x240d   :  { %4769 = vrot.lane.b32.xlu1 %v13972_v48, %s14693_s11  ;;  %v4819_v48 = vmul.f32 %v17029_v11, %v4804_v56 }
0x240e   :  { %v13974_v18 = vpop.eup %13973  ;;  %13983 = vtanh.f32 %v4743_v14 }
0x240f   :  { %4771 = vrot.lane.b32.xlu0 %v13974_v18, %s14693_s11 }
0x2410   :  { %v13976_v50 = vpop.eup %13975 }
0x2411   :  { %4773 = vrot.lane.b32.xlu1 %v13976_v50, %s14693_s11 }
0x2412   :  { %v13978_v55 = vpop.eup %13977 }
0x2413   :  { %4775 = vrot.lane.b32.xlu0 %v13978_v55, %s14693_s11  ;;  %v4758_v55 = vsub.f32 1.0, %v17033_v12 }
0x2414   :  { %v13980_v7 = vpop.eup %13979 }
0x2415   :  { %4779 = vrot.lane.b32.xlu1 %v13980_v7, %s14693_s11 }
0x2416   :  { %v13982_v33 = vpop.eup %13981 }
0x2417   :  { %4783 = vrot.lane.b32.xlu0 %v13982_v33, %s14693_s11  ;;  %v4760_v33 = vsub.f32 1.0, %v17037_v13 }
0x2418   :  { %v13984_v54 = vpop.eup %13983 }
0x2419   :  { %4781 = vrot.lane.b32.xlu1 %v13984_v54, %s14693_s11  ;;  %v4806_v54 = vrot.slane %v16960_v20, 7 }
0x247d   :  { %v4778_v34 = vpop.permute.xlu0 %4777 }
0x247e   :  { %v4797_v16 = vmul.f32 %v4778_v34, %v4757_v30 }
0x247f   :  { %v4770_v31 = vpop.permute.xlu1 %4769 }
0x2480   :  { %v17069_v37 = vadd.f32 %v4820_v38, %v4797_v16  ;;  %v4793_v15 = vmul.f32 %v4770_v31, %v4753_v35  ;;  %v4821_v38 = vmul.f32 %v17033_v12, %v4805_v26 }
0x2481   :  { %v4772_v63 = vpop.permute.xlu0 %4771 }
0x2482   :  { %v17078_v51 = vsel %vm3035_vm13, %v16940_v39, %v17069_v37  ;;  %v17080_v28 = vadd.f32 %v4816_v44, %v4793_v15  ;;  %v4794_v43 = vmul.f32 %v4772_v63, %v4754_v49  ;;  %v4756_v39 = vsub.f32 1.0, %v17029_v11 }
0x2483   :  { %v4774_v42 = vpop.permute.xlu1 %4773  ;;  %v4807_v11 = vrot.slane %v16976_v5, 7  ;;  %v4759_v5 = vsub.f32 1.0, %v17041_v25 }
0x2484   :  { %v17088_v59 = vsel %vm3035_vm13, %v16929_v60, %v17080_v28  ;;  %v17090_v19 = vadd.f32 %v4817_v41, %v4794_v43  ;;  %v4795_v61 = vmul.f32 %v4774_v42, %v4755_v8  ;;  %v4840_v23 = vrot.slane %v17080_v28, 4 }
0x2485   :  { %v4776_v14 = vpop.permute.xlu0 %4775  ;;  %v4823_v35 = vmul.f32 %v17037_v13, %v4807_v11  ;;  %v4822_v13 = vmul.f32 %v17041_v25, %v4806_v54 }
0x2486   :  { %v4841_v18 = vrot.slane %v17090_v19, 3  ;;  %v17100_v32 = vsel %vm3035_vm13, %v16918_v2, %v17090_v19  ;;  %v17102_v60 = vadd.f32 %v4818_v10, %v4795_v61  ;;  %v4796_v50 = vmul.f32 %v4776_v14, %v4756_v39 }
0x2487   :  { %v4780_v7 = vpop.permute.xlu1 %4779 }
0x2488   :  { %v4842_v3 = vsel %vm721_vm2, %v4841_v18, %v4840_v23  ;;  %v4843_v30 = vrot.slane %v17102_v60, 2  ;;  %v17113_v2 = vsel %vm3035_vm13, %v16952_v40, %v17102_v60  ;;  %v17115_v34 = vadd.f32 %v4819_v48, %v4796_v50 }
0x2489   :  { %v4798_v16 = vmul.f32 %v4780_v7, %v4758_v55  ;;  %v4784_v36 = vpop.permute.xlu0 %4783 }
0x248a   :  { %v4844_v20 = vsel %vm724_vm3, %v4843_v30, %v4842_v3  ;;  %v4845_v31 = vrot.slane %v17115_v34, 1  ;;  %v17125_v27 = vsel %vm3035_vm13, %v16908_v24, %v17115_v34  ;;  %v4800_v40 = vmul.f32 %v4784_v36, %v4760_v33 }
0x248b   :  { %v17127_v44 = vadd.f32 %v4821_v38, %v4798_v16  ;;  %v4782_v15 = vpop.permute.xlu1 %4781 }
0x248c   :  { %v17129_v12 = vadd.f32 %v4823_v35, %v4800_v40  ;;  %v4799_v49 = vmul.f32 %v4782_v15, %v4759_v5  ;;  %v4846_v41 = vsel %vm727_vm4, %v4845_v31, %v4844_v20 }
0x248d   :  { %v4848_v63 = vrot.slane %v17127_v44, 7  ;;  %v17137_v47 = vsel %vm3035_vm13, %v16966_v9, %v17127_v44  ;;  %v4847_v25 = vsel %vm730_vm5, %v17069_v37, %v4846_v41 }
0x248e   :  { %v17142_v24 = vsel %vm3035_vm13, %v16985_v6, %v17129_v12  ;;  %v17144_v43 = vadd.f32 %v4822_v13, %v4799_v49  ;;  %v4852_v42 = vrot.slane %v17129_v12, 5 }
0x248f   :  { %v4849_v9 = vsel %vm733_vm6, %v4848_v63, %v4847_v25 }
0x2490   :  { %v4850_v8 = vrot.slane %v17144_v43, 6  ;;  %v17152_v10 = vsel %vm3035_vm13, %v16974_v17, %v17144_v43  ;;  %vm18687_vm13 = vmmov %vm18683_vm10 }
0x2492   :  { %v4851_v6 = vsel %vm736_vm7, %v4850_v8, %v4849_v9 }
0x2493   :  { %v4853_v56 = vsel %vm739_vm8, %v4852_v42, %v4851_v6 }
0x2494   :  { %4854 = vrot.lane.b32.xlu1 %v4853_v56, %s14693_s11 }
0x2506   :  { %v4855_v61 = vpop.permute.xlu1 %4854 }
0x2507   :  { %12751 = vmatmul.mubr.msk.f32.vlgmr.msra.gmra.mrb[16].mxu1 %vm422_vm9, %v4855_v61 }
0x2508   :  { %13290 = vmatpush3.bf16.msra.mxu1 %v16271_v46  ;;  %12772 = vmatprep.mubr.msk.f32.mxu1 %vm14690_vm0, %v18665_v1 }
0x2509   :  { %13291 = vmatprep.subr.bf16.mxu1 %v18663_v0 }
0x250c   :  { %13293 = vmatpush3.bf16.msra.mxu1 %v16277_v4 }
0x25da   :  { %v4924_v17 = vpop.f32.mrb[16].mxu1 }
0x25db   :  { %v4925_v39 = vadd.f32 %v16825_v57, %v4924_v17  ;;  %v12752_v23 = vpop.f32.mrb[17].mxu1 }
0x25dd   :  { %v4930_v48 = vrot.slane %v4925_v39, 4  ;;  %v4929_v14 = vrot.slane %v4925_v39, 3  ;;  %v4932_v26 = vrot.slane %v4925_v39, 6  ;;  %v4931_v18 = vrot.slane %v4925_v39, 5 }
0x25de   :  { %v4934_v46 = vrot.slane %v4925_v39, 1  ;;  %v4933_v50 = vrot.slane %v4925_v39, 7  ;;  %v4935_v4 = vrot.slane %v4925_v39, 2  ;;  %v4949_v13 = vadd.f32 %v4925_v39, %v16390_v53 }
0x25df   :  { %5002 = vrot.lane.b32.xlu1 %v4930_v48, %s14692_s16  ;;  %5000 = vrot.lane.b32.xlu0 %v4929_v14, %s14692_s16  ;;  %v4945_v57 = vadd.f32 %v4930_v48, %v16377_v58  ;;  %v4944_v55 = vadd.f32 %v4929_v14, %v16379_v21  ;;  %v4947_v33 = vadd.f32 %v4932_v26, %v16384_v45 }
0x25e0   :  { %v4946_v54 = vadd.f32 %v4931_v18, %v16386_v52  ;;  %v4950_v38 = vadd.f32 %v4934_v46, %v16398_v29  ;;  %v4948_v36 = vadd.f32 %v4933_v50, %v16392_v22  ;;  %v4951_v31 = vadd.f32 %v4935_v4, %v16396_v62 }
0x25e1   :  { %v4953_v7 = vsub.f32 0.0, %v4945_v57  ;;  %v4952_v11 = vsub.f32 0.0, %v4944_v55  ;;  %v4955_v30 = vsub.f32 0.0, %v4947_v33  ;;  %v4957_v8 = vsub.f32 0.0, %v4949_v13 }
0x25e2   :  { %v4954_v35 = vsub.f32 0.0, %v4946_v54  ;;  %v4958_v20 = vsub.f32 0.0, %v4950_v38  ;;  %v4956_v15 = vsub.f32 0.0, %v4948_v36  ;;  %v4959_v41 = vsub.f32 0.0, %v4951_v31 }
0x25e3   :  { %5006 = vrot.lane.b32.xlu1 %v4932_v26, %s14692_s16  ;;  %5004 = vrot.lane.b32.xlu0 %v4931_v18, %s14692_s16  ;;  %v4962_v3 = vmul.f32 1.442695, %v4953_v7  ;;  %v4960_v16 = vmul.f32 1.442695, %v4952_v11  ;;  %v4966_v5 = vmul.f32 1.442695, %v4955_v30 }
0x25e4   :  { %v4964_v40 = vmul.f32 1.442695, %v4954_v35  ;;  %v4972_v49 = vmul.f32 1.442695, %v4958_v20  ;;  %v4968_v25 = vmul.f32 1.442695, %v4956_v15 }
0x25e5   :  { %13985 = vpow2.f32 %v4962_v3  ;;  %v4974_v9 = vmul.f32 1.442695, %v4959_v41  ;;  %v4970_v42 = vmul.f32 1.442695, %v4957_v8 }
0x25e6   :  { %13987 = vpow2.f32 %v4960_v16 }
0x25e7   :  { %5012 = vrot.lane.b32.xlu1 %v4934_v46, %s14692_s16  ;;  %5008 = vrot.lane.b32.xlu0 %v4933_v50, %s14692_s16  ;;  %13989 = vpow2.f32 %v4966_v5 }
0x25e8   :  { %13991 = vpow2.f32 %v4964_v40 }
0x25e9   :  { %13993 = vpow2.f32 %v4972_v49 }
0x25ea   :  { %13995 = vpow2.f32 %v4968_v25 }
0x25eb   :  { %5014 = vrot.lane.b32.xlu1 %v4935_v4, %s14692_s16  ;;  %5010 = vrot.lane.b32.xlu0 %v4925_v39, %s14692_s16  ;;  %13997 = vpow2.f32 %v4974_v9 }
0x25ec   :  { %13999 = vpow2.f32 %v4970_v42 }
0x25ef   :  { %v13986_v6 = vpop.eup %13985 }
0x25f0   :  { %v13988_v56 = vpop.eup %13987  ;;  %v4977_v61 = vadd.f32 1.0, %v13986_v6 }
0x25f1   :  { %v13990_v17 = vpop.eup %13989  ;;  %v4976_v23 = vadd.f32 1.0, %v13988_v56 }
0x25f2   :  { %v13992_v48 = vpop.eup %13991  ;;  %14001 = vrcp.f32 %v4977_v61  ;;  %v4979_v39 = vadd.f32 1.0, %v13990_v17 }
0x25f3   :  { %v13994_v14 = vpop.eup %13993  ;;  %14003 = vrcp.f32 %v4976_v23  ;;  %v4978_v26 = vadd.f32 1.0, %v13992_v48 }
0x25f4   :  { %v13996_v18 = vpop.eup %13995  ;;  %14005 = vrcp.f32 %v4979_v39  ;;  %v4982_v46 = vadd.f32 1.0, %v13994_v14 }
0x25f5   :  { %v13998_v50 = vpop.eup %13997  ;;  %14007 = vrcp.f32 %v4978_v26  ;;  %v4980_v4 = vadd.f32 1.0, %v13996_v18 }
0x25f6   :  { %v14000_v57 = vpop.eup %13999  ;;  %14009 = vrcp.f32 %v4982_v46  ;;  %v4983_v55 = vadd.f32 1.0, %v13998_v50 }
0x25f7   :  { %14011 = vrcp.f32 %v4980_v4  ;;  %v4981_v7 = vadd.f32 1.0, %v14000_v57 }
0x25f8   :  { %14013 = vrcp.f32 %v4983_v55 }
0x25f9   :  { %14015 = vrcp.f32 %v4981_v7 }
0x25fc   :  { %v17184_v33 = vpop.eup %14001 }
0x25fd   :  { %v17186_v11 = vpop.eup %14003 }
0x25fe   :  { %v17190_v16 = vpop.eup %14005 }
0x25ff   :  { %v17194_v35 = vpop.eup %14007 }
0x2600   :  { %v17198_v40 = vpop.eup %14009 }
0x2601   :  { %v17202_v15 = vpop.eup %14011 }
0x2602   :  { %v17206_v8 = vpop.eup %14013 }
0x2603   :  { %v17210_v9 = vpop.eup %14015 }
0x2651   :  { %v5003_v54 = vpop.permute.xlu1 %5002  ;;  %v5001_v3 = vpop.permute.xlu0 %5000 }
0x2652   :  { %v5025_v30 = vmul.f32 %v17184_v33, %v5003_v54  ;;  %v5024_v38 = vmul.f32 %v17186_v11, %v5001_v3 }
0x2654   :  { %5042 = vrot.lane.b32.xlu1 %v5025_v30, %s14692_s16  ;;  %5040 = vrot.lane.b32.xlu0 %v5024_v38, %s14692_s16 }
0x2655   :  { %v5007_v36 = vpop.permute.xlu1 %5006  ;;  %v5005_v5 = vpop.permute.xlu0 %5004 }
0x2656   :  { %v5027_v20 = vmul.f32 %v17190_v16, %v5007_v36  ;;  %v5026_v31 = vmul.f32 %v17194_v35, %v5005_v5 }
0x2658   :  { %5046 = vrot.lane.b32.xlu1 %v5027_v20, %s14692_s16  ;;  %5044 = vrot.lane.b32.xlu0 %v5026_v31, %s14692_s16 }
0x2659   :  { %v5013_v13 = vpop.permute.xlu1 %5012  ;;  %v5009_v49 = vpop.permute.xlu0 %5008 }
0x265a   :  { %v5030_v41 = vmul.f32 %v17198_v40, %v5013_v13  ;;  %v5028_v25 = vmul.f32 %v17202_v15, %v5009_v49 }
0x265c   :  { %5052 = vrot.lane.b32.xlu1 %v5030_v41, %s14692_s16  ;;  %5048 = vrot.lane.b32.xlu0 %v5028_v25, %s14692_s16  ;;  %v5081_v25 = vsub.f32 1.0, %v17184_v33 }
0x265d   :  { %v5015_v42 = vpop.permute.xlu1 %5014  ;;  %v5011_v6 = vpop.permute.xlu0 %5010 }
0x265e   :  { %v5031_v56 = vmul.f32 %v17206_v8, %v5015_v42  ;;  %v5029_v61 = vmul.f32 %v17210_v9, %v5011_v6  ;;  %v5129_v42 = vrot.slane %v17090_v19, 7 }
0x2660   :  { %5054 = vrot.lane.b32.xlu1 %v5031_v56, %s14692_s16  ;;  %5050 = vrot.lane.b32.xlu0 %v5029_v61, %s14692_s16  ;;  %v5080_v56 = vsub.f32 1.0, %v17186_v11  ;;  %v5128_v61 = vrot.slane %v17080_v28, 7  ;;  %v5130_v28 = vrot.slane %v17102_v60, 7 }
0x26c6   :  { %v5043_v17 = vpop.permute.xlu1 %5042  ;;  %v5041_v23 = vpop.permute.xlu0 %5040 }
0x26c7   :  { %v5065_v48 = vadd.f32 %v5043_v17, %v16377_v58  ;;  %v5064_v39 = vadd.f32 %v5041_v23, %v16379_v21  ;;  %v5144_v17 = vmul.f32 %v17184_v33, %v5129_v42 }
0x26c9   :  { %14017 = vtanh.f32 %v5065_v48 }
0x26ca   :  { %14019 = vtanh.f32 %v5064_v39  ;;  %v5047_v14 = vpop.permute.xlu1 %5046  ;;  %v5045_v26 = vpop.permute.xlu0 %5044  ;;  %v5143_v39 = vmul.f32 %v17186_v11, %v5128_v61 }
0x26cb   :  { %v5067_v18 = vadd.f32 %v5047_v14, %v16384_v45  ;;  %v5066_v46 = vadd.f32 %v5045_v26, %v16386_v52 }
0x26cd   :  { %14021 = vtanh.f32 %v5067_v18  ;;  %v5083_v18 = vsub.f32 1.0, %v17190_v16 }
0x26ce   :  { %14023 = vtanh.f32 %v5066_v46  ;;  %v5053_v50 = vpop.permute.xlu1 %5052  ;;  %v5049_v4 = vpop.permute.xlu0 %5048  ;;  %v5131_v46 = vrot.slane %v17115_v34, 7 }
0x26cf   :  { %v5070_v57 = vadd.f32 %v5053_v50, %v16398_v29  ;;  %v5068_v55 = vadd.f32 %v5049_v4, %v16392_v22  ;;  %v5082_v4 = vsub.f32 1.0, %v17194_v35 }
0x26d1   :  { %14025 = vtanh.f32 %v5070_v57  ;;  %v5146_v57 = vmul.f32 %v17190_v16, %v5131_v46  ;;  %v5086_v16 = vsub.f32 1.0, %v17198_v40 }
0x26d2   :  { %14027 = vtanh.f32 %v5068_v55  ;;  %v5055_v7 = vpop.permute.xlu1 %5054  ;;  %v5051_v54 = vpop.permute.xlu0 %5050 }
0x26d3   :  { %v14018_v3 = vpop.eup %14017  ;;  %v5071_v30 = vadd.f32 %v5055_v7, %v16396_v62  ;;  %v5069_v38 = vadd.f32 %v5051_v54, %v16390_v53  ;;  %v5145_v54 = vmul.f32 %v17194_v35, %v5130_v28  ;;  %v5132_v35 = vrot.slane %v17069_v37, 7 }
0x26d4   :  { %v14020_v36 = vpop.eup %14019  ;;  %5098 = vrot.lane.b32.xlu1 %v14018_v3, %s14693_s11 }
0x26d5   :  { %14029 = vtanh.f32 %v5071_v30  ;;  %5096 = vrot.lane.b32.xlu0 %v14020_v36, %s14693_s11 }
0x26d6   :  { %14031 = vtanh.f32 %v5069_v38  ;;  %v5133_v38 = vrot.slane %v17144_v43, 7 }
0x26d7   :  { %v14022_v5 = vpop.eup %14021 }
0x26d8   :  { %v14024_v20 = vpop.eup %14023  ;;  %5102 = vrot.lane.b32.xlu1 %v14022_v5, %s14693_s11 }
0x26d9   :  { %5100 = vrot.lane.b32.xlu0 %v14024_v20, %s14693_s11  ;;  %v5084_v20 = vsub.f32 1.0, %v17202_v15 }
0x26db   :  { %v14026_v31 = vpop.eup %14025 }
0x26dc   :  { %v14028_v13 = vpop.eup %14027  ;;  %5108 = vrot.lane.b32.xlu1 %v14026_v31, %s14693_s11 }
0x26dd   :  { %5104 = vrot.lane.b32.xlu0 %v14028_v13, %s14693_s11 }
0x26df   :  { %v14030_v49 = vpop.eup %14029 }
0x26e0   :  { %v14032_v41 = vpop.eup %14031  ;;  %5110 = vrot.lane.b32.xlu1 %v14030_v49, %s14693_s11 }
0x26e1   :  { %5106 = vrot.lane.b32.xlu0 %v14032_v41, %s14693_s11 }
0x2746   :  { %v5099_v6 = vpop.permute.xlu1 %5098 }
0x2747   :  { %v5121_v23 = vmul.f32 %v5099_v6, %v5081_v25  ;;  %v5097_v48 = vpop.permute.xlu0 %5096  ;;  %v5147_v25 = vmul.f32 %v17202_v15, %v5132_v35 }
0x2748   :  { %v5120_v14 = vmul.f32 %v5097_v48, %v5080_v56  ;;  %v5134_v56 = vrot.slane %v17129_v12, 7 }
0x2749   :  { %v17238_v26 = vadd.f32 %v5144_v17, %v5121_v23  ;;  %v5085_v23 = vsub.f32 1.0, %v17210_v9 }
0x274a   :  { %v17242_v50 = vadd.f32 %v5143_v39, %v5120_v14  ;;  %v5103_v19 = vpop.permute.xlu1 %5102  ;;  %v5150_v15 = vmul.f32 %v17206_v8, %v5134_v56 }
0x274b   :  { %v5168_v33 = vrot.slane %v17238_v26, 4  ;;  %v5123_v55 = vmul.f32 %v5103_v19, %v5083_v18  ;;  %v5101_v11 = vpop.permute.xlu0 %5100  ;;  %v17251_v7 = vsel %vm3044_vm14, %v17100_v32, %v17238_v26  ;;  %v5148_v18 = vmul.f32 %v17210_v9, %v4848_v63 }
0x274c   :  { %v5167_v34 = vrot.slane %v17242_v50, 5  ;;  %v5122_v3 = vmul.f32 %v5101_v11, %v5082_v4  ;;  %v17258_v60 = vsel %vm3044_vm14, %v17088_v59, %v17242_v50  ;;  %v5149_v59 = vmul.f32 %v17198_v40, %v5133_v38  ;;  %v17332_v11 = vld [vmem:[#allocation16] ss:$0 sm:$0xff] }
0x274d   :  { %v17260_v30 = vadd.f32 %v5146_v57, %v5123_v55  ;;  %v5087_v40 = vsub.f32 1.0, %v17206_v8 }
0x274e   :  { %v5169_v36 = vsel %vm721_vm2, %v5168_v33, %v5167_v34  ;;  %v17265_v32 = vadd.f32 %v5145_v54, %v5122_v3  ;;  %v5109_v5 = vpop.permute.xlu1 %5108 }
0x274f   :  { %v5172_v31 = vrot.slane %v17260_v30, 2  ;;  %v5126_v13 = vmul.f32 %v5109_v5, %v5086_v16  ;;  %v5105_v49 = vpop.permute.xlu0 %5104  ;;  %v17274_v41 = vsel %vm3044_vm14, %v17125_v27, %v17260_v30 }
0x2750   :  { %v5170_v43 = vrot.slane %v17265_v32, 3  ;;  %v5124_v42 = vmul.f32 %v5105_v49, %v5084_v20  ;;  %v17281_v37 = vsel %vm3044_vm14, %v17113_v2, %v17265_v32 }
0x2751   :  { %v17283_v6 = vadd.f32 %v5149_v59, %v5126_v13 }
0x2752   :  { %v5171_v61 = vsel %vm724_vm3, %v5170_v43, %v5169_v36  ;;  %v17288_v27 = vadd.f32 %v5147_v25, %v5124_v42  ;;  %v5111_v17 = vpop.permute.xlu1 %5110 }
0x2753   :  { %v5127_v48 = vmul.f32 %v5111_v17, %v5087_v40  ;;  %v5107_v39 = vpop.permute.xlu0 %5106  ;;  %v5173_v2 = vsel %vm727_vm4, %v5172_v31, %v5171_v61  ;;  %v17296_v14 = vsel %vm3044_vm14, %v17152_v10, %v17283_v6  ;;  %v5177_v10 = vrot.slane %v17283_v6, 7 }
0x2754   :  { %v5174_v12 = vrot.slane %v17288_v27, 1  ;;  %v5125_v46 = vmul.f32 %v5107_v39, %v5085_v23  ;;  %v17305_v8 = vsel %vm3044_vm14, %v17078_v51, %v17288_v27 }
0x2755   :  { %v17307_v19 = vadd.f32 %v5150_v15, %v5127_v48 }
0x2756   :  { %v17309_v4 = vadd.f32 %v5148_v18, %v5125_v46  ;;  %v5175_v28 = vsel %vm730_vm5, %v5174_v12, %v5173_v2 }
0x2757   :  { %v5179_v33 = vrot.slane %v17307_v19, 6  ;;  %v17317_v44 = vsel %vm3044_vm14, %v17142_v24, %v17307_v19 }
0x2758   :  { %v5176_v63 = vsel %vm733_vm6, %v17309_v4, %v5175_v28  ;;  %v17324_v51 = vsel %vm3044_vm14, %v17137_v47, %v17309_v4  ;;  %vm18688_vm14 = vmmov %vm18683_vm10 }
0x2759   :  { %v5178_v9 = vsel %vm736_vm7, %v5177_v10, %v5176_v63 }
0x275a   :  { %v5180_v57 = vsel %vm739_vm8, %v5179_v33, %v5178_v9 }
0x275b   :  { %5181 = vrot.lane.b32.xlu0 %v5180_v57, %s14693_s11 }
0x27cd   :  { %v5182_v55 = vpop.permute.xlu0 %5181 }
0x27ce   :  { %12762 = vmatmul.mubr.msk.f32.vlgmr.msra.gmra.mrb[26].mxu0 %vm422_vm9, %v5182_v55 }
0x28a1   :  { %v5251_v24 = vpop.f32.mrb[26].mxu0 }
0x28a2   :  { %v5252_v34 = vadd.f32 %v17332_v11, %v5251_v24  ;;  %v12763_v54 = vpop.f32.mrb[27].mxu0 }
0x28a4   :  { %v5257_v3 = vrot.slane %v5252_v34, 3  ;;  %v5256_v47 = vrot.slane %v5252_v34, 2  ;;  %v5259_v16 = vrot.slane %v5252_v34, 5  ;;  %v5258_v38 = vrot.slane %v5252_v34, 4 }
0x28a5   :  { %v5261_v36 = vrot.slane %v5252_v34, 7  ;;  %v5260_v5 = vrot.slane %v5252_v34, 6  ;;  %v5262_v20 = vrot.slane %v5252_v34, 1  ;;  %v5277_v12 = vadd.f32 %v5252_v34, %v16398_v29 }
0x28a6   :  { %5329 = vrot.lane.b32.xlu0 %v5257_v3, %s14692_s16  ;;  %5327 = vrot.lane.b32.xlu1 %v5256_v47, %s14692_s16  ;;  %v5272_v35 = vadd.f32 %v5257_v3, %v16377_v58  ;;  %v5271_v31 = vadd.f32 %v5256_v47, %v16379_v21  ;;  %v5274_v13 = vadd.f32 %v5259_v16, %v16384_v45 }
0x28a7   :  { %v5273_v43 = vadd.f32 %v5258_v38, %v16386_v52  ;;  %v5276_v40 = vadd.f32 %v5261_v36, %v16390_v53  ;;  %v5275_v17 = vadd.f32 %v5260_v5, %v16392_v22  ;;  %v5278_v48 = vadd.f32 %v5262_v20, %v16396_v62 }
0x28a8   :  { %v5280_v59 = vsub.f32 0.0, %v5272_v35  ;;  %v5279_v49 = vsub.f32 0.0, %v5271_v31  ;;  %v5282_v42 = vsub.f32 0.0, %v5274_v13  ;;  %v5285_v33 = vsub.f32 0.0, %v5277_v12 }
0x28a9   :  { %v5281_v61 = vsub.f32 0.0, %v5273_v43  ;;  %v5284_v15 = vsub.f32 0.0, %v5276_v40  ;;  %v5283_v2 = vsub.f32 0.0, %v5275_v17  ;;  %v5286_v46 = vsub.f32 0.0, %v5278_v48 }
0x28aa   :  { %5333 = vrot.lane.b32.xlu0 %v5259_v16, %s14692_s16  ;;  %5331 = vrot.lane.b32.xlu1 %v5258_v38, %s14692_s16  ;;  %v5289_v25 = vmul.f32 1.442695, %v5280_v59  ;;  %v5287_v56 = vmul.f32 1.442695, %v5279_v49  ;;  %v5293_v23 = vmul.f32 1.442695, %v5282_v42 }
0x28ab   :  { %v5291_v39 = vmul.f32 1.442695, %v5281_v61  ;;  %v5297_v18 = vmul.f32 1.442695, %v5284_v15  ;;  %v5295_v28 = vmul.f32 1.442695, %v5283_v2 }
0x28ac   :  { %14033 = vpow2.f32 %v5289_v25  ;;  %v5301_v63 = vmul.f32 1.442695, %v5286_v46  ;;  %v5299_v9 = vmul.f32 1.442695, %v5285_v33 }
0x28ad   :  { %14035 = vpow2.f32 %v5287_v56 }
0x28ae   :  { %5337 = vrot.lane.b32.xlu0 %v5261_v36, %s14692_s16  ;;  %5335 = vrot.lane.b32.xlu1 %v5260_v5, %s14692_s16  ;;  %14037 = vpow2.f32 %v5293_v23 }
0x28af   :  { %14039 = vpow2.f32 %v5291_v39 }
0x28b0   :  { %14041 = vpow2.f32 %v5297_v18 }
0x28b1   :  { %14043 = vpow2.f32 %v5295_v28 }
0x28b2   :  { %5339 = vrot.lane.b32.xlu0 %v5252_v34, %s14692_s16  ;;  %5341 = vrot.lane.b32.xlu1 %v5262_v20, %s14692_s16  ;;  %14045 = vpow2.f32 %v5301_v63 }
0x28b3   :  { %14047 = vpow2.f32 %v5299_v9 }
0x28b6   :  { %v14034_v57 = vpop.eup %14033 }
0x28b7   :  { %v14036_v55 = vpop.eup %14035  ;;  %v5304_v24 = vadd.f32 1.0, %v14034_v57 }
0x28b8   :  { %v14038_v54 = vpop.eup %14037  ;;  %v5303_v3 = vadd.f32 1.0, %v14036_v55 }
0x28b9   :  { %v14040_v47 = vpop.eup %14039  ;;  %14049 = vrcp.f32 %v5304_v24  ;;  %v5306_v34 = vadd.f32 1.0, %v14038_v54 }
0x28ba   :  { %v14042_v16 = vpop.eup %14041  ;;  %14051 = vrcp.f32 %v5303_v3  ;;  %v5305_v38 = vadd.f32 1.0, %v14040_v47 }
0x28bb   :  { %v14044_v36 = vpop.eup %14043  ;;  %14053 = vrcp.f32 %v5306_v34  ;;  %v5308_v5 = vadd.f32 1.0, %v14042_v16 }
0x28bc   :  { %v14046_v20 = vpop.eup %14045  ;;  %14055 = vrcp.f32 %v5305_v38  ;;  %v5307_v35 = vadd.f32 1.0, %v14044_v36 }
0x28bd   :  { %v14048_v31 = vpop.eup %14047  ;;  %14057 = vrcp.f32 %v5308_v5  ;;  %v5310_v59 = vadd.f32 1.0, %v14046_v20 }
0x28be   :  { %14059 = vrcp.f32 %v5307_v35  ;;  %v5309_v13 = vadd.f32 1.0, %v14048_v31 }
0x28bf   :  { %14061 = vrcp.f32 %v5310_v59 }
0x28c0   :  { %14063 = vrcp.f32 %v5309_v13 }
0x28c3   :  { %v17351_v49 = vpop.eup %14049 }
0x28c4   :  { %v17353_v43 = vpop.eup %14051 }
0x28c5   :  { %v17357_v61 = vpop.eup %14053 }
0x28c6   :  { %v17361_v17 = vpop.eup %14055 }
0x28c7   :  { %v17365_v2 = vpop.eup %14057 }
0x28c8   :  { %v17369_v12 = vpop.eup %14059 }
0x28c9   :  { %v17373_v63 = vpop.eup %14061 }
0x28ca   :  { %v17377_v9 = vpop.eup %14063 }
0x2918   :  { %v5330_v25 = vpop.permute.xlu0 %5329  ;;  %v5328_v42 = vpop.permute.xlu1 %5327 }
0x2919   :  { %v5352_v40 = vmul.f32 %v17351_v49, %v5330_v25  ;;  %v5351_v56 = vmul.f32 %v17353_v43, %v5328_v42 }
0x291b   :  { %5369 = vrot.lane.b32.xlu0 %v5352_v40, %s14692_s16  ;;  %5367 = vrot.lane.b32.xlu1 %v5351_v56, %s14692_s16 }
0x291c   :  { %v5334_v23 = vpop.permute.xlu0 %5333  ;;  %v5332_v15 = vpop.permute.xlu1 %5331 }
0x291d   :  { %v5354_v48 = vmul.f32 %v17357_v61, %v5334_v23  ;;  %v5353_v39 = vmul.f32 %v17361_v17, %v5332_v15 }
0x291f   :  { %5373 = vrot.lane.b32.xlu0 %v5354_v48, %s14692_s16  ;;  %5371 = vrot.lane.b32.xlu1 %v5353_v39, %s14692_s16 }
0x2920   :  { %v5338_v18 = vpop.permute.xlu0 %5337  ;;  %v5336_v46 = vpop.permute.xlu1 %5335 }
0x2921   :  { %v5356_v28 = vmul.f32 %v17365_v2, %v5338_v18  ;;  %v5355_v33 = vmul.f32 %v17369_v12, %v5336_v46 }
0x2923   :  { %5377 = vrot.lane.b32.xlu0 %v5356_v28, %s14692_s16  ;;  %5375 = vrot.lane.b32.xlu1 %v5355_v33, %s14692_s16 }
0x2924   :  { %v5340_v57 = vpop.permute.xlu0 %5339  ;;  %v5342_v55 = vpop.permute.xlu1 %5341 }
0x2925   :  { %v5357_v24 = vmul.f32 %v17377_v9, %v5340_v57  ;;  %v5358_v54 = vmul.f32 %v17373_v63, %v5342_v55  ;;  %v5408_v57 = vsub.f32 1.0, %v17351_v49  ;;  %v5456_v55 = vrot.slane %v17238_v26, 7 }
0x2927   :  { %5379 = vrot.lane.b32.xlu0 %v5357_v24, %s14692_s16  ;;  %5381 = vrot.lane.b32.xlu1 %v5358_v54, %s14692_s16  ;;  %v5407_v54 = vsub.f32 1.0, %v17353_v43 }
0x298d   :  { %v5370_v3 = vpop.permute.xlu0 %5369  ;;  %v5368_v47 = vpop.permute.xlu1 %5367 }
0x298e   :  { %v5392_v34 = vadd.f32 %v5370_v3, %v16377_v58  ;;  %v5391_v16 = vadd.f32 %v5368_v47, %v16379_v21  ;;  %v5455_v3 = vrot.slane %v17242_v50, 7  ;;  %v5471_v47 = vmul.f32 %v17351_v49, %v5456_v55 }
0x298f   :  { %v5457_v50 = vrot.slane %v17265_v32, 7 }
0x2990   :  { %14065 = vtanh.f32 %v5392_v34 }
0x2991   :  { %14067 = vtanh.f32 %v5391_v16  ;;  %v5374_v38 = vpop.permute.xlu0 %5373  ;;  %v5372_v36 = vpop.permute.xlu1 %5371 }
0x2992   :  { %v5394_v5 = vadd.f32 %v5374_v38, %v16384_v45  ;;  %v5393_v20 = vadd.f32 %v5372_v36, %v16386_v52  ;;  %v5470_v38 = vmul.f32 %v17353_v43, %v5455_v3 }
0x2994   :  { %14069 = vtanh.f32 %v5394_v5 }
0x2995   :  { %14071 = vtanh.f32 %v5393_v20  ;;  %v5378_v35 = vpop.permute.xlu0 %5377  ;;  %v5376_v31 = vpop.permute.xlu1 %5375  ;;  %v5410_v20 = vsub.f32 1.0, %v17357_v61 }
0x2996   :  { %v5396_v59 = vadd.f32 %v5378_v35, %v16390_v53  ;;  %v5395_v13 = vadd.f32 %v5376_v31, %v16392_v22  ;;  %v5458_v35 = vrot.slane %v17260_v30, 7 }
0x2998   :  { %14073 = vtanh.f32 %v5396_v59  ;;  %v5409_v59 = vsub.f32 1.0, %v17361_v17 }
0x2999   :  { %14075 = vtanh.f32 %v5395_v13  ;;  %v5380_v25 = vpop.permute.xlu0 %5379  ;;  %v5382_v42 = vpop.permute.xlu1 %5381  ;;  %v5473_v13 = vmul.f32 %v17357_v61, %v5458_v35  ;;  %v5412_v61 = vsub.f32 1.0, %v17365_v2 }
0x299a   :  { %v14066_v40 = vpop.eup %14065  ;;  %v5397_v56 = vadd.f32 %v5380_v25, %v16398_v29  ;;  %v5398_v23 = vadd.f32 %v5382_v42, %v16396_v62 }
0x299b   :  { %v14068_v15 = vpop.eup %14067  ;;  %5425 = vrot.lane.b32.xlu0 %v14066_v40, %s14693_s11  ;;  %v5472_v40 = vmul.f32 %v17361_v17, %v5457_v50  ;;  %v5459_v17 = vrot.slane %v17288_v27, 7 }
0x299c   :  { %14077 = vtanh.f32 %v5397_v56  ;;  %5423 = vrot.lane.b32.xlu1 %v14068_v15, %s14693_s11  ;;  %v5460_v15 = vrot.slane %v17309_v4, 7 }
0x299d   :  { %14079 = vtanh.f32 %v5398_v23  ;;  %v5474_v55 = vmul.f32 %v17369_v12, %v5459_v17 }
0x299e   :  { %v14070_v48 = vpop.eup %14069 }
0x299f   :  { %v14072_v39 = vpop.eup %14071  ;;  %5429 = vrot.lane.b32.xlu0 %v14070_v48, %s14693_s11 }
0x29a0   :  { %5427 = vrot.lane.b32.xlu1 %v14072_v39, %s14693_s11 }
0x29a2   :  { %v14074_v18 = vpop.eup %14073 }
0x29a3   :  { %v14076_v46 = vpop.eup %14075  ;;  %5433 = vrot.lane.b32.xlu0 %v14074_v18, %s14693_s11  ;;  %v5411_v18 = vsub.f32 1.0, %v17369_v12 }
0x29a4   :  { %5431 = vrot.lane.b32.xlu1 %v14076_v46, %s14693_s11 }
0x29a6   :  { %v14078_v28 = vpop.eup %14077 }
0x29a7   :  { %v14080_v33 = vpop.eup %14079  ;;  %5435 = vrot.lane.b32.xlu0 %v14078_v28, %s14693_s11 }
0x29a8   :  { %5437 = vrot.lane.b32.xlu1 %v14080_v33, %s14693_s11 }
0x2a0d   :  { %v5426_v24 = vpop.permute.xlu0 %5425 }
0x2a0e   :  { %v5448_v34 = vmul.f32 %v5426_v24, %v5408_v57  ;;  %v5424_v16 = vpop.permute.xlu1 %5423 }
0x2a0f   :  { %v5447_v36 = vmul.f32 %v5424_v16, %v5407_v54  ;;  %v5461_v16 = vrot.slane %v17307_v19, 7 }
0x2a10   :  { %v17405_v5 = vadd.f32 %v5471_v47, %v5448_v34  ;;  %v5414_v34 = vsub.f32 1.0, %v17373_v63 }
0x2a11   :  { %v17409_v31 = vadd.f32 %v5470_v38, %v5447_v36  ;;  %v5430_v26 = vpop.permute.xlu0 %5429 }
0x2a12   :  { %v5495_v49 = vrot.slane %v17405_v5, 5  ;;  %v5450_v25 = vmul.f32 %v5430_v26, %v5410_v20  ;;  %v5428_v43 = vpop.permute.xlu1 %5427  ;;  %v17418_v42 = vsel %vm3053_vm15, %v17251_v7, %v17405_v5  ;;  %v5477_v26 = vmul.f32 %v17373_v63, %v5461_v16 }
0x2a13   :  { %v5494_v30 = vrot.slane %v17409_v31, 6  ;;  %v5449_v56 = vmul.f32 %v5428_v43, %v5409_v59  ;;  %v17425_v32 = vsel %vm3053_vm15, %v17258_v60, %v17409_v31  ;;  %v5475_v60 = vmul.f32 %v17365_v2, %v5460_v15 }
0x2a14   :  { %v17427_v23 = vadd.f32 %v5473_v13, %v5450_v25  ;;  %v5413_v2 = vsub.f32 1.0, %v17377_v9 }
0x2a15   :  { %v5496_v48 = vsel %vm721_vm2, %v5495_v49, %v5494_v30  ;;  %v17432_v7 = vadd.f32 %v5472_v40, %v5449_v56  ;;  %v5434_v39 = vpop.permute.xlu0 %5433 }
0x2a16   :  { %v5499_v46 = vrot.slane %v17427_v23, 3  ;;  %v5452_v28 = vmul.f32 %v5434_v39, %v5412_v61  ;;  %v5432_v33 = vpop.permute.xlu1 %5431  ;;  %v17441_v57 = vsel %vm3053_vm15, %v17274_v41, %v17427_v23 }
0x2a17   :  { %v5497_v4 = vrot.slane %v17432_v7, 4  ;;  %v5451_v24 = vmul.f32 %v5432_v33, %v5411_v18  ;;  %v17448_v27 = vsel %vm3053_vm15, %v17281_v37, %v17432_v7  ;;  %v5476_v37 = vmul.f32 %v17377_v9, %v5177_v10 }
0x2a18   :  { %v17450_v54 = vadd.f32 %v5475_v60, %v5452_v28 }
0x2a19   :  { %v5498_v3 = vsel %vm724_vm3, %v5497_v4, %v5496_v48  ;;  %v17454_v47 = vadd.f32 %v5474_v55, %v5451_v24  ;;  %v5436_v41 = vpop.permute.xlu0 %5435 }
0x2a1a   :  { %v5503_v12 = vrot.slane %v17450_v54, 1  ;;  %v5453_v38 = vmul.f32 %v5436_v41, %v5413_v2  ;;  %v5438_v36 = vpop.permute.xlu1 %5437  ;;  %v5500_v20 = vsel %vm727_vm4, %v5499_v46, %v5498_v3  ;;  %v17468_v50 = vsel %vm3053_vm15, %v17324_v51, %v17450_v54 }
0x2a1b   :  { %v5501_v35 = vrot.slane %v17454_v47, 2  ;;  %v5454_v59 = vmul.f32 %v5438_v36, %v5414_v34  ;;  %v17475_v6 = vsel %vm3053_vm15, %v17305_v8, %v17454_v47 }
0x2a1c   :  { %v17470_v19 = vadd.f32 %v5476_v37, %v5453_v38 }
0x2a1d   :  { %v17477_v10 = vadd.f32 %v5477_v26, %v5454_v59  ;;  %v5502_v9 = vsel %vm730_vm5, %v5501_v35, %v5500_v20 }
0x2a1e   :  { %v5504_v49 = vsel %vm733_vm6, %v5503_v12, %v5502_v9  ;;  %v17484_v63 = vsel %vm3053_vm15, %v17296_v14, %v17470_v19 }
0x2a1f   :  { %v5506_v51 = vrot.slane %v17477_v10, 7  ;;  %v5505_v13 = vsel %vm736_vm7, %v17470_v19, %v5504_v49  ;;  %v17492_v8 = vsel %vm3053_vm15, %v17317_v44, %v17477_v10  ;;  %vm18691_vm15 = vmmov %vm18683_vm10 }
0x2a21   :  { %v5507_v25 = vsel %vm739_vm8, %v5506_v51, %v5505_v13 }
0x2a22   :  { %5508 = vrot.lane.b32.xlu1 %v5507_v25, %s14693_s11 }
0x2a94   :  { %v5509_v43 = vpop.permute.xlu1 %5508 }
0x2a95   :  { %12773 = vmatmul.mubr.msk.f32.vlgmr.msra.gmra.mrb[18].mxu1 %vm422_vm9, %v5509_v43 }
0x2b68   :  { %v5578_v14 = vpop.f32.mrb[18].mxu1 }
0x2b69   :  { %v5579_v30 = vadd.f32 %v17332_v11, %v5578_v14  ;;  %v12774_v40 = vpop.f32.mrb[19].mxu1 }
0x2b6b   :  { %v5584_v56 = vrot.slane %v5579_v30, 2  ;;  %v5583_v61 = vrot.slane %v5579_v30, 1  ;;  %v5586_v44 = vrot.slane %v5579_v30, 4  ;;  %v5585_v15 = vrot.slane %v5579_v30, 3 }
0x2b6c   :  { %v5588_v48 = vrot.slane %v5579_v30, 6  ;;  %v5587_v39 = vrot.slane %v5579_v30, 5  ;;  %v5589_v11 = vrot.slane %v5579_v30, 7  ;;  %v5605_v36 = vadd.f32 %v5579_v30, %v16396_v62 }
0x2b6d   :  { %5656 = vrot.lane.b32.xlu1 %v5584_v56, %s14692_s16  ;;  %5654 = vrot.lane.b32.xlu0 %v5583_v61, %s14692_s16  ;;  %v5599_v18 = vadd.f32 %v5584_v56, %v16377_v58  ;;  %v5598_v17 = vadd.f32 %v5583_v61, %v16379_v21  ;;  %v5601_v60 = vadd.f32 %v5586_v44, %v16384_v45 }
0x2b6e   :  { %v5600_v33 = vadd.f32 %v5585_v15, %v16386_v52  ;;  %v5603_v24 = vadd.f32 %v5588_v48, %v16390_v53  ;;  %v5602_v41 = vadd.f32 %v5587_v39, %v16392_v22  ;;  %v5604_v12 = vadd.f32 %v5589_v11, %v16398_v29 }
0x2b6f   :  { %v5607_v46 = vsub.f32 0.0, %v5599_v18  ;;  %v5606_v28 = vsub.f32 0.0, %v5598_v17  ;;  %v5609_v55 = vsub.f32 0.0, %v5601_v60  ;;  %v5613_v59 = vsub.f32 0.0, %v5605_v36 }
0x2b70   :  { %v5608_v3 = vsub.f32 0.0, %v5600_v33  ;;  %v5611_v16 = vsub.f32 0.0, %v5603_v24  ;;  %v5610_v38 = vsub.f32 0.0, %v5602_v41  ;;  %v5612_v35 = vsub.f32 0.0, %v5604_v12 }
0x2b71   :  { %5660 = vrot.lane.b32.xlu1 %v5586_v44, %s14692_s16  ;;  %5658 = vrot.lane.b32.xlu0 %v5585_v15, %s14692_s16  ;;  %v5616_v4 = vmul.f32 1.442695, %v5607_v46  ;;  %v5614_v2 = vmul.f32 1.442695, %v5606_v28  ;;  %v5620_v34 = vmul.f32 1.442695, %v5609_v55 }
0x2b72   :  { %v5618_v37 = vmul.f32 1.442695, %v5608_v3  ;;  %v5624_v20 = vmul.f32 1.442695, %v5611_v16  ;;  %v5622_v26 = vmul.f32 1.442695, %v5610_v38 }
0x2b73   :  { %14081 = vpow2.f32 %v5616_v4  ;;  %v5626_v9 = vmul.f32 1.442695, %v5612_v35  ;;  %v5628_v49 = vmul.f32 1.442695, %v5613_v59 }
0x2b74   :  { %14083 = vpow2.f32 %v5614_v2 }
0x2b75   :  { %5664 = vrot.lane.b32.xlu1 %v5588_v48, %s14692_s16  ;;  %5662 = vrot.lane.b32.xlu0 %v5587_v39, %s14692_s16  ;;  %14085 = vpow2.f32 %v5620_v34 }
0x2b76   :  { %14087 = vpow2.f32 %v5618_v37 }
0x2b77   :  { %14089 = vpow2.f32 %v5624_v20 }
0x2b78   :  { %14091 = vpow2.f32 %v5622_v26 }
0x2b79   :  { %5668 = vrot.lane.b32.xlu1 %v5579_v30, %s14692_s16  ;;  %5666 = vrot.lane.b32.xlu0 %v5589_v11, %s14692_s16  ;;  %14093 = vpow2.f32 %v5626_v9 }
0x2b7a   :  { %14095 = vpow2.f32 %v5628_v49 }
0x2b7d   :  { %v14082_v13 = vpop.eup %14081 }
0x2b7e   :  { %v14084_v25 = vpop.eup %14083  ;;  %v5631_v43 = vadd.f32 1.0, %v14082_v13 }
0x2b7f   :  { %v14086_v14 = vpop.eup %14085  ;;  %v5630_v40 = vadd.f32 1.0, %v14084_v25 }
0x2b80   :  { %v14088_v56 = vpop.eup %14087  ;;  %14097 = vrcp.f32 %v5631_v43  ;;  %v5633_v30 = vadd.f32 1.0, %v14086_v14 }
0x2b81   :  { %v14090_v61 = vpop.eup %14089  ;;  %14099 = vrcp.f32 %v5630_v40  ;;  %v5632_v44 = vadd.f32 1.0, %v14088_v56 }
0x2b82   :  { %v14092_v15 = vpop.eup %14091  ;;  %14101 = vrcp.f32 %v5633_v30  ;;  %v5635_v48 = vadd.f32 1.0, %v14090_v61 }
0x2b83   :  { %v14094_v39 = vpop.eup %14093  ;;  %14103 = vrcp.f32 %v5632_v44  ;;  %v5634_v11 = vadd.f32 1.0, %v14092_v15 }
0x2b84   :  { %v14096_v18 = vpop.eup %14095  ;;  %14105 = vrcp.f32 %v5635_v48  ;;  %v5636_v17 = vadd.f32 1.0, %v14094_v39 }
0x2b85   :  { %14107 = vrcp.f32 %v5634_v11  ;;  %v5637_v46 = vadd.f32 1.0, %v14096_v18 }
0x2b86   :  { %14109 = vrcp.f32 %v5636_v17 }
0x2b87   :  { %14111 = vrcp.f32 %v5637_v46 }
0x2b8a   :  { %v17516_v60 = vpop.eup %14097 }
0x2b8b   :  { %v17518_v28 = vpop.eup %14099 }
0x2b8c   :  { %v17522_v2 = vpop.eup %14101 }
0x2b8d   :  { %v17526_v3 = vpop.eup %14103 }
0x2b8e   :  { %v17530_v37 = vpop.eup %14105 }
0x2b8f   :  { %v17534_v38 = vpop.eup %14107 }
0x2b90   :  { %v17538_v59 = vpop.eup %14109 }
0x2b91   :  { %v17542_v9 = vpop.eup %14111 }
0x2bdf   :  { %v5657_v33 = vpop.permute.xlu1 %5656  ;;  %v5655_v4 = vpop.permute.xlu0 %5654 }
0x2be0   :  { %v5679_v55 = vmul.f32 %v17516_v60, %v5657_v33  ;;  %v5678_v24 = vmul.f32 %v17518_v28, %v5655_v4 }
0x2be2   :  { %5696 = vrot.lane.b32.xlu1 %v5679_v55, %s14692_s16  ;;  %5694 = vrot.lane.b32.xlu0 %v5678_v24, %s14692_s16  ;;  %v6026_v24 = vld [vmem:[#allocation19 + $0x8] sm:$0xff] }
0x2be3   :  { %v5661_v41 = vpop.permute.xlu1 %5660  ;;  %v5659_v34 = vpop.permute.xlu0 %5658 }
0x2be4   :  { %v5681_v16 = vmul.f32 %v17522_v2, %v5661_v41  ;;  %v5680_v12 = vmul.f32 %v17526_v3, %v5659_v34  ;;  %v5871_v41 = vld [vmem:[%s18646_s9 + $0x10] sm:$0xff]  ;;  %v5872_v34 = vld [vmem:[%s18646_s9 + $0x18] sm:$0xff] }
0x2be6   :  { %5700 = vrot.lane.b32.xlu1 %v5681_v16, %s14692_s16  ;;  %5698 = vrot.lane.b32.xlu0 %v5680_v12, %s14692_s16 }
0x2be7   :  { %v5665_v36 = vpop.permute.xlu1 %5664  ;;  %v5663_v20 = vpop.permute.xlu0 %5662 }
0x2be8   :  { %v5683_v35 = vmul.f32 %v17530_v37, %v5665_v36  ;;  %v5682_v26 = vmul.f32 %v17534_v38, %v5663_v20  ;;  %v13298_v36 = vpack.c.bf16 %v5872_v34, %v5871_v41  ;;  %v6027_v20 = vld [vmem:[#allocation19 + $0x10] sm:$0xff] }
0x2bea   :  { %5704 = vrot.lane.b32.xlu1 %v5683_v35, %s14692_s16  ;;  %5702 = vrot.lane.b32.xlu0 %v5682_v26, %s14692_s16  ;;  %v6028_v35 = vld [vmem:[#allocation19 + $0x18] sm:$0xff] }
0x2beb   :  { %v5669_v49 = vpop.permute.xlu1 %5668  ;;  %v5667_v13 = vpop.permute.xlu0 %5666 }
0x2bec   :  { %v5685_v25 = vmul.f32 %v17542_v9, %v5669_v49  ;;  %v5684_v43 = vmul.f32 %v17538_v59, %v5667_v13  ;;  %v13306_v49 = vpack.c.bf16 %v6028_v35, %v6027_v20  ;;  %v5740_v35 = vsub.f32 1.0, %v17538_v59 }
0x2bee   :  { %5708 = vrot.lane.b32.xlu1 %v5685_v25, %s14692_s16  ;;  %5706 = vrot.lane.b32.xlu0 %v5684_v43, %s14692_s16  ;;  %v5735_v43 = vsub.f32 1.0, %v17516_v60 }
0x2c54   :  { %v5697_v14 = vpop.permute.xlu1 %5696  ;;  %v5695_v40 = vpop.permute.xlu0 %5694 }
0x2c55   :  { %v5719_v56 = vadd.f32 %v5697_v14, %v16377_v58  ;;  %v5718_v30 = vadd.f32 %v5695_v40, %v16379_v21  ;;  %v5783_v14 = vrot.slane %v17405_v5, 7 }
0x2c57   :  { %14113 = vtanh.f32 %v5719_v56  ;;  %v5734_v56 = vsub.f32 1.0, %v17518_v28 }
0x2c58   :  { %14115 = vtanh.f32 %v5718_v30  ;;  %v5701_v61 = vpop.permute.xlu1 %5700  ;;  %v5699_v44 = vpop.permute.xlu0 %5698  ;;  %v5782_v30 = vrot.slane %v17409_v31, 7  ;;  %v5784_v31 = vrot.slane %v17432_v7, 7  ;;  %v5739_v7 = vsub.f32 1.0, %v17530_v37 }
0x2c59   :  { %v5721_v15 = vadd.f32 %v5701_v61, %v16384_v45  ;;  %v5720_v48 = vadd.f32 %v5699_v44, %v16386_v52  ;;  %v5798_v61 = vmul.f32 %v17516_v60, %v5783_v14 }
0x2c5b   :  { %14117 = vtanh.f32 %v5721_v15 }
0x2c5c   :  { %14119 = vtanh.f32 %v5720_v48  ;;  %v5705_v39 = vpop.permute.xlu1 %5704  ;;  %v5703_v11 = vpop.permute.xlu0 %5702  ;;  %v5797_v48 = vmul.f32 %v17518_v28, %v5782_v30 }
0x2c5d   :  { %v5723_v18 = vadd.f32 %v5705_v39, %v16390_v53  ;;  %v5722_v17 = vadd.f32 %v5703_v11, %v16392_v22  ;;  %v5869_v22 = vld [vmem:[%s18646_s9] sm:$0xff] }
0x2c5f   :  { %14121 = vtanh.f32 %v5723_v18  ;;  %v5737_v18 = vsub.f32 1.0, %v17522_v2 }
0x2c60   :  { %14123 = vtanh.f32 %v5722_v17  ;;  %v5709_v58 = vpop.permute.xlu1 %5708  ;;  %v5707_v21 = vpop.permute.xlu0 %5706  ;;  %v5785_v17 = vrot.slane %v17427_v23, 7 }
0x2c61   :  { %v14114_v46 = vpop.eup %14113  ;;  %v5725_v33 = vadd.f32 %v5709_v58, %v16396_v62  ;;  %v5724_v4 = vadd.f32 %v5707_v21, %v16398_v29  ;;  %v5870_v62 = vld [vmem:[%s18646_s9 + $0x8] sm:$0xff]  ;;  %v6025_v29 = vld [vmem:[#allocation19] sm:$0xff]  ;;  %s14694_s9 = smov 120  }
0x2c62   :  { %v14116_v45 = vpop.eup %14115  ;;  %5752 = vrot.lane.b32.xlu1 %v14114_v46, %s14693_s11  ;;  %v13294_v55 = vpack.c.bf16 %v5870_v62, %v5869_v22  ;;  %v13302_v12 = vpack.c.bf16 %v6026_v24, %v6025_v29  ;;  %v6141_v58 = vld [vmem:[#allocation22] sm:$0xff]  ;;  %v6142_v21 = vld [vmem:[#allocation22 + $0x8] sm:$0xff]  ;;  %v5800_v60 = vmul.f32 %v17522_v2, %v5785_v17  ;;  %v5787_v2 = vrot.slane %v17450_v54, 7 }
0x2c63   :  { %14125 = vtanh.f32 %v5725_v33  ;;  %5750 = vrot.lane.b32.xlu0 %v14116_v45, %s14693_s11  ;;  %v5736_v33 = vsub.f32 1.0, %v17526_v3 }
0x2c64   :  { %14127 = vtanh.f32 %v5724_v4  ;;  %13295 = vmatprep.subr.bf16.mxu0 %v13294_v55  ;;  %13303 = vmatprep.subr.bf16.mxu1 %v13302_v12  ;;  %v13310_v4 = vpack.c.bf16 %v6142_v21, %v6141_v58  ;;  %v5802_v24 = vmul.f32 %v17530_v37, %v5787_v2 }
0x2c65   :  { %v14118_v52 = vpop.eup %14117  ;;  %13297 = vmatpush3.bf16.msra.mxu0 %v13294_v55  ;;  %13305 = vmatpush3.bf16.msra.mxu1 %v13302_v12 }
0x2c66   :  { %v14120_v53 = vpop.eup %14119  ;;  %5756 = vrot.lane.b32.xlu1 %v14118_v52, %s14693_s11  ;;  %13299 = vmatprep.subr.bf16.mxu0 %v13298_v36 }
0x2c67   :  { %5754 = vrot.lane.b32.xlu0 %v14120_v53, %s14693_s11  ;;  %13307 = vmatprep.subr.bf16.mxu1 %v13306_v49  ;;  %v5799_v53 = vmul.f32 %v17526_v3, %v5784_v31  ;;  %v5786_v3 = vrot.slane %v17454_v47, 7  ;;  %v5741_v47 = vsub.f32 1.0, %v17542_v9 }
0x2c69   :  { %v14122_v16 = vpop.eup %14121  ;;  %13301 = vmatpush3.bf16.msra.mxu0 %v13298_v36  ;;  %13309 = vmatpush3.bf16.msra.mxu1 %v13306_v49 }
0x2c6a   :  { %v14124_v26 = vpop.eup %14123  ;;  %5760 = vrot.lane.b32.xlu1 %v14122_v16, %s14693_s11  ;;  %12840 = vmatprep.subr.mxu1 %v18665_v1  ;;  %v5801_v16 = vmul.f32 %v17534_v38, %v5786_v3 }
0x2c6b   :  { %5758 = vrot.lane.b32.xlu0 %v14124_v26, %s14693_s11  ;;  %13311 = vmatprep.subr.bf16.mxu0 %v13310_v4  ;;  %v5788_v26 = vrot.slane %v17470_v19, 7 }
0x2c6d   :  { %v14126_v13 = vpop.eup %14125 }
0x2c6e   :  { %v14128_v25 = vpop.eup %14127  ;;  %5764 = vrot.lane.b32.xlu1 %v14126_v13, %s14693_s11  ;;  %v5803_v13 = vmul.f32 %v17538_v59, %v5788_v26  ;;  %v6144_v59 = vld [vmem:[#allocation22 + $0x18] sm:$0xff] }
0x2c6f   :  { %5762 = vrot.lane.b32.xlu0 %v14128_v25, %s14693_s11 }
0x2cd4   :  { %v5753_v40 = vpop.permute.xlu1 %5752 }
0x2cd5   :  { %v5775_v44 = vmul.f32 %v5753_v40, %v5735_v43  ;;  %v5751_v15 = vpop.permute.xlu0 %5750 }
0x2cd6   :  { %v5774_v39 = vmul.f32 %v5751_v15, %v5734_v56  ;;  %v12155_v15 = vld [vmem:[#allocation20] ss:$0 sm:$0xff] }
0x2cd7   :  { %v5806_v11 = vadd.f32 %v5798_v61, %v5775_v44 }
0x2cd8   :  { %v5805_v5 = vadd.f32 %v5797_v48, %v5774_v39  ;;  %v5757_v46 = vpop.permute.xlu1 %5756 }
0x2cd9   :  { %v5777_v45 = vmul.f32 %v5757_v46, %v5737_v18  ;;  %v5755_v52 = vpop.permute.xlu0 %5754  ;;  %v5862_v28 = vsel %vm3062_vm1, %v17418_v42, %v5806_v11  ;;  %v5738_v42 = vsub.f32 1.0, %v17534_v38  ;;  %v12146_v11 = vld [vmem:[#allocation17] ss:$0 sm:$0xff] }
0x2cda   :  { %v5776_v22 = vmul.f32 %v5755_v52, %v5736_v33  ;;  %5890 = vrot.lane.b32.xlu1 %v5862_v28, %s14693_s11  ;;  %v5861_v23 = vsel %vm3062_vm1, %v17425_v32, %v5805_v5 }
0x2cdb   :  { %v5808_v62 = vadd.f32 %v5800_v60, %v5777_v45  ;;  %5888 = vrot.lane.b32.xlu0 %v5861_v23, %s14693_s11 }
0x2cdc   :  { %v5807_v29 = vadd.f32 %v5799_v53, %v5776_v22  ;;  %v5761_v55 = vpop.permute.xlu1 %5760 }
0x2cdd   :  { %v5779_v41 = vmul.f32 %v5761_v55, %v5739_v7  ;;  %v5759_v34 = vpop.permute.xlu0 %5758  ;;  %v5864_v32 = vsel %vm3062_vm1, %v17441_v57, %v5808_v62  ;;  %v5804_v57 = vmul.f32 %v17542_v9, %v5506_v51  ;;  %v6143_v51 = vld [vmem:[#allocation22 + $0x10] sm:$0xff] }
0x2cde   :  { %v5778_v12 = vmul.f32 %v5759_v34, %v5738_v42  ;;  %5894 = vrot.lane.b32.xlu1 %v5864_v32, %s14693_s11  ;;  %v5863_v54 = vsel %vm3062_vm1, %v17448_v27, %v5807_v29  ;;  %v13314_v56 = vpack.c.bf16 %v6144_v59, %v6143_v51 }
0x2cdf   :  { %v5810_v36 = vadd.f32 %v5802_v24, %v5779_v41  ;;  %5892 = vrot.lane.b32.xlu0 %v5863_v54, %s14693_s11 }
0x2ce0   :  { %v5809_v20 = vadd.f32 %v5801_v16, %v5778_v12  ;;  %v5765_v37 = vpop.permute.xlu1 %5764  ;;  %v12164_v12 = vld [vmem:[#allocation23] ss:$0 sm:$0xff] }
0x2ce1   :  { %v5781_v38 = vmul.f32 %v5765_v37, %v5741_v47  ;;  %v5763_v49 = vpop.permute.xlu0 %5762  ;;  %v5866_v27 = vsel %vm3062_vm1, %v17468_v50, %v5810_v36 }
0x2ce2   :  { %v5780_v25 = vmul.f32 %v5763_v49, %v5740_v35  ;;  %5898 = vrot.lane.b32.xlu1 %v5866_v27, %s14693_s11  ;;  %v5865_v43 = vsel %vm3062_vm1, %v17475_v6, %v5809_v20 }
0x2ce3   :  { %v5812_v14 = vadd.f32 %v5804_v57, %v5781_v38  ;;  %5896 = vrot.lane.b32.xlu0 %v5865_v43, %s14693_s11 }
0x2ce4   :  { %v5811_v19 = vadd.f32 %v5803_v13, %v5780_v25 }
0x2ce5   :  { %v5868_v10 = vsel %vm3062_vm1, %v17492_v8, %v5812_v14 }
0x2ce6   :  { %5902 = vrot.lane.b32.xlu1 %v5868_v10, %s14693_s11  ;;  %v5867_v50 = vsel %vm3062_vm1, %v17484_v63, %v5811_v19  ;;  %vm6257_vm1 = vcmask 64512  }
0x2ce7   :  { %5900 = vrot.lane.b32.xlu0 %v5867_v50, %s14693_s11 }
0x2d4c   :  { %v5891_v9 = vpop.permute.xlu1 %5890 }
0x2d4d   :  { %v5889_v40 = vpop.permute.xlu0 %5888 }
0x2d4e   :  { %12783 = vmatprep.mubr.msk.f32.mxu0 %vm422_vm9, %v5889_v40  ;;  %12803 = vmatprep.mubr.msk.f32.mxu1 %vm422_vm9, %v5889_v40 }
0x2d4f   :  { %12784 = vmatmul.mubr.msk.f32.vlgmr.msra.gmra.mrb[28].mxu0 %vm422_vm9, %v5891_v9  ;;  %12804 = vmatmul.mubr.msk.f32.vlgmr.msra.gmra.mrb[20].mxu1 %vm422_vm9, %v5891_v9 }
0x2d50   :  { %v5895_v6 = vpop.permute.xlu1 %5894  ;;  %13313 = vmatpush3.bf16.msra.mxu0 %v13310_v4 }
0x2d51   :  { %v5893_v8 = vpop.permute.xlu0 %5892  ;;  %13315 = vmatprep.subr.bf16.mxu0 %v13314_v56 }
0x2d52   :  { %12786 = vmatprep.mubr.msk.f32.mxu0 %vm422_vm9, %v5893_v8  ;;  %12806 = vmatprep.mubr.msk.f32.mxu1 %vm422_vm9, %v5893_v8 }
0x2d53   :  { %12787 = vmatmul.mubr.msk.f32.gmra.mrb[30].mxu0 %vm422_vm9, %v5895_v6  ;;  %12807 = vmatmul.mubr.msk.f32.gmra.mrb[22].mxu1 %vm422_vm9, %v5895_v6 }
0x2d54   :  { %v5899_v63 = vpop.permute.xlu1 %5898  ;;  %13317 = vmatpush3.bf16.msra.mxu0 %v13314_v56 }
0x2d55   :  { %v5897_v30 = vpop.permute.xlu0 %5896  ;;  %12835 = vmatprep.subr.mxu0 %v18665_v1 }
0x2d56   :  { %12789 = vmatprep.mubr.msk.f32.mxu0 %vm422_vm9, %v5897_v30  ;;  %12809 = vmatprep.mubr.msk.f32.mxu1 %vm422_vm9, %v5897_v30 }
0x2d57   :  { %12790 = vmatmul.mubr.msk.f32.gmra.mrb[32].mxu0 %vm422_vm9, %v5899_v63  ;;  %12810 = vmatmul.mubr.msk.f32.gmra.mrb[24].mxu1 %vm422_vm9, %v5899_v63 }
0x2d58   :  { %v5903_v61 = vpop.permute.xlu1 %5902 }
0x2d59   :  { %v5901_v44 = vpop.permute.xlu0 %5900 }
0x2d5a   :  { %12792 = vmatprep.mubr.msk.f32.mxu0 %vm422_vm9, %v5901_v44  ;;  %12812 = vmatprep.mubr.msk.f32.mxu1 %vm422_vm9, %v5901_v44 }
0x2d5b   :  { %12793 = vmatmul.mubr.msk.f32.gmra.mrb[34].mxu0 %vm422_vm9, %v5903_v61  ;;  %12813 = vmatmul.mubr.msk.f32.gmra.mrb[26].mxu1 %vm422_vm9, %v5903_v61 }
0x2d5c   :  { %12823 = vmatprep.mubr.msk.f32.mxu0 %vm422_vm9, %v5889_v40  ;;  %12842 = vmatprep.mubr.msk.f32.mxu1 %vm14690_vm0, %v18665_v1 }
0x2d5f   :  { %12824 = vmatmul.mubr.msk.f32.vlgmr.msra.gmra.mrb[36].mxu0 %vm422_vm9, %v5891_v9 }
0x2d60   :  { %12826 = vmatprep.mubr.msk.f32.mxu0 %vm422_vm9, %v5893_v8 }
0x2d63   :  { %12827 = vmatmul.mubr.msk.f32.gmra.mrb[38].mxu0 %vm422_vm9, %v5895_v6 }
0x2d64   :  { %12829 = vmatprep.mubr.msk.f32.mxu0 %vm422_vm9, %v5897_v30 }
0x2d67   :  { %12830 = vmatmul.mubr.msk.f32.gmra.mrb[40].mxu0 %vm422_vm9, %v5899_v63 }
0x2d68   :  { %12832 = vmatprep.mubr.msk.f32.mxu0 %vm422_vm9, %v5901_v44 }
0x2d6b   :  { %12833 = vmatmul.mubr.msk.f32.gmra.mrb[42].mxu0 %vm422_vm9, %v5903_v61 }
0x2d6c   :  { %12837 = vmatprep.mubr.msk.f32.mxu0 %vm14690_vm0, %v18665_v1 }
0x2e22   :  { %v12785_v48 = vpop.f32.mrb[28].mxu0  ;;  %v12805_v39 = vpop.f32.mrb[20].mxu1 }
0x2e23   :  { %v17655_v18 = vadd.f32 %v12805_v39, %v12155_v15  ;;  %v5986_v17 = vpop.f32.mrb[29].mxu0  ;;  %v6102_v58 = vpop.f32.mrb[21].mxu1  ;;  %v17661_v5 = vadd.f32 %v12785_v48, %v12146_v11 }
0x2e24   :  { %v17657_v21 = vadd.f32 %v12155_v15, %v6102_v58  ;;  %v17666_v31 = vadd.f32 %v12146_v11, %v5986_v17 }
0x2e25   :  { %12841 = vmatpush3.xpose.msk.msra.mxu1 %vm6257_vm1, %v17655_v18 }
0x2e26   :  { %v12788_v46 = vpop.f32.mrb[30].mxu0  ;;  %v12808_v33 = vpop.f32.mrb[22].mxu1  ;;  %12836 = vmatpush3.xpose.msk.msra.mxu0 %vm6257_vm1, %v17657_v21  ;;  %12845 = vmatprep.subr.mxu1 %v18665_v1 }
0x2e27   :  { %v17668_v4 = vadd.f32 %v12808_v33, %v12155_v15  ;;  %v5996_v60 = vpop.f32.mrb[31].mxu0  ;;  %v6112_v45 = vpop.f32.mrb[23].mxu1  ;;  %12850 = vmatprep.subr.mxu0 %v18665_v1  ;;  %v17683_v22 = vadd.f32 %v12788_v46, %v12146_v11 }
0x2e28   :  { %v17671_v52 = vadd.f32 %v12155_v15, %v6112_v45  ;;  %12843 = vmatmul.mubr.msk.f32.vlgmr.msra.gmra.mrb[28].mxu1 %vm6257_vm1, %v17661_v5  ;;  %v17685_v23 = vadd.f32 %v12146_v11, %v5996_v60 }
0x2e29   :  { %12838 = vmatmul.mubr.msk.f32.vlgmr.msra.gmra.mrb[44].mxu0 %vm6257_vm1, %v17666_v31  ;;  %12847 = vmatprep.mubr.msk.f32.mxu1 %vm14690_vm0, %v18665_v1 }
0x2e2a   :  { %v12791_v28 = vpop.f32.mrb[32].mxu0  ;;  %v12811_v53 = vpop.f32.mrb[24].mxu1  ;;  %12846 = vmatpush3.xpose.msk.msra.mxu1 %vm6257_vm1, %v17671_v52  ;;  %12851 = vmatpush3.xpose.msk.msra.mxu0 %vm6257_vm1, %v17668_v4 }
0x2e2b   :  { %v17687_v62 = vadd.f32 %v12811_v53, %v12155_v15  ;;  %v6006_v7 = vpop.f32.mrb[33].mxu0  ;;  %v6122_v2 = vpop.f32.mrb[25].mxu1  ;;  %12852 = vmatprep.mubr.msk.f32.mxu0 %vm14690_vm0, %v18665_v1  ;;  %12855 = vmatprep.subr.mxu1 %v18665_v1  ;;  %v17703_v3 = vadd.f32 %v12791_v28, %v12146_v11 }
0x2e2c   :  { %v17692_v29 = vadd.f32 %v12155_v15, %v6122_v2  ;;  %12860 = vmatprep.subr.mxu0 %v18665_v1  ;;  %v17705_v24 = vadd.f32 %v12146_v11, %v6006_v7 }
0x2e2d   :  { %12848 = vmatmul.mubr.msk.f32.vlgmr.msra.gmra.mrb[30].mxu1 %vm6257_vm1, %v17685_v23  ;;  %12853 = vmatmul.mubr.msk.f32.vlgmr.msra.gmra.mrb[46].mxu0 %vm6257_vm1, %v17683_v22 }
0x2e2e   :  { %v12794_v55 = vpop.f32.mrb[34].mxu0  ;;  %v12814_v42 = vpop.f32.mrb[26].mxu1  ;;  %12856 = vmatpush3.xpose.msk.msra.mxu1 %vm6257_vm1, %v17692_v29  ;;  %12861 = vmatpush3.xpose.msk.msra.mxu0 %vm6257_vm1, %v17687_v62 }
0x2e2f   :  { %v17707_v41 = vadd.f32 %v12814_v42, %v12155_v15  ;;  %v6016_v34 = vpop.f32.mrb[35].mxu0  ;;  %v6132_v32 = vpop.f32.mrb[27].mxu1  ;;  %12857 = vmatprep.mubr.msk.f32.mxu1 %vm14690_vm0, %v18665_v1  ;;  %12862 = vmatprep.mubr.msk.f32.mxu0 %vm14690_vm0, %v18665_v1  ;;  %v17725_v36 = vadd.f32 %v12794_v55, %v12146_v11 }
0x2e30   :  { %v17713_v16 = vadd.f32 %v12155_v15, %v6132_v32  ;;  %12865 = vmatprep.subr.mxu1 %v18665_v1  ;;  %12870 = vmatprep.subr.mxu0 %v18665_v1  ;;  %v17727_v47 = vadd.f32 %v12146_v11, %v6016_v34 }
0x2e31   :  { %12858 = vmatmul.mubr.msk.f32.vlgmr.msra.gmra.mrb[32].mxu1 %vm6257_vm1, %v17705_v24  ;;  %12863 = vmatmul.mubr.msk.f32.vlgmr.msra.gmra.mrb[48].mxu0 %vm6257_vm1, %v17703_v3 }
0x2e32   :  { %v12825_v54 = vpop.f32.mrb[36].mxu0  ;;  %12866 = vmatpush3.xpose.msk.msra.mxu1 %vm6257_vm1, %v17713_v16  ;;  %12871 = vmatpush3.xpose.msk.msra.mxu0 %vm6257_vm1, %v17707_v41 }
0x2e33   :  { %v17729_v20 = vadd.f32 %v12825_v54, %v12164_v12  ;;  %v6218_v37 = vpop.f32.mrb[37].mxu0  ;;  %12867 = vmatprep.mubr.msk.f32.mxu1 %vm14690_vm0, %v18665_v1  ;;  %12872 = vmatprep.mubr.msk.f32.mxu0 %vm14690_vm0, %v18665_v1 }
0x2e34   :  { %v17735_v35 = vadd.f32 %v12164_v12, %v6218_v37  ;;  %12875 = vmatprep.subr.mxu1 %v18665_v1  ;;  %12880 = vmatprep.subr.mxu0 %v18665_v1 }
0x2e35   :  { %12868 = vmatmul.mubr.msk.f32.vlgmr.msra.gmra.mrb[34].mxu1 %vm6257_vm1, %v17727_v47  ;;  %12873 = vmatmul.mubr.msk.f32.vlgmr.msra.gmra.mrb[50].mxu0 %vm6257_vm1, %v17725_v36 }
0x2e36   :  { %v12828_v26 = vpop.f32.mrb[38].mxu0  ;;  %12876 = vmatpush3.msra.mxu1 %v17735_v35  ;;  %12881 = vmatpush3.msra.mxu0 %v17729_v20 }
0x2e37   :  { %v17745_v57 = vadd.f32 %v12828_v26, %v12164_v12  ;;  %v6228_v38 = vpop.f32.mrb[39].mxu0  ;;  %12882 = vmatprep.mubr.msk.f32.mxu0 %vm14690_vm0, %v18665_v1  ;;  %12890 = vmatprep.subr.mxu0 %v18665_v1 }
0x2e38   :  { %v17750_v49 = vadd.f32 %v12164_v12, %v6228_v38  ;;  %12877 = vmatprep.mubr.msk.f32.mxu1 %vm14690_vm0, %v18665_v1  ;;  %12885 = vmatprep.subr.mxu1 %v18665_v1 }
0x2e3a   :  { %v12831_v27 = vpop.f32.mrb[40].mxu0 }
0x2e3b   :  { %v17755_v13 = vadd.f32 %v12831_v27, %v12164_v12  ;;  %v6238_v25 = vpop.f32.mrb[41].mxu0 }
0x2e3c   :  { %v17757_v43 = vadd.f32 %v12164_v12, %v6238_v25 }
0x2e3e   :  { %v12834_v14 = vpop.f32.mrb[42].mxu0 }
0x2e3f   :  { %v17759_v19 = vadd.f32 %v12834_v14, %v12164_v12  ;;  %v6248_v10 = vpop.f32.mrb[43].mxu0 }
0x2e40   :  { %v17761_v50 = vadd.f32 %v12164_v12, %v6248_v10 }
0x2efb   :  { %v6406_v51 = vpop.f32.mrb[28].mxu1 }
0x2efc   :  { %v6867_v59 = vmul.f32 0.35355338, %v6406_v51  ;;  %v6330_v9 = vpop.f32.mrb[44].mxu0  ;;  %v12844_v40 = vpop.f32.mrb[29].mxu1 }
0x2efd   :  { %v6866_v56 = vmul.f32 0.35355338, %v6330_v9  ;;  %v12839_v6 = vpop.f32.mrb[45].mxu0 }
0x2efe   :  { %v6877_v8 = vsel %vm6257_vm1, %v6867_v59, -inf }
0x2eff   :  { %6878 = vmax.xlane.f32.xlu1 %v6877_v8  ;;  %v6874_v63 = vsel %vm6257_vm1, %v6866_v56, -inf }
0x2f00   :  { %v6482_v30 = vpop.f32.mrb[30].mxu1  ;;  %6875 = vmax.xlane.f32.xlu0 %v6874_v63  ;;  %v6558_v61 = vpop.f32.mrb[46].mxu0 }
0x2f01   :  { %v6868_v44 = vmul.f32 0.35355338, %v6482_v30  ;;  %v12849_v15 = vpop.f32.mrb[31].mxu1  ;;  %v12854_v48 = vpop.f32.mrb[47].mxu0  ;;  %v6869_v39 = vmul.f32 0.35355338, %v6558_v61 }
0x2f03   :  { %v6880_v11 = vsel %vm6257_vm1, %v6868_v44, -inf  ;;  %v6883_v53 = vsel %vm6257_vm1, %v6869_v39, -inf }
0x2f04   :  { %v6634_v17 = vpop.f32.mrb[32].mxu1  ;;  %6881 = vmax.xlane.f32.xlu0 %v6880_v11  ;;  %v6710_v58 = vpop.f32.mrb[48].mxu0 }
0x2f05   :  { %v6870_v46 = vmul.f32 0.35355338, %v6634_v17  ;;  %v12859_v33 = vpop.f32.mrb[33].mxu1  ;;  %v12864_v60 = vpop.f32.mrb[49].mxu0  ;;  %v6871_v45 = vmul.f32 0.35355338, %v6710_v58 }
0x2f07   :  { %v6886_v28 = vsel %vm6257_vm1, %v6870_v46, -inf  ;;  %v6889_v54 = vsel %vm6257_vm1, %v6871_v45, -inf }
0x2f08   :  { %6887 = vmax.xlane.f32.xlu1 %v6886_v28  ;;  %v6786_v7 = vpop.f32.mrb[34].mxu1  ;;  %6884 = vmax.xlane.f32.xlu0 %v6883_v53  ;;  %v6862_v2 = vpop.f32.mrb[50].mxu0 }
0x2f09   :  { %v6872_v55 = vmul.f32 0.35355338, %v6786_v7  ;;  %v12869_v42 = vpop.f32.mrb[35].mxu1  ;;  %v12874_v34 = vpop.f32.mrb[51].mxu0  ;;  %v6873_v32 = vmul.f32 0.35355338, %v6862_v2 }
0x2f0b   :  { %v6892_v12 = vsel %vm6257_vm1, %v6872_v55, -inf  ;;  %v6895_v37 = vsel %vm6257_vm1, %v6873_v32, -inf }
0x2f0c   :  { %6893 = vmax.xlane.f32.xlu1 %v6892_v12  ;;  %6890 = vmax.xlane.f32.xlu0 %v6889_v54 }
0x2f10   :  { %6896 = vmax.xlane.f32.xlu0 %v6895_v37 }
0x2f1d   :  { %7548 = vrot.lane.b32.xlu1 %v17657_v21, %s14694_s9 }
0x2f21   :  { %7546 = vrot.lane.b32.xlu1 %v17666_v31, %s14694_s9 }
0x2f25   :  { %7624 = vrot.lane.b32.xlu1 %v17661_v5, %s14694_s9 }
0x2f26   :  { %7626 = vrot.lane.b32.xlu0 %v17655_v18, %s14694_s9 }
0x2f29   :  { %7782 = vrot.lane.b32.xlu1 %v17668_v4, %s14694_s9 }
0x2f2a   :  { %7704 = vrot.lane.b32.xlu0 %v17671_v52, %s14694_s9 }
0x2f8c   :  { %v6879_v26 = vpop.xlane.xlu1 %6878 }
0x2f8d   :  { %v6899_v38 = vsub.f32 %v6867_v59, %v6879_v26  ;;  %v6876_v27 = vpop.xlane.xlu0 %6875 }
0x2f8e   :  { %v6898_v25 = vsub.f32 %v6866_v56, %v6876_v27 }
0x2f8f   :  { %v6908_v14 = vmul.f32 1.442695, %v6899_v38 }
0x2f90   :  { %v6906_v10 = vmul.f32 1.442695, %v6898_v25 }
0x2f91   :  { %14129 = vpow2.f32 %v6908_v14  ;;  %v6882_v51 = vpop.xlane.xlu0 %6881 }
0x2f92   :  { %14131 = vpow2.f32 %v6906_v10  ;;  %v6900_v9 = vsub.f32 %v6868_v44, %v6882_v51 }
0x2f94   :  { %v6910_v40 = vmul.f32 1.442695, %v6900_v9 }
0x2f95   :  { %v6888_v6 = vpop.xlane.xlu1 %6887  ;;  %v6885_v8 = vpop.xlane.xlu0 %6884 }
0x2f96   :  { %14133 = vpow2.f32 %v6910_v40  ;;  %v6902_v63 = vsub.f32 %v6870_v46, %v6888_v6  ;;  %v6901_v30 = vsub.f32 %v6869_v39, %v6885_v8 }
0x2f98   :  { %v6914_v61 = vmul.f32 1.442695, %v6902_v63  ;;  %v6912_v15 = vmul.f32 1.442695, %v6901_v30 }
0x2f99   :  { %v6894_v48 = vpop.xlane.xlu1 %6893  ;;  %v6891_v11 = vpop.xlane.xlu0 %6890 }
0x2f9a   :  { %14135 = vpow2.f32 %v6914_v61  ;;  %v6904_v59 = vsub.f32 %v6872_v55, %v6894_v48  ;;  %v6903_v17 = vsub.f32 %v6871_v45, %v6891_v11 }
0x2f9b   :  { %v14130_v56 = vpop.eup %14129  ;;  %14137 = vpow2.f32 %v6912_v15 }
0x2f9c   :  { %v14132_v58 = vpop.eup %14131  ;;  %v6918_v33 = vmul.f32 1.442695, %v6904_v59  ;;  %v6916_v60 = vmul.f32 1.442695, %v6903_v17  ;;  %v6925_v44 = vsel %vm6257_vm1, %v14130_v56, 0.0 }
0x2f9d   :  { %6926 = vadd.xlane.f32.xlu0 %v6925_v44  ;;  %v6897_v28 = vpop.xlane.xlu0 %6896  ;;  %v6922_v53 = vsel %vm6257_vm1, %v14132_v58, 0.0  ;;  %v17826_v27 = vpop.permute.xlu1 %7548 }
0x2f9e   :  { %14139 = vpow2.f32 %v6918_v33  ;;  %v6905_v39 = vsub.f32 %v6873_v32, %v6897_v28  ;;  %6923 = vadd.xlane.f32.xlu1 %v6922_v53 }
0x2f9f   :  { %14141 = vpow2.f32 %v6916_v60 }
0x2fa0   :  { %v14134_v46 = vpop.eup %14133  ;;  %v6920_v7 = vmul.f32 1.442695, %v6905_v39 }
0x2fa1   :  { %v6928_v2 = vsel %vm6257_vm1, %v14134_v46, 0.0  ;;  %v17828_v25 = vpop.permute.xlu1 %7546  ;;  %v17830_v14 = vpop.permute.xlu0 %7626 }
0x2fa2   :  { %14143 = vpow2.f32 %v6920_v7  ;;  %6929 = vadd.xlane.f32.xlu1 %v6928_v2 }
0x2fa4   :  { %v17786_v45 = vpop.eup %14135 }
0x2fa5   :  { %v17788_v55 = vpop.eup %14137  ;;  %v6934_v42 = vsel %vm6257_vm1, %v17786_v45, 0.0  ;;  %v17832_v10 = vpop.permute.xlu1 %7624 }
0x2fa6   :  { %6935 = vadd.xlane.f32.xlu1 %v6934_v42  ;;  %v6931_v34 = vsel %vm6257_vm1, %v17788_v55, 0.0  ;;  %v17834_v51 = vpop.permute.xlu0 %7704 }
0x2fa7   :  { %6932 = vadd.xlane.f32.xlu0 %v6931_v34 }
0x2fa8   :  { %v17794_v32 = vpop.eup %14139 }
0x2fa9   :  { %v17796_v12 = vpop.eup %14141  ;;  %v6940_v54 = vsel %vm6257_vm1, %v17794_v32, 0.0  ;;  %v17836_v9 = vpop.permute.xlu1 %7782 }
0x2faa   :  { %6941 = vadd.xlane.f32.xlu1 %v6940_v54  ;;  %v6937_v37 = vsel %vm6257_vm1, %v17796_v12, 0.0 }
0x2fab   :  { %6938 = vadd.xlane.f32.xlu0 %v6937_v37 }
0x2fac   :  { %v17802_v26 = vpop.eup %14143 }
0x2fad   :  { %v6943_v38 = vsel %vm6257_vm1, %v17802_v26, 0.0 }
0x2faf   :  { %6944 = vadd.xlane.f32.xlu0 %v6943_v38 }
0x2fbb   :  { %7780 = vrot.lane.b32.xlu1 %v17683_v22, %s14694_s9 }
0x2fbf   :  { %7938 = vrot.lane.b32.xlu1 %v17687_v62, %s14694_s9 }
0x2fc3   :  { %7936 = vrot.lane.b32.xlu1 %v17703_v3, %s14694_s9 }
0x2fc5   :  { %7702 = vrot.lane.b32.xlu0 %v17685_v23, %s14694_s9 }
0x2fc7   :  { %8094 = vrot.lane.b32.xlu1 %v17707_v41, %s14694_s9 }
0x2fc9   :  { %7860 = vrot.lane.b32.xlu0 %v17692_v29, %s14694_s9 }
0x2fcb   :  { %8092 = vrot.lane.b32.xlu1 %v17725_v36, %s14694_s9 }
0x2fcd   :  { %7858 = vrot.lane.b32.xlu0 %v17705_v24, %s14694_s9 }
0x2fd1   :  { %8016 = vrot.lane.b32.xlu0 %v17713_v16, %s14694_s9 }
0x2fd5   :  { %8014 = vrot.lane.b32.xlu0 %v17727_v47, %s14694_s9 }
0x302a   :  { %v6927_v40 = vpop.xlane.xlu0 %6926 }
0x302b   :  { %14145 = vrcp.f32 %v6927_v40  ;;  %v6924_v6 = vpop.xlane.xlu1 %6923 }
0x302c   :  { %14147 = vrcp.f32 %v6924_v6 }
0x302f   :  { %v6930_v8 = vpop.xlane.xlu1 %6929 }
0x3030   :  { %14149 = vrcp.f32 %v6930_v8 }
0x3033   :  { %v6936_v63 = vpop.xlane.xlu1 %6935 }
0x3034   :  { %14151 = vrcp.f32 %v6936_v63  ;;  %v6933_v30 = vpop.xlane.xlu0 %6932 }
0x3035   :  { %v14146_v61 = vpop.eup %14145  ;;  %14153 = vrcp.f32 %v6933_v30 }
0x3036   :  { %v14148_v15 = vpop.eup %14147  ;;  %v6949_v48 = vmul.f32 %v14146_v61, %v14130_v56 }
0x3037   :  { %v6942_v11 = vpop.xlane.xlu1 %6941  ;;  %v6947_v59 = vmul.f32 %v14148_v15, %v14132_v58 }
0x3038   :  { %14155 = vrcp.f32 %v6942_v11  ;;  %v6939_v17 = vpop.xlane.xlu0 %6938  ;;  %12883 = vmatmul.mubr.msk.f32.vlgmr.msra.gmra.mrb[52].mxu0 %vm6257_vm1, %v6949_v48 }
0x3039   :  { %14157 = vrcp.f32 %v6939_v17  ;;  %12891 = vmatpush3.msra.mxu0 %v17745_v57  ;;  %12878 = vmatmul.mubr.msk.f32.vlgmr.msra.gmra.mrb[36].mxu1 %vm6257_vm1, %v6947_v59 }
0x303a   :  { %v14150_v33 = vpop.eup %14149  ;;  %12886 = vmatpush3.msra.mxu1 %v17750_v49  ;;  %12887 = vmatprep.mubr.msk.f32.mxu1 %vm14690_vm0, %v18665_v1 }
0x303b   :  { %12895 = vmatprep.subr.mxu1 %v18665_v1  ;;  %v6951_v56 = vmul.f32 %v14150_v33, %v14134_v46  ;;  %12892 = vmatprep.mubr.msk.f32.mxu0 %vm14690_vm0, %v18665_v1  ;;  %v7781_v42 = vpop.permute.xlu1 %7780 }
0x303c   :  { %v6945_v58 = vpop.xlane.xlu0 %6944  ;;  %12900 = vmatprep.subr.mxu0 %v18665_v1 }
0x303d   :  { %14159 = vrcp.f32 %v6945_v58  ;;  %12888 = vmatmul.mubr.msk.f32.vlgmr.msra.gmra.mrb[38].mxu1 %vm6257_vm1, %v6951_v56 }
0x303e   :  { %v14152_v60 = vpop.eup %14151  ;;  %12896 = vmatpush3.msra.mxu1 %v17757_v43  ;;  %12897 = vmatprep.mubr.msk.f32.mxu1 %vm14690_vm0, %v18665_v1 }
0x303f   :  { %v14154_v44 = vpop.eup %14153  ;;  %12905 = vmatprep.subr.mxu1 %v18665_v1  ;;  %v6955_v28 = vmul.f32 %v14152_v60, %v17786_v45 }
0x3040   :  { %v7703_v53 = vpop.permute.xlu0 %7702  ;;  %v6953_v39 = vmul.f32 %v14154_v44, %v17788_v55 }
0x3041   :  { %12898 = vmatmul.mubr.msk.f32.vlgmr.msra.gmra.mrb[40].mxu1 %vm6257_vm1, %v6955_v28 }
0x3042   :  { %v14156_v46 = vpop.eup %14155  ;;  %12893 = vmatmul.mubr.msk.f32.vlgmr.msra.gmra.mrb[54].mxu0 %vm6257_vm1, %v6953_v39  ;;  %12906 = vmatpush3.msra.mxu1 %v17761_v50 }
0x3043   :  { %v14158_v7 = vpop.eup %14157  ;;  %12901 = vmatpush3.msra.mxu0 %v17755_v13  ;;  %12902 = vmatprep.mubr.msk.f32.mxu0 %vm14690_vm0, %v18665_v1  ;;  %v6959_v2 = vmul.f32 %v14156_v46, %v17794_v32 }
0x3044   :  { %12907 = vmatprep.mubr.msk.f32.mxu1 %vm14690_vm0, %v18665_v1  ;;  %12910 = vmatprep.subr.mxu0 %v18665_v1  ;;  %v6957_v45 = vmul.f32 %v14158_v7, %v17796_v12  ;;  %v7861_v55 = vpop.permute.xlu0 %7860  ;;  %v7939_v12 = vpop.permute.xlu1 %7938 }
0x3045   :  { %12908 = vmatmul.mubr.msk.f32.vlgmr.msra.gmra.mrb[42].mxu1 %vm6257_vm1, %v6959_v2  ;;  %12915 = vmatprep.subr.mxu1 %v18665_v1 }
0x3046   :  { %12903 = vmatmul.mubr.msk.f32.vlgmr.msra.gmra.mrb[56].mxu0 %vm6257_vm1, %v6957_v45  ;;  %12917 = vmatprep.mubr.msk.f32.mxu1 %vm14690_vm0, %v18665_v1 }
0x3047   :  { %v14160_v34 = vpop.eup %14159  ;;  %12911 = vmatpush3.msra.mxu0 %v17759_v19  ;;  %12912 = vmatprep.mubr.msk.f32.mxu0 %vm14690_vm0, %v18665_v1 }
0x3048   :  { %v6961_v32 = vmul.f32 %v14160_v34, %v17802_v26  ;;  %12920 = vmatprep.subr.mxu0 %v18665_v1  ;;  %v7859_v54 = vpop.permute.xlu0 %7858  ;;  %v7937_v37 = vpop.permute.xlu1 %7936 }
0x3049   :  { %12916 = vmatpush3.xpose.msk.msra.mxu1 %vm6257_vm1, %v17826_v27 }
0x304a   :  { %12913 = vmatmul.mubr.msk.f32.vlgmr.msra.gmra.mrb[58].mxu0 %vm6257_vm1, %v6961_v32  ;;  %12925 = vmatprep.subr.mxu1 %v18665_v1 }
0x304b   :  { %12922 = vmatprep.mubr.msk.f32.mxu0 %vm14690_vm0, %v18665_v1 }
0x304c   :  { %12918 = vmatmul.mubr.msk.f32.vlgmr.msra.gmra.mrb[44].mxu1 %vm6257_vm1, %v17828_v25  ;;  %v8017_v26 = vpop.permute.xlu0 %8016  ;;  %v8095_v38 = vpop.permute.xlu1 %8094 }
0x304d   :  { %12926 = vmatpush3.xpose.msk.msra.mxu1 %vm6257_vm1, %v17834_v51  ;;  %12927 = vmatprep.mubr.msk.f32.mxu1 %vm14690_vm0, %v18665_v1 }
0x304e   :  { %12921 = vmatpush3.xpose.msk.msra.mxu0 %vm6257_vm1, %v17830_v14  ;;  %12935 = vmatprep.subr.mxu1 %v18665_v1 }
0x304f   :  { %12930 = vmatprep.subr.mxu0 %v18665_v1 }
0x3050   :  { %12928 = vmatmul.mubr.msk.f32.vlgmr.msra.gmra.mrb[46].mxu1 %vm6257_vm1, %v7703_v53  ;;  %v8015_v27 = vpop.permute.xlu0 %8014  ;;  %v8093_v25 = vpop.permute.xlu1 %8092 }
0x3051   :  { %12923 = vmatmul.mubr.msk.f32.vlgmr.msra.gmra.mrb[60].mxu0 %vm6257_vm1, %v17832_v10  ;;  %12936 = vmatpush3.xpose.msk.msra.mxu1 %vm6257_vm1, %v7861_v55 }
0x3052   :  { %12931 = vmatpush3.xpose.msk.msra.mxu0 %vm6257_vm1, %v17836_v9  ;;  %12932 = vmatprep.mubr.msk.f32.mxu0 %vm14690_vm0, %v18665_v1 }
0x3053   :  { %12937 = vmatprep.mubr.msk.f32.mxu1 %vm14690_vm0, %v18665_v1  ;;  %12940 = vmatprep.subr.mxu0 %v18665_v1 }
0x3054   :  { %12938 = vmatmul.mubr.msk.f32.vlgmr.msra.gmra.mrb[48].mxu1 %vm6257_vm1, %v7859_v54  ;;  %12945 = vmatprep.subr.mxu1 %v18665_v1 }
0x3055   :  { %12933 = vmatmul.mubr.msk.f32.vlgmr.msra.gmra.mrb[62].mxu0 %vm6257_vm1, %v7781_v42  ;;  %12946 = vmatpush3.xpose.msk.msra.mxu1 %vm6257_vm1, %v8017_v26 }
0x3056   :  { %12941 = vmatpush3.xpose.msk.msra.mxu0 %vm6257_vm1, %v7939_v12  ;;  %12942 = vmatprep.mubr.msk.f32.mxu0 %vm14690_vm0, %v18665_v1 }
0x3057   :  { %12947 = vmatprep.mubr.msk.f32.mxu1 %vm14690_vm0, %v18665_v1  ;;  %12950 = vmatprep.subr.mxu0 %v18665_v1 }
0x3058   :  { %12948 = vmatmul.mubr.msk.f32.vlgmr.msra.gmra.mrb[50].mxu1 %vm6257_vm1, %v8015_v27  ;;  %12955 = vmatprep.subr.mxu1 %v18665_v1 }
0x3059   :  { %12943 = vmatmul.mubr.msk.f32.vlgmr.msra.gmra.mrb[64].mxu0 %vm6257_vm1, %v7937_v37  ;;  %12957 = vmatprep.mubr.msk.f32.mxu1 %vm14690_vm0, %v18665_v1 }
0x305a   :  { %12951 = vmatpush3.xpose.msk.msra.mxu0 %vm6257_vm1, %v8095_v38  ;;  %12952 = vmatprep.mubr.msk.f32.mxu0 %vm14690_vm0, %v18665_v1 }
0x305b   :  { %12960 = vmatprep.subr.mxu0 %v18665_v1 }
0x305d   :  { %12953 = vmatmul.mubr.msk.f32.vlgmr.msra.gmra.mrb[66].mxu0 %vm6257_vm1, %v8093_v25 }
0x305e   :  { %12962 = vmatprep.mubr.msk.f32.mxu0 %vm14690_vm0, %v18665_v1 }
0x310b   :  { %v17925_v14 = vpop.f32.mrb[52].mxu0 }
0x310c   :  { %v17927_v10 = vpop.f32.mrb[36].mxu1  ;;  %v12884_v51 = vpop.f32.mrb[53].mxu0 }
0x310d   :  { %v12879_v9 = vpop.f32.mrb[37].mxu1 }
0x3110   :  { %v17929_v40 = vpop.f32.mrb[38].mxu1 }
0x3111   :  { %v12889_v6 = vpop.f32.mrb[39].mxu1 }
0x3114   :  { %v17931_v8 = vpop.f32.mrb[40].mxu1 }
0x3115   :  { %v17933_v63 = vpop.f32.mrb[54].mxu0  ;;  %v12899_v30 = vpop.f32.mrb[41].mxu1 }
0x3116   :  { %18677 = vst [vmem:[#allocation39_spill] sm:$0xff] %v17933_v63  ;;  %v12894_v61 = vpop.f32.mrb[55].mxu0 }
0x3118   :  { %v17935_v15 = vpop.f32.mrb[42].mxu1 }
0x3119   :  { %18678 = vst [vmem:[#allocation40_spill] sm:$0xff] %v17935_v15  ;;  %v17937_v48 = vpop.f32.mrb[56].mxu0  ;;  %v12909_v11 = vpop.f32.mrb[43].mxu1 }
0x311a   :  { %18679 = vst [vmem:[#allocation41_spill] sm:$0xff] %v17937_v48  ;;  %v12904_v59 = vpop.f32.mrb[57].mxu0 }
0x311d   :  { %v17939_v17 = vpop.f32.mrb[58].mxu0 }
0x311e   :  { %18680 = vst [vmem:[#allocation42_spill] sm:$0xff] %v17939_v17  ;;  %v12914_v33 = vpop.f32.mrb[59].mxu0 }
0x311f   :  { %v7620_v56 = vpop.f32.mrb[44].mxu1 }
0x3120   :  { %v8170_v58 = vmul.f32 0.35355338, %v7620_v56  ;;  %v12919_v60 = vpop.f32.mrb[45].mxu1 }
0x3122   :  { %v8178_v44 = vsel %vm6257_vm1, %v8170_v58, -inf }
0x3123   :  { %8179 = vmax.xlane.f32.xlu0 %v8178_v44  ;;  %v7776_v28 = vpop.f32.mrb[46].mxu1 }
0x3124   :  { %v7698_v53 = vpop.f32.mrb[60].mxu0  ;;  %v8172_v39 = vmul.f32 0.35355338, %v7776_v28  ;;  %v12929_v46 = vpop.f32.mrb[47].mxu1 }
0x3125   :  { %v8171_v7 = vmul.f32 0.35355338, %v7698_v53  ;;  %v12924_v2 = vpop.f32.mrb[61].mxu0 }
0x3126   :  { %v8184_v42 = vsel %vm6257_vm1, %v8172_v39, -inf }
0x3127   :  { %8185 = vmax.xlane.f32.xlu0 %v8184_v42  ;;  %v7932_v45 = vpop.f32.mrb[48].mxu1  ;;  %v8181_v55 = vsel %vm6257_vm1, %v8171_v7, -inf }
0x3128   :  { %v8174_v34 = vmul.f32 0.35355338, %v7932_v45  ;;  %8182 = vmax.xlane.f32.xlu1 %v8181_v55  ;;  %v7854_v32 = vpop.f32.mrb[62].mxu0  ;;  %v12939_v12 = vpop.f32.mrb[49].mxu1 }
0x3129   :  { %v8173_v54 = vmul.f32 0.35355338, %v7854_v32  ;;  %v12934_v37 = vpop.f32.mrb[63].mxu0 }
0x312a   :  { %v8190_v26 = vsel %vm6257_vm1, %v8174_v34, -inf }
0x312b   :  { %v8088_v38 = vpop.f32.mrb[50].mxu1  ;;  %v8187_v27 = vsel %vm6257_vm1, %v8173_v54, -inf }
0x312c   :  { %8191 = vmax.xlane.f32.xlu1 %v8190_v26  ;;  %8188 = vmax.xlane.f32.xlu0 %v8187_v27  ;;  %v8010_v25 = vpop.f32.mrb[64].mxu0  ;;  %v12949_v51 = vpop.f32.mrb[51].mxu1  ;;  %v17960_v56 = vmul.f32 0.35355338, %v8088_v38 }
0x312d   :  { %v8175_v9 = vmul.f32 0.35355338, %v8010_v25  ;;  %v12944_v6 = vpop.f32.mrb[65].mxu0 }
0x312e   :  { %v8196_v60 = vsel %vm6257_vm1, %v17960_v56, -inf }
0x312f   :  { %v8193_v30 = vsel %vm6257_vm1, %v8175_v9, -inf }
0x3130   :  { %8194 = vmax.xlane.f32.xlu0 %v8193_v30  ;;  %v8166_v61 = vpop.f32.mrb[66].mxu0 }
0x3131   :  { %v8177_v11 = vmul.f32 0.35355338, %v8166_v61  ;;  %v12954_v59 = vpop.f32.mrb[67].mxu0 }
0x3133   :  { %v8199_v33 = vsel %vm6257_vm1, %v8177_v11, -inf }
0x3134   :  { %8200 = vmax.xlane.f32.xlu0 %v8199_v33 }
0x313d   :  { %8267 = vrot.lane.b32.xlu1 %v17735_v35, %s14694_s9 }
0x314a   :  { %8344 = vrot.lane.b32.xlu0 %v17729_v20, %s14694_s9 }
0x314e   :  { %8575 = vrot.lane.b32.xlu0 %v17757_v43, %s14694_s9 }
0x3152   :  { %8729 = vrot.lane.b32.xlu0 %v17761_v50, %s14694_s9 }
0x3156   :  { %8884 = vrot.lane.b32.xlu0 %v17657_v21, %s14695_s19 }
0x315a   :  { %8882 = vrot.lane.b32.xlu0 %v17666_v31, %s14695_s19 }
0x315e   :  { %9040 = vrot.lane.b32.xlu0 %v17671_v52, %s14695_s19 }
0x3161   :  { %8197 = vmax.xlane.f32.xlu1 %v8196_v60 }
0x3172   :  { %8421 = vrot.lane.b32.xlu1 %v17750_v49, %s14694_s9 }
0x3176   :  { %8498 = vrot.lane.b32.xlu1 %v17745_v57, %s14694_s9 }
0x317a   :  { %8652 = vrot.lane.b32.xlu1 %v17755_v13, %s14694_s9 }
0x317e   :  { %8806 = vrot.lane.b32.xlu1 %v17759_v19, %s14694_s9 }
0x3182   :  { %8962 = vrot.lane.b32.xlu1 %v17655_v18, %s14695_s19 }
0x3186   :  { %8960 = vrot.lane.b32.xlu1 %v17661_v5, %s14695_s19 }
0x318a   :  { %9118 = vrot.lane.b32.xlu1 %v17668_v4, %s14695_s19 }
0x31b0   :  { %v8180_v44 = vpop.xlane.xlu0 %8179 }
0x31b1   :  { %v8202_v28 = vsub.f32 %v8170_v58, %v8180_v44 }
0x31b3   :  { %v8210_v53 = vmul.f32 1.442695, %v8202_v28 }
0x31b4   :  { %v8186_v46 = vpop.xlane.xlu0 %8185 }
0x31b5   :  { %14161 = vpow2.f32 %v8210_v53  ;;  %v8204_v2 = vsub.f32 %v8172_v39, %v8186_v46  ;;  %v8183_v42 = vpop.xlane.xlu1 %8182 }
0x31b6   :  { %v8203_v45 = vsub.f32 %v8171_v7, %v8183_v42 }
0x31b7   :  { %v8214_v55 = vmul.f32 1.442695, %v8204_v2 }
0x31b8   :  { %v8212_v32 = vmul.f32 1.442695, %v8203_v45 }
0x31b9   :  { %14163 = vpow2.f32 %v8214_v55  ;;  %v8192_v12 = vpop.xlane.xlu1 %8191  ;;  %v8189_v37 = vpop.xlane.xlu0 %8188 }
0x31ba   :  { %14165 = vpow2.f32 %v8212_v32  ;;  %v8206_v26 = vsub.f32 %v8174_v34, %v8192_v12  ;;  %v8205_v38 = vsub.f32 %v8173_v54, %v8189_v37 }
0x31bc   :  { %v8218_v27 = vmul.f32 1.442695, %v8206_v26  ;;  %v8216_v25 = vmul.f32 1.442695, %v8205_v38 }
0x31bd   :  { %v8268_v51 = vpop.permute.xlu1 %8267  ;;  %v8195_v6 = vpop.xlane.xlu0 %8194 }
0x31be   :  { %14167 = vpow2.f32 %v8218_v27  ;;  %v8207_v58 = vsub.f32 %v8175_v9, %v8195_v6  ;;  %12956 = vmatpush3.msra.mxu1 %v8268_v51 }
0x31bf   :  { %v17980_v30 = vpop.eup %14161  ;;  %14169 = vpow2.f32 %v8216_v25  ;;  %12965 = vmatprep.subr.mxu1 %v18665_v1 }
0x31c0   :  { %v8220_v39 = vmul.f32 1.442695, %v8207_v58  ;;  %v8226_v7 = vsel %vm6257_vm1, %v17980_v30, 0.0 }
0x31c1   :  { %v8201_v61 = vpop.xlane.xlu0 %8200  ;;  %8227 = vadd.xlane.f32.xlu1 %v8226_v7 }
0x31c2   :  { %14171 = vpow2.f32 %v8220_v39  ;;  %v8209_v34 = vsub.f32 %v8177_v11, %v8201_v61 }
0x31c3   :  { %v17985_v54 = vpop.eup %14163 }
0x31c4   :  { %v17987_v59 = vpop.eup %14165  ;;  %v8224_v33 = vmul.f32 1.442695, %v8209_v34  ;;  %v8232_v9 = vsel %vm6257_vm1, %v17985_v54, 0.0 }
0x31c5   :  { %v8345_v60 = vpop.permute.xlu0 %8344  ;;  %8233 = vadd.xlane.f32.xlu1 %v8232_v9  ;;  %v8229_v44 = vsel %vm6257_vm1, %v17987_v59, 0.0 }
0x31c6   :  { %14173 = vpow2.f32 %v8224_v33  ;;  %8230 = vadd.xlane.f32.xlu0 %v8229_v44  ;;  %12961 = vmatpush3.msra.mxu0 %v8345_v60 }
0x31c7   :  { %12970 = vmatprep.subr.mxu0 %v18665_v1 }
0x31c8   :  { %v17994_v28 = vpop.eup %14167 }
0x31c9   :  { %v17996_v11 = vpop.eup %14169  ;;  %v8238_v53 = vsel %vm6257_vm1, %v17994_v28, 0.0  ;;  %v8576_v27 = vpop.permute.xlu0 %8575 }
0x31ca   :  { %8239 = vadd.xlane.f32.xlu1 %v8238_v53  ;;  %v8235_v46 = vsel %vm6257_vm1, %v17996_v11, 0.0 }
0x31cb   :  { %8236 = vadd.xlane.f32.xlu0 %v8235_v46 }
0x31cc   :  { %v18002_v2 = vpop.eup %14171 }
0x31cd   :  { %v8241_v42 = vsel %vm6257_vm1, %v18002_v2, 0.0  ;;  %v8730_v51 = vpop.permute.xlu0 %8729 }
0x31cf   :  { %8242 = vadd.xlane.f32.xlu0 %v8241_v42 }
0x31d0   :  { %v18006_v45 = vpop.eup %14173 }
0x31d1   :  { %v8247_v55 = vsel %vm6257_vm1, %v18006_v45, 0.0  ;;  %v18059_v58 = vpop.permute.xlu0 %8884 }
0x31d3   :  { %8248 = vadd.xlane.f32.xlu0 %v8247_v55 }
0x31d5   :  { %v18061_v7 = vpop.permute.xlu0 %8882 }
0x31d9   :  { %v18063_v33 = vpop.permute.xlu0 %9040 }
0x31e9   :  { %9038 = vrot.lane.b32.xlu0 %v17685_v23, %s14695_s19 }
0x31ed   :  { %9196 = vrot.lane.b32.xlu0 %v17692_v29, %s14695_s19 }
0x31ee   :  { %v8198_v32 = vpop.xlane.xlu1 %8197 }
0x31ef   :  { %v8208_v12 = vsub.f32 %v17960_v56, %v8198_v32 }
0x31f1   :  { %v8222_v37 = vmul.f32 1.442695, %v8208_v12  ;;  %9194 = vrot.lane.b32.xlu0 %v17705_v24, %s14695_s19 }
0x31f3   :  { %14175 = vpow2.f32 %v8222_v37 }
0x31f5   :  { %9352 = vrot.lane.b32.xlu0 %v17713_v16, %s14695_s19 }
0x31f9   :  { %9350 = vrot.lane.b32.xlu0 %v17727_v47, %s14695_s19 }
0x31fd   :  { %v18021_v26 = vpop.eup %14175  ;;  %9678 = vrot.lane.b32.xlu0 %v17729_v20, %s14695_s19 }
0x31fe   :  { %v8244_v38 = vsel %vm6257_vm1, %v18021_v26, 0.0 }
0x31ff   :  { %8245 = vadd.xlane.f32.xlu1 %v8244_v38 }
0x3201   :  { %9906 = vrot.lane.b32.xlu0 %v17757_v43, %s14695_s19 }
0x3205   :  { %10058 = vrot.lane.b32.xlu0 %v17761_v50, %s14695_s19 }
0x3209   :  { %10212 = vrot.lane.b32.xlu0 %v17657_v21, %s14696_s20  ;;  %v8422_v21 = vpop.permute.xlu1 %8421 }
0x320d   :  { %10210 = vrot.lane.b32.xlu0 %v17666_v31, %s14696_s20  ;;  %v8499_v31 = vpop.permute.xlu1 %8498 }
0x3210   :  { %9116 = vrot.lane.b32.xlu1 %v17683_v22, %s14695_s19 }
0x3211   :  { %v8653_v56 = vpop.permute.xlu1 %8652 }
0x3214   :  { %9274 = vrot.lane.b32.xlu1 %v17687_v62, %s14695_s19 }
0x3215   :  { %v8807_v25 = vpop.permute.xlu1 %8806 }
0x3218   :  { %9272 = vrot.lane.b32.xlu1 %v17703_v3, %s14695_s19 }
0x3219   :  { %v8963_v6 = vpop.permute.xlu1 %8962 }
0x321c   :  { %9430 = vrot.lane.b32.xlu1 %v17707_v41, %s14695_s19 }
0x321d   :  { %v8961_v39 = vpop.permute.xlu1 %8960 }
0x3220   :  { %9428 = vrot.lane.b32.xlu1 %v17725_v36, %s14695_s19 }
0x3221   :  { %v9119_v61 = vpop.permute.xlu1 %9118 }
0x3224   :  { %9602 = vrot.lane.b32.xlu1 %v17735_v35, %s14695_s19 }
0x3228   :  { %9754 = vrot.lane.b32.xlu1 %v17750_v49, %s14695_s19 }
0x322c   :  { %9830 = vrot.lane.b32.xlu1 %v17745_v57, %s14695_s19 }
0x3230   :  { %9982 = vrot.lane.b32.xlu1 %v17755_v13, %s14695_s19 }
0x3234   :  { %10134 = vrot.lane.b32.xlu1 %v17759_v19, %s14695_s19 }
0x3238   :  { %10290 = vrot.lane.b32.xlu1 %v17655_v18, %s14696_s20 }
0x323c   :  { %10288 = vrot.lane.b32.xlu1 %v17661_v5, %s14696_s20 }
0x324e   :  { %v8228_v34 = vpop.xlane.xlu1 %8227 }
0x324f   :  { %14177 = vrcp.f32 %v8228_v34 }
0x3252   :  { %v8234_v9 = vpop.xlane.xlu1 %8233 }
0x3253   :  { %14179 = vrcp.f32 %v8234_v9  ;;  %v8231_v60 = vpop.xlane.xlu0 %8230 }
0x3254   :  { %14181 = vrcp.f32 %v8231_v60 }
0x3257   :  { %v8240_v18 = vpop.xlane.xlu1 %8239 }
0x3258   :  { %14183 = vrcp.f32 %v8240_v18  ;;  %v8237_v44 = vpop.xlane.xlu0 %8236 }
0x3259   :  { %v14178_v5 = vpop.eup %14177  ;;  %14185 = vrcp.f32 %v8237_v44 }
0x325a   :  { %v8251_v53 = vmul.f32 %v14178_v5, %v17980_v30 }
0x325c   :  { %v8243_v46 = vpop.xlane.xlu0 %8242  ;;  %12958 = vmatmul.mubr.msk.f32.vlgmr.msra.gmra.mrb[52].mxu1 %vm6257_vm1, %v8251_v53 }
0x325d   :  { %v14180_v42 = vpop.eup %14179  ;;  %14187 = vrcp.f32 %v8243_v46  ;;  %12966 = vmatpush3.msra.mxu1 %v8422_v21  ;;  %12967 = vmatprep.mubr.msk.f32.mxu1 %vm14690_vm0, %v18665_v1 }
0x325e   :  { %v14182_v55 = vpop.eup %14181  ;;  %12975 = vmatprep.subr.mxu1 %v18665_v1  ;;  %v8255_v32 = vmul.f32 %v14180_v42, %v17985_v54 }
0x325f   :  { %v8253_v12 = vmul.f32 %v14182_v55, %v17987_v59 }
0x3260   :  { %v8249_v37 = vpop.xlane.xlu0 %8248  ;;  %12968 = vmatmul.mubr.msk.f32.vlgmr.msra.gmra.mrb[54].mxu1 %vm6257_vm1, %v8255_v32 }
0x3261   :  { %14189 = vrcp.f32 %v8249_v37  ;;  %12963 = vmatmul.mubr.msk.f32.vlgmr.msra.gmra.mrb[68].mxu0 %vm6257_vm1, %v8253_v12  ;;  %12976 = vmatpush3.msra.mxu1 %v8576_v27 }
0x3262   :  { %v14184_v30 = vpop.eup %14183  ;;  %12971 = vmatpush3.msra.mxu0 %v8499_v31  ;;  %12972 = vmatprep.mubr.msk.f32.mxu0 %vm14690_vm0, %v18665_v1 }
0x3263   :  { %v14186_v38 = vpop.eup %14185  ;;  %12977 = vmatprep.mubr.msk.f32.mxu1 %vm14690_vm0, %v18665_v1  ;;  %12980 = vmatprep.subr.mxu0 %v18665_v1  ;;  %v8259_v54 = vmul.f32 %v14184_v30, %v17994_v28 }
0x3264   :  { %12985 = vmatprep.subr.mxu1 %v18665_v1  ;;  %v8257_v59 = vmul.f32 %v14186_v38, %v17996_v11 }
0x3265   :  { %12978 = vmatmul.mubr.msk.f32.vlgmr.msra.gmra.mrb[56].mxu1 %vm6257_vm1, %v8259_v54 }
0x3266   :  { %12973 = vmatmul.mubr.msk.f32.vlgmr.msra.gmra.mrb[70].mxu0 %vm6257_vm1, %v8257_v59  ;;  %12986 = vmatpush3.msra.mxu1 %v8730_v51 }
0x3267   :  { %v14188_v21 = vpop.eup %14187  ;;  %12981 = vmatpush3.msra.mxu0 %v8653_v56  ;;  %12982 = vmatprep.mubr.msk.f32.mxu0 %vm14690_vm0, %v18665_v1 }
0x3268   :  { %12990 = vmatprep.subr.mxu0 %v18665_v1  ;;  %v8261_v31 = vmul.f32 %v14188_v21, %v18002_v2  ;;  %12987 = vmatprep.mubr.msk.f32.mxu1 %vm14690_vm0, %v18665_v1  ;;  %v9039_v2 = vpop.permute.xlu0 %9038 }
0x3269   :  { %12995 = vmatprep.subr.mxu1 %v18665_v1 }
0x326a   :  { %12983 = vmatmul.mubr.msk.f32.vlgmr.msra.gmra.mrb[72].mxu0 %vm6257_vm1, %v8261_v31 }
0x326b   :  { %v14190_v28 = vpop.eup %14189  ;;  %12991 = vmatpush3.msra.mxu0 %v8807_v25  ;;  %12992 = vmatprep.mubr.msk.f32.mxu0 %vm14690_vm0, %v18665_v1 }
0x326c   :  { %v8265_v11 = vmul.f32 %v14190_v28, %v18006_v45  ;;  %13000 = vmatprep.subr.mxu0 %v18665_v1  ;;  %v9197_v45 = vpop.permute.xlu0 %9196 }
0x326e   :  { %12993 = vmatmul.mubr.msk.f32.vlgmr.msra.gmra.mrb[74].mxu0 %vm6257_vm1, %v8265_v11 }
0x326f   :  { %13002 = vmatprep.mubr.msk.f32.mxu0 %vm14690_vm0, %v18665_v1 }
0x3270   :  { %v9195_v27 = vpop.permute.xlu0 %9194 }
0x3272   :  { %13001 = vmatpush3.xpose.msk.msra.mxu0 %vm6257_vm1, %v8963_v6 }
0x3273   :  { %13010 = vmatprep.subr.mxu0 %v18665_v1 }
0x3274   :  { %v9353_v6 = vpop.permute.xlu0 %9352 }
0x3275   :  { %13003 = vmatmul.mubr.msk.f32.vlgmr.msra.gmra.mrb[76].mxu0 %vm6257_vm1, %v8961_v39 }
0x3276   :  { %13011 = vmatpush3.xpose.msk.msra.mxu0 %vm6257_vm1, %v9119_v61  ;;  %13012 = vmatprep.mubr.msk.f32.mxu0 %vm14690_vm0, %v18665_v1 }
0x3277   :  { %13020 = vmatprep.subr.mxu0 %v18665_v1 }
0x3278   :  { %v9351_v9 = vpop.permute.xlu0 %9350 }
0x328c   :  { %v8246_v56 = vpop.xlane.xlu1 %8245 }
0x328d   :  { %14191 = vrcp.f32 %v8246_v56 }
0x3290   :  { %v9117_v25 = vpop.permute.xlu1 %9116 }
0x3291   :  { %13013 = vmatmul.mubr.msk.f32.vlgmr.msra.gmra.mrb[78].mxu0 %vm6257_vm1, %v9117_v25 }
0x3292   :  { %13022 = vmatprep.mubr.msk.f32.mxu0 %vm14690_vm0, %v18665_v1 }
0x3294   :  { %v9275_v51 = vpop.permute.xlu1 %9274 }
0x3295   :  { %13021 = vmatpush3.xpose.msk.msra.mxu0 %vm6257_vm1, %v9275_v51 }
0x3296   :  { %13030 = vmatprep.subr.mxu0 %v18665_v1 }
0x3297   :  { %v14192_v39 = vpop.eup %14191 }
0x3298   :  { %v9273_v61 = vpop.permute.xlu1 %9272  ;;  %v8263_v34 = vmul.f32 %v14192_v39, %v18021_v26 }
0x3299   :  { %13023 = vmatmul.mubr.msk.f32.vlgmr.msra.gmra.mrb[80].mxu0 %vm6257_vm1, %v9273_v61 }
0x329a   :  { %12988 = vmatmul.mubr.msk.f32.vlgmr.msra.gmra.mrb[58].mxu1 %vm6257_vm1, %v8263_v34  ;;  %13032 = vmatprep.mubr.msk.f32.mxu0 %vm14690_vm0, %v18665_v1 }
0x329b   :  { %12996 = vmatpush3.xpose.msk.msra.mxu1 %vm6257_vm1, %v18059_v58  ;;  %12997 = vmatprep.mubr.msk.f32.mxu1 %vm14690_vm0, %v18665_v1  ;;  %v9679_v58 = vpop.permute.xlu0 %9678 }
0x329c   :  { %v9431_v60 = vpop.permute.xlu1 %9430  ;;  %13005 = vmatprep.subr.mxu1 %v18665_v1 }
0x329d   :  { %13031 = vmatpush3.xpose.msk.msra.mxu0 %vm6257_vm1, %v9431_v60 }
0x329e   :  { %12998 = vmatmul.mubr.msk.f32.vlgmr.msra.gmra.mrb[60].mxu1 %vm6257_vm1, %v18061_v7  ;;  %13040 = vmatprep.subr.mxu0 %v18665_v1 }
0x329f   :  { %13006 = vmatpush3.xpose.msk.msra.mxu1 %vm6257_vm1, %v18063_v33  ;;  %13007 = vmatprep.mubr.msk.f32.mxu1 %vm14690_vm0, %v18665_v1 }
0x32a0   :  { %v9429_v26 = vpop.permute.xlu1 %9428  ;;  %13015 = vmatprep.subr.mxu1 %v18665_v1 }
0x32a1   :  { %13033 = vmatmul.mubr.msk.f32.vlgmr.msra.gmra.mrb[82].mxu0 %vm6257_vm1, %v9429_v26 }
0x32a2   :  { %13041 = vmatpush3.msra.mxu0 %v9679_v58  ;;  %13008 = vmatmul.mubr.msk.f32.vlgmr.msra.gmra.mrb[62].mxu1 %vm6257_vm1, %v9039_v2 }
0x32a3   :  { %13016 = vmatpush3.xpose.msk.msra.mxu1 %vm6257_vm1, %v9197_v45  ;;  %13017 = vmatprep.mubr.msk.f32.mxu1 %vm14690_vm0, %v18665_v1 }
0x32a4   :  { %13025 = vmatprep.subr.mxu1 %v18665_v1  ;;  %13042 = vmatprep.mubr.msk.f32.mxu0 %vm14690_vm0, %v18665_v1  ;;  %v9603_v7 = vpop.permute.xlu1 %9602 }
0x32a5   :  { %13050 = vmatprep.subr.mxu0 %v18665_v1 }
0x32a6   :  { %13018 = vmatmul.mubr.msk.f32.vlgmr.msra.gmra.mrb[64].mxu1 %vm6257_vm1, %v9195_v27 }
0x32a7   :  { %13026 = vmatpush3.xpose.msk.msra.mxu1 %vm6257_vm1, %v9353_v6  ;;  %13027 = vmatprep.mubr.msk.f32.mxu1 %vm14690_vm0, %v18665_v1 }
0x32a8   :  { %13035 = vmatprep.subr.mxu1 %v18665_v1 }
0x32aa   :  { %13028 = vmatmul.mubr.msk.f32.vlgmr.msra.gmra.mrb[66].mxu1 %vm6257_vm1, %v9351_v9 }
0x32ab   :  { %13036 = vmatpush3.msra.mxu1 %v9603_v7  ;;  %13037 = vmatprep.mubr.msk.f32.mxu1 %vm14690_vm0, %v18665_v1 }
0x32ac   :  { %13045 = vmatprep.subr.mxu1 %v18665_v1 }
0x332f   :  { %v18148_v33 = vpop.f32.mrb[52].mxu1 }
0x3330   :  { %v12959_v18 = vpop.f32.mrb[53].mxu1 }
0x3333   :  { %v18150_v44 = vpop.f32.mrb[54].mxu1 }
0x3334   :  { %v18152_v5 = vpop.f32.mrb[68].mxu0  ;;  %v12969_v53 = vpop.f32.mrb[55].mxu1 }
0x3335   :  { %v12964_v46 = vpop.f32.mrb[69].mxu0 }
0x3338   :  { %v18154_v42 = vpop.f32.mrb[56].mxu1 }
0x3339   :  { %v18156_v55 = vpop.f32.mrb[70].mxu0  ;;  %v12979_v32 = vpop.f32.mrb[57].mxu1 }
0x333a   :  { %v12974_v12 = vpop.f32.mrb[71].mxu0 }
0x333d   :  { %v18158_v37 = vpop.f32.mrb[72].mxu0 }
0x333e   :  { %v12984_v30 = vpop.f32.mrb[73].mxu0 }
0x3341   :  { %v18160_v38 = vpop.f32.mrb[74].mxu0 }
0x3342   :  { %v12994_v54 = vpop.f32.mrb[75].mxu0 }
0x3348   :  { %v9034_v59 = vpop.f32.mrb[76].mxu0 }
0x3349   :  { %v9507_v21 = vmul.f32 0.35355338, %v9034_v59  ;;  %v13004_v31 = vpop.f32.mrb[77].mxu0 }
0x334b   :  { %v9517_v28 = vsel %vm6257_vm1, %v9507_v21, -inf }
0x334c   :  { %9518 = vmax.xlane.f32.xlu1 %v9517_v28 }
0x3364   :  { %v9190_v11 = vpop.f32.mrb[78].mxu0 }
0x3365   :  { %v13014_v2 = vpop.f32.mrb[79].mxu0  ;;  %v9509_v7 = vmul.f32 0.35355338, %v9190_v11 }
0x3367   :  { %v9523_v54 = vsel %vm6257_vm1, %v9509_v7, -inf }
0x336c   :  { %v9346_v45 = vpop.f32.mrb[80].mxu0 }
0x336d   :  { %v18163_v56 = vpop.f32.mrb[58].mxu1  ;;  %v13024_v27 = vpop.f32.mrb[81].mxu0  ;;  %v9511_v12 = vmul.f32 0.35355338, %v9346_v45 }
0x336e   :  { %v12989_v25 = vpop.f32.mrb[59].mxu1 }
0x336f   :  { %v9529_v27 = vsel %vm6257_vm1, %v9511_v12, -inf  ;;  %v18182_v25 = vpop.permute.xlu1 %9754 }
0x3371   :  { %v8956_v51 = vpop.f32.mrb[60].mxu1 }
0x3372   :  { %v9506_v6 = vmul.f32 0.35355338, %v8956_v51  ;;  %v12999_v39 = vpop.f32.mrb[61].mxu1 }
0x3373   :  { %v18184_v51 = vpop.permute.xlu1 %9830 }
0x3374   :  { %v9502_v61 = vpop.f32.mrb[82].mxu0  ;;  %v9514_v34 = vsel %vm6257_vm1, %v9506_v6, -inf }
0x3375   :  { %9515 = vmax.xlane.f32.xlu0 %v9514_v34  ;;  %v9112_v9 = vpop.f32.mrb[62].mxu1  ;;  %v13034_v60 = vpop.f32.mrb[83].mxu0  ;;  %v18171_v2 = vmul.f32 0.35355338, %v9502_v61 }
0x3376   :  { %v9508_v26 = vmul.f32 0.35355338, %v9112_v9  ;;  %v13009_v58 = vpop.f32.mrb[63].mxu1 }
0x3377   :  { %v9535_v45 = vsel %vm6257_vm1, %v18171_v2, -inf  ;;  %v18186_v39 = vpop.permute.xlu1 %9982 }
0x3378   :  { %v9520_v18 = vsel %vm6257_vm1, %v9508_v26, -inf }
0x3379   :  { %9521 = vmax.xlane.f32.xlu0 %v9520_v18  ;;  %v9268_v53 = vpop.f32.mrb[64].mxu1 }
0x337a   :  { %v9510_v46 = vmul.f32 0.35355338, %v9268_v53  ;;  %v13019_v32 = vpop.f32.mrb[65].mxu1  ;;  %v18198_v53 = vpop.permute.xlu0 %9906 }
0x337b   :  { %v18188_v61 = vpop.permute.xlu1 %10134 }
0x337c   :  { %v9526_v30 = vsel %vm6257_vm1, %v9510_v46, -inf }
0x337d   :  { %v9424_v59 = vpop.f32.mrb[66].mxu1  ;;  %9527 = vmax.xlane.f32.xlu1 %v9526_v30  ;;  %9524 = vmax.xlane.f32.xlu0 %v9523_v54 }
0x337e   :  { %v18169_v31 = vmul.f32 0.35355338, %v9424_v59  ;;  %v13029_v28 = vpop.f32.mrb[67].mxu1  ;;  %v18200_v32 = vpop.permute.xlu0 %10058 }
0x337f   :  { %v18190_v34 = vpop.permute.xlu1 %10290 }
0x3380   :  { %v9532_v11 = vsel %vm6257_vm1, %v18169_v31, -inf }
0x3381   :  { %9533 = vmax.xlane.f32.xlu1 %v9532_v11  ;;  %9530 = vmax.xlane.f32.xlu0 %v9529_v27 }
0x3382   :  { %v18202_v30 = vpop.permute.xlu0 %10212 }
0x3383   :  { %v18192_v9 = vpop.permute.xlu1 %10288 }
0x3385   :  { %9536 = vmax.xlane.f32.xlu0 %v9535_v45 }
0x3386   :  { %v18204_v54 = vpop.permute.xlu0 %10210 }
0x3392   :  { %10446 = vrot.lane.b32.xlu1 %v17668_v4, %s14696_s20 }
0x339b   :  { %10368 = vrot.lane.b32.xlu0 %v17671_v52, %s14696_s20 }
0x33d9   :  { %v9519_v60 = vpop.xlane.xlu1 %9518 }
0x33da   :  { %v9539_v58 = vsub.f32 %v9507_v21, %v9519_v60 }
0x33dc   :  { %v9548_v18 = vmul.f32 1.442695, %v9539_v58 }
0x33de   :  { %14193 = vpow2.f32 %v9548_v18 }
0x33e8   :  { %v18194_v4 = vpop.eup %14193 }
0x33e9   :  { %v9565_v52 = vsel %vm6257_vm1, %v18194_v4, 0.0 }
0x33ea   :  { %9566 = vadd.xlane.f32.xlu0 %v9565_v52 }
0x3402   :  { %v9516_v59 = vpop.xlane.xlu0 %9515 }
0x3403   :  { %v9538_v28 = vsub.f32 %v9506_v6, %v9516_v59 }
0x3405   :  { %v9546_v11 = vmul.f32 1.442695, %v9538_v28 }
0x3406   :  { %v9522_v21 = vpop.xlane.xlu0 %9521 }
0x3407   :  { %14195 = vpow2.f32 %v9546_v11  ;;  %v9540_v27 = vsub.f32 %v9508_v26, %v9522_v21 }
0x3409   :  { %v9550_v45 = vmul.f32 1.442695, %v9540_v27 }
0x340a   :  { %v9528_v60 = vpop.xlane.xlu1 %9527  ;;  %v9525_v58 = vpop.xlane.xlu0 %9524 }
0x340b   :  { %14197 = vpow2.f32 %v9550_v45  ;;  %v9542_v18 = vsub.f32 %v9510_v46, %v9528_v60  ;;  %v9541_v52 = vsub.f32 %v9509_v7, %v9525_v58 }
0x340d   :  { %v9554_v0 = vmul.f32 1.442695, %v9542_v18  ;;  %v9552_v1 = vmul.f32 1.442695, %v9541_v52 }
0x340e   :  { %v9531_v17 = vpop.xlane.xlu0 %9530 }
0x340f   :  { %14199 = vpow2.f32 %v9554_v0  ;;  %v9543_v48 = vsub.f32 %v9511_v12, %v9531_v17 }
0x3410   :  { %14201 = vpow2.f32 %v9552_v1 }
0x3411   :  { %v14196_v15 = vpop.eup %14195  ;;  %v9556_v63 = vmul.f32 1.442695, %v9543_v48  ;;  %v9534_v48 = vpop.xlane.xlu1 %9533 }
0x3412   :  { %v9562_v6 = vsel %vm6257_vm1, %v14196_v15, 0.0  ;;  %v9544_v17 = vsub.f32 %v18169_v31, %v9534_v48  ;;  %v9537_v12 = vpop.xlane.xlu0 %9536 }
0x3413   :  { %9563 = vadd.xlane.f32.xlu1 %v9562_v6  ;;  %14203 = vpow2.f32 %v9556_v63  ;;  %v9545_v21 = vsub.f32 %v18171_v2, %v9537_v12 }
0x3414   :  { %v9558_v11 = vmul.f32 1.442695, %v9544_v17 }
0x3415   :  { %v14198_v59 = vpop.eup %14197  ;;  %v9560_v27 = vmul.f32 1.442695, %v9545_v21 }
0x3416   :  { %v9568_v26 = vsel %vm6257_vm1, %v14198_v59, 0.0  ;;  %14205 = vpow2.f32 %v9558_v11  ;;  %v18246_v31 = vpop.permute.xlu0 %10368 }
0x3417   :  { %9569 = vadd.xlane.f32.xlu1 %v9568_v26  ;;  %14207 = vpow2.f32 %v9560_v27 }
0x3419   :  { %v18208_v28 = vpop.eup %14199 }
0x341a   :  { %v18210_v46 = vpop.eup %14201  ;;  %v9574_v7 = vsel %vm6257_vm1, %v18208_v28, 0.0 }
0x341b   :  { %9575 = vadd.xlane.f32.xlu1 %v9574_v7  ;;  %v9571_v0 = vsel %vm6257_vm1, %v18210_v46, 0.0 }
0x341c   :  { %9572 = vadd.xlane.f32.xlu0 %v9571_v0 }
0x341d   :  { %v18216_v1 = vpop.eup %14203 }
0x341e   :  { %v9577_v63 = vsel %vm6257_vm1, %v18216_v1, 0.0 }
0x3420   :  { %9578 = vadd.xlane.f32.xlu0 %v9577_v63  ;;  %v18226_v45 = vpop.eup %14205 }
0x3421   :  { %v9580_v60 = vsel %vm6257_vm1, %v18226_v45, 0.0 }
0x342c   :  { %10444 = vrot.lane.b32.xlu1 %v17683_v22, %s14696_s20  ;;  %v18230_v22 = vpop.eup %14207 }
0x3436   :  { %10366 = vrot.lane.b32.xlu0 %v17685_v23, %s14696_s20  ;;  %v9583_v23 = vsel %vm6257_vm1, %v18230_v22, 0.0 }
0x3450   :  { %9581 = vadd.xlane.f32.xlu1 %v9580_v60 }
0x3455   :  { %9584 = vadd.xlane.f32.xlu0 %v9583_v23 }
0x3461   :  { %10602 = vrot.lane.b32.xlu1 %v17687_v62, %s14696_s20 }
0x3465   :  { %10600 = vrot.lane.b32.xlu1 %v17703_v3, %s14696_s20 }
0x3469   :  { %10758 = vrot.lane.b32.xlu1 %v17707_v41, %s14696_s20 }
0x346b   :  { %10524 = vrot.lane.b32.xlu0 %v17692_v29, %s14696_s20  ;;  %v18681_v29 = vmov 0.0  }
0x346d   :  { %10756 = vrot.lane.b32.xlu1 %v17725_v36, %s14696_s20 }
0x346f   :  { %10522 = vrot.lane.b32.xlu0 %v17705_v24, %s14696_s20  ;;  %v18258_v24 = vpop.permute.xlu1 %10446 }
0x3473   :  { %10680 = vrot.lane.b32.xlu0 %v17713_v16, %s14696_s20 }
0x3477   :  { %v9567_v62 = vpop.xlane.xlu0 %9566  ;;  %10678 = vrot.lane.b32.xlu0 %v17727_v47, %s14696_s20 }
0x3478   :  { %14209 = vrcp.f32 %v9567_v62 }
0x3482   :  { %v14210_v3 = vpop.eup %14209 }
0x3483   :  { %v9589_v41 = vmul.f32 %v14210_v3, %v18194_v4 }
0x3485   :  { %13043 = vmatmul.mubr.msk.f32.vlgmr.msra.gmra.mrb[84].mxu0 %vm6257_vm1, %v9589_v41 }
0x3486   :  { %13051 = vmatpush3.msra.mxu0 %v18184_v51  ;;  %13052 = vmatprep.mubr.msk.f32.mxu0 %vm14690_vm0, %v18681_v29 }
0x3487   :  { %13060 = vmatprep.subr.mxu0 %v18681_v29 }
0x34a0   :  { %v9564_v16 = vpop.xlane.xlu1 %9563 }
0x34a1   :  { %14211 = vrcp.f32 %v9564_v16 }
0x34a4   :  { %v9570_v36 = vpop.xlane.xlu1 %9569 }
0x34a5   :  { %14213 = vrcp.f32 %v9570_v36 }
0x34a8   :  { %v9576_v47 = vpop.xlane.xlu1 %9575 }
0x34a9   :  { %14215 = vrcp.f32 %v9576_v47  ;;  %v9573_v2 = vpop.xlane.xlu0 %9572 }
0x34aa   :  { %14217 = vrcp.f32 %v9573_v2 }
0x34ab   :  { %v14212_v4 = vpop.eup %14211 }
0x34ac   :  { %v9587_v58 = vmul.f32 %v14212_v4, %v14196_v15 }
0x34ad   :  { %v9579_v18 = vpop.xlane.xlu0 %9578 }
0x34ae   :  { %14219 = vrcp.f32 %v9579_v18  ;;  %13038 = vmatmul.mubr.msk.f32.vlgmr.msra.gmra.mrb[68].mxu1 %vm6257_vm1, %v9587_v58 }
0x34af   :  { %v14214_v51 = vpop.eup %14213  ;;  %13046 = vmatpush3.msra.mxu1 %v18182_v25  ;;  %13047 = vmatprep.mubr.msk.f32.mxu1 %vm14690_vm0, %v18681_v29 }
0x34b0   :  { %v9591_v52 = vmul.f32 %v14214_v51, %v14198_v59  ;;  %13055 = vmatprep.subr.mxu1 %v18681_v29 }
0x34b2   :  { %13048 = vmatmul.mubr.msk.f32.vlgmr.msra.gmra.mrb[70].mxu1 %vm6257_vm1, %v9591_v52 }
0x34b3   :  { %v14216_v6 = vpop.eup %14215  ;;  %13056 = vmatpush3.msra.mxu1 %v18198_v53  ;;  %13057 = vmatprep.mubr.msk.f32.mxu1 %vm14690_vm0, %v18681_v29 }
0x34b4   :  { %v14218_v15 = vpop.eup %14217  ;;  %v9595_v26 = vmul.f32 %v14216_v6, %v18208_v28  ;;  %13065 = vmatprep.subr.mxu1 %v18681_v29  ;;  %v10367_v28 = vpop.permute.xlu0 %10366 }
0x34b5   :  { %v9593_v25 = vmul.f32 %v14218_v15, %v18210_v46 }
0x34b6   :  { %13058 = vmatmul.mubr.msk.f32.vlgmr.msra.gmra.mrb[72].mxu1 %vm6257_vm1, %v9595_v26 }
0x34b7   :  { %13053 = vmatmul.mubr.msk.f32.vlgmr.msra.gmra.mrb[86].mxu0 %vm6257_vm1, %v9593_v25  ;;  %13066 = vmatpush3.msra.mxu1 %v18200_v32 }
0x34b8   :  { %v14220_v59 = vpop.eup %14219  ;;  %13061 = vmatpush3.msra.mxu0 %v18186_v39  ;;  %13062 = vmatprep.mubr.msk.f32.mxu0 %vm14690_vm0, %v18681_v29  ;;  %v10445_v39 = vpop.permute.xlu1 %10444 }
0x34b9   :  { %v9597_v53 = vmul.f32 %v14220_v59, %v18216_v1  ;;  %13070 = vmatprep.subr.mxu0 %v18681_v29  ;;  %13067 = vmatprep.mubr.msk.f32.mxu1 %vm14690_vm0, %v18681_v29 }
0x34ba   :  { %13075 = vmatprep.subr.mxu1 %v18681_v29 }
0x34bb   :  { %13063 = vmatmul.mubr.msk.f32.vlgmr.msra.gmra.mrb[88].mxu0 %vm6257_vm1, %v9597_v53 }
0x34bc   :  { %13071 = vmatpush3.msra.mxu0 %v18188_v61  ;;  %13072 = vmatprep.mubr.msk.f32.mxu0 %vm14690_vm0, %v18681_v29 }
0x34bd   :  { %13080 = vmatprep.subr.mxu0 %v18681_v29 }
0x34dd   :  { %v9582_v32 = vpop.xlane.xlu1 %9581 }
0x34de   :  { %14221 = vrcp.f32 %v9582_v32 }
0x34e1   :  { %v10603_v63 = vpop.permute.xlu1 %10602 }
0x34e2   :  { %v9585_v46 = vpop.xlane.xlu0 %9584 }
0x34e3   :  { %14223 = vrcp.f32 %v9585_v46 }
0x34e6   :  { %v10525_v0 = vpop.permute.xlu0 %10524 }
0x34e8   :  { %v14222_v7 = vpop.eup %14221 }
0x34e9   :  { %v9599_v1 = vmul.f32 %v14222_v7, %v18226_v45 }
0x34ea   :  { %v10523_v17 = vpop.permute.xlu0 %10522 }
0x34eb   :  { %13068 = vmatmul.mubr.msk.f32.vlgmr.msra.gmra.mrb[74].mxu1 %vm6257_vm1, %v9599_v1 }
0x34ec   :  { %13076 = vmatpush3.xpose.msk.msra.mxu1 %vm6257_vm1, %v18202_v30  ;;  %13077 = vmatprep.mubr.msk.f32.mxu1 %vm14690_vm0, %v18681_v29  ;;  %v10601_v30 = vpop.permute.xlu1 %10600 }
0x34ed   :  { %v14224_v61 = vpop.eup %14223  ;;  %13085 = vmatprep.subr.mxu1 %v18681_v29 }
0x34ee   :  { %v9601_v48 = vmul.f32 %v14224_v61, %v18230_v22 }
0x34ef   :  { %13078 = vmatmul.mubr.msk.f32.vlgmr.msra.gmra.mrb[76].mxu1 %vm6257_vm1, %v18204_v54  ;;  %v10681_v54 = vpop.permute.xlu0 %10680 }
0x34f0   :  { %13073 = vmatmul.mubr.msk.f32.vlgmr.msra.gmra.mrb[90].mxu0 %vm6257_vm1, %v9601_v48  ;;  %13086 = vmatpush3.xpose.msk.msra.mxu1 %vm6257_vm1, %v18246_v31 }
0x34f1   :  { %13081 = vmatpush3.xpose.msk.msra.mxu0 %vm6257_vm1, %v18190_v34  ;;  %13082 = vmatprep.mubr.msk.f32.mxu0 %vm14690_vm0, %v18681_v29  ;;  %v10759_v34 = vpop.permute.xlu1 %10758 }
0x34f2   :  { %13087 = vmatprep.mubr.msk.f32.mxu1 %vm14690_vm0, %v18681_v29  ;;  %13090 = vmatprep.subr.mxu0 %v18681_v29 }
0x34f3   :  { %13095 = vmatprep.subr.mxu1 %v18681_v29  ;;  %13088 = vmatmul.mubr.msk.f32.vlgmr.msra.gmra.mrb[78].mxu1 %vm6257_vm1, %v10367_v28 }
0x34f4   :  { %13083 = vmatmul.mubr.msk.f32.vlgmr.msra.gmra.mrb[92].mxu0 %vm6257_vm1, %v18192_v9  ;;  %13096 = vmatpush3.xpose.msk.msra.mxu1 %vm6257_vm1, %v10525_v0  ;;  %v10679_v9 = vpop.permute.xlu0 %10678 }
0x34f5   :  { %13091 = vmatpush3.xpose.msk.msra.mxu0 %vm6257_vm1, %v18258_v24  ;;  %13092 = vmatprep.mubr.msk.f32.mxu0 %vm14690_vm0, %v18681_v29  ;;  %v10757_v12 = vpop.permute.xlu1 %10756 }
0x34f6   :  { %13097 = vmatprep.mubr.msk.f32.mxu1 %vm14690_vm0, %v18681_v29  ;;  %13100 = vmatprep.subr.mxu0 %v18681_v29 }
0x34f7   :  { %13105 = vmatprep.subr.mxu1 %v18681_v29  ;;  %13098 = vmatmul.mubr.msk.f32.vlgmr.msra.gmra.mrb[80].mxu1 %vm6257_vm1, %v10523_v17 }
0x34f8   :  { %13093 = vmatmul.mubr.msk.f32.vlgmr.msra.gmra.mrb[94].mxu0 %vm6257_vm1, %v10445_v39  ;;  %13106 = vmatpush3.xpose.msk.msra.mxu1 %vm6257_vm1, %v10681_v54 }
0x34f9   :  { %13101 = vmatpush3.xpose.msk.msra.mxu0 %vm6257_vm1, %v10603_v63  ;;  %13102 = vmatprep.mubr.msk.f32.mxu0 %vm14690_vm0, %v18681_v29 }
0x34fa   :  { %13107 = vmatprep.mubr.msk.f32.mxu1 %vm14690_vm0, %v18681_v29  ;;  %13110 = vmatprep.subr.mxu0 %v18681_v29 }
0x34fb   :  { %13108 = vmatmul.mubr.msk.f32.vlgmr.msra.gmra.mrb[82].mxu1 %vm6257_vm1, %v10679_v9  ;;  %13115 = vmatprep.subr.mxu1 %v18681_v29 }
0x34fc   :  { %13103 = vmatmul.mubr.msk.f32.vlgmr.msra.gmra.mrb[96].mxu0 %vm6257_vm1, %v10601_v30  ;;  %13117 = vmatprep.mubr.msk.f32.mxu1 %vm14690_vm0, %v18681_v29 }
0x34fd   :  { %13111 = vmatpush3.xpose.msk.msra.mxu0 %vm6257_vm1, %v10759_v34  ;;  %13112 = vmatprep.mubr.msk.f32.mxu0 %vm14690_vm0, %v18681_v29 }
0x34fe   :  { %13120 = vmatprep.subr.mxu0 %v18681_v29 }
0x3500   :  { %13113 = vmatmul.mubr.msk.f32.vlgmr.msra.gmra.mrb[98].mxu0 %vm6257_vm1, %v10757_v12 }
0x3501   :  { %13122 = vmatprep.mubr.msk.f32.mxu0 %vm14690_vm0, %v18681_v29 }
0x3558   :  { %v18342_v11 = vpop.f32.mrb[84].mxu0 }
0x3559   :  { %v13044_v21 = vpop.f32.mrb[85].mxu0 }
0x3581   :  { %v18344_v27 = vpop.f32.mrb[68].mxu1 }
0x3582   :  { %v13039_v45 = vpop.f32.mrb[69].mxu1 }
0x3585   :  { %v18346_v60 = vpop.f32.mrb[70].mxu1 }
0x3586   :  { %v13049_v22 = vpop.f32.mrb[71].mxu1 }
0x3589   :  { %v18348_v23 = vpop.f32.mrb[72].mxu1 }
0x358a   :  { %v18350_v31 = vpop.f32.mrb[86].mxu0  ;;  %v13059_v62 = vpop.f32.mrb[73].mxu1 }
0x358b   :  { %v13054_v3 = vpop.f32.mrb[87].mxu0 }
0x358e   :  { %v18352_v41 = vpop.f32.mrb[88].mxu0 }
0x358f   :  { %v13064_v24 = vpop.f32.mrb[89].mxu0 }
0x35be   :  { %v18354_v16 = vpop.f32.mrb[74].mxu1 }
0x35bf   :  { %v13069_v36 = vpop.f32.mrb[75].mxu1 }
0x35c2   :  { %v10284_v47 = vpop.f32.mrb[76].mxu1 }
0x35c3   :  { %v18356_v2 = vpop.f32.mrb[90].mxu0  ;;  %v10834_v4 = vmul.f32 0.35355338, %v10284_v47  ;;  %v13079_v58 = vpop.f32.mrb[77].mxu1 }
0x35c4   :  { %v13074_v18 = vpop.f32.mrb[91].mxu0 }
0x35c5   :  { %v10842_v51 = vsel %vm6257_vm1, %v10834_v4, -inf }
0x35c6   :  { %10843 = vmax.xlane.f32.xlu0 %v10842_v51  ;;  %v10440_v52 = vpop.f32.mrb[78].mxu1 }
0x35c7   :  { %v10362_v6 = vpop.f32.mrb[92].mxu0  ;;  %v10836_v15 = vmul.f32 0.35355338, %v10440_v52  ;;  %v13089_v26 = vpop.f32.mrb[79].mxu1 }
0x35c8   :  { %v10835_v25 = vmul.f32 0.35355338, %v10362_v6  ;;  %v13084_v59 = vpop.f32.mrb[93].mxu0 }
0x35c9   :  { %v10848_v53 = vsel %vm6257_vm1, %v10836_v15, -inf }
0x35ca   :  { %10849 = vmax.xlane.f32.xlu0 %v10848_v53  ;;  %v10596_v39 = vpop.f32.mrb[80].mxu1  ;;  %v10845_v32 = vsel %vm6257_vm1, %v10835_v25, -inf }
0x35cb   :  { %v10838_v28 = vmul.f32 0.35355338, %v10596_v39  ;;  %10846 = vmax.xlane.f32.xlu1 %v10845_v32  ;;  %v10518_v46 = vpop.f32.mrb[94].mxu0  ;;  %v13099_v7 = vpop.f32.mrb[81].mxu1 }
0x35cc   :  { %v10837_v0 = vmul.f32 0.35355338, %v10518_v46  ;;  %v13094_v1 = vpop.f32.mrb[95].mxu0 }
0x35cd   :  { %v10854_v61 = vsel %vm6257_vm1, %v10838_v28, -inf }
0x35ce   :  { %v10752_v63 = vpop.f32.mrb[82].mxu1  ;;  %v10851_v48 = vsel %vm6257_vm1, %v10837_v0, -inf }
0x35cf   :  { %v10840_v17 = vmul.f32 0.35355338, %v10752_v63  ;;  %10855 = vmax.xlane.f32.xlu1 %v10854_v61  ;;  %10852 = vmax.xlane.f32.xlu0 %v10851_v48  ;;  %v10674_v30 = vpop.f32.mrb[96].mxu0  ;;  %v13109_v54 = vpop.f32.mrb[83].mxu1 }
0x35d0   :  { %v10839_v34 = vmul.f32 0.35355338, %v10674_v30  ;;  %v13104_v9 = vpop.f32.mrb[97].mxu0 }
0x35d1   :  { %v10860_v12 = vsel %vm6257_vm1, %v10840_v17, -inf }
0x35d2   :  { %v10857_v21 = vsel %vm6257_vm1, %v10839_v34, -inf }
0x35d3   :  { %10861 = vmax.xlane.f32.xlu1 %v10860_v12  ;;  %10858 = vmax.xlane.f32.xlu0 %v10857_v21  ;;  %v10830_v45 = vpop.f32.mrb[98].mxu0 }
0x35d4   :  { %v10841_v22 = vmul.f32 0.35355338, %v10830_v45  ;;  %v13114_v62 = vpop.f32.mrb[99].mxu0 }
0x35d6   :  { %v10863_v3 = vsel %vm6257_vm1, %v10841_v22, -inf }
0x35d7   :  { %10864 = vmax.xlane.f32.xlu0 %v10863_v3 }
0x35e4   :  { %10930 = vrot.lane.b32.xlu1 %v17735_v35, %s14696_s20 }
0x35e8   :  { %11082 = vrot.lane.b32.xlu1 %v17750_v49, %s14696_s20 }
0x35ec   :  { %11158 = vrot.lane.b32.xlu1 %v17745_v57, %s14696_s20 }
0x35ed   :  { %11006 = vrot.lane.b32.xlu0 %v17729_v20, %s14696_s20 }
0x35f0   :  { %11310 = vrot.lane.b32.xlu1 %v17755_v13, %s14696_s20 }
0x35f1   :  { %11234 = vrot.lane.b32.xlu0 %v17757_v43, %s14696_s20 }
0x3653   :  { %v10844_v24 = vpop.xlane.xlu0 %10843 }
0x3654   :  { %v10866_v36 = vsub.f32 %v10834_v4, %v10844_v24 }
0x3656   :  { %v10874_v47 = vmul.f32 1.442695, %v10866_v36 }
0x3657   :  { %v10850_v58 = vpop.xlane.xlu0 %10849 }
0x3658   :  { %14225 = vpow2.f32 %v10874_v47  ;;  %v10868_v35 = vsub.f32 %v10836_v15, %v10850_v58  ;;  %v10847_v18 = vpop.xlane.xlu1 %10846 }
0x3659   :  { %v10867_v49 = vsub.f32 %v10835_v25, %v10847_v18 }
0x365a   :  { %v10878_v51 = vmul.f32 1.442695, %v10868_v35 }
0x365b   :  { %v10876_v52 = vmul.f32 1.442695, %v10867_v49 }
0x365c   :  { %14227 = vpow2.f32 %v10878_v51  ;;  %v10856_v57 = vpop.xlane.xlu1 %10855  ;;  %v10853_v6 = vpop.xlane.xlu0 %10852 }
0x365d   :  { %14229 = vpow2.f32 %v10876_v52  ;;  %v10870_v20 = vsub.f32 %v10838_v28, %v10856_v57  ;;  %v10869_v26 = vsub.f32 %v10837_v0, %v10853_v6 }
0x365f   :  { %v10882_v13 = vmul.f32 1.442695, %v10870_v20  ;;  %v10880_v59 = vmul.f32 1.442695, %v10869_v26 }
0x3660   :  { %v10862_v53 = vpop.xlane.xlu1 %10861  ;;  %v10859_v43 = vpop.xlane.xlu0 %10858 }
0x3661   :  { %14231 = vpow2.f32 %v10882_v13  ;;  %v10872_v4 = vsub.f32 %v10840_v17, %v10862_v53  ;;  %v10871_v39 = vsub.f32 %v10839_v34, %v10859_v43  ;;  %v18682_v13 = vmov 0.0|0.0   ;;  %v11660_v53 = vld [vmem:[#allocation25 + $0x8] sm:$0xff] }
0x3662   :  { %v18378_v32 = vpop.eup %14225  ;;  %14233 = vpow2.f32 %v10880_v59  ;;  %v11659_v59 = vld [vmem:[#allocation25] sm:$0xff] }
0x3663   :  { %v10886_v15 = vmul.f32 1.442695, %v10872_v4  ;;  %v10884_v25 = vmul.f32 1.442695, %v10871_v39  ;;  %v10890_v46 = vsel %vm6257_vm1, %v18378_v32, 0.0  ;;  %v13318_v43 = vpack.c.bf16 %v11660_v53, %v11659_v59  ;;  %v11661_v4 = vld [vmem:[#allocation25 + $0x10] sm:$0xff] }
0x3664   :  { %v10931_v7 = vpop.permute.xlu1 %10930  ;;  %v10865_v1 = vpop.xlane.xlu0 %10864  ;;  %10891 = vadd.xlane.f32.xlu1 %v10890_v46  ;;  %v11662_v39 = vld [vmem:[#allocation25 + $0x18] sm:$0xff] }
0x3665   :  { %14235 = vpow2.f32 %v10886_v15  ;;  %v10873_v28 = vsub.f32 %v10841_v22, %v10865_v1  ;;  %13116 = vmatpush3.msra.mxu1 %v10931_v7 }
0x3666   :  { %v18382_v0 = vpop.eup %14227  ;;  %14237 = vpow2.f32 %v10884_v25  ;;  %13125 = vmatprep.subr.mxu1 %v18681_v29 }
0x3667   :  { %v18385_v61 = vpop.eup %14229  ;;  %v10888_v63 = vmul.f32 1.442695, %v10873_v28  ;;  %v10896_v48 = vsel %vm6257_vm1, %v18382_v0, 0.0 }
0x3668   :  { %v11007_v17 = vpop.permute.xlu0 %11006  ;;  %10897 = vadd.xlane.f32.xlu1 %v10896_v48  ;;  %v10893_v30 = vsel %vm6257_vm1, %v18385_v61, 0.0 }
0x3669   :  { %14239 = vpow2.f32 %v10888_v63  ;;  %10894 = vadd.xlane.f32.xlu0 %v10893_v30  ;;  %13121 = vmatpush3.msra.mxu0 %v11007_v17 }
0x366a   :  { %13130 = vmatprep.subr.mxu0 %v18681_v29 }
0x366b   :  { %v18392_v54 = vpop.eup %14231 }
0x366c   :  { %v18394_v34 = vpop.eup %14233  ;;  %v10902_v9 = vsel %vm6257_vm1, %v18392_v54, 0.0 }
0x366d   :  { %10903 = vadd.xlane.f32.xlu1 %v10902_v9  ;;  %v10899_v12 = vsel %vm6257_vm1, %v18394_v34, 0.0 }
0x366e   :  { %10900 = vadd.xlane.f32.xlu0 %v10899_v12 }
0x366f   :  { %v18400_v21 = vpop.eup %14235 }
0x3670   :  { %v18402_v45 = vpop.eup %14237  ;;  %v10908_v22 = vsel %vm6257_vm1, %v18400_v21, 0.0 }
0x3671   :  { %10909 = vadd.xlane.f32.xlu1 %v10908_v22  ;;  %v10905_v62 = vsel %vm6257_vm1, %v18402_v45, 0.0 }
0x3672   :  { %10906 = vadd.xlane.f32.xlu0 %v10905_v62 }
0x3673   :  { %v18408_v3 = vpop.eup %14239 }
0x3674   :  { %v10911_v24 = vsel %vm6257_vm1, %v18408_v3, 0.0 }
0x3676   :  { %10912 = vadd.xlane.f32.xlu0 %v10911_v24 }
0x3682   :  { %11462 = vrot.lane.b32.xlu1 %v17759_v19, %s14696_s20  ;;  %v11083_v19 = vpop.permute.xlu1 %11082 }
0x3686   :  { %11548 = vrot.lane.b32.xlu1 %v18152_v5, %s14674_s29  ;;  %v11235_v5 = vpop.permute.xlu0 %11234 }
0x368a   :  { %11580 = vrot.lane.b32.xlu1 %v18342_v11, %s14697_s21 }
0x368c   :  { %11386 = vrot.lane.b32.xlu0 %v17761_v50, %s14696_s20  ;;  %v11159_v50 = vpop.permute.xlu1 %11158 }
0x368e   :  { %11552 = vrot.lane.b32.xlu1 %v18156_v55, %s14674_s29 }
0x3690   :  { %11546 = vrot.lane.b32.xlu0 %v18148_v33, %s14674_s29  ;;  %v11311_v33 = vpop.permute.xlu1 %11310 }
0x3692   :  { %11584 = vrot.lane.b32.xlu1 %v18350_v31, %s14697_s21 }
0x3694   :  { %11578 = vrot.lane.b32.xlu0 %v18344_v27, %s14697_s21 }
0x3696   :  { %11556 = vrot.lane.b32.xlu1 %v18158_v37, %s14674_s29 }
0x3698   :  { %11550 = vrot.lane.b32.xlu0 %v18150_v44, %s14674_s29 }
0x369a   :  { %11588 = vrot.lane.b32.xlu1 %v18352_v41, %s14697_s21 }
0x369c   :  { %11582 = vrot.lane.b32.xlu0 %v18346_v60, %s14697_s21 }
0x369e   :  { %11560 = vrot.lane.b32.xlu1 %v18160_v38, %s14674_s29 }
0x36a0   :  { %11554 = vrot.lane.b32.xlu0 %v18154_v42, %s14674_s29 }
0x36a2   :  { %11592 = vrot.lane.b32.xlu1 %v18356_v2, %s14697_s21 }
0x36a4   :  { %11586 = vrot.lane.b32.xlu0 %v18348_v23, %s14697_s21 }
0x36a8   :  { %11558 = vrot.lane.b32.xlu0 %v18163_v56, %s14674_s29  ;;  %s14698_s29 = smov 24  }
0x36ac   :  { %11590 = vrot.lane.b32.xlu0 %v18354_v16, %s14697_s21 }
0x36f1   :  { %v10892_v44 = vpop.xlane.xlu1 %10891 }
0x36f2   :  { %14241 = vrcp.f32 %v10892_v44 }
0x36f5   :  { %v10898_v55 = vpop.xlane.xlu1 %10897 }
0x36f6   :  { %14243 = vrcp.f32 %v10898_v55  ;;  %v10895_v37 = vpop.xlane.xlu0 %10894 }
0x36f7   :  { %14245 = vrcp.f32 %v10895_v37 }
0x36fa   :  { %v10904_v42 = vpop.xlane.xlu1 %10903 }
0x36fb   :  { %14247 = vrcp.f32 %v10904_v42  ;;  %v10901_v38 = vpop.xlane.xlu0 %10900 }
0x36fc   :  { %v14242_v11 = vpop.eup %14241  ;;  %14249 = vrcp.f32 %v10901_v38 }
0x36fd   :  { %v10915_v27 = vmul.f32 %v14242_v11, %v18378_v32  ;;  %v13322_v32 = vpack.c.bf16 %v11662_v39, %v11661_v4 }
0x36fe   :  { %v10910_v56 = vpop.xlane.xlu1 %10909 }
0x36ff   :  { %14251 = vrcp.f32 %v10910_v56  ;;  %v10907_v60 = vpop.xlane.xlu0 %10906  ;;  %13118 = vmatmul.mubr.msk.f32.vlgmr.msra.gmra.mrb[84].mxu1 %vm6257_vm1, %v10915_v27 }
0x3700   :  { %v14244_v23 = vpop.eup %14243  ;;  %14253 = vrcp.f32 %v10907_v60  ;;  %13126 = vmatpush3.msra.mxu1 %v11083_v19  ;;  %13127 = vmatprep.mubr.msk.f32.mxu1 %vm14690_vm0, %v18681_v29 }
0x3701   :  { %v14246_v31 = vpop.eup %14245  ;;  %v10919_v41 = vmul.f32 %v14244_v23, %v18382_v0  ;;  %13135 = vmatprep.subr.mxu1 %v18681_v29 }
0x3702   :  { %v10917_v16 = vmul.f32 %v14246_v31, %v18385_v61  ;;  %v11463_v6 = vpop.permute.xlu1 %11462 }
0x3703   :  { %v10913_v2 = vpop.xlane.xlu0 %10912  ;;  %13128 = vmatmul.mubr.msk.f32.vlgmr.msra.gmra.mrb[86].mxu1 %vm6257_vm1, %v10919_v41 }
0x3704   :  { %14255 = vrcp.f32 %v10913_v2  ;;  %13123 = vmatmul.mubr.msk.f32.vlgmr.msra.gmra.mrb[100].mxu0 %vm6257_vm1, %v10917_v16  ;;  %13136 = vmatpush3.msra.mxu1 %v11235_v5 }
0x3705   :  { %v14248_v36 = vpop.eup %14247  ;;  %13131 = vmatpush3.msra.mxu0 %v11159_v50  ;;  %13132 = vmatprep.mubr.msk.f32.mxu0 %vm14690_vm0, %v18681_v29 }
0x3706   :  { %v14250_v47 = vpop.eup %14249  ;;  %v10923_v58 = vmul.f32 %v14248_v36, %v18392_v54  ;;  %13137 = vmatprep.mubr.msk.f32.mxu1 %vm14690_vm0, %v18681_v29  ;;  %13140 = vmatprep.subr.mxu0 %v18681_v29 }
0x3707   :  { %v10921_v35 = vmul.f32 %v14250_v47, %v18394_v34  ;;  %v11387_v18 = vpop.permute.xlu0 %11386  ;;  %13145 = vmatprep.subr.mxu1 %v18681_v29 }
0x3708   :  { %13138 = vmatmul.mubr.msk.f32.vlgmr.msra.gmra.mrb[88].mxu1 %vm6257_vm1, %v10923_v58 }
0x3709   :  { %v14252_v49 = vpop.eup %14251  ;;  %13133 = vmatmul.mubr.msk.f32.vlgmr.msra.gmra.mrb[102].mxu0 %vm6257_vm1, %v10921_v35  ;;  %13146 = vmatpush3.msra.mxu1 %v11387_v18 }
0x370a   :  { %v14254_v51 = vpop.eup %14253  ;;  %v10927_v52 = vmul.f32 %v14252_v49, %v18400_v21  ;;  %13141 = vmatpush3.msra.mxu0 %v11311_v33  ;;  %13142 = vmatprep.mubr.msk.f32.mxu0 %vm14690_vm0, %v18681_v29  ;;  %v11549_v21 = vpop.permute.xlu1 %11548 }
0x370b   :  { %v10925_v57 = vmul.f32 %v14254_v51, %v18402_v45  ;;  %13147 = vmatprep.mubr.msk.f32.mxu1 %vm14690_vm0, %v18681_v29  ;;  %13150 = vmatprep.subr.mxu0 %v18681_v29  ;;  %v11547_v12 = vpop.permute.xlu0 %11546  ;;  %v11635_v31 = vsel %vm6257_vm1, %v17925_v14, %v11549_v21 }
0x370c   :  { %13148 = vmatmul.mubr.msk.f32.vlgmr.msra.gmra.mrb[90].mxu1 %vm6257_vm1, %v10927_v52  ;;  %13319 = vmatprep.subr.bf16.mxu1 %v13318_v43  ;;  %v11634_v38 = vsel %vm6257_vm1, %v17927_v10, %v11547_v12 }
0x370d   :  { %13143 = vmatmul.mubr.msk.f32.vlgmr.msra.gmra.mrb[104].mxu0 %vm6257_vm1, %v10925_v57  ;;  %13321 = vmatpush3.bf16.msra.mxu1 %v13318_v43 }
0x370e   :  { %v14256_v20 = vpop.eup %14255  ;;  %13151 = vmatpush3.msra.mxu0 %v11463_v6  ;;  %13152 = vmatprep.mubr.msk.f32.mxu0 %vm14690_vm0, %v18681_v29  ;;  %v11581_v22 = vpop.permute.xlu1 %11580  ;;  %v18689_v6 = vld [vmem:[#allocation40_spill] sm:$0xff] }
0x370f   :  { %v10929_v26 = vmul.f32 %v14256_v20, %v18408_v3  ;;  %13326 = vmatprep.subr.bf16.mxu0 %v18682_v13  ;;  %13323 = vmatprep.subr.bf16.mxu1 %v13322_v32  ;;  %v11579_v45 = vpop.permute.xlu0 %11578  ;;  %v11643_v2 = vsel %vm18685_vm12, %v11635_v31, %v11581_v22 }
0x3710   :  { %v11642_v11 = vsel %vm18683_vm10, %v11634_v38, %v11579_v45 }
0x3711   :  { %13153 = vmatmul.mubr.msk.f32.vlgmr.msra.gmra.mrb[106].mxu0 %vm6257_vm1, %v10929_v26  ;;  %13325 = vmatpush3.bf16.msra.mxu1 %v13322_v32 }
0x3712   :  { %13183 = vmatprep.mubr.msk.f32.mxu0 %vm14690_vm0, %v18681_v29  ;;  %v11553_v3 = vpop.permute.xlu1 %11552  ;;  %vm11650_vm0 = vcmask 195584  }
0x3713   :  { %v11551_v62 = vpop.permute.xlu0 %11550 }
0x3714   :  { %v11636_v23 = vsel %vm6257_vm1, %v17929_v40, %v11551_v62  ;;  %v18686_v40 = vld [vmem:[#allocation39_spill] sm:$0xff] }
0x3715   :  { %v11637_v14 = vsel %vm6257_vm1, %v18686_v40, %v11553_v3 }
0x3716   :  { %v11585_v19 = vpop.permute.xlu1 %11584 }
0x3717   :  { %v11583_v24 = vpop.permute.xlu0 %11582  ;;  %v11645_v49 = vsel %vm18688_vm14, %v11637_v14, %v11585_v19 }
0x3718   :  { %v11644_v41 = vsel %vm18684_vm11, %v11636_v23, %v11583_v24  ;;  %vm18693_vm11 = vmmov %vm18683_vm10 }
0x371a   :  { %v11557_v33 = vpop.permute.xlu1 %11556 }
0x371b   :  { %v11555_v50 = vpop.permute.xlu0 %11554 }
0x371c   :  { %v11638_v58 = vsel %vm6257_vm1, %v17931_v8, %v11555_v50  ;;  %v18690_v8 = vld [vmem:[#allocation41_spill] sm:$0xff] }
0x371d   :  { %v11639_v26 = vsel %vm6257_vm1, %v18690_v8, %v11557_v33 }
0x371e   :  { %v11589_v5 = vpop.permute.xlu1 %11588 }
0x371f   :  { %v11587_v44 = vpop.permute.xlu0 %11586  ;;  %v11647_v43 = vsel %vm18683_vm10, %v11639_v26, %v11589_v5 }
0x3720   :  { %v11646_v35 = vsel %vm18687_vm13, %v11638_v58, %v11587_v44 }
0x3722   :  { %v11561_v37 = vpop.permute.xlu1 %11560 }
0x3723   :  { %v11559_v55 = vpop.permute.xlu0 %11558 }
0x3724   :  { %v11640_v20 = vsel %vm6257_vm1, %v18689_v6, %v11559_v55 }
0x3726   :  { %v11593_v56 = vpop.permute.xlu1 %11592 }
0x3727   :  { %v11591_v42 = vpop.permute.xlu0 %11590 }
0x3728   :  { %v11648_v59 = vsel %vm18691_vm15, %v11640_v20, %v11591_v42 }
0x37d2   :  { %v11002_v15 = vpop.f32.mrb[84].mxu1 }
0x37d3   :  { %v13119_v25 = vpop.f32.mrb[85].mxu1  ;;  %11610 = vrot.lane.b32.xlu0 %v11002_v15, %s14698_s29  ;;  %v18692_v15 = vld [vmem:[#allocation42_spill] sm:$0xff] }
0x37d4   :  { %v11641_v25 = vsel %vm6257_vm1, %v18692_v15, %v11561_v37 }
0x37d6   :  { %v11154_v46 = vpop.f32.mrb[86].mxu1 }
0x37d7   :  { %v11078_v7 = vpop.f32.mrb[100].mxu0  ;;  %v13129_v1 = vpop.f32.mrb[87].mxu1  ;;  %11614 = vrot.lane.b32.xlu0 %v11154_v46, %s14698_s29  ;;  %v11649_v46 = vsel %vm18693_vm11, %v11641_v25, %v11593_v56 }
0x37d8   :  { %11612 = vrot.lane.b32.xlu1 %v11078_v7, %s14698_s29  ;;  %v13124_v29 = vpop.f32.mrb[101].mxu0 }
0x37d9   :  { %v11983_v29 = vld [vmem:[%s18654_s17] sm:$0xff] }
0x37db   :  { %v11306_v28 = vpop.f32.mrb[88].mxu1 }
0x37dc   :  { %v11230_v0 = vpop.f32.mrb[102].mxu0  ;;  %11618 = vrot.lane.b32.xlu0 %v11306_v28, %s14698_s29  ;;  %v13139_v61 = vpop.f32.mrb[89].mxu1  ;;  %v11984_v28 = vld [vmem:[%s18654_s17 + $0x8] sm:$0xff] }
0x37dd   :  { %11616 = vrot.lane.b32.xlu1 %v11230_v0, %s14698_s29  ;;  %v13134_v63 = vpop.f32.mrb[103].mxu0  ;;  %v11985_v0 = vld [vmem:[%s18654_s17 + $0x10] sm:$0xff]  ;;  %v13327_v61 = vpack.c.bf16 %v11984_v28, %v11983_v29 }
0x37de   :  { %v11986_v63 = vld [vmem:[%s18654_s17 + $0x18] sm:$0xff] }
0x37df   :  { %v11458_v48 = vpop.f32.mrb[90].mxu1  ;;  %13328 = vmatpush3.bf16.msra.mxu0 %v13327_v61 }
0x37e0   :  { %v11382_v17 = vpop.f32.mrb[104].mxu0  ;;  %11622 = vrot.lane.b32.xlu0 %v11458_v48, %s14698_s29  ;;  %v13149_v30 = vpop.f32.mrb[91].mxu1  ;;  %v13330_v48 = vpack.c.bf16 %v11986_v63, %v11985_v0  ;;  %13329 = vmatprep.subr.bf16.mxu0 %v18682_v13 }
0x37e1   :  { %11620 = vrot.lane.b32.xlu1 %v11382_v17, %s14698_s29  ;;  %v13144_v54 = vpop.f32.mrb[105].mxu0  ;;  %v12269_v17 = vld [vmem:[#allocation26] ss:$0 sm:$0xff] }
0x37e3   :  { %13331 = vmatpush3.bf16.msra.mxu0 %v13330_v48 }
0x37e4   :  { %v11534_v34 = vpop.f32.mrb[106].mxu0 }
0x37e5   :  { %11624 = vrot.lane.b32.xlu1 %v11534_v34, %s14698_s29  ;;  %v13154_v9 = vpop.f32.mrb[107].mxu0 }
0x3845   :  { %v11611_v27 = vpop.permute.xlu0 %11610 }
0x3846   :  { %v11651_v60 = vsel %vm11650_vm0, %v11642_v11, %v11611_v27 }
0x3847   :  { %13163 = vmatprep.mubr.msk.f32.mxu1 %vm422_vm9, %v11651_v60 }
0x3849   :  { %v11615_v16 = vpop.permute.xlu0 %11614 }
0x384a   :  { %v11653_v10 = vsel %vm11650_vm0, %v11644_v41, %v11615_v16  ;;  %v11613_v36 = vpop.permute.xlu1 %11612 }
0x384b   :  { %v11652_v47 = vsel %vm11650_vm0, %v11643_v2, %v11613_v36 }
0x384c   :  { %13164 = vmatmul.mubr.msk.f32.vlgmr.msra.gmra.mrb[92].mxu1 %vm422_vm9, %v11652_v47 }
0x384d   :  { %13166 = vmatprep.mubr.msk.f32.mxu1 %vm422_vm9, %v11653_v10 }
0x384e   :  { %v11619_v18 = vpop.permute.xlu0 %11618 }
0x384f   :  { %v11655_v51 = vsel %vm11650_vm0, %v11646_v35, %v11619_v18  ;;  %v11617_v52 = vpop.permute.xlu1 %11616 }
0x3850   :  { %v11654_v57 = vsel %vm11650_vm0, %v11645_v49, %v11617_v52 }
0x3851   :  { %13167 = vmatmul.mubr.msk.f32.gmra.mrb[94].mxu1 %vm422_vm9, %v11654_v57 }
0x3852   :  { %13169 = vmatprep.mubr.msk.f32.mxu1 %vm422_vm9, %v11655_v51  ;;  %v11623_v53 = vpop.permute.xlu0 %11622 }
0x3853   :  { %v11657_v4 = vsel %vm11650_vm0, %v11648_v59, %v11623_v53  ;;  %v11621_v39 = vpop.permute.xlu1 %11620 }
0x3854   :  { %v11656_v32 = vsel %vm11650_vm0, %v11647_v43, %v11621_v39 }
0x3855   :  { %13170 = vmatmul.mubr.msk.f32.gmra.mrb[96].mxu1 %vm422_vm9, %v11656_v32 }
0x3856   :  { %13172 = vmatprep.mubr.msk.f32.mxu1 %vm422_vm9, %v11657_v4 }
0x3857   :  { %v11625_v7 = vpop.permute.xlu1 %11624 }
0x3858   :  { %v11658_v1 = vsel %vm11650_vm0, %v11649_v46, %v11625_v7 }
0x3859   :  { %13173 = vmatmul.mubr.msk.f32.gmra.mrb[98].mxu1 %vm422_vm9, %v11658_v1 }
0x391f   :  { %v13165_v30 = vpop.f32.mrb[92].mxu1 }
0x3920   :  { %v18528_v54 = vadd.f32 %v13165_v30, %v12269_v17  ;;  %v11760_v34 = vpop.f32.mrb[93].mxu1 }
0x3921   :  { %v18530_v9 = vadd.f32 %v12269_v17, %v11760_v34 }
0x3922   :  { %v11808_v12 = vrot.slane %v18528_v54, 1  ;;  %v11832_v21 = vrot.slane %v18528_v54, 2  ;;  %v11856_v45 = vrot.slane %v18528_v54, 3  ;;  %v11880_v13 = vrot.slane %v18528_v54, 4 }
0x3923   :  { %v11807_v22 = vrot.slane %v18530_v9, 1  ;;  %v11904_v3 = vrot.slane %v18528_v54, 5  ;;  %v11831_v24 = vrot.slane %v18530_v9, 2  ;;  %v11855_v33 = vrot.slane %v18530_v9, 3 }
0x3924   :  { %v11824_v62 = vmax.f32 %v18528_v54, %v11808_v12  ;;  %v13168_v19 = vpop.f32.mrb[94].mxu1  ;;  %v11879_v44 = vrot.slane %v18530_v9, 4  ;;  %v11903_v42 = vrot.slane %v18530_v9, 5  ;;  %v11927_v38 = vrot.slane %v18530_v9, 6 }
0x3925   :  { %v11823_v50 = vmax.f32 %v18530_v9, %v11807_v22  ;;  %v18543_v5 = vadd.f32 %v13168_v19, %v12269_v17  ;;  %v11770_v55 = vpop.f32.mrb[95].mxu1  ;;  %v11951_v56 = vrot.slane %v18530_v9, 7  ;;  %v11928_v23 = vrot.slane %v18528_v54, 6 }
0x3926   :  { %v11848_v37 = vmax.f32 %v11824_v62, %v11832_v21  ;;  %v18547_v11 = vadd.f32 %v12269_v17, %v11770_v55 }
0x3927   :  { %v11847_v27 = vmax.f32 %v11823_v50, %v11831_v24  ;;  %v11810_v60 = vrot.slane %v18543_v5, 1  ;;  %v11834_v41 = vrot.slane %v18543_v5, 2  ;;  %v11858_v10 = vrot.slane %v18543_v5, 3 }
0x3928   :  { %v11872_v31 = vmax.f32 %v11848_v37, %v11856_v45  ;;  %v11809_v16 = vrot.slane %v18547_v11, 1  ;;  %v13171_v2 = vpop.f32.mrb[96].mxu1  ;;  %v11833_v58 = vrot.slane %v18547_v11, 2  ;;  %v11857_v18 = vrot.slane %v18547_v11, 3 }
0x3929   :  { %v11871_v36 = vmax.f32 %v11847_v27, %v11855_v33  ;;  %v11826_v47 = vmax.f32 %v18543_v5, %v11810_v60  ;;  %v18557_v40 = vadd.f32 %v13171_v2, %v12269_v17  ;;  %v11780_v14 = vpop.f32.mrb[97].mxu1  ;;  %v11881_v49 = vrot.slane %v18547_v11, 4 }
0x392a   :  { %v11825_v35 = vmax.f32 %v18547_v11, %v11809_v16  ;;  %v18562_v51 = vadd.f32 %v12269_v17, %v11780_v14  ;;  %v11882_v20 = vrot.slane %v18543_v5, 4  ;;  %v11896_v43 = vmax.f32 %v11872_v31, %v11880_v13 }
0x392b   :  { %v11895_v52 = vmax.f32 %v11871_v36, %v11879_v44  ;;  %v11812_v57 = vrot.slane %v18557_v40, 1  ;;  %v11850_v6 = vmax.f32 %v11826_v47, %v11834_v41  ;;  %v11836_v53 = vrot.slane %v18557_v40, 2 }
0x392c   :  { %v11849_v8 = vmax.f32 %v11825_v35, %v11833_v58  ;;  %v11811_v26 = vrot.slane %v18562_v51, 1  ;;  %v13174_v59 = vpop.f32.mrb[98].mxu1  ;;  %v11835_v25 = vrot.slane %v18562_v51, 2  ;;  %v11859_v1 = vrot.slane %v18562_v51, 3 }
0x392d   :  { %v11919_v4 = vmax.f32 %v11895_v52, %v11903_v42  ;;  %v18568_v39 = vadd.f32 %v13174_v59, %v12269_v17  ;;  %v11790_v32 = vpop.f32.mrb[99].mxu1  ;;  %v11828_v15 = vmax.f32 %v18557_v40, %v11812_v57  ;;  %v11860_v29 = vrot.slane %v18557_v40, 3 }
0x392e   :  { %v18572_v46 = vadd.f32 %v12269_v17, %v11790_v32  ;;  %v11827_v7 = vmax.f32 %v18562_v51, %v11811_v26  ;;  %v11873_v61 = vmax.f32 %v11849_v8, %v11857_v18  ;;  %v11874_v63 = vmax.f32 %v11850_v6, %v11858_v10 }
0x392f   :  { %v11814_v28 = vrot.slane %v18568_v39, 1  ;;  %v11852_v0 = vmax.f32 %v11828_v15, %v11836_v53  ;;  %v11943_v48 = vmax.f32 %v11919_v4, %v11927_v38  ;;  %v11838_v34 = vrot.slane %v18568_v39, 2 }
0x3930   :  { %v11813_v30 = vrot.slane %v18572_v46, 1  ;;  %v11851_v12 = vmax.f32 %v11827_v7, %v11835_v25  ;;  %v11837_v21 = vrot.slane %v18572_v46, 2  ;;  %v11861_v45 = vrot.slane %v18572_v46, 3 }
0x3931   :  { %v11830_v17 = vmax.f32 %v18568_v39, %v11814_v28  ;;  %v11876_v22 = vmax.f32 %v11852_v0, %v11860_v29  ;;  %v11862_v13 = vrot.slane %v18568_v39, 3  ;;  %v11883_v19 = vrot.slane %v18562_v51, 4 }
0x3932   :  { %v11829_v62 = vmax.f32 %v18572_v46, %v11813_v30  ;;  %v11875_v24 = vmax.f32 %v11851_v12, %v11859_v1  ;;  %v11884_v33 = vrot.slane %v18557_v40, 4  ;;  %v11885_v44 = vrot.slane %v18572_v46, 4 }
0x3933   :  { %v11854_v50 = vmax.f32 %v11830_v17, %v11838_v34  ;;  %v11886_v55 = vrot.slane %v18568_v39, 4  ;;  %v11897_v42 = vmax.f32 %v11873_v61, %v11881_v49  ;;  %v11898_v38 = vmax.f32 %v11874_v63, %v11882_v20 }
0x3934   :  { %v11853_v37 = vmax.f32 %v11829_v62, %v11837_v21  ;;  %v11899_v27 = vmax.f32 %v11875_v24, %v11883_v19  ;;  %v11900_v31 = vmax.f32 %v11876_v22, %v11884_v33  ;;  %v11905_v41 = vrot.slane %v18547_v11, 5 }
0x3935   :  { %v11878_v60 = vmax.f32 %v11854_v50, %v11862_v13  ;;  %v11906_v16 = vrot.slane %v18543_v5, 5  ;;  %v11907_v10 = vrot.slane %v18562_v51, 5  ;;  %v11908_v36 = vrot.slane %v18557_v40, 5 }
0x3936   :  { %v11877_v2 = vmax.f32 %v11853_v37, %v11861_v45  ;;  %v11909_v47 = vrot.slane %v18572_v46, 5  ;;  %v11910_v14 = vrot.slane %v18568_v39, 5  ;;  %v11920_v35 = vmax.f32 %v11896_v43, %v11904_v3 }
0x3937   :  { %v11902_v58 = vmax.f32 %v11878_v60, %v11886_v55  ;;  %v11921_v18 = vmax.f32 %v11897_v42, %v11905_v41  ;;  %v11922_v52 = vmax.f32 %v11898_v38, %v11906_v16  ;;  %v11923_v57 = vmax.f32 %v11899_v27, %v11907_v10 }
0x3938   :  { %v11901_v49 = vmax.f32 %v11877_v2, %v11885_v44  ;;  %v11924_v6 = vmax.f32 %v11900_v31, %v11908_v36  ;;  %v11967_v20 = vmax.f32 %v11943_v48, %v11951_v56  ;;  %v11929_v8 = vrot.slane %v18547_v11, 6  ;;  %v12278_v2 = vld [vmem:[%s18694_s18] ss:$0 sm:$0xff] }
0x3939   :  { %v11930_v26 = vrot.slane %v18543_v5, 6  ;;  %v11931_v59 = vrot.slane %v18562_v51, 6  ;;  %v11926_v4 = vmax.f32 %v11902_v58, %v11910_v14  ;;  %v11932_v32 = vrot.slane %v18557_v40, 6 }
0x393a   :  { %v11925_v53 = vmax.f32 %v11901_v49, %v11909_v47  ;;  %v11933_v3 = vrot.slane %v18572_v46, 6  ;;  %v11944_v43 = vmax.f32 %v11920_v35, %v11928_v23  ;;  %v11945_v15 = vmax.f32 %v11921_v18, %v11929_v8 }
0x393b   :  { %v11946_v25 = vmax.f32 %v11922_v52, %v11930_v26  ;;  %v11947_v7 = vmax.f32 %v11923_v57, %v11931_v59  ;;  %v11934_v9 = vrot.slane %v18568_v39, 6  ;;  %v11948_v56 = vmax.f32 %v11924_v6, %v11932_v32 }
0x393c   :  { %v11952_v1 = vrot.slane %v18528_v54, 7  ;;  %v11953_v29 = vrot.slane %v18547_v11, 7  ;;  %v11949_v28 = vmax.f32 %v11925_v53, %v11933_v3  ;;  %v11954_v0 = vrot.slane %v18543_v5, 7 }
0x393d   :  { %v11955_v61 = vrot.slane %v18562_v51, 7  ;;  %v11950_v63 = vmax.f32 %v11926_v4, %v11934_v9  ;;  %v11956_v48 = vrot.slane %v18557_v40, 7  ;;  %14257 = vtanh.f32 %v11967_v20 }
0x393e   :  { %v11968_v30 = vmax.f32 %v11944_v43, %v11952_v1  ;;  %v11969_v23 = vmax.f32 %v11945_v15, %v11953_v29  ;;  %v11957_v34 = vrot.slane %v18572_v46, 7  ;;  %v11970_v12 = vmax.f32 %v11946_v25, %v11954_v0 }
0x393f   :  { %v11971_v17 = vmax.f32 %v11947_v7, %v11955_v61  ;;  %v11958_v21 = vrot.slane %v18568_v39, 7  ;;  %v11972_v54 = vmax.f32 %v11948_v56, %v11956_v48 }
0x3940   :  { %14259 = vtanh.f32 %v11968_v30  ;;  %v11973_v11 = vmax.f32 %v11949_v28, %v11957_v34 }
0x3941   :  { %14261 = vtanh.f32 %v11969_v23  ;;  %v11974_v45 = vmax.f32 %v11950_v63, %v11958_v21 }
0x3942   :  { %14263 = vtanh.f32 %v11970_v12 }
0x3943   :  { %14265 = vtanh.f32 %v11971_v17 }
0x3944   :  { %14267 = vtanh.f32 %v11972_v54 }
0x3945   :  { %14269 = vtanh.f32 %v11973_v11 }
0x3946   :  { %14271 = vtanh.f32 %v11974_v45 }
0x3947   :  { %v14258_v5 = vpop.eup %14257 }
0x394a   :  { %v14260_v40 = vpop.eup %14259 }
0x394b   :  { %v14262_v51 = vpop.eup %14261  ;;  %v12002_v22 = vrot.slane %v14260_v40, 7 }
0x394c   :  { %v14264_v62 = vpop.eup %14263  ;;  %v12004_v46 = vrot.slane %v14262_v51, 6 }
0x394d   :  { %v14266_v13 = vpop.eup %14265  ;;  %v12003_v24 = vsel %vm721_vm2, %v12002_v22, %v14258_v5  ;;  %v12006_v39 = vrot.slane %v14264_v62, 5 }
0x394e   :  { %v14268_v19 = vpop.eup %14267  ;;  %v12005_v50 = vsel %vm724_vm3, %v12004_v46, %v12003_v24  ;;  %v12008_v33 = vrot.slane %v14266_v13, 4 }
0x394f   :  { %v14270_v44 = vpop.eup %14269  ;;  %v12007_v55 = vsel %vm727_vm4, %v12006_v39, %v12005_v50  ;;  %v12010_v37 = vrot.slane %v14268_v19, 3 }
0x3950   :  { %v14272_v42 = vpop.eup %14271  ;;  %v12009_v38 = vsel %vm730_vm5, %v12008_v33, %v12007_v55  ;;  %v12012_v27 = vrot.slane %v14270_v44, 2 }
0x3951   :  { %v12011_v60 = vsel %vm733_vm6, %v12010_v37, %v12009_v38  ;;  %v12014_v31 = vrot.slane %v14272_v42, 1 }
0x3952   :  { %v12013_v41 = vsel %vm736_vm7, %v12012_v27, %v12011_v60 }
0x3953   :  { %v12015_v16 = vsel %vm739_vm8, %v12014_v31, %v12013_v41 }
0x3954   :  { %13184 = vmatmul.mubr.msk.f32.vlgmr.msra.gmra.mrb[108].mxu0 %vm422_vm9, %v12015_v16 }
0x3a27   :  { %v12084_v10 = vpop.f32.mrb[108].mxu0 }
0x3a28   :  { %v12085_v36 = vadd.f32 %v12278_v2, %v12084_v10  ;;  %v13185_v47 = vpop.f32.mrb[109].mxu0 }
0x3a2a   :  { %12088 = vst [vmem:[#allocation28] sm:$0xff] %v12085_v36 }
0x3a2b   :  { %14640 = shalt.err (!%p14637_p6)
}
0x3a2c   :  { %s18695_s16 = sld [smem:[#allocation48_spill]] }
0x3a32   :  { %s14641_s11 = scalar_lea.hbm %s18695_s16, 128 }
0x3a33   :  { %p14642_p7 = scmp.ne.s32.totalorder %s18695_s16, %s14641_s11  ;;  %p14645_p8 = scmp.lt.u32.totalorder %s14641_s11, %s18695_s16 }
0x3a35   :  { %p14647_p9 = pnand %p14645_p8, %p14642_p7 }
0x3a37   :  { %14650 = shalt.err (!%p14647_p9)
}
0x3a38   :  { %12098 = dma.vmem_to_hbm [thread:$0]  %s12096_s22, 128, %s18695_s16, [#allocation4]  }
0x3a39   :  { %14669 = dma.done.wait [#allocation4], 128  }
0x3a3a   :  { %14670 = vsyncadd [#allocation4], 4294967168 }
0x3a3b   :  { %12102 = vsyncpa [#allocation3], 1 }
0x3a3c   :  { %12103 = vsyncpa [#allocation6], 1 }
0x3a3d   :  { %12104 = vsyncpa [#allocation9], 1 }
0x3a3e   :  { %12105 = vsyncpa [#allocation12], 1 }
0x3a3f   :  { %12106 = vsyncpa [#allocation15], 1 }
0x3a40   :  { %12107 = vsyncpa [#allocation18], 1 }
0x3a41   :  { %12108 = vsyncpa [#allocation21], 1 }
0x3a42   :  { %12109 = vsyncpa [#allocation24], 1 }
0x3a43   :  { %12110 = vsyncpa [#allocation27], 1 }
0x3a44   :  { %12111 = vsyncpa [#allocation4], 1 }

</bundles_post_ra>
